<compile_context>
chip_gen: v7x
topology: tpu7x:2x2x1
jax: 0.10.0
libtpu: 0.0.40
codegen_flags: <defaults>
</compile_context>

<pallas_src>
import functools

import jax
import jax.numpy as jnp
from jax.experimental import pallas as pl
from jax.experimental.pallas import tpu as pltpu


def _round_up(x, m):
    return ((x + m - 1) // m) * m


# ---------------------------------------------------------------------------
# Plain tiled matmul + bias + (optional) LeakyReLU kernel (conv1, final head)
# ---------------------------------------------------------------------------

def _mm_bias_act_kernel(x_ref, w_ref, b_ref, o_ref, *, alpha, n_k):
    # x: (tm, tk) bf16, w: (tk, tn) bf16, b: (1, tn) f32, o: (tm, tn) f32/bf16
    prod = jnp.dot(x_ref[...], w_ref[...], preferred_element_type=jnp.float32)
    if n_k == 1:
        # Single K step: no accumulator, no zero-fill.
        y = prod + b_ref[...]
        if alpha is not None:
            y = jnp.where(y >= 0, y, alpha * y)
        o_ref[...] = y.astype(o_ref.dtype)
    else:
        # Multi K step: o_ref (f32) is itself the resident accumulator.
        k = pl.program_id(2)

        @pl.when(k == 0)
        def _():
            o_ref[...] = prod

        @pl.when(k > 0)
        def _():
            o_ref[...] += prod

        @pl.when(k == n_k - 1)
        def _():
            y = o_ref[...] + b_ref[...]
            if alpha is not None:
                y = jnp.where(y >= 0, y, alpha * y)
            o_ref[...] = y


def pallas_matmul_bias_act(x, w, b, *, alpha=None, out_dtype=jnp.float32):
    """(M, K) @ (K, C) + b, optional LeakyReLU. bf16 MXU, f32 accumulate."""
    M, K = x.shape
    K2, C = w.shape
    assert K == K2

    Mp8 = _round_up(M, 8)
    tm = min(256, Mp8)                      # >=2 M tiles for v7x when M >= 512
    Mp = _round_up(M, tm)
    tn = 128                                # lane-dense stores
    Cp = _round_up(C, tn)
    Kp = _round_up(K, 128)
    tk = min(Kp, 8192 if Mp <= 64 else 1024)
    Kp = _round_up(Kp, tk)
    n_k = Kp // tk
    if out_dtype == jnp.bfloat16:
        assert n_k == 1, "bf16 output requires a single K step"

    xp = x if (Mp, Kp) == (M, K) else jnp.pad(x, ((0, Mp - M), (0, Kp - K)))
    wp = w if (Kp, Cp) == (K, C) else jnp.pad(w, ((0, Kp - K), (0, Cp - C)))
    bp = b if Cp == C else jnp.pad(b, (0, Cp - C))

    xp = xp.astype(jnp.bfloat16)
    wp = wp.astype(jnp.bfloat16)
    bp = bp.reshape(1, Cp).astype(jnp.float32)

    grid = (Mp // tm, Cp // tn, n_k)
    kern = functools.partial(_mm_bias_act_kernel, alpha=alpha, n_k=n_k)

    out = pl.pallas_call(
        kern,
        out_shape=jax.ShapeDtypeStruct((Mp, Cp), out_dtype),
        grid_spec=pltpu.PrefetchScalarGridSpec(
            num_scalar_prefetch=0,
            grid=grid,
            in_specs=[
                pl.BlockSpec((tm, tk), lambda i, j, k: (i, k)),
                pl.BlockSpec((tk, tn), lambda i, j, k: (k, j)),
                pl.BlockSpec((1, tn), lambda i, j, k: (0, j)),
            ],
            out_specs=pl.BlockSpec((tm, tn), lambda i, j, k: (i, j)),
        ),
        compiler_params=pltpu.CompilerParams(
            dimension_semantics=("parallel", "parallel", "arbitrary")),
        cost_estimate=pl.CostEstimate(
            flops=2 * Mp * Kp * Cp,
            transcendentals=0,
            bytes_accessed=Mp * Kp * 2 + Kp * Cp * 2 + Mp * Cp * 4),
    )(xp, wp, bp)

    if (Mp, Cp) != (M, C):
        out = out[:M, :C]
    return out


# ---------------------------------------------------------------------------
# Fused conv-matmul + InstanceNorm2d(affine=False) + LeakyReLU kernel
# ---------------------------------------------------------------------------

def _conv_in_lrelu_kernel(x_ref, w_ref, o_ref, acc_ref, *, alpha, eps, hw):
    # x: (tm, tk) bf16 (one image's Ho*Wo rows, padded to tm), w: (tk, tn) bf16,
    # acc: (tm, tn) f32, o: (tm, tn) bf16.
    k = pl.program_id(2)
    prod = jnp.dot(x_ref[...], w_ref[...], preferred_element_type=jnp.float32)

    @pl.when(k == 0)
    def _():
        acc_ref[...] = prod                    # init with first dot, no zero-fill

    @pl.when(k > 0)
    def _():
        acc_ref[...] += prod

    @pl.when(k == pl.num_programs(2) - 1)
    def _():
        acc = acc_ref[...]
        tm = acc.shape[0]
        inv_n = 1.0 / hw
        if tm == hw:
            mean = jnp.mean(acc, axis=0, keepdims=True)
            var = jnp.mean(jnp.square(acc - mean), axis=0, keepdims=True)
        else:
            # Exclude the <=7 zero-padded rows from the statistics.
            mask = (jax.lax.broadcasted_iota(jnp.int32, (tm, 1), 0) < hw
                    ).astype(jnp.float32)
            mean = jnp.sum(acc * mask, axis=0, keepdims=True) * inv_n
            var = jnp.sum(jnp.square(acc - mean) * mask, axis=0,
                          keepdims=True) * inv_n
        y = (acc - mean) * jax.lax.rsqrt(var + eps)
        y = jnp.where(y >= 0, y, alpha * y)
        o_ref[...] = y.astype(o_ref.dtype)


# ---------------------------------------------------------------------------
# Standalone InstanceNorm2d + LeakyReLU (fallback for very large feature maps)
# ---------------------------------------------------------------------------

def _instnorm_lrelu_kernel(x_ref, o_ref, *, alpha, eps):
    x = x_ref[...].astype(jnp.float32)
    mean = jnp.mean(x, axis=1, keepdims=True)
    var = jnp.mean(jnp.square(x - mean), axis=1, keepdims=True)
    y = (x - mean) * jax.lax.rsqrt(var + eps)
    o_ref[...] = jnp.where(y >= 0, y, alpha * y).astype(o_ref.dtype)


def pallas_instnorm_lrelu(x, alpha=0.2, eps=1e-5):
    # x: (N, H, W, C) f32 -> (N, H, W, C) bf16
    # TODO(synk): chunk H*W with a two-pass sum/sumsq reduction for very large
    # feature maps instead of loading the whole (1, H*W, 128) block at once.
    N, H, W, C = x.shape
    HW = H * W
    cb = 128 if C % 128 == 0 else C
    xr = x.reshape(N, HW, C)
    kern = functools.partial(_instnorm_lrelu_kernel, alpha=alpha, eps=eps)
    out = pl.pallas_call(
        kern,
        out_shape=jax.ShapeDtypeStruct((N, HW, C), jnp.bfloat16),
        grid=(N, C // cb),
        in_specs=[pl.BlockSpec((1, HW, cb), lambda n, c: (n, 0, c))],
        out_specs=pl.BlockSpec((1, HW, cb), lambda n, c: (n, 0, c)),
        compiler_params=pltpu.CompilerParams(
            dimension_semantics=("parallel", "parallel"),
            vmem_limit_bytes=64 << 20),
    )(xr)
    return out.reshape(N, H, W, C)


# ---------------------------------------------------------------------------
# Glue: NHWC bf16 im2col + conv wrappers (no per-layer transposes)
# ---------------------------------------------------------------------------

def im2col_nhwc(x, kh, kw, stride, pad):
    """x: (N, H, W, C) -> patches (N*Ho*Wo, kh*kw*C), K ordered (i, j, c)."""
    N, H, W, C = x.shape
    xp = jnp.pad(x, ((0, 0), (pad, pad), (pad, pad), (0, 0)))
    Ho = (H + 2 * pad - kh) // stride + 1
    Wo = (W + 2 * pad - kw) // stride + 1
    pieces = []
    for i in range(kh):
        for j in range(kw):
            pieces.append(
                xp[:, i:i + Ho * stride:stride, j:j + Wo * stride:stride, :])
    p = jnp.stack(pieces, axis=3)                       # (N, Ho, Wo, kh*kw, C)
    p = p.reshape(N * Ho * Wo, kh * kw * C)
    return p, Ho, Wo


def _flatten_weight(w):
    # torch (Cout, Cin, kh, kw) -> (kh*kw*Cin, Cout) bf16, K ordered (i, j, c)
    Cout, Cin, kh, kw = w.shape
    return jnp.transpose(w, (2, 3, 1, 0)).reshape(kh * kw * Cin, Cout
                                                  ).astype(jnp.bfloat16)


def conv2d_lrelu(x, w, b, stride, pad, alpha):
    """Conv2d + bias + LeakyReLU on bf16 NHWC activations, bf16 output."""
    N = x.shape[0]
    Cout, _, kh, kw = w.shape
    patches, Ho, Wo = im2col_nhwc(x, kh, kw, stride, pad)      # bf16
    y = pallas_matmul_bias_act(patches, _flatten_weight(w), b,
                               alpha=alpha, out_dtype=jnp.bfloat16)
    return y.reshape(N, Ho, Wo, Cout)


MAX_FUSED_ROWS = 4096   # fuse InstanceNorm into the matmul while Ho*Wo fits a tile


def conv2d_instnorm_lrelu(x, w, b, stride, pad, alpha=0.2, eps=1e-5):
    """Conv2d + InstanceNorm2d(affine=False) + LeakyReLU, fused in one kernel.

    The conv bias `b` cancels exactly under InstanceNorm without affine (the
    per-channel mean removes it), so it is not applied.
    """
    del b
    N = x.shape[0]
    Cout, Cin, kh, kw = w.shape
    patches, Ho, Wo = im2col_nhwc(x, kh, kw, stride, pad)      # bf16 (N*HW, K)
    HW = Ho * Wo
    K = kh * kw * Cin
    tm = _round_up(HW, 8)

    if tm > MAX_FUSED_ROWS:
        # Fallback: plain conv (f32 out) + standalone InstanceNorm+LeakyReLU.
        y = pallas_matmul_bias_act(patches, _flatten_weight(w),
                                   jnp.zeros((Cout,), jnp.float32),
                                   alpha=None, out_dtype=jnp.float32)
        y = y.reshape(N, Ho, Wo, Cout)
        return pallas_instnorm_lrelu(y, alpha=alpha, eps=eps)

    tn = 128                                   # Cout is 128/256/512 here
    Cp = _round_up(Cout, tn)
    Kp = _round_up(K, 128)
    # Keep the (tm, tk) bf16 LHS tile at <= ~2 MiB -> safe on v5e/v6e/v7x.
    tk_cap = max(128, ((2 << 20) // (tm * 2)) // 128 * 128)
    tk = min(Kp, tk_cap)
    Kp = _round_up(Kp, tk)
    n_k = Kp // tk

    p = patches.reshape(N, HW, K)
    if (tm, Kp) != (HW, K):
        p = jnp.pad(p, ((0, 0), (0, tm - HW), (0, Kp - K)))
    xp = p.reshape(N * tm, Kp)

    wp = _flatten_weight(w)
    if (Kp, Cp) != (K, Cout):
        wp = jnp.pad(wp, ((0, Kp - K), (0, Cp - Cout)))

    kern = functools.partial(_conv_in_lrelu_kernel, alpha=alpha, eps=eps, hw=HW)
    out = pl.pallas_call(
        kern,
        out_shape=jax.ShapeDtypeStruct((N * tm, Cp), jnp.bfloat16),
        grid_spec=pltpu.PrefetchScalarGridSpec(
            num_scalar_prefetch=0,
            grid=(N, Cp // tn, n_k),
            in_specs=[
                pl.BlockSpec((tm, tk), lambda n, j, k: (n, k)),
                pl.BlockSpec((tk, tn), lambda n, j, k: (k, j)),
            ],
            out_specs=pl.BlockSpec((tm, tn), lambda n, j, k: (n, j)),
            scratch_shapes=[pltpu.VMEM((tm, tn), jnp.float32)],
        ),
        compiler_params=pltpu.CompilerParams(
            dimension_semantics=("parallel", "parallel", "arbitrary"),
            vmem_limit_bytes=32 << 20),
        cost_estimate=pl.CostEstimate(
            flops=2 * N * tm * Kp * Cp,
            transcendentals=0,
            bytes_accessed=N * tm * Kp * 2 + N * Kp * Cp * 2 + N * tm * Cp * 2),
    )(xp, wp)

    out = out.reshape(N, tm, Cp)[:, :HW, :Cout].reshape(N, Ho, Wo, Cout)
    return out


def conv_mean_head(x, w, b):
    """Fused final Conv2d(512->1, k4, s1, p1) + global avg-pool + flatten.

    mean_s(patch_s @ w + b) == (mean_s patch_s) @ w + b, so average the im2col
    rows per batch first, then one lane-dense padded matmul -> (N, 1).
    """
    N = x.shape[0]
    Cout, Cin, kh, kw = w.shape
    patches, Ho, Wo = im2col_nhwc(x, kh, kw, 1, 1)             # bf16 (N*HW, K)
    K = kh * kw * Cin
    pm = patches.reshape(N, Ho * Wo, K).astype(jnp.float32).mean(axis=1)
    return pallas_matmul_bias_act(pm.astype(jnp.bfloat16), _flatten_weight(w),
                                  b, alpha=None, out_dtype=jnp.float32)


# ---------------------------------------------------------------------------
# Discriminator forward
# ---------------------------------------------------------------------------

def discriminator_forward(x_nchw, params):
    (w1, b1), (w2, b2), (w3, b3), (w4, b4), (w5, b5) = params
    # Single NCHW -> NHWC transpose and f32 -> bf16 cast BEFORE any im2col.
    x = jnp.transpose(x_nchw, (0, 2, 3, 1)).astype(jnp.bfloat16)
    # Conv(3->64, k4, s2, p1) + LeakyReLU(0.2)
    x = conv2d_lrelu(x, w1, b1, stride=2, pad=1, alpha=0.2)
    # Conv(64->128) + InstanceNorm + LeakyReLU  (fused kernel, bf16 out)
    x = conv2d_instnorm_lrelu(x, w2, b2, stride=2, pad=1)
    # Conv(128->256) + InstanceNorm + LeakyReLU
    x = conv2d_instnorm_lrelu(x, w3, b3, stride=2, pad=1)
    # Conv(256->512, s1) + InstanceNorm + LeakyReLU
    x = conv2d_instnorm_lrelu(x, w4, b4, stride=1, pad=1)
    # Conv(512->1, k4, s1, p1) + avg_pool over full spatial + flatten -> (N, 1)
    return conv_mean_head(x, w5, b5)


def init_params(key):
    shapes = [
        (64, 3, 4, 4),
        (128, 64, 4, 4),
        (256, 128, 4, 4),
        (512, 256, 4, 4),
        (1, 512, 4, 4),
    ]
    params = []
    for s in shapes:
        key, wk = jax.random.split(key)
        w = (0.02 * jax.random.normal(wk, s)).astype(jnp.float32)
        b = jnp.zeros((s[0],), jnp.float32)
        params.append((w, b))
    return params


if __name__ == "__main__":
    key = jax.random.PRNGKey(0)
    pkey, xkey = jax.random.split(key)
    params = init_params(pkey)
    # 32x32 input: 32 -> 16 -> 8 -> 4 -> 3 -> 2 spatially, then global avg pool.
    x = jax.random.normal(xkey, (2, 3, 32, 32), dtype=jnp.float32)

    fwd = jax.jit(discriminator_forward)
    out = fwd(x, params)
    jax.block_until_ready(out)
    assert out.shape == (2, 1), out.shape
    assert bool(jnp.all(jnp.isfinite(out)))
    print("KERNEL_OK")
</pallas_src>

<mosaic_0001>
module attributes {stable_mosaic.version = 11 : i64} {
  func.func @_mm_bias_act_kernel(%arg0: i32, %arg1: i32, %arg2: i32, %arg3: memref<256x128xbf16, #tpu.memory_space<vmem>>, %arg4: memref<128x128xbf16, #tpu.memory_space<vmem>>, %arg5: memref<1x128xf32, #tpu.memory_space<vmem>>, %arg6: memref<256x128xbf16, #tpu.memory_space<vmem>>) attributes {dimension_semantics = [#tpu.dimension_semantics<parallel>, #tpu.dimension_semantics<parallel>, #tpu.dimension_semantics<arbitrary>], iteration_bounds = array<i64: 2, 1, 1>, scalar_prefetch = 0 : i64, scratch_operands = 0 : i64, tpu.core_type = #tpu.core_type<tc>, window_params = [{transform_indices = @transform_0, window_bounds = array<i64: 256, 128>}, {transform_indices = @transform_1, window_bounds = array<i64: 128, 128>}, {transform_indices = @transform_2, window_bounds = array<i64: 1, 128>}, {transform_indices = @transform_3, window_bounds = array<i64: 256, 128>}]} {
    %c0 = arith.constant 0 : index
    %c0_0 = arith.constant 0 : index
    %0 = vector.load %arg3[%c0, %c0_0] : memref<256x128xbf16, #tpu.memory_space<vmem>>, vector<256x128xbf16>
    %c0_1 = arith.constant 0 : index
    %c0_2 = arith.constant 0 : index
    %1 = vector.load %arg4[%c0_1, %c0_2] : memref<128x128xbf16, #tpu.memory_space<vmem>>, vector<128x128xbf16>
    %cst = arith.constant dense<0.000000e+00> : vector<256x128xf32>
    %2 = tpu.matmul %0, %1, %cst {dimension_numbers = #tpu.dot_dimension_numbers<[1], [0], [0], [1], [0, 0, 1, 1], [], []>} : vector<256x128xbf16>, vector<128x128xbf16>, vector<256x128xf32> -> vector<256x128xf32>
    %c0_3 = arith.constant 0 : index
    %c0_4 = arith.constant 0 : index
    %3 = vector.load %arg5[%c0_3, %c0_4] : memref<1x128xf32, #tpu.memory_space<vmem>>, vector<1x128xf32>
    %4 = vector.broadcast %3 : vector<1x128xf32> to vector<256x128xf32>
    %5 = arith.addf %2, %4 : vector<256x128xf32>
    %cst_5 = arith.constant 0.000000e+00 : f32
    %6 = vector.broadcast %cst_5 : f32 to vector<256x128xf32>
    %7 = arith.cmpf oge, %5, %6 : vector<256x128xf32>
    %cst_6 = arith.constant 2.000000e-01 : f32
    %8 = vector.broadcast %cst_6 : f32 to vector<256x128xf32>
    %9 = arith.mulf %8, %5 : vector<256x128xf32>
    %10 = arith.select %7, %5, %9 : vector<256x128xi1>, vector<256x128xf32>
    %11 = arith.truncf %10 : vector<256x128xf32> to vector<256x128xbf16>
    %c0_7 = arith.constant 0 : index
    %c0_8 = arith.constant 0 : index
    %12 = vector.load %arg6[%c0_7, %c0_8] : memref<256x128xbf16, #tpu.memory_space<vmem>>, vector<256x128xbf16>
    tpu.vector_store %arg6[%c0_7, %c0_8], %11 {strides = array<i32>} : memref<256x128xbf16, #tpu.memory_space<vmem>>, vector<256x128xbf16>,
    return
  }
  func.func @transform_0(%arg0: i32, %arg1: i32, %arg2: i32) -> (i32, i32) {
    %c0_i32 = arith.constant 0 : i32
    return %arg0, %arg2 : i32, i32
  }
  func.func @transform_1(%arg0: i32, %arg1: i32, %arg2: i32) -> (i32, i32) {
    %c0_i32 = arith.constant 0 : i32
    return %arg2, %arg1 : i32, i32
  }
  func.func @transform_2(%arg0: i32, %arg1: i32, %arg2: i32) -> (i32, i32) {
    %c0_i32 = arith.constant 0 : i32
    %c0_i32_0 = arith.constant 0 : i32
    return %c0_i32, %arg1 : i32, i32
  }
  func.func @transform_3(%arg0: i32, %arg1: i32, %arg2: i32) -> (i32, i32) {
    %c0_i32 = arith.constant 0 : i32
    return %arg0, %arg1 : i32, i32
  }
}

module attributes {stable_mosaic.version = 11 : i64} {
  func.func @_conv_in_lrelu_kernel(%arg0: i32, %arg1: i32, %arg2: i32, %arg3: memref<64x1024xbf16, #tpu.memory_space<vmem>>, %arg4: memref<1024x128xbf16, #tpu.memory_space<vmem>>, %arg5: memref<64x128xbf16, #tpu.memory_space<vmem>>, %arg6: memref<64x128xf32, #tpu.memory_space<vmem>>) attributes {dimension_semantics = [#tpu.dimension_semantics<parallel>, #tpu.dimension_semantics<parallel>, #tpu.dimension_semantics<arbitrary>], iteration_bounds = array<i64: 2, 1, 1>, scalar_prefetch = 0 : i64, scratch_operands = 1 : i64, tpu.core_type = #tpu.core_type<tc>, window_params = [{transform_indices = @transform_0, window_bounds = array<i64: 64, 1024>}, {transform_indices = @transform_1, window_bounds = array<i64: 1024, 128>}, {transform_indices = @transform_2, window_bounds = array<i64: 64, 128>}]} {
    %c0 = arith.constant 0 : index
    %c0_0 = arith.constant 0 : index
    %0 = vector.load %arg3[%c0, %c0_0] : memref<64x1024xbf16, #tpu.memory_space<vmem>>, vector<64x1024xbf16>
    %c0_1 = arith.constant 0 : index
    %c0_2 = arith.constant 0 : index
    %1 = vector.load %arg4[%c0_1, %c0_2] : memref<1024x128xbf16, #tpu.memory_space<vmem>>, vector<1024x128xbf16>
    %cst = arith.constant dense<0.000000e+00> : vector<64x128xf32>
    %2 = tpu.matmul %0, %1, %cst {dimension_numbers = #tpu.dot_dimension_numbers<[1], [0], [0], [1], [0, 0, 1, 1], [], []>} : vector<64x1024xbf16>, vector<1024x128xbf16>, vector<64x128xf32> -> vector<64x128xf32>
    %c0_i32 = arith.constant 0 : i32
    %3 = arith.cmpi eq, %arg2, %c0_i32 : i32
    %4 = arith.extui %3 : i1 to i32
    %c0_i32_3 = arith.constant 0 : i32
    %5 = arith.cmpi ne, %4, %c0_i32_3 : i32
    scf.if %5 {
      %c0_8 = arith.constant 0 : index
      %c0_9 = arith.constant 0 : index
      %12 = vector.load %arg6[%c0_8, %c0_9] : memref<64x128xf32, #tpu.memory_space<vmem>>, vector<64x128xf32>
      tpu.vector_store %arg6[%c0_8, %c0_9], %2 {strides = array<i32>} : memref<64x128xf32, #tpu.memory_space<vmem>>, vector<64x128xf32>,
    } else {
    }
    %c0_i32_4 = arith.constant 0 : i32
    %6 = arith.cmpi sgt, %arg2, %c0_i32_4 : i32
    %7 = arith.extui %6 : i1 to i32
    %c0_i32_5 = arith.constant 0 : i32
    %8 = arith.cmpi ne, %7, %c0_i32_5 : i32
    scf.if %8 {
      %c0_8 = arith.constant 0 : index
      %c0_9 = arith.constant 0 : index
      %12 = vector.load %arg6[%c0_8, %c0_9] : memref<64x128xf32, #tpu.memory_space<vmem>>, vector<64x128xf32>
      %13 = arith.addf %12, %2 : vector<64x128xf32>
      %c0_10 = arith.constant 0 : index
      %c0_11 = arith.constant 0 : index
      %14 = vector.load %arg6[%c0_10, %c0_11] : memref<64x128xf32, #tpu.memory_space<vmem>>, vector<64x128xf32>
      tpu.vector_store %arg6[%c0_10, %c0_11], %13 {strides = array<i32>} : memref<64x128xf32, #tpu.memory_space<vmem>>, vector<64x128xf32>,
    } else {
    }
    %c0_i32_6 = arith.constant 0 : i32
    %9 = arith.cmpi eq, %arg2, %c0_i32_6 : i32
    %10 = arith.extui %9 : i1 to i32
    %c0_i32_7 = arith.constant 0 : i32
    %11 = arith.cmpi ne, %10, %c0_i32_7 : i32
    scf.if %11 {
      %c0_8 = arith.constant 0 : index
      %c0_9 = arith.constant 0 : index
      %12 = vector.load %arg6[%c0_8, %c0_9] : memref<64x128xf32, #tpu.memory_space<vmem>>, vector<64x128xf32>
      %cst_10 = arith.constant dense<0.000000e+00> : vector<128xf32>
      %13 = vector.multi_reduction <add>, %12, %cst_10 [0] : vector<64x128xf32> to vector<128xf32>
      %14 = vector.shape_cast %13 : vector<128xf32> to vector<1x128xf32>
      %cst_11 = arith.constant 6.400000e+01 : f32
      %15 = vector.broadcast %cst_11 : f32 to vector<1x128xf32>
      %16 = arith.divf %14, %15 : vector<1x128xf32>
      %17 = vector.broadcast %16 : vector<1x128xf32> to vector<64x128xf32>
      %18 = arith.subf %12, %17 : vector<64x128xf32>
      %19 = arith.mulf %18, %18 : vector<64x128xf32>
      %cst_12 = arith.constant dense<0.000000e+00> : vector<128xf32>
      %20 = vector.multi_reduction <add>, %19, %cst_12 [0] : vector<64x128xf32> to vector<128xf32>
      %21 = vector.shape_cast %20 : vector<128xf32> to vector<1x128xf32>
      %cst_13 = arith.constant 6.400000e+01 : f32
      %22 = vector.broadcast %cst_13 : f32 to vector<1x128xf32>
      %23 = arith.divf %21, %22 : vector<1x128xf32>
      %24 = vector.broadcast %16 : vector<1x128xf32> to vector<64x128xf32>
      %25 = arith.subf %12, %24 : vector<64x128xf32>
      %cst_14 = arith.constant 9.99999974E-6 : f32
      %26 = vector.broadcast %cst_14 : f32 to vector<1x128xf32>
      %27 = arith.addf %23, %26 : vector<1x128xf32>
      %28 = math.rsqrt %27 : vector<1x128xf32>
      %29 = vector.broadcast %28 : vector<1x128xf32> to vector<64x128xf32>
      %30 = arith.mulf %25, %29 : vector<64x128xf32>
      %cst_15 = arith.constant 0.000000e+00 : f32
      %31 = vector.broadcast %cst_15 : f32 to vector<64x128xf32>
      %32 = arith.cmpf oge, %30, %31 : vector<64x128xf32>
      %cst_16 = arith.constant 2.000000e-01 : f32
      %33 = vector.broadcast %cst_16 : f32 to vector<64x128xf32>
      %34 = arith.mulf %33, %30 : vector<64x128xf32>
      %35 = arith.select %32, %30, %34 : vector<64x128xi1>, vector<64x128xf32>
      %36 = arith.truncf %35 : vector<64x128xf32> to vector<64x128xbf16>
      %c0_17 = arith.constant 0 : index
      %c0_18 = arith.constant 0 : index
      %37 = vector.load %arg5[%c0_17, %c0_18] : memref<64x128xbf16, #tpu.memory_space<vmem>>, vector<64x128xbf16>
      tpu.vector_store %arg5[%c0_17, %c0_18], %36 {strides = array<i32>} : memref<64x128xbf16, #tpu.memory_space<vmem>>, vector<64x128xbf16>,
    } else {
    }
    return
  }
  func.func @transform_0(%arg0: i32, %arg1: i32, %arg2: i32) -> (i32, i32) {
    %c0_i32 = arith.constant 0 : i32
    return %arg0, %arg2 : i32, i32
  }
  func.func @transform_1(%arg0: i32, %arg1: i32, %arg2: i32) -> (i32, i32) {
    %c0_i32 = arith.constant 0 : i32
    return %arg2, %arg1 : i32, i32
  }
  func.func @transform_2(%arg0: i32, %arg1: i32, %arg2: i32) -> (i32, i32) {
    %c0_i32 = arith.constant 0 : i32
    return %arg0, %arg1 : i32, i32
  }
}

module attributes {stable_mosaic.version = 11 : i64} {
  func.func @_conv_in_lrelu_kernel(%arg0: i32, %arg1: i32, %arg2: i32, %arg3: memref<16x2048xbf16, #tpu.memory_space<vmem>>, %arg4: memref<2048x128xbf16, #tpu.memory_space<vmem>>, %arg5: memref<16x128xbf16, #tpu.memory_space<vmem>>, %arg6: memref<16x128xf32, #tpu.memory_space<vmem>>) attributes {dimension_semantics = [#tpu.dimension_semantics<parallel>, #tpu.dimension_semantics<parallel>, #tpu.dimension_semantics<arbitrary>], iteration_bounds = array<i64: 2, 2, 1>, scalar_prefetch = 0 : i64, scratch_operands = 1 : i64, tpu.core_type = #tpu.core_type<tc>, window_params = [{transform_indices = @transform_0, window_bounds = array<i64: 16, 2048>}, {transform_indices = @transform_1, window_bounds = array<i64: 2048, 128>}, {transform_indices = @transform_2, window_bounds = array<i64: 16, 128>}]} {
    %c0 = arith.constant 0 : index
    %c0_0 = arith.constant 0 : index
    %0 = vector.load %arg3[%c0, %c0_0] : memref<16x2048xbf16, #tpu.memory_space<vmem>>, vector<16x2048xbf16>
    %c0_1 = arith.constant 0 : index
    %c0_2 = arith.constant 0 : index
    %1 = vector.load %arg4[%c0_1, %c0_2] : memref<2048x128xbf16, #tpu.memory_space<vmem>>, vector<2048x128xbf16>
    %cst = arith.constant dense<0.000000e+00> : vector<16x128xf32>
    %2 = tpu.matmul %0, %1, %cst {dimension_numbers = #tpu.dot_dimension_numbers<[1], [0], [0], [1], [0, 0, 1, 1], [], []>} : vector<16x2048xbf16>, vector<2048x128xbf16>, vector<16x128xf32> -> vector<16x128xf32>
    %c0_i32 = arith.constant 0 : i32
    %3 = arith.cmpi eq, %arg2, %c0_i32 : i32
    %4 = arith.extui %3 : i1 to i32
    %c0_i32_3 = arith.constant 0 : i32
    %5 = arith.cmpi ne, %4, %c0_i32_3 : i32
    scf.if %5 {
      %c0_8 = arith.constant 0 : index
      %c0_9 = arith.constant 0 : index
      %12 = vector.load %arg6[%c0_8, %c0_9] : memref<16x128xf32, #tpu.memory_space<vmem>>, vector<16x128xf32>
      tpu.vector_store %arg6[%c0_8, %c0_9], %2 {strides = array<i32>} : memref<16x128xf32, #tpu.memory_space<vmem>>, vector<16x128xf32>,
    } else {
    }
    %c0_i32_4 = arith.constant 0 : i32
    %6 = arith.cmpi sgt, %arg2, %c0_i32_4 : i32
    %7 = arith.extui %6 : i1 to i32
    %c0_i32_5 = arith.constant 0 : i32
    %8 = arith.cmpi ne, %7, %c0_i32_5 : i32
    scf.if %8 {
      %c0_8 = arith.constant 0 : index
      %c0_9 = arith.constant 0 : index
      %12 = vector.load %arg6[%c0_8, %c0_9] : memref<16x128xf32, #tpu.memory_space<vmem>>, vector<16x128xf32>
      %13 = arith.addf %12, %2 : vector<16x128xf32>
      %c0_10 = arith.constant 0 : index
      %c0_11 = arith.constant 0 : index
      %14 = vector.load %arg6[%c0_10, %c0_11] : memref<16x128xf32, #tpu.memory_space<vmem>>, vector<16x128xf32>
      tpu.vector_store %arg6[%c0_10, %c0_11], %13 {strides = array<i32>} : memref<16x128xf32, #tpu.memory_space<vmem>>, vector<16x128xf32>,
    } else {
    }
    %c0_i32_6 = arith.constant 0 : i32
    %9 = arith.cmpi eq, %arg2, %c0_i32_6 : i32
    %10 = arith.extui %9 : i1 to i32
    %c0_i32_7 = arith.constant 0 : i32
    %11 = arith.cmpi ne, %10, %c0_i32_7 : i32
    scf.if %11 {
      %c0_8 = arith.constant 0 : index
      %c0_9 = arith.constant 0 : index
      %12 = vector.load %arg6[%c0_8, %c0_9] : memref<16x128xf32, #tpu.memory_space<vmem>>, vector<16x128xf32>
      %cst_10 = arith.constant dense<0.000000e+00> : vector<128xf32>
      %13 = vector.multi_reduction <add>, %12, %cst_10 [0] : vector<16x128xf32> to vector<128xf32>
      %14 = vector.shape_cast %13 : vector<128xf32> to vector<1x128xf32>
      %cst_11 = arith.constant 1.600000e+01 : f32
      %15 = vector.broadcast %cst_11 : f32 to vector<1x128xf32>
      %16 = arith.divf %14, %15 : vector<1x128xf32>
      %17 = vector.broadcast %16 : vector<1x128xf32> to vector<16x128xf32>
      %18 = arith.subf %12, %17 : vector<16x128xf32>
      %19 = arith.mulf %18, %18 : vector<16x128xf32>
      %cst_12 = arith.constant dense<0.000000e+00> : vector<128xf32>
      %20 = vector.multi_reduction <add>, %19, %cst_12 [0] : vector<16x128xf32> to vector<128xf32>
      %21 = vector.shape_cast %20 : vector<128xf32> to vector<1x128xf32>
      %cst_13 = arith.constant 1.600000e+01 : f32
      %22 = vector.broadcast %cst_13 : f32 to vector<1x128xf32>
      %23 = arith.divf %21, %22 : vector<1x128xf32>
      %24 = vector.broadcast %16 : vector<1x128xf32> to vector<16x128xf32>
      %25 = arith.subf %12, %24 : vector<16x128xf32>
      %cst_14 = arith.constant 9.99999974E-6 : f32
      %26 = vector.broadcast %cst_14 : f32 to vector<1x128xf32>
      %27 = arith.addf %23, %26 : vector<1x128xf32>
      %28 = math.rsqrt %27 : vector<1x128xf32>
      %29 = vector.broadcast %28 : vector<1x128xf32> to vector<16x128xf32>
      %30 = arith.mulf %25, %29 : vector<16x128xf32>
      %cst_15 = arith.constant 0.000000e+00 : f32
      %31 = vector.broadcast %cst_15 : f32 to vector<16x128xf32>
      %32 = arith.cmpf oge, %30, %31 : vector<16x128xf32>
      %cst_16 = arith.constant 2.000000e-01 : f32
      %33 = vector.broadcast %cst_16 : f32 to vector<16x128xf32>
      %34 = arith.mulf %33, %30 : vector<16x128xf32>
      %35 = arith.select %32, %30, %34 : vector<16x128xi1>, vector<16x128xf32>
      %36 = arith.truncf %35 : vector<16x128xf32> to vector<16x128xbf16>
      %c0_17 = arith.constant 0 : index
      %c0_18 = arith.constant 0 : index
      %37 = vector.load %arg5[%c0_17, %c0_18] : memref<16x128xbf16, #tpu.memory_space<vmem>>, vector<16x128xbf16>
      tpu.vector_store %arg5[%c0_17, %c0_18], %36 {strides = array<i32>} : memref<16x128xbf16, #tpu.memory_space<vmem>>, vector<16x128xbf16>,
    } else {
    }
    return
  }
  func.func @transform_0(%arg0: i32, %arg1: i32, %arg2: i32) -> (i32, i32) {
    %c0_i32 = arith.constant 0 : i32
    return %arg0, %arg2 : i32, i32
  }
  func.func @transform_1(%arg0: i32, %arg1: i32, %arg2: i32) -> (i32, i32) {
    %c0_i32 = arith.constant 0 : i32
    return %arg2, %arg1 : i32, i32
  }
  func.func @transform_2(%arg0: i32, %arg1: i32, %arg2: i32) -> (i32, i32) {
    %c0_i32 = arith.constant 0 : i32
    return %arg0, %arg1 : i32, i32
  }
}

module attributes {stable_mosaic.version = 11 : i64} {
  func.func @_conv_in_lrelu_kernel(%arg0: i32, %arg1: i32, %arg2: i32, %arg3: memref<16x4096xbf16, #tpu.memory_space<vmem>>, %arg4: memref<4096x128xbf16, #tpu.memory_space<vmem>>, %arg5: memref<16x128xbf16, #tpu.memory_space<vmem>>, %arg6: memref<16x128xf32, #tpu.memory_space<vmem>>) attributes {dimension_semantics = [#tpu.dimension_semantics<parallel>, #tpu.dimension_semantics<parallel>, #tpu.dimension_semantics<arbitrary>], iteration_bounds = array<i64: 2, 4, 1>, scalar_prefetch = 0 : i64, scratch_operands = 1 : i64, tpu.core_type = #tpu.core_type<tc>, window_params = [{transform_indices = @transform_0, window_bounds = array<i64: 16, 4096>}, {transform_indices = @transform_1, window_bounds = array<i64: 4096, 128>}, {transform_indices = @transform_2, window_bounds = array<i64: 16, 128>}]} {
    %c0 = arith.constant 0 : index
    %c0_0 = arith.constant 0 : index
    %0 = vector.load %arg3[%c0, %c0_0] : memref<16x4096xbf16, #tpu.memory_space<vmem>>, vector<16x4096xbf16>
    %c0_1 = arith.constant 0 : index
    %c0_2 = arith.constant 0 : index
    %1 = vector.load %arg4[%c0_1, %c0_2] : memref<4096x128xbf16, #tpu.memory_space<vmem>>, vector<4096x128xbf16>
    %cst = arith.constant dense<0.000000e+00> : vector<16x128xf32>
    %2 = tpu.matmul %0, %1, %cst {dimension_numbers = #tpu.dot_dimension_numbers<[1], [0], [0], [1], [0, 0, 1, 1], [], []>} : vector<16x4096xbf16>, vector<4096x128xbf16>, vector<16x128xf32> -> vector<16x128xf32>
    %c0_i32 = arith.constant 0 : i32
    %3 = arith.cmpi eq, %arg2, %c0_i32 : i32
    %4 = arith.extui %3 : i1 to i32
    %c0_i32_3 = arith.constant 0 : i32
    %5 = arith.cmpi ne, %4, %c0_i32_3 : i32
    scf.if %5 {
      %c0_8 = arith.constant 0 : index
      %c0_9 = arith.constant 0 : index
      %12 = vector.load %arg6[%c0_8, %c0_9] : memref<16x128xf32, #tpu.memory_space<vmem>>, vector<16x128xf32>
      tpu.vector_store %arg6[%c0_8, %c0_9], %2 {strides = array<i32>} : memref<16x128xf32, #tpu.memory_space<vmem>>, vector<16x128xf32>,
    } else {
    }
    %c0_i32_4 = arith.constant 0 : i32
    %6 = arith.cmpi sgt, %arg2, %c0_i32_4 : i32
    %7 = arith.extui %6 : i1 to i32
    %c0_i32_5 = arith.constant 0 : i32
    %8 = arith.cmpi ne, %7, %c0_i32_5 : i32
    scf.if %8 {
      %c0_8 = arith.constant 0 : index
      %c0_9 = arith.constant 0 : index
      %12 = vector.load %arg6[%c0_8, %c0_9] : memref<16x128xf32, #tpu.memory_space<vmem>>, vector<16x128xf32>
      %13 = arith.addf %12, %2 : vector<16x128xf32>
      %c0_10 = arith.constant 0 : index
      %c0_11 = arith.constant 0 : index
      %14 = vector.load %arg6[%c0_10, %c0_11] : memref<16x128xf32, #tpu.memory_space<vmem>>, vector<16x128xf32>
      tpu.vector_store %arg6[%c0_10, %c0_11], %13 {strides = array<i32>} : memref<16x128xf32, #tpu.memory_space<vmem>>, vector<16x128xf32>,
    } else {
    }
    %c0_i32_6 = arith.constant 0 : i32
    %9 = arith.cmpi eq, %arg2, %c0_i32_6 : i32
    %10 = arith.extui %9 : i1 to i32
    %c0_i32_7 = arith.constant 0 : i32
    %11 = arith.cmpi ne, %10, %c0_i32_7 : i32
    scf.if %11 {
      %c0_8 = arith.constant 0 : index
      %c0_9 = arith.constant 0 : index
      %12 = vector.load %arg6[%c0_8, %c0_9] : memref<16x128xf32, #tpu.memory_space<vmem>>, vector<16x128xf32>
      %13 = tpu.iota {dimensions = array<i32: 0>} : vector<16x1xi32>
      %c9_i32 = arith.constant 9 : i32
      %14 = vector.broadcast %c9_i32 : i32 to vector<16x1xi32>
      %15 = arith.cmpi slt, %13, %14 : vector<16x1xi32>
      %16 = arith.extui %15 : vector<16x1xi1> to vector<16x1xi32>
      %17 = arith.sitofp %16 : vector<16x1xi32> to vector<16x1xf32>
      %18 = vector.broadcast %17 : vector<16x1xf32> to vector<16x128xf32>
      %19 = arith.mulf %12, %18 : vector<16x128xf32>
      %cst_10 = arith.constant dense<0.000000e+00> : vector<128xf32>
      %20 = vector.multi_reduction <add>, %19, %cst_10 [0] : vector<16x128xf32> to vector<128xf32>
      %21 = vector.shape_cast %20 : vector<128xf32> to vector<1x128xf32>
      %cst_11 = arith.constant 0.111111112 : f32
      %22 = vector.broadcast %cst_11 : f32 to vector<1x128xf32>
      %23 = arith.mulf %21, %22 : vector<1x128xf32>
      %24 = vector.broadcast %23 : vector<1x128xf32> to vector<16x128xf32>
      %25 = arith.subf %12, %24 : vector<16x128xf32>
      %26 = arith.mulf %25, %25 : vector<16x128xf32>
      %27 = vector.broadcast %17 : vector<16x1xf32> to vector<16x128xf32>
      %28 = arith.mulf %26, %27 : vector<16x128xf32>
      %cst_12 = arith.constant dense<0.000000e+00> : vector<128xf32>
      %29 = vector.multi_reduction <add>, %28, %cst_12 [0] : vector<16x128xf32> to vector<128xf32>
      %30 = vector.shape_cast %29 : vector<128xf32> to vector<1x128xf32>
      %cst_13 = arith.constant 0.111111112 : f32
      %31 = vector.broadcast %cst_13 : f32 to vector<1x128xf32>
      %32 = arith.mulf %30, %31 : vector<1x128xf32>
      %33 = vector.broadcast %23 : vector<1x128xf32> to vector<16x128xf32>
      %34 = arith.subf %12, %33 : vector<16x128xf32>
      %cst_14 = arith.constant 9.99999974E-6 : f32
      %35 = vector.broadcast %cst_14 : f32 to vector<1x128xf32>
      %36 = arith.addf %32, %35 : vector<1x128xf32>
      %37 = math.rsqrt %36 : vector<1x128xf32>
      %38 = vector.broadcast %37 : vector<1x128xf32> to vector<16x128xf32>
      %39 = arith.mulf %34, %38 : vector<16x128xf32>
      %cst_15 = arith.constant 0.000000e+00 : f32
      %40 = vector.broadcast %cst_15 : f32 to vector<16x128xf32>
      %41 = arith.cmpf oge, %39, %40 : vector<16x128xf32>
      %cst_16 = arith.constant 2.000000e-01 : f32
      %42 = vector.broadcast %cst_16 : f32 to vector<16x128xf32>
      %43 = arith.mulf %42, %39 : vector<16x128xf32>
      %44 = arith.select %41, %39, %43 : vector<16x128xi1>, vector<16x128xf32>
      %45 = arith.truncf %44 : vector<16x128xf32> to vector<16x128xbf16>
      %c0_17 = arith.constant 0 : index
      %c0_18 = arith.constant 0 : index
      %46 = vector.load %arg5[%c0_17, %c0_18] : memref<16x128xbf16, #tpu.memory_space<vmem>>, vector<16x128xbf16>
      tpu.vector_store %arg5[%c0_17, %c0_18], %45 {strides = array<i32>} : memref<16x128xbf16, #tpu.memory_space<vmem>>, vector<16x128xbf16>,
    } else {
    }
    return
  }
  func.func @transform_0(%arg0: i32, %arg1: i32, %arg2: i32) -> (i32, i32) {
    %c0_i32 = arith.constant 0 : i32
    return %arg0, %arg2 : i32, i32
  }
  func.func @transform_1(%arg0: i32, %arg1: i32, %arg2: i32) -> (i32, i32) {
    %c0_i32 = arith.constant 0 : i32
    return %arg2, %arg1 : i32, i32
  }
  func.func @transform_2(%arg0: i32, %arg1: i32, %arg2: i32) -> (i32, i32) {
    %c0_i32 = arith.constant 0 : i32
    return %arg0, %arg1 : i32, i32
  }
}

module attributes {stable_mosaic.version = 11 : i64} {
  func.func @_mm_bias_act_kernel(%arg0: i32, %arg1: i32, %arg2: i32, %arg3: memref<8x8192xbf16, #tpu.memory_space<vmem>>, %arg4: memref<8192x128xbf16, #tpu.memory_space<vmem>>, %arg5: memref<1x128xf32, #tpu.memory_space<vmem>>, %arg6: memref<8x128xf32, #tpu.memory_space<vmem>>) attributes {dimension_semantics = [#tpu.dimension_semantics<parallel>, #tpu.dimension_semantics<parallel>, #tpu.dimension_semantics<arbitrary>], iteration_bounds = array<i64: 1, 1, 1>, scalar_prefetch = 0 : i64, scratch_operands = 0 : i64, tpu.core_type = #tpu.core_type<tc>, window_params = [{transform_indices = @transform_0, window_bounds = array<i64: 8, 8192>}, {transform_indices = @transform_1, window_bounds = array<i64: 8192, 128>}, {transform_indices = @transform_2, window_bounds = array<i64: 1, 128>}, {transform_indices = @transform_3, window_bounds = array<i64: 8, 128>}]} {
    %c0 = arith.constant 0 : index
    %c0_0 = arith.constant 0 : index
    %0 = vector.load %arg3[%c0, %c0_0] : memref<8x8192xbf16, #tpu.memory_space<vmem>>, vector<8x8192xbf16>
    %c0_1 = arith.constant 0 : index
    %c0_2 = arith.constant 0 : index
    %1 = vector.load %arg4[%c0_1, %c0_2] : memref<8192x128xbf16, #tpu.memory_space<vmem>>, vector<8192x128xbf16>
    %cst = arith.constant dense<0.000000e+00> : vector<8x128xf32>
    %2 = tpu.matmul %0, %1, %cst {dimension_numbers = #tpu.dot_dimension_numbers<[1], [0], [0], [1], [0, 0, 1, 1], [], []>} : vector<8x8192xbf16>, vector<8192x128xbf16>, vector<8x128xf32> -> vector<8x128xf32>
    %c0_3 = arith.constant 0 : index
    %c0_4 = arith.constant 0 : index
    %3 = vector.load %arg5[%c0_3, %c0_4] : memref<1x128xf32, #tpu.memory_space<vmem>>, vector<1x128xf32>
    %4 = vector.broadcast %3 : vector<1x128xf32> to vector<8x128xf32>
    %5 = arith.addf %2, %4 : vector<8x128xf32>
    %c0_5 = arith.constant 0 : index
    %c0_6 = arith.constant 0 : index
    %6 = vector.load %arg6[%c0_5, %c0_6] : memref<8x128xf32, #tpu.memory_space<vmem>>, vector<8x128xf32>
    tpu.vector_store %arg6[%c0_5, %c0_6], %5 {strides = array<i32>} : memref<8x128xf32, #tpu.memory_space<vmem>>, vector<8x128xf32>,
    return
  }
  func.func @transform_0(%arg0: i32, %arg1: i32, %arg2: i32) -> (i32, i32) {
    %c0_i32 = arith.constant 0 : i32
    return %arg0, %arg2 : i32, i32
  }
  func.func @transform_1(%arg0: i32, %arg1: i32, %arg2: i32) -> (i32, i32) {
    %c0_i32 = arith.constant 0 : i32
    return %arg2, %arg1 : i32, i32
  }
  func.func @transform_2(%arg0: i32, %arg1: i32, %arg2: i32) -> (i32, i32) {
    %c0_i32 = arith.constant 0 : i32
    %c0_i32_0 = arith.constant 0 : i32
    return %c0_i32, %arg1 : i32, i32
  }
  func.func @transform_3(%arg0: i32, %arg1: i32, %arg2: i32) -> (i32, i32) {
    %c0_i32 = arith.constant 0 : i32
    return %arg0, %arg1 : i32, i32
  }
}

</mosaic_0001>

<bundles_post_ra>
// kernel: discriminator_forward.5
= control target key start
LH: loop header
LB: loop body
LE: loop exit
PB: predicated region body
PF: predicated region fallthrough
CT: control target
= control target key end

     0   :  { %s1364_s12 = smov 0   ;;  %s1366_s13 = smov 0   ;;  %s1507_s0 = inlined_call_operand.vmem [shape: bf16[512,128], index: 0, kind: input, shape index: {}]   ;;  %s1508_s1 = inlined_call_operand.vmem [shape: bf16[128,128], index: 1, kind: input, shape index: {}]   ;;  %s1509_s2 = inlined_call_operand.vmem [shape: f32[1,128], index: 2, kind: input, shape index: {}]   ;;  %s1510_s3 = inlined_call_operand.vmem [shape: bf16[512,128], index: 3, kind: output, shape index: {}]  }
   0x1   :  { %s1368_s14 = smov 0  }
   0x2 LB: > { %s32_s15 = sadd.s32 1, %s1338_s13  ;;  %p993_p0 = scmp.ge.s32.totalorder %s1342_s14, 1  ;;  %s1342_s14 = sphi %s1368_s14, %s13_s14   ;;  %s1338_s13 = sphi %s1366_s13, %s1512_s13   ;;  %s1334_s12 = sphi %s1364_s12, %s1511_s12  }
   0x3   : > { %p34_p1 = scmp.ge.s32.totalorder %s32_s15, 2  ;;  %p188_p2 = scmp.lt.s32.totalorder %s1342_s14, 3 }
   0x5   : > { %s1514_s15 = smov (%p34_p1, %s32_s15), 0  ;;  %p189_p3 = pnand %p993_p0, %p188_p2 }
   0x6   : > { %v1296_v0 = vld [vmem:[%s1508_s1] sm:$0xff] (!%p189_p3)   ;;  %s994_s18 = sshll.u32 (!%p189_p3), %s1334_s12, 5  ;;  %v1297_v1 = vld [vmem:[%s1508_s1 + $0x8] sm:$0xff] (!%p189_p3)   ;;  %v1298_v2 = vld [vmem:[%s1508_s1 + $0x10] sm:$0xff] (!%p189_p3)  }
   0x7   : > { %192 = sbr.rel (%p189_p3) target bundleno = 294 (0x126), region = 32  ;;  %p230_p4 = scmp.lt.s32.totalorder (!%p189_p3), %s994_s18, 63  ;;  %1208 = vmatprep.subr.bf16.mxu0 (!%p189_p3), %v1296_v0  ;;  %1256 = vmatprep.subr.bf16.mxu1 (!%p189_p3), %v1296_v0  ;;  %v1299_v3 = vld [vmem:[%s1508_s1 + $0x18] sm:$0xff] (!%p189_p3)   ;;  %v1300_v6 = vld [vmem:[%s1508_s1 + $0x20] sm:$0xff] (!%p189_p3)   ;;  %v1301_v7 = vld [vmem:[%s1508_s1 + $0x28] sm:$0xff] (!%p189_p3)  }
   0x8   : > { %1209 = vmatpush3.bf16.msra.mxu0 (!%p189_p3), %v1296_v0  ;;  %1264 = vmatpush3.bf16.msra.mxu1 (!%p189_p3), %v1296_v0  ;;  %v1302_v8 = vld [vmem:[%s1508_s1 + $0x30] sm:$0xff] (!%p189_p3)   ;;  %v1303_v9 = vld [vmem:[%s1508_s1 + $0x38] sm:$0xff] (!%p189_p3)   ;;  %v1435_v24 = vld [vmem:[%s1509_s2] ss:$0 sm:$0xff] (!%p189_p3) }
   0x9   : > { %1210 = vmatprep.subr.bf16.mxu0 (!%p189_p3), %v1297_v1  ;;  %1257 = vmatprep.subr.bf16.mxu1 (!%p189_p3), %v1297_v1 }
   0xc   : > { %1211 = vmatpush3.bf16.msra.mxu0 (!%p189_p3), %v1297_v1  ;;  %1265 = vmatpush3.bf16.msra.mxu1 (!%p189_p3), %v1297_v1 }
   0xd   : > { %1212 = vmatprep.subr.bf16.mxu0 (!%p189_p3), %v1298_v2  ;;  %1258 = vmatprep.subr.bf16.mxu1 (!%p189_p3), %v1298_v2 }
   0xe   : > { %s1516_s18 = smov (!%p230_p4, %s994_s18), 63 }
   0xf   : > { %s995_s23 = sshll.u32 %s1516_s18, 2 }
  0x10   : > { %s1399_s26 = scalar_lea.vmem %s1507_s0, %s995_s23  ;;  %1213 = vmatpush3.bf16.msra.mxu0 %v1298_v2  ;;  %1266 = vmatpush3.bf16.msra.mxu1 %v1298_v2  ;;  %s1452_s17 = scalar_lea.vmem %s1510_s3, %s995_s23 }
  0x11   : > { %v1304_v4 = vld [vmem:[%s1399_s26] sm:$0xff]   ;;  %1214 = vmatprep.subr.bf16.mxu0 %v1299_v3  ;;  %1259 = vmatprep.subr.bf16.mxu1 %v1299_v3  ;;  %v1306_v10 = vld [vmem:[%s1399_s26 + $0x8] sm:$0xff]   ;;  %v1308_v12 = vld [vmem:[%s1399_s26 + $0x10] sm:$0xff]  }
  0x12   : > { %v1305_v5 = vld [vmem:[%s1399_s26 + $0x40] sm:$0xff]   ;;  %1224 = vmatprep.mubr.bf16.mxu0 %v1304_v4  ;;  %v1307_v11 = vld [vmem:[%s1399_s26 + $0x48] sm:$0xff]   ;;  %v1309_v13 = vld [vmem:[%s1399_s26 + $0x50] sm:$0xff]  }
  0x13   : > { %1240 = vmatprep.mubr.bf16.mxu1 %v1305_v5  ;;  %v1310_v14 = vld [vmem:[%s1399_s26 + $0x18] sm:$0xff]   ;;  %v1312_v16 = vld [vmem:[%s1399_s26 + $0x20] sm:$0xff]   ;;  %v1314_v18 = vld [vmem:[%s1399_s26 + $0x28] sm:$0xff]  }
  0x14   : > { %1215 = vmatpush3.bf16.msra.mxu0 %v1299_v3  ;;  %1267 = vmatpush3.bf16.msra.mxu1 %v1299_v3  ;;  %v1311_v15 = vld [vmem:[%s1399_s26 + $0x58] sm:$0xff]   ;;  %v1313_v17 = vld [vmem:[%s1399_s26 + $0x60] sm:$0xff]   ;;  %v1315_v19 = vld [vmem:[%s1399_s26 + $0x68] sm:$0xff]  }
  0x15   : > { %1216 = vmatprep.subr.bf16.mxu0 %v1300_v6  ;;  %1260 = vmatprep.subr.bf16.mxu1 %v1300_v6  ;;  %v1316_v20 = vld [vmem:[%s1399_s26 + $0x30] sm:$0xff]   ;;  %v1318_v22 = vld [vmem:[%s1399_s26 + $0x38] sm:$0xff]  }
  0x16   : > { %v1317_v21 = vld [vmem:[%s1399_s26 + $0x70] sm:$0xff]   ;;  %v1319_v23 = vld [vmem:[%s1399_s26 + $0x78] sm:$0xff]  }
  0x18   : > { %1217 = vmatpush3.bf16.msra.mxu0 %v1300_v6  ;;  %1268 = vmatpush3.bf16.msra.mxu1 %v1300_v6 }
  0x19   : > { %1218 = vmatprep.subr.bf16.mxu0 %v1301_v7  ;;  %1261 = vmatprep.subr.bf16.mxu1 %v1301_v7 }
  0x1c   : > { %1219 = vmatpush3.bf16.msra.mxu0 %v1301_v7  ;;  %1269 = vmatpush3.bf16.msra.mxu1 %v1301_v7 }
  0x1d   : > { %1220 = vmatprep.subr.bf16.mxu0 %v1302_v8  ;;  %1262 = vmatprep.subr.bf16.mxu1 %v1302_v8 }
  0x20   : > { %1221 = vmatpush3.bf16.msra.mxu0 %v1302_v8  ;;  %1270 = vmatpush3.bf16.msra.mxu1 %v1302_v8 }
  0x21   : > { %1222 = vmatprep.subr.bf16.mxu0 %v1303_v9  ;;  %1263 = vmatprep.subr.bf16.mxu1 %v1303_v9 }
  0x24   : > { %1223 = vmatpush3.bf16.msra.mxu0 %v1303_v9  ;;  %1271 = vmatpush3.bf16.msra.mxu1 %v1303_v9 }
  0x27   : > { %1225 = vmatmul.mubr.bf16.vlgmr.msra.gmra.mrb[0].mxu0 %v1306_v10  ;;  %1241 = vmatmul.mubr.bf16.vlgmr.msra.gmra.mrb[0].mxu1 %v1307_v11 }
  0x28   : > { %1228 = vmatprep.mubr.bf16.mxu0 %v1308_v12  ;;  %1244 = vmatprep.mubr.bf16.mxu1 %v1309_v13 }
  0x2f   : > { %1229 = vmatmul.mubr.bf16.gmra.mrb[4].mxu0 %v1310_v14  ;;  %1245 = vmatmul.mubr.bf16.gmra.mrb[4].mxu1 %v1311_v15 }
  0x30   : > { %1232 = vmatprep.mubr.bf16.mxu0 %v1312_v16  ;;  %1248 = vmatprep.mubr.bf16.mxu1 %v1313_v17 }
  0x37   : > { %1233 = vmatmul.mubr.bf16.gmra.mrb[8].mxu0 %v1314_v18  ;;  %1249 = vmatmul.mubr.bf16.gmra.mrb[8].mxu1 %v1315_v19 }
  0x38   : > { %1236 = vmatprep.mubr.bf16.mxu0 %v1316_v20  ;;  %1252 = vmatprep.mubr.bf16.mxu1 %v1317_v21 }
  0x3f   : > { %1237 = vmatmul.mubr.bf16.gmra.mrb[12].mxu0 %v1318_v22  ;;  %1253 = vmatmul.mubr.bf16.gmra.mrb[12].mxu1 %v1319_v23 }
  0xfa   : > { %v1226_v25 = vpop.f32.mrb[0].mxu0  ;;  %v1242_v26 = vpop.f32.mrb[0].mxu1 }
  0xfb   : > { %v502_v27 = vadd.f32 %v1226_v25, %v1435_v24  ;;  %v566_v28 = vadd.f32 %v1242_v26, %v1435_v24  ;;  %v493_v29 = vpop.f32.mrb[1].mxu0  ;;  %v557_v30 = vpop.f32.mrb[1].mxu1 }
  0xfc   : > { %v494_v31 = vadd.f32 %v1435_v24, %v493_v29  ;;  %v558_v32 = vadd.f32 %v1435_v24, %v557_v30  ;;  %v1227_v33 = vpop.f32.mrb[2].mxu0  ;;  %v1243_v34 = vpop.f32.mrb[2].mxu1 }
  0xfd   : > { %vm622_vm0 = vcmp.ge.f32.partialorder %v502_v27, 0.0  ;;  %v654_v35 = vmul.f32 0.2, %v502_v27  ;;  %vm638_vm1 = vcmp.ge.f32.partialorder %v566_v28, 0.0  ;;  %v670_v36 = vmul.f32 0.2, %v566_v28 }
  0xfe   : > { %vm620_vm2 = vcmp.ge.f32.partialorder %v494_v31, 0.0  ;;  %v652_v37 = vmul.f32 0.2, %v494_v31  ;;  %vm636_vm3 = vcmp.ge.f32.partialorder %v558_v32, 0.0  ;;  %v668_v38 = vmul.f32 0.2, %v558_v32 }
  0xff   : > { %v505_v39 = vadd.f32 %v1227_v33, %v1435_v24  ;;  %v569_v40 = vadd.f32 %v1243_v34, %v1435_v24  ;;  %v496_v41 = vpop.f32.mrb[3].mxu0  ;;  %v560_v42 = vpop.f32.mrb[3].mxu1  ;;  %v686_v43 = vsel %vm622_vm0, %v502_v27, %v654_v35  ;;  %v702_v44 = vsel %vm638_vm1, %v566_v28, %v670_v36 }
 0x100   : > { %v497_v45 = vadd.f32 %v1435_v24, %v496_v41  ;;  %v561_v46 = vadd.f32 %v1435_v24, %v560_v42  ;;  %v684_v51 = vsel %vm620_vm2, %v494_v31, %v652_v37  ;;  %v700_v52 = vsel %vm636_vm3, %v558_v32, %v668_v38 }
 0x101   : > { %vm623_vm4 = vcmp.ge.f32.partialorder %v505_v39, 0.0  ;;  %v655_v47 = vmul.f32 0.2, %v505_v39  ;;  %vm639_vm5 = vcmp.ge.f32.partialorder %v569_v40, 0.0  ;;  %v671_v48 = vmul.f32 0.2, %v569_v40 }
 0x102   : > { %vm621_vm6 = vcmp.ge.f32.partialorder %v497_v45, 0.0  ;;  %v653_v49 = vmul.f32 0.2, %v497_v45  ;;  %vm637_vm7 = vcmp.ge.f32.partialorder %v561_v46, 0.0  ;;  %v669_v50 = vmul.f32 0.2, %v561_v46 }
 0x103   : > { %v687_v53 = vsel %vm623_vm4, %v505_v39, %v655_v47  ;;  %v703_v54 = vsel %vm639_vm5, %v569_v40, %v671_v48  ;;  %v1230_v55 = vpop.f32.mrb[4].mxu0  ;;  %v1246_v56 = vpop.f32.mrb[4].mxu1 }
 0x104   : > { %v1097_v57 = vpack.c.bf16 %v687_v53, %v686_v43  ;;  %v1137_v58 = vpack.c.bf16 %v703_v54, %v702_v44  ;;  %v685_v59 = vsel %vm621_vm6, %v497_v45, %v653_v49  ;;  %v701_v60 = vsel %vm637_vm7, %v561_v46, %v669_v50  ;;  %v509_v61 = vpop.f32.mrb[5].mxu0  ;;  %v573_v62 = vpop.f32.mrb[5].mxu1 }
 0x105   : > { %v1092_v63 = vpack.c.bf16 %v685_v59, %v684_v51  ;;  %v1132_v0 = vpack.c.bf16 %v701_v60, %v700_v52  ;;  %v518_v1 = vadd.f32 %v1230_v55, %v1435_v24  ;;  %v582_v2 = vadd.f32 %v1246_v56, %v1435_v24  ;;  %v1231_v3 = vpop.f32.mrb[6].mxu0  ;;  %v1247_v4 = vpop.f32.mrb[6].mxu1 }
 0x106   : > { %1169 = vst [vmem:[%s1452_s17 + $0x8] sm:$0xff] %v1097_v57   ;;  %1177 = vst [vmem:[%s1452_s17 + $0x48] sm:$0xff] %v1137_v58   ;;  %v510_v5 = vadd.f32 %v1435_v24, %v509_v61  ;;  %v574_v6 = vadd.f32 %v1435_v24, %v573_v62  ;;  %v521_v7 = vadd.f32 %v1231_v3, %v1435_v24  ;;  %v512_v9 = vpop.f32.mrb[7].mxu0  ;;  %v576_v10 = vpop.f32.mrb[7].mxu1 }
 0x107   : > { %v585_v8 = vadd.f32 %v1247_v4, %v1435_v24  ;;  %1093 = vst [vmem:[%s1452_s17] sm:$0xff] %v1092_v63   ;;  %1176 = vst [vmem:[%s1452_s17 + $0x40] sm:$0xff] %v1132_v0   ;;  %vm626_vm8 = vcmp.ge.f32.partialorder %v518_v1, 0.0  ;;  %v658_v11 = vmul.f32 0.2, %v518_v1  ;;  %vm642_vm9 = vcmp.ge.f32.partialorder %v582_v2, 0.0 }
 0x108   : > { %v674_v12 = vmul.f32 0.2, %v582_v2  ;;  %vm624_vm10 = vcmp.ge.f32.partialorder %v510_v5, 0.0  ;;  %v656_v13 = vmul.f32 0.2, %v510_v5  ;;  %vm640_vm11 = vcmp.ge.f32.partialorder %v574_v6, 0.0 }
 0x109   : > { %v690_v14 = vsel %vm626_vm8, %v518_v1, %v658_v11  ;;  %v672_v15 = vmul.f32 0.2, %v574_v6  ;;  %vm627_vm12 = vcmp.ge.f32.partialorder %v521_v7, 0.0  ;;  %v659_v16 = vmul.f32 0.2, %v521_v7 }
 0x10a   : > { %v706_v17 = vsel %vm642_vm9, %v582_v2, %v674_v12  ;;  %v688_v18 = vsel %vm624_vm10, %v510_v5, %v656_v13  ;;  %vm643_vm13 = vcmp.ge.f32.partialorder %v585_v8, 0.0  ;;  %v675_v19 = vmul.f32 0.2, %v585_v8  ;;  %v1234_v20 = vpop.f32.mrb[8].mxu0  ;;  %v1250_v21 = vpop.f32.mrb[8].mxu1 }
 0x10b   : > { %v691_v22 = vsel %vm627_vm12, %v521_v7, %v659_v16  ;;  %v513_v23 = vadd.f32 %v1435_v24, %v512_v9  ;;  %v577_v25 = vadd.f32 %v1435_v24, %v576_v10  ;;  %v534_v26 = vadd.f32 %v1234_v20, %v1435_v24  ;;  %v525_v27 = vpop.f32.mrb[9].mxu0  ;;  %v589_v28 = vpop.f32.mrb[9].mxu1 }
 0x10c   : > { %v1107_v29 = vpack.c.bf16 %v691_v22, %v690_v14  ;;  %v707_v30 = vsel %vm643_vm13, %v585_v8, %v675_v19  ;;  %v598_v31 = vadd.f32 %v1250_v21, %v1435_v24  ;;  %v526_v32 = vadd.f32 %v1435_v24, %v525_v27  ;;  %v1235_v33 = vpop.f32.mrb[10].mxu0  ;;  %v1251_v34 = vpop.f32.mrb[10].mxu1 }
 0x10d   : > { %v1147_v35 = vpack.c.bf16 %v707_v30, %v706_v17  ;;  %vm625_vm14 = vcmp.ge.f32.partialorder %v513_v23, 0.0  ;;  %v657_v36 = vmul.f32 0.2, %v513_v23  ;;  %vm641_vm15 = vcmp.ge.f32.partialorder %v577_v25, 0.0  ;;  %v528_v37 = vpop.f32.mrb[11].mxu0  ;;  %v592_v38 = vpop.f32.mrb[11].mxu1 }
 0x10e   : > { %1171 = vst [vmem:[%s1452_s17 + $0x18] sm:$0xff] %v1107_v29   ;;  %v673_v39 = vmul.f32 0.2, %v577_v25  ;;  %vm630_vm0 = vcmp.ge.f32.partialorder %v534_v26, 0.0  ;;  %v662_v40 = vmul.f32 0.2, %v534_v26  ;;  %v704_v41 = vsel %vm640_vm11, %v574_v6, %v672_v15 }
 0x10f   : > { %vm646_vm1 = vcmp.ge.f32.partialorder %v598_v31, 0.0  ;;  %1179 = vst [vmem:[%s1452_s17 + $0x58] sm:$0xff] %v1147_v35   ;;  %v689_v42 = vsel %vm625_vm14, %v513_v23, %v657_v36  ;;  %v678_v43 = vmul.f32 0.2, %v598_v31  ;;  %vm628_vm2 = vcmp.ge.f32.partialorder %v526_v32, 0.0 }
 0x110   : > { %v1102_v44 = vpack.c.bf16 %v689_v42, %v688_v18  ;;  %v705_v45 = vsel %vm641_vm15, %v577_v25, %v673_v39  ;;  %v660_v46 = vmul.f32 0.2, %v526_v32  ;;  %v590_v47 = vadd.f32 %v1435_v24, %v589_v28 }
 0x111   : > { %v1142_v48 = vpack.c.bf16 %v705_v45, %v704_v41  ;;  %v694_v49 = vsel %vm630_vm0, %v534_v26, %v662_v40  ;;  %v710_v50 = vsel %vm646_vm1, %v598_v31, %v678_v43  ;;  %v537_v51 = vadd.f32 %v1235_v33, %v1435_v24 }
 0x112   : > { %1170 = vst [vmem:[%s1452_s17 + $0x10] sm:$0xff] %v1102_v44   ;;  %vm644_vm3 = vcmp.ge.f32.partialorder %v590_v47, 0.0  ;;  %v676_v52 = vmul.f32 0.2, %v590_v47  ;;  %v601_v53 = vadd.f32 %v1251_v34, %v1435_v24  ;;  %v529_v54 = vadd.f32 %v1435_v24, %v528_v37  ;;  %v1238_v55 = vpop.f32.mrb[12].mxu0  ;;  %v1254_v56 = vpop.f32.mrb[12].mxu1 }
 0x113   : > { %1178 = vst [vmem:[%s1452_s17 + $0x50] sm:$0xff] %v1142_v48   ;;  %vm631_vm4 = vcmp.ge.f32.partialorder %v537_v51, 0.0  ;;  %v663_v57 = vmul.f32 0.2, %v537_v51  ;;  %v593_v58 = vadd.f32 %v1435_v24, %v592_v38  ;;  %v550_v59 = vadd.f32 %v1238_v55, %v1435_v24  ;;  %v541_v60 = vpop.f32.mrb[13].mxu0  ;;  %v605_v61 = vpop.f32.mrb[13].mxu1 }
 0x114   : > { %v692_v62 = vsel %vm628_vm2, %v526_v32, %v660_v46  ;;  %vm647_vm5 = vcmp.ge.f32.partialorder %v601_v53, 0.0  ;;  %v679_v63 = vmul.f32 0.2, %v601_v53  ;;  %vm629_vm6 = vcmp.ge.f32.partialorder %v529_v54, 0.0  ;;  %v1239_v0 = vpop.f32.mrb[14].mxu0  ;;  %v1255_v1 = vpop.f32.mrb[14].mxu1 }
 0x115   : > { %v695_v2 = vsel %vm631_vm4, %v537_v51, %v663_v57  ;;  %v661_v3 = vmul.f32 0.2, %v529_v54  ;;  %vm645_vm7 = vcmp.ge.f32.partialorder %v593_v58, 0.0  ;;  %v677_v4 = vmul.f32 0.2, %v593_v58  ;;  %v544_v5 = vpop.f32.mrb[15].mxu0 }
 0x116   : > { %v708_v6 = vsel %vm644_vm3, %v590_v47, %v676_v52  ;;  %v1117_v7 = vpack.c.bf16 %v695_v2, %v694_v49  ;;  %v711_v8 = vsel %vm647_vm5, %v601_v53, %v679_v63  ;;  %v666_v9 = vmul.f32 0.2, %v550_v59  ;;  %v608_v10 = vpop.f32.mrb[15].mxu1 }
 0x117   : > { %v1157_v11 = vpack.c.bf16 %v711_v8, %v710_v50  ;;  %v693_v12 = vsel %vm629_vm6, %v529_v54, %v661_v3  ;;  %v709_v13 = vsel %vm645_vm7, %v593_v58, %v677_v4  ;;  %v614_v14 = vadd.f32 %v1254_v56, %v1435_v24 }
 0x118   : > { %1173 = vst [vmem:[%s1452_s17 + $0x28] sm:$0xff] %v1117_v7   ;;  %v1112_v15 = vpack.c.bf16 %v693_v12, %v692_v62  ;;  %v1152_v16 = vpack.c.bf16 %v709_v13, %v708_v6  ;;  %vm634_vm8 = vcmp.ge.f32.partialorder %v550_v59, 0.0  ;;  %v542_v17 = vadd.f32 %v1435_v24, %v541_v60 }
 0x119   : > { %1181 = vst [vmem:[%s1452_s17 + $0x68] sm:$0xff] %v1157_v11   ;;  %vm650_vm9 = vcmp.ge.f32.partialorder %v614_v14, 0.0  ;;  %v682_v18 = vmul.f32 0.2, %v614_v14  ;;  %v606_v19 = vadd.f32 %v1435_v24, %v605_v61  ;;  %v553_v20 = vadd.f32 %v1239_v0, %v1435_v24 }
 0x11a   : > { %1172 = vst [vmem:[%s1452_s17 + $0x20] sm:$0xff] %v1112_v15   ;;  %1180 = vst [vmem:[%s1452_s17 + $0x60] sm:$0xff] %v1152_v16   ;;  %v664_v21 = vmul.f32 0.2, %v542_v17  ;;  %v617_v22 = vadd.f32 %v1255_v1, %v1435_v24  ;;  %v545_v23 = vadd.f32 %v1435_v24, %v544_v5  ;;  %v698_v25 = vsel %vm634_vm8, %v550_v59, %v666_v9 }
 0x11b   : > { %vm632_vm10 = vcmp.ge.f32.partialorder %v542_v17, 0.0  ;;  %vm635_vm11 = vcmp.ge.f32.partialorder %v553_v20, 0.0  ;;  %v714_v26 = vsel %vm650_vm9, %v614_v14, %v682_v18  ;;  %v667_v27 = vmul.f32 0.2, %v553_v20 }
 0x11c   : > { %vm651_vm12 = vcmp.ge.f32.partialorder %v617_v22, 0.0  ;;  %v683_v28 = vmul.f32 0.2, %v617_v22  ;;  %vm648_vm13 = vcmp.ge.f32.partialorder %v606_v19, 0.0  ;;  %vm633_vm14 = vcmp.ge.f32.partialorder %v545_v23, 0.0 }
 0x11d   : > { %v665_v29 = vmul.f32 0.2, %v545_v23  ;;  %v609_v30 = vadd.f32 %v1435_v24, %v608_v10  ;;  %v696_v31 = vsel %vm632_vm10, %v542_v17, %v664_v21  ;;  %v680_v32 = vmul.f32 0.2, %v606_v19 }
 0x11e   : > { %v699_v33 = vsel %vm635_vm11, %v553_v20, %v667_v27  ;;  %v715_v34 = vsel %vm651_vm12, %v617_v22, %v683_v28 }
 0x11f   : > { %v1127_v35 = vpack.c.bf16 %v699_v33, %v698_v25  ;;  %v1167_v36 = vpack.c.bf16 %v715_v34, %v714_v26  ;;  %v697_v37 = vsel %vm633_vm14, %v545_v23, %v665_v29  ;;  %vm649_vm15 = vcmp.ge.f32.partialorder %v609_v30, 0.0 }
 0x120   : > { %v1122_v38 = vpack.c.bf16 %v697_v37, %v696_v31  ;;  %v681_v39 = vmul.f32 0.2, %v609_v30  ;;  %v712_v40 = vsel %vm648_vm13, %v606_v19, %v680_v32 }
 0x121   : > { %1175 = vst [vmem:[%s1452_s17 + $0x38] sm:$0xff] %v1127_v35   ;;  %1183 = vst [vmem:[%s1452_s17 + $0x78] sm:$0xff] %v1167_v36  }
 0x122   : > { %1174 = vst [vmem:[%s1452_s17 + $0x30] sm:$0xff] %v1122_v38   ;;  %v713_v41 = vsel %vm649_vm15, %v609_v30, %v681_v39 }
 0x123   : > { %v1162_v42 = vpack.c.bf16 %v713_v41, %v712_v40 }
 0x125   : > { %1182 = vst [vmem:[%s1452_s17 + $0x70] sm:$0xff] %v1162_v42  }
 0x126 PF: > { %s13_s14 = sadd.s32 1, %s1342_s14   ;;  %s1511_s12 = smov %s1338_s13 }
 0x127   : > { %p10_p5 = scmp.ge.s32.totalorder %s13_s14, 4   ;;  %s1512_s13 = smov %s1514_s15 }
 0x129   :  { %12 = sbr.rel (!%p10_p5) target bundleno = 2 (0x2), region = 68 }

// kernel: discriminator_forward.6
= control target key start
LH: loop header
LB: loop body
LE: loop exit
PB: predicated region body
PF: predicated region fallthrough
CT: control target
= control target key end

     0   :  { %s1901_s9 = smov 0   ;;  %s1903_s10 = smov 0   ;;  %s2192_s0 = inlined_call_operand.vmem [shape: bf16[128,1024], index: 0, kind: input, shape index: {}]   ;;  %s2193_s1 = inlined_call_operand.vmem [shape: bf16[1024,128], index: 1, kind: input, shape index: {}]   ;;  %s2194_s2 = inlined_call_operand.vmem [shape: bf16[128,128], index: 2, kind: output, shape index: {}]  }
   0x1   :  { %s1905_s11 = smov 0  }
   0x2 LB: > { %s31_s12 = sadd.s32 1, %s1880_s10  ;;  %p1468_p0 = scmp.ge.s32.totalorder %s1884_s11, 1  ;;  %s1884_s11 = sphi %s1905_s11, %s12_s11   ;;  %s1880_s10 = sphi %s1903_s10, %s2196_s10   ;;  %s1876_s9 = sphi %s1901_s9, %s2195_s9  }
   0x3   : > { %p33_p1 = scmp.ge.s32.totalorder %s31_s12, 2  ;;  %p158_p2 = scmp.lt.s32.totalorder %s1884_s11, 3 }
   0x5   : > { %s2198_s12 = smov (%p33_p1, %s31_s12), 0  ;;  %p159_p3 = pnand %p1468_p0, %p158_p2 }
   0x6   : > { %v1796_v0 = vld [vmem:[%s2193_s1 + $0x40] sm:$0xff] (!%p159_p3)   ;;  %v1800_v4 = vld [vmem:[%s2193_s1 + $0x48] sm:$0xff] (!%p159_p3)   ;;  %v1804_v8 = vld [vmem:[%s2193_s1 + $0x50] sm:$0xff] (!%p159_p3)   ;;  %s1469_s21 = sshll.u32 (!%p159_p3), %s1876_s9, 3 }
   0x7   : > { %162 = sbr.rel (%p159_p3) target bundleno = 390 (0x186), region = 28  ;;  %v1797_v1 = vld [vmem:[%s2193_s1 + $0xc0] sm:$0xff] (!%p159_p3)   ;;  %1612 = vmatprep.subr.bf16.mxu0 (!%p159_p3), %v1796_v0  ;;  %v1801_v5 = vld [vmem:[%s2193_s1 + $0xc8] sm:$0xff] (!%p159_p3)   ;;  %v1805_v9 = vld [vmem:[%s2193_s1 + $0xd0] sm:$0xff] (!%p159_p3)   ;;  %p198_p4 = scmp.lt.s32.totalorder (!%p159_p3), %s1469_s21, 15 }
   0x8   : > { %v1798_v2 = vld [vmem:[%s2193_s1] sm:$0xff] (!%p159_p3)   ;;  %1652 = vmatprep.subr.bf16.mxu1 (!%p159_p3), %v1797_v1  ;;  %v1802_v6 = vld [vmem:[%s2193_s1 + $0x8] sm:$0xff] (!%p159_p3)   ;;  %v1806_v10 = vld [vmem:[%s2193_s1 + $0x10] sm:$0xff] (!%p159_p3)  }
   0x9   : > { %v1799_v3 = vld [vmem:[%s2193_s1 + $0x80] sm:$0xff] (!%p159_p3)   ;;  %1613 = vmatpush3.bf16.msra.mxu0 (!%p159_p3), %v1798_v2  ;;  %v1803_v7 = vld [vmem:[%s2193_s1 + $0x88] sm:$0xff] (!%p159_p3)   ;;  %v1807_v11 = vld [vmem:[%s2193_s1 + $0x90] sm:$0xff] (!%p159_p3)  }
   0xa   : > { %1653 = vmatpush3.bf16.msra.mxu1 (!%p159_p3), %v1799_v3  ;;  %1614 = vmatprep.subr.bf16.mxu0 (!%p159_p3), %v1800_v4  ;;  %v1808_v12 = vld [vmem:[%s2193_s1 + $0x58] sm:$0xff] (!%p159_p3)   ;;  %v1812_v16 = vld [vmem:[%s2193_s1 + $0x60] sm:$0xff] (!%p159_p3)   ;;  %v1816_v20 = vld [vmem:[%s2193_s1 + $0x68] sm:$0xff] (!%p159_p3)  }
   0xb   : > { %1654 = vmatprep.subr.bf16.mxu1 (!%p159_p3), %v1801_v5  ;;  %v1809_v13 = vld [vmem:[%s2193_s1 + $0xd8] sm:$0xff] (!%p159_p3)   ;;  %v1813_v17 = vld [vmem:[%s2193_s1 + $0xe0] sm:$0xff] (!%p159_p3)   ;;  %v1817_v21 = vld [vmem:[%s2193_s1 + $0xe8] sm:$0xff] (!%p159_p3)  }
   0xc   : > { %v1810_v14 = vld [vmem:[%s2193_s1 + $0x18] sm:$0xff] (!%p159_p3)   ;;  %v1814_v18 = vld [vmem:[%s2193_s1 + $0x20] sm:$0xff] (!%p159_p3)   ;;  %v1818_v22 = vld [vmem:[%s2193_s1 + $0x28] sm:$0xff] (!%p159_p3)  }
   0xd   : > { %1615 = vmatpush3.bf16.msra.mxu0 (!%p159_p3), %v1802_v6  ;;  %v1811_v15 = vld [vmem:[%s2193_s1 + $0x98] sm:$0xff] (!%p159_p3)   ;;  %v1815_v19 = vld [vmem:[%s2193_s1 + $0xa0] sm:$0xff] (!%p159_p3)   ;;  %v1819_v23 = vld [vmem:[%s2193_s1 + $0xa8] sm:$0xff] (!%p159_p3)  }
   0xe   : > { %1655 = vmatpush3.bf16.msra.mxu1 %v1803_v7  ;;  %1616 = vmatprep.subr.bf16.mxu0 %v1804_v8  ;;  %s2200_s21 = smov (!%p198_p4, %s1469_s21), 15  ;;  %v1820_v24 = vld [vmem:[%s2193_s1 + $0x70] sm:$0xff]   ;;  %v1824_v28 = vld [vmem:[%s2193_s1 + $0x78] sm:$0xff]   ;;  %v1828_v40 = vld [vmem:[%s2193_s1 + $0x140] sm:$0xff]  }
   0xf   : > { %1656 = vmatprep.subr.bf16.mxu1 %v1805_v9  ;;  %v1821_v25 = vld [vmem:[%s2193_s1 + $0xf0] sm:$0xff]   ;;  %s1580_s19 = sshll.u32 %s2200_s21, 5  ;;  %v1825_v29 = vld [vmem:[%s2193_s1 + $0xf8] sm:$0xff]   ;;  %v1829_v41 = vld [vmem:[%s2193_s1 + $0x1c0] sm:$0xff]  }
  0x10   : > { %v1822_v26 = vld [vmem:[%s2193_s1 + $0x30] sm:$0xff]   ;;  %s2018_s29 = scalar_lea.vmem %s2192_s0, %s1580_s19  ;;  %v1826_v30 = vld [vmem:[%s2193_s1 + $0x38] sm:$0xff]   ;;  %v1830_v42 = vld [vmem:[%s2193_s1 + $0x100] sm:$0xff]  }
  0x11   : > { %1617 = vmatpush3.bf16.msra.mxu0 %v1806_v10  ;;  %v1823_v27 = vld [vmem:[%s2193_s1 + $0xb0] sm:$0xff]   ;;  %v1827_v31 = vld [vmem:[%s2193_s1 + $0xb8] sm:$0xff]   ;;  %v227_v32 = vld [vmem:[%s2018_s29] sm:$0xff] }
  0x12   : > { %1657 = vmatpush3.bf16.msra.mxu1 %v1807_v11  ;;  %1618 = vmatprep.subr.bf16.mxu0 %v1808_v12  ;;  %v231_v33 = vld [vmem:[%s2018_s29 + $0x20] sm:$0xff]  ;;  %v228_v34 = vld [vmem:[%s2018_s29 + $0x8] sm:$0xff]  ;;  %v1836_v56 = vld [vmem:[%s2193_s1 + $0x150] sm:$0xff]  }
  0x13   : > { %1658 = vmatprep.subr.bf16.mxu1 %v1809_v13  ;;  %v1474_v35 = vcombine.low %v227_v32, %v231_v33  ;;  %v1475_v36 = vcombine.high %v227_v32, %v231_v33  ;;  %v232_v37 = vld [vmem:[%s2018_s29 + $0x28] sm:$0xff]  ;;  %v1831_v43 = vld [vmem:[%s2193_s1 + $0x180] sm:$0xff]   ;;  %v1837_v57 = vld [vmem:[%s2193_s1 + $0x1d0] sm:$0xff]  }
  0x14   : > { %v1476_v38 = vcombine.low %v228_v34, %v232_v37  ;;  %v1477_v39 = vcombine.high %v228_v34, %v232_v37  ;;  %v1832_v44 = vld [vmem:[%s2193_s1 + $0x148] sm:$0xff]   ;;  %v235_v48 = vld [vmem:[%s2018_s29 + $0x40] sm:$0xff]  ;;  %v1838_v58 = vld [vmem:[%s2193_s1 + $0x110] sm:$0xff]  }
  0x15   : > { %1619 = vmatpush3.bf16.msra.mxu0 %v1810_v14  ;;  %963 = vmatprep.mubr.bf16.mxu0 %v1475_v36  ;;  %v1833_v45 = vld [vmem:[%s2193_s1 + $0x1c8] sm:$0xff]   ;;  %v239_v49 = vld [vmem:[%s2018_s29 + $0x60] sm:$0xff]  ;;  %v1839_v59 = vld [vmem:[%s2193_s1 + $0x190] sm:$0xff]  }
  0x16   : > { %1659 = vmatpush3.bf16.msra.mxu1 %v1811_v15  ;;  %1620 = vmatprep.subr.bf16.mxu0 %v1812_v16  ;;  %v1834_v46 = vld [vmem:[%s2193_s1 + $0x108] sm:$0xff]   ;;  %v1483_v50 = vcombine.high %v235_v48, %v239_v49  ;;  %v1482_v53 = vcombine.low %v235_v48, %v239_v49  ;;  %v1840_v60 = vld [vmem:[%s2193_s1 + $0x158] sm:$0xff]   ;;  %v243_v0 = vld [vmem:[%s2018_s29 + $0x80] sm:$0xff] }
  0x17   : > { %1660 = vmatprep.subr.bf16.mxu1 %v1813_v17  ;;  %1028 = vmatprep.mubr.bf16.mxu1 %v1477_v39  ;;  %v1835_v47 = vld [vmem:[%s2193_s1 + $0x188] sm:$0xff]   ;;  %v1841_v61 = vld [vmem:[%s2193_s1 + $0x1d8] sm:$0xff]   ;;  %v247_v1 = vld [vmem:[%s2018_s29 + $0xa0] sm:$0xff] }
  0x18   : > { %v236_v51 = vld [vmem:[%s2018_s29 + $0x48] sm:$0xff]  ;;  %v1842_v62 = vld [vmem:[%s2193_s1 + $0x118] sm:$0xff]   ;;  %v1491_v4 = vcombine.high %v243_v0, %v247_v1  ;;  %v1490_v6 = vcombine.low %v243_v0, %v247_v1  ;;  %v1844_v8 = vld [vmem:[%s2193_s1 + $0x160] sm:$0xff]  }
  0x19   : > { %1621 = vmatpush3.bf16.msra.mxu0 %v1814_v18  ;;  %v240_v52 = vld [vmem:[%s2018_s29 + $0x68] sm:$0xff]  ;;  %v1843_v63 = vld [vmem:[%s2193_s1 + $0x198] sm:$0xff]   ;;  %v1845_v9 = vld [vmem:[%s2193_s1 + $0x1e0] sm:$0xff]  }
  0x1a   : > { %1661 = vmatpush3.bf16.msra.mxu1 %v1815_v19  ;;  %1622 = vmatprep.subr.bf16.mxu0 %v1816_v20  ;;  %v1485_v54 = vcombine.high %v236_v51, %v240_v52  ;;  %v1484_v55 = vcombine.low %v236_v51, %v240_v52  ;;  %v244_v2 = vld [vmem:[%s2018_s29 + $0x88] sm:$0xff]  ;;  %v1846_v10 = vld [vmem:[%s2193_s1 + $0x120] sm:$0xff]   ;;  %v229_v32 = vld [vmem:[%s2018_s29 + $0x10] sm:$0xff] }
  0x1b   : > { %1662 = vmatprep.subr.bf16.mxu1 %v1817_v21  ;;  %v248_v3 = vld [vmem:[%s2018_s29 + $0xa8] sm:$0xff]  ;;  %v1847_v11 = vld [vmem:[%s2193_s1 + $0x1a0] sm:$0xff]   ;;  %v233_v33 = vld [vmem:[%s2018_s29 + $0x30] sm:$0xff] }
  0x1c   : > { %v1493_v5 = vcombine.high %v244_v2, %v248_v3  ;;  %v1492_v7 = vcombine.low %v244_v2, %v248_v3  ;;  %v1848_v12 = vld [vmem:[%s2193_s1 + $0x168] sm:$0xff]   ;;  %v251_v16 = vld [vmem:[%s2018_s29 + $0xc0] sm:$0xff]  ;;  %v1478_v34 = vcombine.low %v229_v32, %v233_v33  ;;  %v230_v36 = vld [vmem:[%s2018_s29 + $0x18] sm:$0xff] }
  0x1d   : > { %1623 = vmatpush3.bf16.msra.mxu0 %v1818_v22  ;;  %v1849_v13 = vld [vmem:[%s2193_s1 + $0x1e8] sm:$0xff]   ;;  %v255_v17 = vld [vmem:[%s2018_s29 + $0xe0] sm:$0xff]  ;;  %v234_v37 = vld [vmem:[%s2018_s29 + $0x38] sm:$0xff] }
  0x1e   : > { %1663 = vmatpush3.bf16.msra.mxu1 %v1819_v23  ;;  %1624 = vmatprep.subr.bf16.mxu0 %v1820_v24  ;;  %v1850_v14 = vld [vmem:[%s2193_s1 + $0x128] sm:$0xff]   ;;  %v1499_v19 = vcombine.high %v251_v16, %v255_v17  ;;  %v1498_v21 = vcombine.low %v251_v16, %v255_v17  ;;  %v1852_v24 = vld [vmem:[%s2193_s1 + $0x170] sm:$0xff]   ;;  %v1480_v39 = vcombine.low %v230_v36, %v234_v37  ;;  %v246_v48 = vld [vmem:[%s2018_s29 + $0x98] sm:$0xff] }
  0x1f   : > { %1664 = vmatprep.subr.bf16.mxu1 %v1821_v25  ;;  %v1851_v15 = vld [vmem:[%s2193_s1 + $0x1a8] sm:$0xff]   ;;  %v1853_v25 = vld [vmem:[%s2193_s1 + $0x1f0] sm:$0xff]   ;;  %v250_v49 = vld [vmem:[%s2018_s29 + $0xb8] sm:$0xff] }
  0x20   : > { %v252_v18 = vld [vmem:[%s2018_s29 + $0xc8] sm:$0xff] }
  0x21   : > { %1625 = vmatpush3.bf16.msra.mxu0 %v1822_v26  ;;  %v256_v20 = vld [vmem:[%s2018_s29 + $0xe8] sm:$0xff]  ;;  %v1854_v26 = vld [vmem:[%s2193_s1 + $0x130] sm:$0xff]  }
  0x22   : > { %1665 = vmatpush3.bf16.msra.mxu1 %v1823_v27  ;;  %1626 = vmatprep.subr.bf16.mxu0 %v1824_v28  ;;  %v1501_v22 = vcombine.high %v252_v18, %v256_v20  ;;  %v1500_v23 = vcombine.low %v252_v18, %v256_v20  ;;  %v1855_v27 = vld [vmem:[%s2193_s1 + $0x1b0] sm:$0xff]   ;;  %v1856_v28 = vld [vmem:[%s2193_s1 + $0x178] sm:$0xff]  }
  0x23   : > { %1666 = vmatprep.subr.bf16.mxu1 %v1825_v29  ;;  %v1857_v29 = vld [vmem:[%s2193_s1 + $0x1f8] sm:$0xff]  }
  0x25   : > { %1627 = vmatpush3.bf16.msra.mxu0 %v1826_v30  ;;  %v1858_v30 = vld [vmem:[%s2193_s1 + $0x138] sm:$0xff]  }
  0x26   : > { %1667 = vmatpush3.bf16.msra.mxu1 %v1827_v31  ;;  %1692 = vmatprep.subr.bf16.mxu0 %v1828_v40  ;;  %v1859_v31 = vld [vmem:[%s2193_s1 + $0x1b8] sm:$0xff]   ;;  %v1481_v40 = vcombine.high %v230_v36, %v234_v37 }
  0x27   : > { %1732 = vmatprep.subr.bf16.mxu1 %v1829_v41  ;;  %v241_v41 = vld [vmem:[%s2018_s29 + $0x70] sm:$0xff] }
  0x28   : > { %964 = vmatmul.mubr.bf16.vlgmr.msra.gmra.mrb[0].mxu0 %v1474_v35  ;;  %v1479_v35 = vcombine.high %v229_v32, %v233_v33 }
  0x29   : > { %1029 = vmatmul.mubr.bf16.vlgmr.msra.gmra.mrb[0].mxu1 %v1476_v38  ;;  %1693 = vmatpush3.bf16.msra.mxu0 %v1830_v42  ;;  %v237_v38 = vld [vmem:[%s2018_s29 + $0x50] sm:$0xff]  ;;  %v238_v42 = vld [vmem:[%s2018_s29 + $0x58] sm:$0xff] }
  0x2a   : > { %1733 = vmatpush3.bf16.msra.mxu1 %v1831_v43  ;;  %1694 = vmatprep.subr.bf16.mxu0 %v1832_v44  ;;  %v242_v43 = vld [vmem:[%s2018_s29 + $0x78] sm:$0xff]  ;;  %v1487_v44 = vcombine.high %v237_v38, %v241_v41 }
  0x2b   : > { %1734 = vmatprep.subr.bf16.mxu1 %v1833_v45  ;;  %971 = vmatprep.mubr.bf16.mxu0 %v1483_v50  ;;  %v1489_v45 = vcombine.high %v238_v42, %v242_v43  ;;  %v1486_v50 = vcombine.low %v237_v38, %v241_v41  ;;  %v1488_v51 = vcombine.low %v238_v42, %v242_v43 }
  0x2c   : > { %1036 = vmatprep.mubr.bf16.mxu1 %v1485_v54  ;;  %v253_v54 = vld [vmem:[%s2018_s29 + $0xd0] sm:$0xff] }
  0x2d   : > { %1695 = vmatpush3.bf16.msra.mxu0 %v1834_v46  ;;  %v245_v46 = vld [vmem:[%s2018_s29 + $0x90] sm:$0xff] }
  0x2e   : > { %1735 = vmatpush3.bf16.msra.mxu1 %v1835_v47  ;;  %1696 = vmatprep.subr.bf16.mxu0 %v1836_v56  ;;  %v249_v47 = vld [vmem:[%s2018_s29 + $0xb0] sm:$0xff]  ;;  %v254_v56 = vld [vmem:[%s2018_s29 + $0xd8] sm:$0xff] }
  0x2f   : > { %1736 = vmatprep.subr.bf16.mxu1 %v1837_v57  ;;  %v1495_v52 = vcombine.high %v245_v46, %v249_v47  ;;  %v258_v57 = vld [vmem:[%s2018_s29 + $0xf8] sm:$0xff] }
  0x30   : > { %972 = vmatmul.mubr.bf16.gmra.mrb[4].mxu0 %v1482_v53  ;;  %v1497_v53 = vcombine.high %v246_v48, %v250_v49 }
  0x31   : > { %1037 = vmatmul.mubr.bf16.gmra.mrb[4].mxu1 %v1484_v55  ;;  %1697 = vmatpush3.bf16.msra.mxu0 %v1838_v58  ;;  %v257_v55 = vld [vmem:[%s2018_s29 + $0xf0] sm:$0xff]  ;;  %v1494_v58 = vcombine.low %v245_v46, %v249_v47  ;;  %s1473_s29 = sshll.u32 %s2200_s21, 2 }
  0x32   : > { %1737 = vmatpush3.bf16.msra.mxu1 %v1839_v59  ;;  %1698 = vmatprep.subr.bf16.mxu0 %v1840_v60  ;;  %v1496_v59 = vcombine.low %v246_v48, %v250_v49  ;;  %v1503_v60 = vcombine.high %v253_v54, %v257_v55  ;;  %s224_s21 = scalar_lea.vmem %s2194_s2, %s1473_s29 }
  0x33   : > { %1738 = vmatprep.subr.bf16.mxu1 %v1841_v61  ;;  %979 = vmatprep.mubr.bf16.mxu0 %v1491_v4  ;;  %v1505_v61 = vcombine.high %v254_v56, %v258_v57 }
  0x34   : > { %1044 = vmatprep.mubr.bf16.mxu1 %v1493_v5 }
  0x35   : > { %1699 = vmatpush3.bf16.msra.mxu0 %v1842_v62  ;;  %v1502_v62 = vcombine.low %v253_v54, %v257_v55 }
  0x36   : > { %1739 = vmatpush3.bf16.msra.mxu1 %v1843_v63  ;;  %1700 = vmatprep.subr.bf16.mxu0 %v1844_v8  ;;  %v1504_v63 = vcombine.low %v254_v56, %v258_v57 }
  0x37   : > { %1740 = vmatprep.subr.bf16.mxu1 %v1845_v9 }
  0x38   : > { %980 = vmatmul.mubr.bf16.gmra.mrb[8].mxu0 %v1490_v6 }
  0x39   : > { %1045 = vmatmul.mubr.bf16.gmra.mrb[8].mxu1 %v1492_v7  ;;  %1701 = vmatpush3.bf16.msra.mxu0 %v1846_v10 }
  0x3a   : > { %1741 = vmatpush3.bf16.msra.mxu1 %v1847_v11  ;;  %1702 = vmatprep.subr.bf16.mxu0 %v1848_v12 }
  0x3b   : > { %1742 = vmatprep.subr.bf16.mxu1 %v1849_v13  ;;  %987 = vmatprep.mubr.bf16.mxu0 %v1499_v19 }
  0x3c   : > { %1052 = vmatprep.mubr.bf16.mxu1 %v1501_v22 }
  0x3d   : > { %1703 = vmatpush3.bf16.msra.mxu0 %v1850_v14 }
  0x3e   : > { %1743 = vmatpush3.bf16.msra.mxu1 %v1851_v15  ;;  %1704 = vmatprep.subr.bf16.mxu0 %v1852_v24 }
  0x3f   : > { %1744 = vmatprep.subr.bf16.mxu1 %v1853_v25 }
  0x40   : > { %988 = vmatmul.mubr.bf16.gmra.mrb[12].mxu0 %v1498_v21 }
  0x41   : > { %1053 = vmatmul.mubr.bf16.gmra.mrb[12].mxu1 %v1500_v23  ;;  %1705 = vmatpush3.bf16.msra.mxu0 %v1854_v26 }
  0x42   : > { %1745 = vmatpush3.bf16.msra.mxu1 %v1855_v27  ;;  %1706 = vmatprep.subr.bf16.mxu0 %v1856_v28 }
  0x43   : > { %1746 = vmatprep.subr.bf16.mxu1 %v1857_v29  ;;  %1093 = vmatprep.mubr.bf16.mxu0 %v1479_v35 }
  0x44   : > { %1158 = vmatprep.mubr.bf16.mxu1 %v1481_v40 }
  0x45   : > { %1707 = vmatpush3.bf16.msra.mxu0 %v1858_v30 }
  0x46   : > { %1747 = vmatpush3.bf16.msra.mxu1 %v1859_v31 }
  0x48   : > { %1094 = vmatmul.mubr.bf16.vlgmr.msra.gmra.mrb[16].mxu0 %v1478_v34 }
  0x49   : > { %1159 = vmatmul.mubr.bf16.vlgmr.msra.gmra.mrb[16].mxu1 %v1480_v39  ;;  %1101 = vmatprep.mubr.bf16.mxu0 %v1487_v44 }
  0x4a   : > { %1166 = vmatprep.mubr.bf16.mxu1 %v1489_v45 }
  0x50   : > { %1102 = vmatmul.mubr.bf16.gmra.mrb[20].mxu0 %v1486_v50 }
  0x51   : > { %1167 = vmatmul.mubr.bf16.gmra.mrb[20].mxu1 %v1488_v51  ;;  %1109 = vmatprep.mubr.bf16.mxu0 %v1495_v52 }
  0x52   : > { %1174 = vmatprep.mubr.bf16.mxu1 %v1497_v53 }
  0x58   : > { %1110 = vmatmul.mubr.bf16.gmra.mrb[24].mxu0 %v1494_v58 }
  0x59   : > { %1175 = vmatmul.mubr.bf16.gmra.mrb[24].mxu1 %v1496_v59  ;;  %1117 = vmatprep.mubr.bf16.mxu0 %v1503_v60 }
  0x5a   : > { %1182 = vmatprep.mubr.bf16.mxu1 %v1505_v61 }
  0x60   : > { %1118 = vmatmul.mubr.bf16.gmra.mrb[28].mxu0 %v1502_v62 }
  0x61   : > { %1183 = vmatmul.mubr.bf16.gmra.mrb[28].mxu1 %v1504_v63 }
  0xfb   : > { %v1628_v0 = vpop.f32.mrb[0].mxu0 }
  0xfc   : > { %v1668_v1 = vpop.f32.mrb[0].mxu1  ;;  %v1629_v2 = vpop.f32.mrb[1].mxu0 }
  0xfd   : > { %v1630_v3 = vadd.f32 %v1629_v2, %v1628_v0  ;;  %v1669_v4 = vpop.f32.mrb[1].mxu1  ;;  %v1631_v5 = vpop.f32.mrb[2].mxu0 }
  0xfe   : > { %v1670_v6 = vadd.f32 %v1669_v4, %v1668_v1  ;;  %v1671_v7 = vpop.f32.mrb[2].mxu1  ;;  %v1632_v8 = vpop.f32.mrb[3].mxu0 }
  0xff   : > { %v1633_v9 = vadd.f32 %v1632_v8, %v1631_v5  ;;  %v1672_v10 = vpop.f32.mrb[3].mxu1 }
 0x100   : > { %v1031_v11 = vadd.f32 %v1670_v6, %v1630_v3  ;;  %v1673_v12 = vadd.f32 %v1672_v10, %v1671_v7 }
 0x102   : > { %v1034_v13 = vadd.f32 %v1673_v12, %v1633_v9 }
 0x103   : > { %v1634_v14 = vpop.f32.mrb[4].mxu0 }
 0x104   : > { %v1674_v15 = vpop.f32.mrb[4].mxu1  ;;  %v1635_v16 = vpop.f32.mrb[5].mxu0 }
 0x105   : > { %v1636_v17 = vadd.f32 %v1635_v16, %v1634_v14  ;;  %v1675_v18 = vpop.f32.mrb[5].mxu1  ;;  %v1637_v19 = vpop.f32.mrb[6].mxu0 }
 0x106   : > { %v1676_v20 = vadd.f32 %v1675_v18, %v1674_v15  ;;  %v1677_v21 = vpop.f32.mrb[6].mxu1  ;;  %v1638_v22 = vpop.f32.mrb[7].mxu0 }
 0x107   : > { %v1639_v23 = vadd.f32 %v1638_v22, %v1637_v19  ;;  %v1678_v24 = vpop.f32.mrb[7].mxu1 }
 0x108   : > { %v1039_v25 = vadd.f32 %v1676_v20, %v1636_v17  ;;  %v1679_v26 = vadd.f32 %v1678_v24, %v1677_v21 }
 0x10a   : > { %v1042_v27 = vadd.f32 %v1679_v26, %v1639_v23 }
 0x10b   : > { %v1640_v28 = vpop.f32.mrb[8].mxu0 }
 0x10c   : > { %v1680_v29 = vpop.f32.mrb[8].mxu1  ;;  %v1641_v30 = vpop.f32.mrb[9].mxu0 }
 0x10d   : > { %v1681_v31 = vpop.f32.mrb[9].mxu1  ;;  %v1642_v32 = vadd.f32 %v1641_v30, %v1640_v28  ;;  %v1643_v34 = vpop.f32.mrb[10].mxu0 }
 0x10e   : > { %v1682_v33 = vadd.f32 %v1681_v31, %v1680_v29  ;;  %v1683_v35 = vpop.f32.mrb[10].mxu1  ;;  %v1644_v36 = vpop.f32.mrb[11].mxu0 }
 0x10f   : > { %v1684_v37 = vpop.f32.mrb[11].mxu1  ;;  %v1645_v39 = vadd.f32 %v1644_v36, %v1643_v34 }
 0x110   : > { %v1047_v38 = vadd.f32 %v1682_v33, %v1642_v32  ;;  %v1685_v40 = vadd.f32 %v1684_v37, %v1683_v35 }
 0x112   : > { %v2154_v41 = vadd.f32 %v1685_v40, %v1645_v39 }
 0x113   : > { %v1646_v42 = vpop.f32.mrb[12].mxu0 }
 0x114   : > { %v1686_v43 = vpop.f32.mrb[12].mxu1  ;;  %v1647_v44 = vpop.f32.mrb[13].mxu0 }
 0x115   : > { %v1648_v45 = vadd.f32 %v1647_v44, %v1646_v42  ;;  %v1687_v46 = vpop.f32.mrb[13].mxu1  ;;  %v1649_v47 = vpop.f32.mrb[14].mxu0 }
 0x116   : > { %v1688_v48 = vadd.f32 %v1687_v46, %v1686_v43  ;;  %v1689_v49 = vpop.f32.mrb[14].mxu1  ;;  %v1650_v50 = vpop.f32.mrb[15].mxu0 }
 0x117   : > { %v1651_v51 = vadd.f32 %v1650_v50, %v1649_v47  ;;  %v1690_v52 = vpop.f32.mrb[15].mxu1 }
 0x118   : > { %v2156_v53 = vadd.f32 %v1688_v48, %v1648_v45  ;;  %v1691_v54 = vadd.f32 %v1690_v52, %v1689_v49 }
 0x11a   : > { %v2158_v55 = vadd.f32 %v1691_v54, %v1651_v51 }
 0x11b   : > { %v1708_v56 = vpop.f32.mrb[16].mxu0 }
 0x11c   : > { %v1748_v57 = vpop.f32.mrb[16].mxu1  ;;  %v1709_v58 = vpop.f32.mrb[17].mxu0 }
 0x11d   : > { %v1710_v59 = vadd.f32 %v1709_v58, %v1708_v56  ;;  %v1749_v60 = vpop.f32.mrb[17].mxu1  ;;  %v1711_v61 = vpop.f32.mrb[18].mxu0 }
 0x11e   : > { %v1750_v62 = vadd.f32 %v1749_v60, %v1748_v57  ;;  %v1751_v63 = vpop.f32.mrb[18].mxu1  ;;  %v1712_v0 = vpop.f32.mrb[19].mxu0 }
 0x11f   : > { %v1096_v1 = vadd.f32 %v1710_v59, %v1031_v11  ;;  %v1713_v2 = vadd.f32 %v1712_v0, %v1711_v61  ;;  %v1752_v3 = vpop.f32.mrb[19].mxu1 }
 0x120   : > { %v1753_v4 = vadd.f32 %v1752_v3, %v1751_v63 }
 0x121   : > { %v2160_v5 = vadd.f32 %v1750_v62, %v1096_v1  ;;  %v1099_v6 = vadd.f32 %v1713_v2, %v1034_v13 }
 0x123   : > { %v2162_v7 = vadd.f32 %v1753_v4, %v1099_v6  ;;  %v1714_v8 = vpop.f32.mrb[20].mxu0 }
 0x124   : > { %v1754_v9 = vpop.f32.mrb[20].mxu1  ;;  %v1715_v10 = vpop.f32.mrb[21].mxu0 }
 0x125   : > { %v1242_v12 = vadd.f32 %v2162_v7, %v2160_v5  ;;  %v1716_v14 = vadd.f32 %v1715_v10, %v1714_v8  ;;  %v1755_v15 = vpop.f32.mrb[21].mxu1  ;;  %v1717_v16 = vpop.f32.mrb[22].mxu0 }
 0x126   : > { %v1756_v17 = vadd.f32 %v1755_v15, %v1754_v9  ;;  %v1757_v18 = vpop.f32.mrb[22].mxu1  ;;  %v1718_v11 = vpop.f32.mrb[23].mxu0 }
 0x127   : > { %v1104_v19 = vadd.f32 %v1716_v14, %v1039_v25  ;;  %v1719_v20 = vadd.f32 %v1718_v11, %v1717_v16  ;;  %v1758_v21 = vpop.f32.mrb[23].mxu1 }
 0x128   : > { %v1759_v22 = vadd.f32 %v1758_v21, %v1757_v18 }
 0x129   : > { %v1169_v23 = vadd.f32 %v1756_v17, %v1104_v19  ;;  %v1107_v13 = vadd.f32 %v1719_v20, %v1042_v27 }
 0x12b   : > { %v1243_v24 = vadd.f32 %v1242_v12, %v1169_v23  ;;  %v1172_v26 = vadd.f32 %v1759_v22, %v1107_v13  ;;  %v1720_v28 = vpop.f32.mrb[24].mxu0 }
 0x12c   : > { %v1760_v29 = vpop.f32.mrb[24].mxu1  ;;  %v1721_v30 = vpop.f32.mrb[25].mxu0 }
 0x12d   : > { %v1244_v31 = vadd.f32 %v1243_v24, %v1172_v26  ;;  %v1722_v32 = vadd.f32 %v1721_v30, %v1720_v28  ;;  %v1761_v33 = vpop.f32.mrb[25].mxu1  ;;  %v1723_v34 = vpop.f32.mrb[26].mxu0 }
 0x12e   : > { %v1762_v35 = vadd.f32 %v1761_v33, %v1760_v29  ;;  %v1763_v36 = vpop.f32.mrb[26].mxu1  ;;  %v1724_v37 = vpop.f32.mrb[27].mxu0 }
 0x12f   : > { %v1112_v39 = vadd.f32 %v1722_v32, %v1047_v38  ;;  %v1725_v40 = vadd.f32 %v1724_v37, %v1723_v34  ;;  %v1764_v25 = vpop.f32.mrb[27].mxu1 }
 0x130   : > { %v1765_v42 = vadd.f32 %v1764_v25, %v1763_v36 }
 0x131   : > { %v1177_v43 = vadd.f32 %v1762_v35, %v1112_v39  ;;  %v1115_v44 = vadd.f32 %v1725_v40, %v2154_v41 }
 0x133   : > { %v1245_v27 = vadd.f32 %v1244_v31, %v1177_v43  ;;  %v1180_v45 = vadd.f32 %v1765_v42, %v1115_v44  ;;  %v1726_v46 = vpop.f32.mrb[28].mxu0 }
 0x134   : > { %v1766_v47 = vpop.f32.mrb[28].mxu1  ;;  %v1727_v48 = vpop.f32.mrb[29].mxu0 }
 0x135   : > { %v1246_v49 = vadd.f32 %v1245_v27, %v1180_v45  ;;  %v1728_v50 = vadd.f32 %v1727_v48, %v1726_v46  ;;  %v1767_v51 = vpop.f32.mrb[29].mxu1  ;;  %v1729_v52 = vpop.f32.mrb[30].mxu0 }
 0x136   : > { %v1768_v54 = vadd.f32 %v1767_v51, %v1766_v47  ;;  %v1769_v56 = vpop.f32.mrb[30].mxu1  ;;  %v1730_v57 = vpop.f32.mrb[31].mxu0 }
 0x137   : > { %v1120_v38 = vadd.f32 %v1728_v50, %v2156_v53  ;;  %v1731_v58 = vadd.f32 %v1730_v57, %v1729_v52  ;;  %v1770_v59 = vpop.f32.mrb[31].mxu1 }
 0x138   : > { %v1771_v60 = vadd.f32 %v1770_v59, %v1769_v56 }
 0x139   : > { %v1185_v61 = vadd.f32 %v1768_v54, %v1120_v38  ;;  %v1123_v41 = vadd.f32 %v1731_v58, %v2158_v55 }
 0x13b   : > { %v1247_v62 = vadd.f32 %v1246_v49, %v1185_v61  ;;  %v1188_v63 = vadd.f32 %v1771_v60, %v1123_v41 }
 0x13d   : > { %v1248_v0 = vadd.f32 %v1247_v62, %v1188_v63 }
 0x13f   : > { %v1249_v1 = vrot.slane %v1248_v0, 4 }
 0x141   : > { %v1250_v2 = vadd.f32 %v1249_v1, %v1248_v0 }
 0x143   : > { %v1251_v3 = vrot.slane %v1250_v2, 2 }
 0x145   : > { %v1252_v4 = vadd.f32 %v1251_v3, %v1250_v2 }
 0x147   : > { %v1253_v6 = vrot.slane %v1252_v4, 1 }
 0x149   : > { %v1254_v8 = vadd.f32 %v1253_v6, %v1252_v4 }
 0x14b   : > { %v1256_v9 = vmul.f32 0.015625, %v1254_v8 }
 0x14d   : > { %v1257_v10 = vsub.f32 %v2160_v5, %v1256_v9  ;;  %v1258_v53 = vsub.f32 %v2162_v7, %v1256_v9  ;;  %v1259_v12 = vsub.f32 %v1169_v23, %v1256_v9  ;;  %v1260_v14 = vsub.f32 %v1172_v26, %v1256_v9 }
 0x14e   : > { %v1261_v15 = vsub.f32 %v1177_v43, %v1256_v9  ;;  %v1262_v16 = vsub.f32 %v1180_v45, %v1256_v9  ;;  %v1263_v17 = vsub.f32 %v1185_v61, %v1256_v9  ;;  %v1264_v55 = vsub.f32 %v1188_v63, %v1256_v9 }
 0x14f   : > { %v1265_v18 = vmul.f32 %v1257_v10, %v1257_v10  ;;  %v1266_v11 = vmul.f32 %v1258_v53, %v1258_v53  ;;  %v1267_v19 = vmul.f32 %v1259_v12, %v1259_v12  ;;  %v1268_v21 = vmul.f32 %v1260_v14, %v1260_v14 }
 0x150   : > { %v1269_v13 = vmul.f32 %v1261_v15, %v1261_v15  ;;  %v1270_v28 = vmul.f32 %v1262_v16, %v1262_v16  ;;  %v1271_v30 = vmul.f32 %v1263_v17, %v1263_v17  ;;  %v1272_v31 = vmul.f32 %v1264_v55, %v1264_v55 }
 0x151   : > { %v1273_v20 = vadd.f32 %v1266_v11, %v1265_v18 }
 0x153   : > { %v1274_v22 = vadd.f32 %v1273_v20, %v1267_v19 }
 0x155   : > { %v1275_v24 = vadd.f32 %v1274_v22, %v1268_v21 }
 0x157   : > { %v1276_v29 = vadd.f32 %v1275_v24, %v1269_v13 }
 0x159   : > { %v1277_v5 = vadd.f32 %v1276_v29, %v1270_v28 }
 0x15b   : > { %v1278_v7 = vadd.f32 %v1277_v5, %v1271_v30 }
 0x15d   : > { %v1279_v23 = vadd.f32 %v1278_v7, %v1272_v31 }
 0x15f   : > { %v1280_v26 = vrot.slane %v1279_v23, 4 }
 0x161   : > { %v1281_v32 = vadd.f32 %v1280_v26, %v1279_v23 }
 0x163   : > { %v1282_v33 = vrot.slane %v1281_v32, 2 }
 0x165   : > { %v1283_v34 = vadd.f32 %v1282_v33, %v1281_v32 }
 0x167   : > { %v1284_v35 = vrot.slane %v1283_v34, 1 }
 0x169   : > { %v1285_v36 = vadd.f32 %v1284_v35, %v1283_v34 }
 0x16b   : > { %v1286_v37 = vmul.f32 0.015625, %v1285_v36 }
 0x16d   : > { %v1287_v39 = vadd.f32 1e-05, %v1286_v37 }
 0x16f   : > { %1860 = vrsqrt.f32 %v1287_v39 }
 0x179   : > { %v1861_v40 = vpop.eup %1860 }
 0x17a   : > { %v1289_v25 = vmul.f32 %v1861_v40, %v1257_v10  ;;  %v1290_v42 = vmul.f32 %v1861_v40, %v1258_v53  ;;  %v1291_v43 = vmul.f32 %v1861_v40, %v1259_v12  ;;  %v1292_v44 = vmul.f32 %v1861_v40, %v1260_v14 }
 0x17b   : > { %v1293_v27 = vmul.f32 %v1861_v40, %v1261_v15  ;;  %v1294_v45 = vmul.f32 %v1861_v40, %v1262_v16  ;;  %v1295_v46 = vmul.f32 %v1861_v40, %v1263_v17  ;;  %v1296_v47 = vmul.f32 %v1861_v40, %v1264_v55 }
 0x17c   : > { %vm1297_vm0 = vcmp.ge.f32.partialorder %v1289_v25, 0.0  ;;  %vm1298_vm1 = vcmp.ge.f32.partialorder %v1290_v42, 0.0  ;;  %vm1299_vm2 = vcmp.ge.f32.partialorder %v1291_v43, 0.0  ;;  %vm1300_vm3 = vcmp.ge.f32.partialorder %v1292_v44, 0.0 }
 0x17d   : > { %vm1301_vm4 = vcmp.ge.f32.partialorder %v1293_v27, 0.0  ;;  %vm1302_vm5 = vcmp.ge.f32.partialorder %v1294_v45, 0.0  ;;  %vm1303_vm6 = vcmp.ge.f32.partialorder %v1295_v46, 0.0  ;;  %vm1304_vm7 = vcmp.ge.f32.partialorder %v1296_v47, 0.0 }
 0x17e   : > { %v1305_v48 = vmul.f32 0.2, %v1289_v25  ;;  %v1306_v49 = vmul.f32 0.2, %v1290_v42  ;;  %v1307_v50 = vmul.f32 0.2, %v1291_v43 }
 0x17f   : > { %v1308_v51 = vmul.f32 0.2, %v1292_v44  ;;  %v1309_v52 = vmul.f32 0.2, %v1293_v27  ;;  %v1310_v54 = vmul.f32 0.2, %v1294_v45 }
 0x180   : > { %v1311_v56 = vmul.f32 0.2, %v1295_v46  ;;  %v1312_v57 = vmul.f32 0.2, %v1296_v47  ;;  %v1313_v38 = vsel %vm1297_vm0, %v1289_v25, %v1305_v48  ;;  %v1314_v58 = vsel %vm1298_vm1, %v1290_v42, %v1306_v49 }
 0x181   : > { %v1315_v59 = vsel %vm1299_vm2, %v1291_v43, %v1307_v50  ;;  %v1316_v60 = vsel %vm1300_vm3, %v1292_v44, %v1308_v51  ;;  %v1317_v61 = vsel %vm1301_vm4, %v1293_v27, %v1309_v52  ;;  %v1318_v41 = vsel %vm1302_vm5, %v1294_v45, %v1310_v54 }
 0x182   : > { %v1319_v62 = vsel %vm1303_vm6, %v1295_v46, %v1311_v56  ;;  %v1320_v63 = vsel %vm1304_vm7, %v1296_v47, %v1312_v57  ;;  %v1592_v0 = vpack.c.bf16 %v1314_v58, %v1313_v38  ;;  %v1597_v1 = vpack.c.bf16 %v1316_v60, %v1315_v59 }
 0x183   : > { %v1602_v2 = vpack.c.bf16 %v1318_v41, %v1317_v61  ;;  %v1607_v3 = vpack.c.bf16 %v1320_v63, %v1319_v62 }
 0x184   : > { %1593 = vst [vmem:[%s224_s21] sm:$0xff] %v1592_v0   ;;  %1609 = vst [vmem:[%s224_s21 + $0x8] sm:$0xff] %v1597_v1  }
 0x185   : > { %1610 = vst [vmem:[%s224_s21 + $0x10] sm:$0xff] %v1602_v2   ;;  %1611 = vst [vmem:[%s224_s21 + $0x18] sm:$0xff] %v1607_v3  }
 0x186 PF: > { %s12_s11 = sadd.s32 1, %s1884_s11   ;;  %s2195_s9 = smov %s1880_s10 }
 0x187   : > { %p9_p5 = scmp.ge.s32.totalorder %s12_s11, 4   ;;  %s2196_s10 = smov %s2198_s12 }
 0x189   :  { %11 = sbr.rel (!%p9_p5) target bundleno = 2 (0x2), region = 73 }

// kernel: discriminator_forward.7
= control target key start
LH: loop header
LB: loop body
LE: loop exit
PB: predicated region body
PF: predicated region fallthrough
CT: control target
= control target key end

     0   :  { %s3565_s9 = smov 0   ;;  %s3567_s10 = smov 0   ;;  %s4351_s0 = inlined_call_operand.vmem [shape: bf16[32,2048], index: 0, kind: input, shape index: {}]   ;;  %s4352_s1 = inlined_call_operand.vmem [shape: bf16[2048,256], index: 1, kind: input, shape index: {}]   ;;  %s4353_s2 = inlined_call_operand.vmem [shape: bf16[32,256], index: 2, kind: output, shape index: {}]  }
   0x1   :  { %s3569_s11 = smov 0   ;;  %s3571_s12 = smov 0  }
   0x2   :  { %s3573_s13 = smov 0   ;;  %s3575_s14 = smov 0  }
   0x3   :  { %s3577_s15 = smov 0   ;;  %s3579_s16 = smov 0  }
   0x4   :  { %s3581_s17 = smov 0  }
   0x5 LB: > { %s2927_s18 = sadd.s32 4294967295, %s3548_s17   ;;  %s27_s19 = sadd.s32 1, %s3540_s15  ;;  %s3548_s17 = sphi %s3581_s17, %s12_s17   ;;  %s3544_s16 = sphi %s3579_s16, %s4362_s16   ;;  %s3540_s15 = sphi %s3577_s15, %s4361_s15   ;;  %s3536_s14 = sphi %s3575_s14, %s4360_s14   ;;  %s3532_s13 = sphi %s3573_s13, %s4359_s13   ;;  %s3528_s12 = sphi %s3571_s12, %s4358_s12   ;;  %s3524_s11 = sphi %s3569_s11, %s4357_s11   ;;  %s3520_s10 = sphi %s3567_s10, %s4356_s10   ;;  %s3516_s9 = sphi %s3565_s9, %s4355_s9  }
   0x6   : > { %p29_p0 = scmp.ge.s32.totalorder %s27_s19, 2  ;;  %s31_s20 = sadd.s32 1, %s3544_s16 }
   0x7   : > { %s68_s21 = sadd.s32 1, %s3528_s12  ;;  %p75_p1 = scmp.ne.s32.totalorder %s3528_s12, %s3524_s11 }
   0x8   : > { %s4364_s19 = smov (%p29_p0, %s27_s19), 0  ;;  %s4366_s20 = smov (!%p29_p0, %s31_s20), %s3544_s16 }
   0x9   : > { %s64_s22 = ssub.s32 %s3540_s15, %s4364_s19  ;;  %p76_p2 = scmp.eq.s32.totalorder %s3548_s17, 0 }
   0xa   : > { %p33_p3 = scmp.ge.s32.totalorder %s4366_s20, 2  ;;  %p66_p4 = scmp.eq.s32.totalorder %s64_s22, 0 }
   0xb   : > { %p77_p5 = por %p76_p2, %p75_p1  ;;  %s96_s23 = sadd.s32 1, %s3520_s10 }
   0xc   : > { %s4368_s20 = smov (%p33_p3, %s4366_s20), 0  ;;  %p106_p6 = scmp.ne.s32.totalorder %s3520_s10, %s3516_s9 }
   0xd   : > { %s3626_s24 = scalar_select %p66_p4, %s3528_s12, %s68_s21  }
   0xe   : > { %s91_s25 = ssub.s32 %s3544_s16, %s4368_s20  ;;  %p107_p7 = scmp.eq.s32.totalorder %s2927_s18, 3 }
   0xf   : > { %s93_s26 = sor.u32 %s91_s25, %s64_s22  ;;  %p2930_p10 = scmp.ge.s32.totalorder %s3548_s17, 4 }
  0x10   : > { %p94_p8 = scmp.eq.s32.totalorder %s93_s26, 0  ;;  %p3632_p9 = por %p107_p7, %p106_p6 }
  0x11   : > { %129 = sbr.rel (%p2930_p10) target bundleno = 198 (0xc6), region = 16 }
  0x12   : > { %s3637_s28 = scalar_select %p94_p8, %s3520_s10, %s96_s23  }
  0x18   : > { %147 = sbr.rel (!%p77_p5) target bundleno = 198 (0xc6), region = 24  ;;  %s149_s29 = sand.u32 (%p77_p5), 1, %s3528_s12  }
  0x19   : > { %s2932_s30 = sshll.u32 (%p77_p5), %s3540_s15, 2  ;;  %s2931_s3 = sshll.u32 (%p77_p5), %s149_s29, 10 }
  0x1a   : > { %s3645_s6 = scalar_lea.vmem (%p77_p5), %s4352_s1, %s2932_s30  ;;  %s3649_s7 = scalar_lea.vmem (%p77_p5), [#allocation3], %s2931_s3 }
  0x1b   : > { %v172_v0 = vld [vmem:[%s3645_s6] sm:$0xf] (%p77_p5)  ;;  %v174_v1 = vld [vmem:[%s3645_s6 + $0x8] sm:$0xf] (%p77_p5)  ;;  %v176_v2 = vld [vmem:[%s3645_s6 + $0x10] sm:$0xf] (%p77_p5) }
  0x1c   : > { %173 = vst [vmem:[%s3649_s7] sm:$0xf] (%p77_p5), %v172_v0  ;;  %175 = vst [vmem:[%s3649_s7 + $0x4] sm:$0xf] (%p77_p5), %v174_v1  ;;  %v178_v3 = vld [vmem:[%s3645_s6 + $0x18] sm:$0xf] (%p77_p5) }
  0x1d   : > { %v180_v4 = vld [vmem:[%s3645_s6 + $0x20] sm:$0xf] (%p77_p5)  ;;  %177 = vst [vmem:[%s3649_s7 + $0x8] sm:$0xf] (%p77_p5), %v176_v2  ;;  %179 = vst [vmem:[%s3649_s7 + $0xc] sm:$0xf] (%p77_p5), %v178_v3 }
  0x1e   : > { %181 = vst [vmem:[%s3649_s7 + $0x10] sm:$0xf] (%p77_p5), %v180_v4  ;;  %v182_v5 = vld [vmem:[%s3645_s6 + $0x28] sm:$0xf] (%p77_p5)  ;;  %v184_v6 = vld [vmem:[%s3645_s6 + $0x30] sm:$0xf] (%p77_p5) }
  0x1f   : > { %v186_v7 = vld [vmem:[%s3645_s6 + $0x38] sm:$0xf]  ;;  %183 = vst [vmem:[%s3649_s7 + $0x14] sm:$0xf] %v182_v5  ;;  %185 = vst [vmem:[%s3649_s7 + $0x18] sm:$0xf] %v184_v6 }
  0x20   : > { %187 = vst [vmem:[%s3649_s7 + $0x1c] sm:$0xf] %v186_v7  ;;  %v188_v8 = vld [vmem:[%s3645_s6 + $0x40] sm:$0xf]  ;;  %v190_v9 = vld [vmem:[%s3645_s6 + $0x48] sm:$0xf] }
  0x21   : > { %v192_v10 = vld [vmem:[%s3645_s6 + $0x50] sm:$0xf]  ;;  %189 = vst [vmem:[%s3649_s7 + $0x20] sm:$0xf] %v188_v8  ;;  %191 = vst [vmem:[%s3649_s7 + $0x24] sm:$0xf] %v190_v9 }
  0x22   : > { %193 = vst [vmem:[%s3649_s7 + $0x28] sm:$0xf] %v192_v10  ;;  %v194_v11 = vld [vmem:[%s3645_s6 + $0x58] sm:$0xf]  ;;  %v196_v12 = vld [vmem:[%s3645_s6 + $0x60] sm:$0xf] }
  0x23   : > { %v198_v13 = vld [vmem:[%s3645_s6 + $0x68] sm:$0xf]  ;;  %195 = vst [vmem:[%s3649_s7 + $0x2c] sm:$0xf] %v194_v11  ;;  %197 = vst [vmem:[%s3649_s7 + $0x30] sm:$0xf] %v196_v12 }
  0x24   : > { %199 = vst [vmem:[%s3649_s7 + $0x34] sm:$0xf] %v198_v13  ;;  %v200_v14 = vld [vmem:[%s3645_s6 + $0x70] sm:$0xf]  ;;  %v202_v15 = vld [vmem:[%s3645_s6 + $0x78] sm:$0xf] }
  0x25   : > { %v204_v16 = vld [vmem:[%s3645_s6 + $0x80] sm:$0xf]  ;;  %201 = vst [vmem:[%s3649_s7 + $0x38] sm:$0xf] %v200_v14  ;;  %203 = vst [vmem:[%s3649_s7 + $0x3c] sm:$0xf] %v202_v15 }
  0x26   : > { %205 = vst [vmem:[%s3649_s7 + $0x40] sm:$0xf] %v204_v16  ;;  %v206_v17 = vld [vmem:[%s3645_s6 + $0x88] sm:$0xf]  ;;  %v208_v18 = vld [vmem:[%s3645_s6 + $0x90] sm:$0xf] }
  0x27   : > { %v210_v19 = vld [vmem:[%s3645_s6 + $0x98] sm:$0xf]  ;;  %207 = vst [vmem:[%s3649_s7 + $0x44] sm:$0xf] %v206_v17  ;;  %209 = vst [vmem:[%s3649_s7 + $0x48] sm:$0xf] %v208_v18 }
  0x28   : > { %211 = vst [vmem:[%s3649_s7 + $0x4c] sm:$0xf] %v210_v19  ;;  %v212_v20 = vld [vmem:[%s3645_s6 + $0xa0] sm:$0xf]  ;;  %v214_v21 = vld [vmem:[%s3645_s6 + $0xa8] sm:$0xf] }
  0x29   : > { %v216_v22 = vld [vmem:[%s3645_s6 + $0xb0] sm:$0xf]  ;;  %213 = vst [vmem:[%s3649_s7 + $0x50] sm:$0xf] %v212_v20  ;;  %215 = vst [vmem:[%s3649_s7 + $0x54] sm:$0xf] %v214_v21 }
  0x2a   : > { %217 = vst [vmem:[%s3649_s7 + $0x58] sm:$0xf] %v216_v22  ;;  %v218_v23 = vld [vmem:[%s3645_s6 + $0xb8] sm:$0xf]  ;;  %v220_v24 = vld [vmem:[%s3645_s6 + $0xc0] sm:$0xf] }
  0x2b   : > { %v222_v25 = vld [vmem:[%s3645_s6 + $0xc8] sm:$0xf]  ;;  %219 = vst [vmem:[%s3649_s7 + $0x5c] sm:$0xf] %v218_v23  ;;  %221 = vst [vmem:[%s3649_s7 + $0x60] sm:$0xf] %v220_v24 }
  0x2c   : > { %223 = vst [vmem:[%s3649_s7 + $0x64] sm:$0xf] %v222_v25  ;;  %v224_v26 = vld [vmem:[%s3645_s6 + $0xd0] sm:$0xf]  ;;  %v226_v27 = vld [vmem:[%s3645_s6 + $0xd8] sm:$0xf] }
  0x2d   : > { %v228_v28 = vld [vmem:[%s3645_s6 + $0xe0] sm:$0xf]  ;;  %225 = vst [vmem:[%s3649_s7 + $0x68] sm:$0xf] %v224_v26  ;;  %227 = vst [vmem:[%s3649_s7 + $0x6c] sm:$0xf] %v226_v27 }
  0x2e   : > { %229 = vst [vmem:[%s3649_s7 + $0x70] sm:$0xf] %v228_v28  ;;  %v230_v29 = vld [vmem:[%s3645_s6 + $0xe8] sm:$0xf]  ;;  %v232_v30 = vld [vmem:[%s3645_s6 + $0xf0] sm:$0xf] }
  0x2f   : > { %v234_v31 = vld [vmem:[%s3645_s6 + $0xf8] sm:$0xf]  ;;  %231 = vst [vmem:[%s3649_s7 + $0x74] sm:$0xf] %v230_v29  ;;  %233 = vst [vmem:[%s3649_s7 + $0x78] sm:$0xf] %v232_v30 }
  0x30   : > { %235 = vst [vmem:[%s3649_s7 + $0x7c] sm:$0xf] %v234_v31  ;;  %v236_v32 = vld [vmem:[%s3645_s6 + $0x100] sm:$0xf]  ;;  %v238_v33 = vld [vmem:[%s3645_s6 + $0x108] sm:$0xf] }
  0x31   : > { %v240_v34 = vld [vmem:[%s3645_s6 + $0x110] sm:$0xf]  ;;  %237 = vst [vmem:[%s3649_s7 + $0x80] sm:$0xf] %v236_v32  ;;  %239 = vst [vmem:[%s3649_s7 + $0x84] sm:$0xf] %v238_v33 }
  0x32   : > { %241 = vst [vmem:[%s3649_s7 + $0x88] sm:$0xf] %v240_v34  ;;  %v242_v35 = vld [vmem:[%s3645_s6 + $0x118] sm:$0xf]  ;;  %v244_v36 = vld [vmem:[%s3645_s6 + $0x120] sm:$0xf] }
  0x33   : > { %v246_v37 = vld [vmem:[%s3645_s6 + $0x128] sm:$0xf]  ;;  %243 = vst [vmem:[%s3649_s7 + $0x8c] sm:$0xf] %v242_v35  ;;  %245 = vst [vmem:[%s3649_s7 + $0x90] sm:$0xf] %v244_v36 }
  0x34   : > { %247 = vst [vmem:[%s3649_s7 + $0x94] sm:$0xf] %v246_v37  ;;  %v248_v38 = vld [vmem:[%s3645_s6 + $0x130] sm:$0xf]  ;;  %v250_v39 = vld [vmem:[%s3645_s6 + $0x138] sm:$0xf] }
  0x35   : > { %v252_v40 = vld [vmem:[%s3645_s6 + $0x140] sm:$0xf]  ;;  %249 = vst [vmem:[%s3649_s7 + $0x98] sm:$0xf] %v248_v38  ;;  %251 = vst [vmem:[%s3649_s7 + $0x9c] sm:$0xf] %v250_v39 }
  0x36   : > { %253 = vst [vmem:[%s3649_s7 + $0xa0] sm:$0xf] %v252_v40  ;;  %v254_v41 = vld [vmem:[%s3645_s6 + $0x148] sm:$0xf]  ;;  %v256_v42 = vld [vmem:[%s3645_s6 + $0x150] sm:$0xf] }
  0x37   : > { %v258_v43 = vld [vmem:[%s3645_s6 + $0x158] sm:$0xf]  ;;  %255 = vst [vmem:[%s3649_s7 + $0xa4] sm:$0xf] %v254_v41  ;;  %257 = vst [vmem:[%s3649_s7 + $0xa8] sm:$0xf] %v256_v42 }
  0x38   : > { %259 = vst [vmem:[%s3649_s7 + $0xac] sm:$0xf] %v258_v43  ;;  %v260_v44 = vld [vmem:[%s3645_s6 + $0x160] sm:$0xf]  ;;  %v262_v45 = vld [vmem:[%s3645_s6 + $0x168] sm:$0xf] }
  0x39   : > { %v264_v46 = vld [vmem:[%s3645_s6 + $0x170] sm:$0xf]  ;;  %261 = vst [vmem:[%s3649_s7 + $0xb0] sm:$0xf] %v260_v44  ;;  %263 = vst [vmem:[%s3649_s7 + $0xb4] sm:$0xf] %v262_v45 }
  0x3a   : > { %265 = vst [vmem:[%s3649_s7 + $0xb8] sm:$0xf] %v264_v46  ;;  %v266_v47 = vld [vmem:[%s3645_s6 + $0x178] sm:$0xf]  ;;  %v268_v48 = vld [vmem:[%s3645_s6 + $0x180] sm:$0xf] }
  0x3b   : > { %v270_v49 = vld [vmem:[%s3645_s6 + $0x188] sm:$0xf]  ;;  %267 = vst [vmem:[%s3649_s7 + $0xbc] sm:$0xf] %v266_v47  ;;  %269 = vst [vmem:[%s3649_s7 + $0xc0] sm:$0xf] %v268_v48 }
  0x3c   : > { %271 = vst [vmem:[%s3649_s7 + $0xc4] sm:$0xf] %v270_v49  ;;  %v272_v50 = vld [vmem:[%s3645_s6 + $0x190] sm:$0xf]  ;;  %v274_v51 = vld [vmem:[%s3645_s6 + $0x198] sm:$0xf] }
  0x3d   : > { %v276_v52 = vld [vmem:[%s3645_s6 + $0x1a0] sm:$0xf]  ;;  %273 = vst [vmem:[%s3649_s7 + $0xc8] sm:$0xf] %v272_v50  ;;  %275 = vst [vmem:[%s3649_s7 + $0xcc] sm:$0xf] %v274_v51 }
  0x3e   : > { %277 = vst [vmem:[%s3649_s7 + $0xd0] sm:$0xf] %v276_v52  ;;  %v278_v53 = vld [vmem:[%s3645_s6 + $0x1a8] sm:$0xf]  ;;  %v280_v54 = vld [vmem:[%s3645_s6 + $0x1b0] sm:$0xf] }
  0x3f   : > { %v282_v55 = vld [vmem:[%s3645_s6 + $0x1b8] sm:$0xf]  ;;  %279 = vst [vmem:[%s3649_s7 + $0xd4] sm:$0xf] %v278_v53  ;;  %281 = vst [vmem:[%s3649_s7 + $0xd8] sm:$0xf] %v280_v54 }
  0x40   : > { %283 = vst [vmem:[%s3649_s7 + $0xdc] sm:$0xf] %v282_v55  ;;  %v284_v56 = vld [vmem:[%s3645_s6 + $0x1c0] sm:$0xf]  ;;  %v286_v57 = vld [vmem:[%s3645_s6 + $0x1c8] sm:$0xf] }
  0x41   : > { %v288_v58 = vld [vmem:[%s3645_s6 + $0x1d0] sm:$0xf]  ;;  %285 = vst [vmem:[%s3649_s7 + $0xe0] sm:$0xf] %v284_v56  ;;  %287 = vst [vmem:[%s3649_s7 + $0xe4] sm:$0xf] %v286_v57 }
  0x42   : > { %289 = vst [vmem:[%s3649_s7 + $0xe8] sm:$0xf] %v288_v58  ;;  %v290_v59 = vld [vmem:[%s3645_s6 + $0x1d8] sm:$0xf]  ;;  %v292_v60 = vld [vmem:[%s3645_s6 + $0x1e0] sm:$0xf] }
  0x43   : > { %v294_v61 = vld [vmem:[%s3645_s6 + $0x1e8] sm:$0xf]  ;;  %291 = vst [vmem:[%s3649_s7 + $0xec] sm:$0xf] %v290_v59  ;;  %293 = vst [vmem:[%s3649_s7 + $0xf0] sm:$0xf] %v292_v60 }
  0x44   : > { %295 = vst [vmem:[%s3649_s7 + $0xf4] sm:$0xf] %v294_v61  ;;  %v296_v62 = vld [vmem:[%s3645_s6 + $0x1f0] sm:$0xf]  ;;  %v298_v63 = vld [vmem:[%s3645_s6 + $0x1f8] sm:$0xf] }
  0x45   : > { %v300_v0 = vld [vmem:[%s3645_s6 + $0x200] sm:$0xf]  ;;  %297 = vst [vmem:[%s3649_s7 + $0xf8] sm:$0xf] %v296_v62  ;;  %299 = vst [vmem:[%s3649_s7 + $0xfc] sm:$0xf] %v298_v63 }
  0x46   : > { %301 = vst [vmem:[%s3649_s7 + $0x100] sm:$0xf] %v300_v0  ;;  %v302_v1 = vld [vmem:[%s3645_s6 + $0x208] sm:$0xf]  ;;  %v304_v2 = vld [vmem:[%s3645_s6 + $0x210] sm:$0xf] }
  0x47   : > { %v306_v3 = vld [vmem:[%s3645_s6 + $0x218] sm:$0xf]  ;;  %303 = vst [vmem:[%s3649_s7 + $0x104] sm:$0xf] %v302_v1  ;;  %305 = vst [vmem:[%s3649_s7 + $0x108] sm:$0xf] %v304_v2 }
  0x48   : > { %307 = vst [vmem:[%s3649_s7 + $0x10c] sm:$0xf] %v306_v3  ;;  %v308_v4 = vld [vmem:[%s3645_s6 + $0x220] sm:$0xf]  ;;  %v310_v5 = vld [vmem:[%s3645_s6 + $0x228] sm:$0xf] }
  0x49   : > { %v312_v6 = vld [vmem:[%s3645_s6 + $0x230] sm:$0xf]  ;;  %309 = vst [vmem:[%s3649_s7 + $0x110] sm:$0xf] %v308_v4  ;;  %311 = vst [vmem:[%s3649_s7 + $0x114] sm:$0xf] %v310_v5 }
  0x4a   : > { %313 = vst [vmem:[%s3649_s7 + $0x118] sm:$0xf] %v312_v6  ;;  %v314_v7 = vld [vmem:[%s3645_s6 + $0x238] sm:$0xf]  ;;  %v316_v8 = vld [vmem:[%s3645_s6 + $0x240] sm:$0xf] }
  0x4b   : > { %v318_v9 = vld [vmem:[%s3645_s6 + $0x248] sm:$0xf]  ;;  %315 = vst [vmem:[%s3649_s7 + $0x11c] sm:$0xf] %v314_v7  ;;  %317 = vst [vmem:[%s3649_s7 + $0x120] sm:$0xf] %v316_v8 }
  0x4c   : > { %319 = vst [vmem:[%s3649_s7 + $0x124] sm:$0xf] %v318_v9  ;;  %v320_v10 = vld [vmem:[%s3645_s6 + $0x250] sm:$0xf]  ;;  %v322_v11 = vld [vmem:[%s3645_s6 + $0x258] sm:$0xf] }
  0x4d   : > { %v324_v12 = vld [vmem:[%s3645_s6 + $0x260] sm:$0xf]  ;;  %321 = vst [vmem:[%s3649_s7 + $0x128] sm:$0xf] %v320_v10  ;;  %323 = vst [vmem:[%s3649_s7 + $0x12c] sm:$0xf] %v322_v11 }
  0x4e   : > { %325 = vst [vmem:[%s3649_s7 + $0x130] sm:$0xf] %v324_v12  ;;  %v326_v13 = vld [vmem:[%s3645_s6 + $0x268] sm:$0xf]  ;;  %v328_v14 = vld [vmem:[%s3645_s6 + $0x270] sm:$0xf] }
  0x4f   : > { %v330_v15 = vld [vmem:[%s3645_s6 + $0x278] sm:$0xf]  ;;  %327 = vst [vmem:[%s3649_s7 + $0x134] sm:$0xf] %v326_v13  ;;  %329 = vst [vmem:[%s3649_s7 + $0x138] sm:$0xf] %v328_v14 }
  0x50   : > { %331 = vst [vmem:[%s3649_s7 + $0x13c] sm:$0xf] %v330_v15  ;;  %v332_v16 = vld [vmem:[%s3645_s6 + $0x280] sm:$0xf]  ;;  %v334_v17 = vld [vmem:[%s3645_s6 + $0x288] sm:$0xf] }
  0x51   : > { %v336_v18 = vld [vmem:[%s3645_s6 + $0x290] sm:$0xf]  ;;  %333 = vst [vmem:[%s3649_s7 + $0x140] sm:$0xf] %v332_v16  ;;  %335 = vst [vmem:[%s3649_s7 + $0x144] sm:$0xf] %v334_v17 }
  0x52   : > { %337 = vst [vmem:[%s3649_s7 + $0x148] sm:$0xf] %v336_v18  ;;  %v338_v19 = vld [vmem:[%s3645_s6 + $0x298] sm:$0xf]  ;;  %v340_v20 = vld [vmem:[%s3645_s6 + $0x2a0] sm:$0xf] }
  0x53   : > { %v342_v21 = vld [vmem:[%s3645_s6 + $0x2a8] sm:$0xf]  ;;  %339 = vst [vmem:[%s3649_s7 + $0x14c] sm:$0xf] %v338_v19  ;;  %341 = vst [vmem:[%s3649_s7 + $0x150] sm:$0xf] %v340_v20 }
  0x54   : > { %343 = vst [vmem:[%s3649_s7 + $0x154] sm:$0xf] %v342_v21  ;;  %v344_v22 = vld [vmem:[%s3645_s6 + $0x2b0] sm:$0xf]  ;;  %v346_v23 = vld [vmem:[%s3645_s6 + $0x2b8] sm:$0xf] }
  0x55   : > { %v348_v24 = vld [vmem:[%s3645_s6 + $0x2c0] sm:$0xf]  ;;  %345 = vst [vmem:[%s3649_s7 + $0x158] sm:$0xf] %v344_v22  ;;  %347 = vst [vmem:[%s3649_s7 + $0x15c] sm:$0xf] %v346_v23 }
  0x56   : > { %349 = vst [vmem:[%s3649_s7 + $0x160] sm:$0xf] %v348_v24  ;;  %v350_v25 = vld [vmem:[%s3645_s6 + $0x2c8] sm:$0xf]  ;;  %v352_v26 = vld [vmem:[%s3645_s6 + $0x2d0] sm:$0xf] }
  0x57   : > { %v354_v27 = vld [vmem:[%s3645_s6 + $0x2d8] sm:$0xf]  ;;  %351 = vst [vmem:[%s3649_s7 + $0x164] sm:$0xf] %v350_v25  ;;  %353 = vst [vmem:[%s3649_s7 + $0x168] sm:$0xf] %v352_v26 }
  0x58   : > { %355 = vst [vmem:[%s3649_s7 + $0x16c] sm:$0xf] %v354_v27  ;;  %v356_v28 = vld [vmem:[%s3645_s6 + $0x2e0] sm:$0xf]  ;;  %v358_v29 = vld [vmem:[%s3645_s6 + $0x2e8] sm:$0xf] }
  0x59   : > { %v360_v30 = vld [vmem:[%s3645_s6 + $0x2f0] sm:$0xf]  ;;  %357 = vst [vmem:[%s3649_s7 + $0x170] sm:$0xf] %v356_v28  ;;  %359 = vst [vmem:[%s3649_s7 + $0x174] sm:$0xf] %v358_v29 }
  0x5a   : > { %361 = vst [vmem:[%s3649_s7 + $0x178] sm:$0xf] %v360_v30  ;;  %v362_v31 = vld [vmem:[%s3645_s6 + $0x2f8] sm:$0xf]  ;;  %v364_v32 = vld [vmem:[%s3645_s6 + $0x300] sm:$0xf] }
  0x5b   : > { %v366_v33 = vld [vmem:[%s3645_s6 + $0x308] sm:$0xf]  ;;  %363 = vst [vmem:[%s3649_s7 + $0x17c] sm:$0xf] %v362_v31  ;;  %365 = vst [vmem:[%s3649_s7 + $0x180] sm:$0xf] %v364_v32 }
  0x5c   : > { %367 = vst [vmem:[%s3649_s7 + $0x184] sm:$0xf] %v366_v33  ;;  %v368_v34 = vld [vmem:[%s3645_s6 + $0x310] sm:$0xf]  ;;  %v370_v35 = vld [vmem:[%s3645_s6 + $0x318] sm:$0xf] }
  0x5d   : > { %v372_v36 = vld [vmem:[%s3645_s6 + $0x320] sm:$0xf]  ;;  %369 = vst [vmem:[%s3649_s7 + $0x188] sm:$0xf] %v368_v34  ;;  %371 = vst [vmem:[%s3649_s7 + $0x18c] sm:$0xf] %v370_v35 }
  0x5e   : > { %373 = vst [vmem:[%s3649_s7 + $0x190] sm:$0xf] %v372_v36  ;;  %v374_v37 = vld [vmem:[%s3645_s6 + $0x328] sm:$0xf]  ;;  %v376_v38 = vld [vmem:[%s3645_s6 + $0x330] sm:$0xf] }
  0x5f   : > { %v378_v39 = vld [vmem:[%s3645_s6 + $0x338] sm:$0xf]  ;;  %375 = vst [vmem:[%s3649_s7 + $0x194] sm:$0xf] %v374_v37  ;;  %377 = vst [vmem:[%s3649_s7 + $0x198] sm:$0xf] %v376_v38 }
  0x60   : > { %379 = vst [vmem:[%s3649_s7 + $0x19c] sm:$0xf] %v378_v39  ;;  %v380_v40 = vld [vmem:[%s3645_s6 + $0x340] sm:$0xf]  ;;  %v382_v41 = vld [vmem:[%s3645_s6 + $0x348] sm:$0xf] }
  0x61   : > { %v384_v42 = vld [vmem:[%s3645_s6 + $0x350] sm:$0xf]  ;;  %381 = vst [vmem:[%s3649_s7 + $0x1a0] sm:$0xf] %v380_v40  ;;  %383 = vst [vmem:[%s3649_s7 + $0x1a4] sm:$0xf] %v382_v41 }
  0x62   : > { %385 = vst [vmem:[%s3649_s7 + $0x1a8] sm:$0xf] %v384_v42  ;;  %v386_v43 = vld [vmem:[%s3645_s6 + $0x358] sm:$0xf]  ;;  %v388_v44 = vld [vmem:[%s3645_s6 + $0x360] sm:$0xf] }
  0x63   : > { %v390_v45 = vld [vmem:[%s3645_s6 + $0x368] sm:$0xf]  ;;  %387 = vst [vmem:[%s3649_s7 + $0x1ac] sm:$0xf] %v386_v43  ;;  %389 = vst [vmem:[%s3649_s7 + $0x1b0] sm:$0xf] %v388_v44 }
  0x64   : > { %391 = vst [vmem:[%s3649_s7 + $0x1b4] sm:$0xf] %v390_v45  ;;  %v392_v46 = vld [vmem:[%s3645_s6 + $0x370] sm:$0xf]  ;;  %v394_v47 = vld [vmem:[%s3645_s6 + $0x378] sm:$0xf] }
  0x65   : > { %v396_v48 = vld [vmem:[%s3645_s6 + $0x380] sm:$0xf]  ;;  %393 = vst [vmem:[%s3649_s7 + $0x1b8] sm:$0xf] %v392_v46  ;;  %395 = vst [vmem:[%s3649_s7 + $0x1bc] sm:$0xf] %v394_v47 }
  0x66   : > { %397 = vst [vmem:[%s3649_s7 + $0x1c0] sm:$0xf] %v396_v48  ;;  %v398_v49 = vld [vmem:[%s3645_s6 + $0x388] sm:$0xf]  ;;  %v400_v50 = vld [vmem:[%s3645_s6 + $0x390] sm:$0xf] }
  0x67   : > { %v402_v51 = vld [vmem:[%s3645_s6 + $0x398] sm:$0xf]  ;;  %399 = vst [vmem:[%s3649_s7 + $0x1c4] sm:$0xf] %v398_v49  ;;  %401 = vst [vmem:[%s3649_s7 + $0x1c8] sm:$0xf] %v400_v50 }
  0x68   : > { %403 = vst [vmem:[%s3649_s7 + $0x1cc] sm:$0xf] %v402_v51  ;;  %v404_v52 = vld [vmem:[%s3645_s6 + $0x3a0] sm:$0xf]  ;;  %v406_v53 = vld [vmem:[%s3645_s6 + $0x3a8] sm:$0xf] }
  0x69   : > { %v408_v54 = vld [vmem:[%s3645_s6 + $0x3b0] sm:$0xf]  ;;  %405 = vst [vmem:[%s3649_s7 + $0x1d0] sm:$0xf] %v404_v52  ;;  %407 = vst [vmem:[%s3649_s7 + $0x1d4] sm:$0xf] %v406_v53 }
  0x6a   : > { %409 = vst [vmem:[%s3649_s7 + $0x1d8] sm:$0xf] %v408_v54  ;;  %v410_v55 = vld [vmem:[%s3645_s6 + $0x3b8] sm:$0xf]  ;;  %v412_v56 = vld [vmem:[%s3645_s6 + $0x3c0] sm:$0xf] }
  0x6b   : > { %v414_v57 = vld [vmem:[%s3645_s6 + $0x3c8] sm:$0xf]  ;;  %411 = vst [vmem:[%s3649_s7 + $0x1dc] sm:$0xf] %v410_v55  ;;  %413 = vst [vmem:[%s3649_s7 + $0x1e0] sm:$0xf] %v412_v56 }
  0x6c   : > { %415 = vst [vmem:[%s3649_s7 + $0x1e4] sm:$0xf] %v414_v57  ;;  %v416_v58 = vld [vmem:[%s3645_s6 + $0x3d0] sm:$0xf]  ;;  %v418_v59 = vld [vmem:[%s3645_s6 + $0x3d8] sm:$0xf] }
  0x6d   : > { %v420_v60 = vld [vmem:[%s3645_s6 + $0x3e0] sm:$0xf]  ;;  %417 = vst [vmem:[%s3649_s7 + $0x1e8] sm:$0xf] %v416_v58  ;;  %419 = vst [vmem:[%s3649_s7 + $0x1ec] sm:$0xf] %v418_v59 }
  0x6e   : > { %421 = vst [vmem:[%s3649_s7 + $0x1f0] sm:$0xf] %v420_v60  ;;  %v422_v61 = vld [vmem:[%s3645_s6 + $0x3e8] sm:$0xf]  ;;  %v424_v62 = vld [vmem:[%s3645_s6 + $0x3f0] sm:$0xf] }
  0x6f   : > { %v426_v63 = vld [vmem:[%s3645_s6 + $0x3f8] sm:$0xf]  ;;  %423 = vst [vmem:[%s3649_s7 + $0x1f4] sm:$0xf] %v422_v61  ;;  %425 = vst [vmem:[%s3649_s7 + $0x1f8] sm:$0xf] %v424_v62 }
  0x70   : > { %427 = vst [vmem:[%s3649_s7 + $0x1fc] sm:$0xf] %v426_v63  ;;  %v428_v0 = vld [vmem:[%s3645_s6 + $0x400] sm:$0xf]  ;;  %v430_v1 = vld [vmem:[%s3645_s6 + $0x408] sm:$0xf] }
  0x71   : > { %v432_v2 = vld [vmem:[%s3645_s6 + $0x410] sm:$0xf]  ;;  %429 = vst [vmem:[%s3649_s7 + $0x200] sm:$0xf] %v428_v0  ;;  %431 = vst [vmem:[%s3649_s7 + $0x204] sm:$0xf] %v430_v1 }
  0x72   : > { %433 = vst [vmem:[%s3649_s7 + $0x208] sm:$0xf] %v432_v2  ;;  %v434_v3 = vld [vmem:[%s3645_s6 + $0x418] sm:$0xf]  ;;  %v436_v4 = vld [vmem:[%s3645_s6 + $0x420] sm:$0xf] }
  0x73   : > { %v438_v5 = vld [vmem:[%s3645_s6 + $0x428] sm:$0xf]  ;;  %435 = vst [vmem:[%s3649_s7 + $0x20c] sm:$0xf] %v434_v3  ;;  %437 = vst [vmem:[%s3649_s7 + $0x210] sm:$0xf] %v436_v4 }
  0x74   : > { %439 = vst [vmem:[%s3649_s7 + $0x214] sm:$0xf] %v438_v5  ;;  %v440_v6 = vld [vmem:[%s3645_s6 + $0x430] sm:$0xf]  ;;  %v442_v7 = vld [vmem:[%s3645_s6 + $0x438] sm:$0xf] }
  0x75   : > { %v444_v8 = vld [vmem:[%s3645_s6 + $0x440] sm:$0xf]  ;;  %441 = vst [vmem:[%s3649_s7 + $0x218] sm:$0xf] %v440_v6  ;;  %443 = vst [vmem:[%s3649_s7 + $0x21c] sm:$0xf] %v442_v7 }
  0x76   : > { %445 = vst [vmem:[%s3649_s7 + $0x220] sm:$0xf] %v444_v8  ;;  %v446_v9 = vld [vmem:[%s3645_s6 + $0x448] sm:$0xf]  ;;  %v448_v10 = vld [vmem:[%s3645_s6 + $0x450] sm:$0xf] }
  0x77   : > { %v450_v11 = vld [vmem:[%s3645_s6 + $0x458] sm:$0xf]  ;;  %447 = vst [vmem:[%s3649_s7 + $0x224] sm:$0xf] %v446_v9  ;;  %449 = vst [vmem:[%s3649_s7 + $0x228] sm:$0xf] %v448_v10 }
  0x78   : > { %451 = vst [vmem:[%s3649_s7 + $0x22c] sm:$0xf] %v450_v11  ;;  %v452_v12 = vld [vmem:[%s3645_s6 + $0x460] sm:$0xf]  ;;  %v454_v13 = vld [vmem:[%s3645_s6 + $0x468] sm:$0xf] }
  0x79   : > { %v456_v14 = vld [vmem:[%s3645_s6 + $0x470] sm:$0xf]  ;;  %453 = vst [vmem:[%s3649_s7 + $0x230] sm:$0xf] %v452_v12  ;;  %455 = vst [vmem:[%s3649_s7 + $0x234] sm:$0xf] %v454_v13 }
  0x7a   : > { %457 = vst [vmem:[%s3649_s7 + $0x238] sm:$0xf] %v456_v14  ;;  %v458_v15 = vld [vmem:[%s3645_s6 + $0x478] sm:$0xf]  ;;  %v460_v16 = vld [vmem:[%s3645_s6 + $0x480] sm:$0xf] }
  0x7b   : > { %v462_v17 = vld [vmem:[%s3645_s6 + $0x488] sm:$0xf]  ;;  %459 = vst [vmem:[%s3649_s7 + $0x23c] sm:$0xf] %v458_v15  ;;  %461 = vst [vmem:[%s3649_s7 + $0x240] sm:$0xf] %v460_v16 }
  0x7c   : > { %463 = vst [vmem:[%s3649_s7 + $0x244] sm:$0xf] %v462_v17  ;;  %v464_v18 = vld [vmem:[%s3645_s6 + $0x490] sm:$0xf]  ;;  %v466_v19 = vld [vmem:[%s3645_s6 + $0x498] sm:$0xf] }
  0x7d   : > { %v468_v20 = vld [vmem:[%s3645_s6 + $0x4a0] sm:$0xf]  ;;  %465 = vst [vmem:[%s3649_s7 + $0x248] sm:$0xf] %v464_v18  ;;  %467 = vst [vmem:[%s3649_s7 + $0x24c] sm:$0xf] %v466_v19 }
  0x7e   : > { %469 = vst [vmem:[%s3649_s7 + $0x250] sm:$0xf] %v468_v20  ;;  %v470_v21 = vld [vmem:[%s3645_s6 + $0x4a8] sm:$0xf]  ;;  %v472_v22 = vld [vmem:[%s3645_s6 + $0x4b0] sm:$0xf] }
  0x7f   : > { %v474_v23 = vld [vmem:[%s3645_s6 + $0x4b8] sm:$0xf]  ;;  %471 = vst [vmem:[%s3649_s7 + $0x254] sm:$0xf] %v470_v21  ;;  %473 = vst [vmem:[%s3649_s7 + $0x258] sm:$0xf] %v472_v22 }
  0x80   : > { %475 = vst [vmem:[%s3649_s7 + $0x25c] sm:$0xf] %v474_v23  ;;  %v476_v24 = vld [vmem:[%s3645_s6 + $0x4c0] sm:$0xf]  ;;  %v478_v25 = vld [vmem:[%s3645_s6 + $0x4c8] sm:$0xf] }
  0x81   : > { %v480_v26 = vld [vmem:[%s3645_s6 + $0x4d0] sm:$0xf]  ;;  %477 = vst [vmem:[%s3649_s7 + $0x260] sm:$0xf] %v476_v24  ;;  %479 = vst [vmem:[%s3649_s7 + $0x264] sm:$0xf] %v478_v25 }
  0x82   : > { %481 = vst [vmem:[%s3649_s7 + $0x268] sm:$0xf] %v480_v26  ;;  %v482_v27 = vld [vmem:[%s3645_s6 + $0x4d8] sm:$0xf]  ;;  %v484_v28 = vld [vmem:[%s3645_s6 + $0x4e0] sm:$0xf] }
  0x83   : > { %v486_v29 = vld [vmem:[%s3645_s6 + $0x4e8] sm:$0xf]  ;;  %483 = vst [vmem:[%s3649_s7 + $0x26c] sm:$0xf] %v482_v27  ;;  %485 = vst [vmem:[%s3649_s7 + $0x270] sm:$0xf] %v484_v28 }
  0x84   : > { %487 = vst [vmem:[%s3649_s7 + $0x274] sm:$0xf] %v486_v29  ;;  %v488_v30 = vld [vmem:[%s3645_s6 + $0x4f0] sm:$0xf]  ;;  %v490_v31 = vld [vmem:[%s3645_s6 + $0x4f8] sm:$0xf] }
  0x85   : > { %v492_v32 = vld [vmem:[%s3645_s6 + $0x500] sm:$0xf]  ;;  %489 = vst [vmem:[%s3649_s7 + $0x278] sm:$0xf] %v488_v30  ;;  %491 = vst [vmem:[%s3649_s7 + $0x27c] sm:$0xf] %v490_v31 }
  0x86   : > { %493 = vst [vmem:[%s3649_s7 + $0x280] sm:$0xf] %v492_v32  ;;  %v494_v33 = vld [vmem:[%s3645_s6 + $0x508] sm:$0xf]  ;;  %v496_v34 = vld [vmem:[%s3645_s6 + $0x510] sm:$0xf] }
  0x87   : > { %v498_v35 = vld [vmem:[%s3645_s6 + $0x518] sm:$0xf]  ;;  %495 = vst [vmem:[%s3649_s7 + $0x284] sm:$0xf] %v494_v33  ;;  %497 = vst [vmem:[%s3649_s7 + $0x288] sm:$0xf] %v496_v34 }
  0x88   : > { %499 = vst [vmem:[%s3649_s7 + $0x28c] sm:$0xf] %v498_v35  ;;  %v500_v36 = vld [vmem:[%s3645_s6 + $0x520] sm:$0xf]  ;;  %v502_v37 = vld [vmem:[%s3645_s6 + $0x528] sm:$0xf] }
  0x89   : > { %v504_v38 = vld [vmem:[%s3645_s6 + $0x530] sm:$0xf]  ;;  %501 = vst [vmem:[%s3649_s7 + $0x290] sm:$0xf] %v500_v36  ;;  %503 = vst [vmem:[%s3649_s7 + $0x294] sm:$0xf] %v502_v37 }
  0x8a   : > { %505 = vst [vmem:[%s3649_s7 + $0x298] sm:$0xf] %v504_v38  ;;  %v506_v39 = vld [vmem:[%s3645_s6 + $0x538] sm:$0xf]  ;;  %v508_v40 = vld [vmem:[%s3645_s6 + $0x540] sm:$0xf] }
  0x8b   : > { %v510_v41 = vld [vmem:[%s3645_s6 + $0x548] sm:$0xf]  ;;  %507 = vst [vmem:[%s3649_s7 + $0x29c] sm:$0xf] %v506_v39  ;;  %509 = vst [vmem:[%s3649_s7 + $0x2a0] sm:$0xf] %v508_v40 }
  0x8c   : > { %511 = vst [vmem:[%s3649_s7 + $0x2a4] sm:$0xf] %v510_v41  ;;  %v512_v42 = vld [vmem:[%s3645_s6 + $0x550] sm:$0xf]  ;;  %v514_v43 = vld [vmem:[%s3645_s6 + $0x558] sm:$0xf] }
  0x8d   : > { %v516_v44 = vld [vmem:[%s3645_s6 + $0x560] sm:$0xf]  ;;  %513 = vst [vmem:[%s3649_s7 + $0x2a8] sm:$0xf] %v512_v42  ;;  %515 = vst [vmem:[%s3649_s7 + $0x2ac] sm:$0xf] %v514_v43 }
  0x8e   : > { %517 = vst [vmem:[%s3649_s7 + $0x2b0] sm:$0xf] %v516_v44  ;;  %v518_v45 = vld [vmem:[%s3645_s6 + $0x568] sm:$0xf]  ;;  %v520_v46 = vld [vmem:[%s3645_s6 + $0x570] sm:$0xf] }
  0x8f   : > { %v522_v47 = vld [vmem:[%s3645_s6 + $0x578] sm:$0xf]  ;;  %519 = vst [vmem:[%s3649_s7 + $0x2b4] sm:$0xf] %v518_v45  ;;  %521 = vst [vmem:[%s3649_s7 + $0x2b8] sm:$0xf] %v520_v46 }
  0x90   : > { %523 = vst [vmem:[%s3649_s7 + $0x2bc] sm:$0xf] %v522_v47  ;;  %v524_v48 = vld [vmem:[%s3645_s6 + $0x580] sm:$0xf]  ;;  %v526_v49 = vld [vmem:[%s3645_s6 + $0x588] sm:$0xf] }
  0x91   : > { %v528_v50 = vld [vmem:[%s3645_s6 + $0x590] sm:$0xf]  ;;  %525 = vst [vmem:[%s3649_s7 + $0x2c0] sm:$0xf] %v524_v48  ;;  %527 = vst [vmem:[%s3649_s7 + $0x2c4] sm:$0xf] %v526_v49 }
  0x92   : > { %529 = vst [vmem:[%s3649_s7 + $0x2c8] sm:$0xf] %v528_v50  ;;  %v530_v51 = vld [vmem:[%s3645_s6 + $0x598] sm:$0xf]  ;;  %v532_v52 = vld [vmem:[%s3645_s6 + $0x5a0] sm:$0xf] }
  0x93   : > { %v534_v53 = vld [vmem:[%s3645_s6 + $0x5a8] sm:$0xf]  ;;  %531 = vst [vmem:[%s3649_s7 + $0x2cc] sm:$0xf] %v530_v51  ;;  %533 = vst [vmem:[%s3649_s7 + $0x2d0] sm:$0xf] %v532_v52 }
  0x94   : > { %535 = vst [vmem:[%s3649_s7 + $0x2d4] sm:$0xf] %v534_v53  ;;  %v536_v54 = vld [vmem:[%s3645_s6 + $0x5b0] sm:$0xf]  ;;  %v538_v55 = vld [vmem:[%s3645_s6 + $0x5b8] sm:$0xf] }
  0x95   : > { %v540_v56 = vld [vmem:[%s3645_s6 + $0x5c0] sm:$0xf]  ;;  %537 = vst [vmem:[%s3649_s7 + $0x2d8] sm:$0xf] %v536_v54  ;;  %539 = vst [vmem:[%s3649_s7 + $0x2dc] sm:$0xf] %v538_v55 }
  0x96   : > { %541 = vst [vmem:[%s3649_s7 + $0x2e0] sm:$0xf] %v540_v56  ;;  %v542_v57 = vld [vmem:[%s3645_s6 + $0x5c8] sm:$0xf]  ;;  %v544_v58 = vld [vmem:[%s3645_s6 + $0x5d0] sm:$0xf] }
  0x97   : > { %v546_v59 = vld [vmem:[%s3645_s6 + $0x5d8] sm:$0xf]  ;;  %543 = vst [vmem:[%s3649_s7 + $0x2e4] sm:$0xf] %v542_v57  ;;  %545 = vst [vmem:[%s3649_s7 + $0x2e8] sm:$0xf] %v544_v58 }
  0x98   : > { %547 = vst [vmem:[%s3649_s7 + $0x2ec] sm:$0xf] %v546_v59  ;;  %v548_v60 = vld [vmem:[%s3645_s6 + $0x5e0] sm:$0xf]  ;;  %v550_v61 = vld [vmem:[%s3645_s6 + $0x5e8] sm:$0xf] }
  0x99   : > { %v552_v62 = vld [vmem:[%s3645_s6 + $0x5f0] sm:$0xf]  ;;  %549 = vst [vmem:[%s3649_s7 + $0x2f0] sm:$0xf] %v548_v60  ;;  %551 = vst [vmem:[%s3649_s7 + $0x2f4] sm:$0xf] %v550_v61 }
  0x9a   : > { %553 = vst [vmem:[%s3649_s7 + $0x2f8] sm:$0xf] %v552_v62  ;;  %v554_v63 = vld [vmem:[%s3645_s6 + $0x5f8] sm:$0xf]  ;;  %v556_v0 = vld [vmem:[%s3645_s6 + $0x600] sm:$0xf] }
  0x9b   : > { %v558_v1 = vld [vmem:[%s3645_s6 + $0x608] sm:$0xf]  ;;  %555 = vst [vmem:[%s3649_s7 + $0x2fc] sm:$0xf] %v554_v63  ;;  %557 = vst [vmem:[%s3649_s7 + $0x300] sm:$0xf] %v556_v0 }
  0x9c   : > { %559 = vst [vmem:[%s3649_s7 + $0x304] sm:$0xf] %v558_v1  ;;  %v560_v2 = vld [vmem:[%s3645_s6 + $0x610] sm:$0xf]  ;;  %v562_v3 = vld [vmem:[%s3645_s6 + $0x618] sm:$0xf] }
  0x9d   : > { %v564_v4 = vld [vmem:[%s3645_s6 + $0x620] sm:$0xf]  ;;  %561 = vst [vmem:[%s3649_s7 + $0x308] sm:$0xf] %v560_v2  ;;  %563 = vst [vmem:[%s3649_s7 + $0x30c] sm:$0xf] %v562_v3 }
  0x9e   : > { %565 = vst [vmem:[%s3649_s7 + $0x310] sm:$0xf] %v564_v4  ;;  %v566_v5 = vld [vmem:[%s3645_s6 + $0x628] sm:$0xf]  ;;  %v568_v6 = vld [vmem:[%s3645_s6 + $0x630] sm:$0xf] }
  0x9f   : > { %v570_v7 = vld [vmem:[%s3645_s6 + $0x638] sm:$0xf]  ;;  %567 = vst [vmem:[%s3649_s7 + $0x314] sm:$0xf] %v566_v5  ;;  %569 = vst [vmem:[%s3649_s7 + $0x318] sm:$0xf] %v568_v6 }
  0xa0   : > { %571 = vst [vmem:[%s3649_s7 + $0x31c] sm:$0xf] %v570_v7  ;;  %v572_v8 = vld [vmem:[%s3645_s6 + $0x640] sm:$0xf]  ;;  %v574_v9 = vld [vmem:[%s3645_s6 + $0x648] sm:$0xf] }
  0xa1   : > { %v576_v10 = vld [vmem:[%s3645_s6 + $0x650] sm:$0xf]  ;;  %573 = vst [vmem:[%s3649_s7 + $0x320] sm:$0xf] %v572_v8  ;;  %575 = vst [vmem:[%s3649_s7 + $0x324] sm:$0xf] %v574_v9 }
  0xa2   : > { %577 = vst [vmem:[%s3649_s7 + $0x328] sm:$0xf] %v576_v10  ;;  %v578_v11 = vld [vmem:[%s3645_s6 + $0x658] sm:$0xf]  ;;  %v580_v12 = vld [vmem:[%s3645_s6 + $0x660] sm:$0xf] }
  0xa3   : > { %v582_v13 = vld [vmem:[%s3645_s6 + $0x668] sm:$0xf]  ;;  %579 = vst [vmem:[%s3649_s7 + $0x32c] sm:$0xf] %v578_v11  ;;  %581 = vst [vmem:[%s3649_s7 + $0x330] sm:$0xf] %v580_v12 }
  0xa4   : > { %583 = vst [vmem:[%s3649_s7 + $0x334] sm:$0xf] %v582_v13  ;;  %v584_v14 = vld [vmem:[%s3645_s6 + $0x670] sm:$0xf]  ;;  %v586_v15 = vld [vmem:[%s3645_s6 + $0x678] sm:$0xf] }
  0xa5   : > { %v588_v16 = vld [vmem:[%s3645_s6 + $0x680] sm:$0xf]  ;;  %585 = vst [vmem:[%s3649_s7 + $0x338] sm:$0xf] %v584_v14  ;;  %587 = vst [vmem:[%s3649_s7 + $0x33c] sm:$0xf] %v586_v15 }
  0xa6   : > { %589 = vst [vmem:[%s3649_s7 + $0x340] sm:$0xf] %v588_v16  ;;  %v590_v17 = vld [vmem:[%s3645_s6 + $0x688] sm:$0xf]  ;;  %v592_v18 = vld [vmem:[%s3645_s6 + $0x690] sm:$0xf] }
  0xa7   : > { %v594_v19 = vld [vmem:[%s3645_s6 + $0x698] sm:$0xf]  ;;  %591 = vst [vmem:[%s3649_s7 + $0x344] sm:$0xf] %v590_v17  ;;  %593 = vst [vmem:[%s3649_s7 + $0x348] sm:$0xf] %v592_v18 }
  0xa8   : > { %595 = vst [vmem:[%s3649_s7 + $0x34c] sm:$0xf] %v594_v19  ;;  %v596_v20 = vld [vmem:[%s3645_s6 + $0x6a0] sm:$0xf]  ;;  %v598_v21 = vld [vmem:[%s3645_s6 + $0x6a8] sm:$0xf] }
  0xa9   : > { %v600_v22 = vld [vmem:[%s3645_s6 + $0x6b0] sm:$0xf]  ;;  %597 = vst [vmem:[%s3649_s7 + $0x350] sm:$0xf] %v596_v20  ;;  %599 = vst [vmem:[%s3649_s7 + $0x354] sm:$0xf] %v598_v21 }
  0xaa   : > { %601 = vst [vmem:[%s3649_s7 + $0x358] sm:$0xf] %v600_v22  ;;  %v602_v23 = vld [vmem:[%s3645_s6 + $0x6b8] sm:$0xf]  ;;  %v604_v24 = vld [vmem:[%s3645_s6 + $0x6c0] sm:$0xf] }
  0xab   : > { %v606_v25 = vld [vmem:[%s3645_s6 + $0x6c8] sm:$0xf]  ;;  %603 = vst [vmem:[%s3649_s7 + $0x35c] sm:$0xf] %v602_v23  ;;  %605 = vst [vmem:[%s3649_s7 + $0x360] sm:$0xf] %v604_v24 }
  0xac   : > { %607 = vst [vmem:[%s3649_s7 + $0x364] sm:$0xf] %v606_v25  ;;  %v608_v26 = vld [vmem:[%s3645_s6 + $0x6d0] sm:$0xf]  ;;  %v610_v27 = vld [vmem:[%s3645_s6 + $0x6d8] sm:$0xf] }
  0xad   : > { %v612_v28 = vld [vmem:[%s3645_s6 + $0x6e0] sm:$0xf]  ;;  %609 = vst [vmem:[%s3649_s7 + $0x368] sm:$0xf] %v608_v26  ;;  %611 = vst [vmem:[%s3649_s7 + $0x36c] sm:$0xf] %v610_v27 }
  0xae   : > { %613 = vst [vmem:[%s3649_s7 + $0x370] sm:$0xf] %v612_v28  ;;  %v614_v29 = vld [vmem:[%s3645_s6 + $0x6e8] sm:$0xf]  ;;  %v616_v30 = vld [vmem:[%s3645_s6 + $0x6f0] sm:$0xf] }
  0xaf   : > { %v618_v31 = vld [vmem:[%s3645_s6 + $0x6f8] sm:$0xf]  ;;  %615 = vst [vmem:[%s3649_s7 + $0x374] sm:$0xf] %v614_v29  ;;  %617 = vst [vmem:[%s3649_s7 + $0x378] sm:$0xf] %v616_v30 }
  0xb0   : > { %619 = vst [vmem:[%s3649_s7 + $0x37c] sm:$0xf] %v618_v31  ;;  %v620_v32 = vld [vmem:[%s3645_s6 + $0x700] sm:$0xf]  ;;  %v622_v33 = vld [vmem:[%s3645_s6 + $0x708] sm:$0xf] }
  0xb1   : > { %v624_v34 = vld [vmem:[%s3645_s6 + $0x710] sm:$0xf]  ;;  %621 = vst [vmem:[%s3649_s7 + $0x380] sm:$0xf] %v620_v32  ;;  %623 = vst [vmem:[%s3649_s7 + $0x384] sm:$0xf] %v622_v33 }
  0xb2   : > { %625 = vst [vmem:[%s3649_s7 + $0x388] sm:$0xf] %v624_v34  ;;  %v626_v35 = vld [vmem:[%s3645_s6 + $0x718] sm:$0xf]  ;;  %v628_v36 = vld [vmem:[%s3645_s6 + $0x720] sm:$0xf] }
  0xb3   : > { %v630_v37 = vld [vmem:[%s3645_s6 + $0x728] sm:$0xf]  ;;  %627 = vst [vmem:[%s3649_s7 + $0x38c] sm:$0xf] %v626_v35  ;;  %629 = vst [vmem:[%s3649_s7 + $0x390] sm:$0xf] %v628_v36 }
  0xb4   : > { %631 = vst [vmem:[%s3649_s7 + $0x394] sm:$0xf] %v630_v37  ;;  %v632_v38 = vld [vmem:[%s3645_s6 + $0x730] sm:$0xf]  ;;  %v634_v39 = vld [vmem:[%s3645_s6 + $0x738] sm:$0xf] }
  0xb5   : > { %v636_v40 = vld [vmem:[%s3645_s6 + $0x740] sm:$0xf]  ;;  %633 = vst [vmem:[%s3649_s7 + $0x398] sm:$0xf] %v632_v38  ;;  %635 = vst [vmem:[%s3649_s7 + $0x39c] sm:$0xf] %v634_v39 }
  0xb6   : > { %637 = vst [vmem:[%s3649_s7 + $0x3a0] sm:$0xf] %v636_v40  ;;  %v638_v41 = vld [vmem:[%s3645_s6 + $0x748] sm:$0xf]  ;;  %v640_v42 = vld [vmem:[%s3645_s6 + $0x750] sm:$0xf] }
  0xb7   : > { %v642_v43 = vld [vmem:[%s3645_s6 + $0x758] sm:$0xf]  ;;  %639 = vst [vmem:[%s3649_s7 + $0x3a4] sm:$0xf] %v638_v41  ;;  %641 = vst [vmem:[%s3649_s7 + $0x3a8] sm:$0xf] %v640_v42 }
  0xb8   : > { %643 = vst [vmem:[%s3649_s7 + $0x3ac] sm:$0xf] %v642_v43  ;;  %v644_v44 = vld [vmem:[%s3645_s6 + $0x760] sm:$0xf]  ;;  %v646_v45 = vld [vmem:[%s3645_s6 + $0x768] sm:$0xf] }
  0xb9   : > { %v648_v46 = vld [vmem:[%s3645_s6 + $0x770] sm:$0xf]  ;;  %645 = vst [vmem:[%s3649_s7 + $0x3b0] sm:$0xf] %v644_v44  ;;  %647 = vst [vmem:[%s3649_s7 + $0x3b4] sm:$0xf] %v646_v45 }
  0xba   : > { %649 = vst [vmem:[%s3649_s7 + $0x3b8] sm:$0xf] %v648_v46  ;;  %v650_v47 = vld [vmem:[%s3645_s6 + $0x778] sm:$0xf]  ;;  %v652_v48 = vld [vmem:[%s3645_s6 + $0x780] sm:$0xf] }
  0xbb   : > { %v654_v49 = vld [vmem:[%s3645_s6 + $0x788] sm:$0xf]  ;;  %651 = vst [vmem:[%s3649_s7 + $0x3bc] sm:$0xf] %v650_v47  ;;  %653 = vst [vmem:[%s3649_s7 + $0x3c0] sm:$0xf] %v652_v48 }
  0xbc   : > { %655 = vst [vmem:[%s3649_s7 + $0x3c4] sm:$0xf] %v654_v49  ;;  %v656_v50 = vld [vmem:[%s3645_s6 + $0x790] sm:$0xf]  ;;  %v658_v51 = vld [vmem:[%s3645_s6 + $0x798] sm:$0xf] }
  0xbd   : > { %v660_v52 = vld [vmem:[%s3645_s6 + $0x7a0] sm:$0xf]  ;;  %657 = vst [vmem:[%s3649_s7 + $0x3c8] sm:$0xf] %v656_v50  ;;  %659 = vst [vmem:[%s3649_s7 + $0x3cc] sm:$0xf] %v658_v51 }
  0xbe   : > { %661 = vst [vmem:[%s3649_s7 + $0x3d0] sm:$0xf] %v660_v52  ;;  %v662_v53 = vld [vmem:[%s3645_s6 + $0x7a8] sm:$0xf]  ;;  %v664_v54 = vld [vmem:[%s3645_s6 + $0x7b0] sm:$0xf] }
  0xbf   : > { %v666_v55 = vld [vmem:[%s3645_s6 + $0x7b8] sm:$0xf]  ;;  %663 = vst [vmem:[%s3649_s7 + $0x3d4] sm:$0xf] %v662_v53  ;;  %665 = vst [vmem:[%s3649_s7 + $0x3d8] sm:$0xf] %v664_v54 }
  0xc0   : > { %667 = vst [vmem:[%s3649_s7 + $0x3dc] sm:$0xf] %v666_v55  ;;  %v668_v56 = vld [vmem:[%s3645_s6 + $0x7c0] sm:$0xf]  ;;  %v670_v57 = vld [vmem:[%s3645_s6 + $0x7c8] sm:$0xf] }
  0xc1   : > { %v672_v58 = vld [vmem:[%s3645_s6 + $0x7d0] sm:$0xf]  ;;  %669 = vst [vmem:[%s3649_s7 + $0x3e0] sm:$0xf] %v668_v56  ;;  %671 = vst [vmem:[%s3649_s7 + $0x3e4] sm:$0xf] %v670_v57 }
  0xc2   : > { %673 = vst [vmem:[%s3649_s7 + $0x3e8] sm:$0xf] %v672_v58  ;;  %v674_v59 = vld [vmem:[%s3645_s6 + $0x7d8] sm:$0xf]  ;;  %v676_v60 = vld [vmem:[%s3645_s6 + $0x7e0] sm:$0xf] }
  0xc3   : > { %v678_v61 = vld [vmem:[%s3645_s6 + $0x7e8] sm:$0xf]  ;;  %675 = vst [vmem:[%s3649_s7 + $0x3ec] sm:$0xf] %v674_v59  ;;  %677 = vst [vmem:[%s3649_s7 + $0x3f0] sm:$0xf] %v676_v60 }
  0xc4   : > { %679 = vst [vmem:[%s3649_s7 + $0x3f4] sm:$0xf] %v678_v61  ;;  %v680_v62 = vld [vmem:[%s3645_s6 + $0x7f0] sm:$0xf]  ;;  %v682_v63 = vld [vmem:[%s3645_s6 + $0x7f8] sm:$0xf] }
  0xc5   : > { %681 = vst [vmem:[%s3649_s7 + $0x3f8] sm:$0xf] %v680_v62  ;;  %683 = vst [vmem:[%s3649_s7 + $0x3fc] sm:$0xf] %v682_v63 }
  0xc6 PF: > { %p2933_p11 = scmp.ge.s32.totalorder %s3548_s17, 1  ;;  %p1217_p12 = scmp.lt.s32.totalorder %s3548_s17, 5 }
  0xc8   : > { %p1218_p13 = pnand %p2933_p11, %p1217_p12 }
  0xc9   : > { %s1224_s8 = sand.u32 (!%p1218_p13), 1, %s3524_s11   ;;  %s2936_s11 = sshll.u32 (!%p1218_p13), %s3536_s14, 1 }
  0xca   : > { %1221 = sbr.rel (%p1218_p13) target bundleno = 620 (0x26c), region = 65  ;;  %s2934_s18 = sshll.u32 (!%p1218_p13), %s1224_s8, 10 }
  0xcb   : > { %s4164_s21 = scalar_lea.vmem (!%p1218_p13), [#allocation3], %s2934_s18  ;;  %p1256_p0 = scmp.lt.s32.totalorder (!%p1218_p13), %s2936_s11, 3 }
  0xcc   : > { %v3348_v0 = vld [vmem:[%s4164_s21 + $0x40] sm:$0xff] (!%p1218_p13)   ;;  %v3352_v4 = vld [vmem:[%s4164_s21 + $0x48] sm:$0xff] (!%p1218_p13)   ;;  %v3356_v8 = vld [vmem:[%s4164_s21 + $0x50] sm:$0xff] (!%p1218_p13)   ;;  %s1251_s29 = sand.u32 (!%p1218_p13), 1, %s3516_s9  }
  0xcd   : > { %v3349_v1 = vld [vmem:[%s4164_s21 + $0xc0] sm:$0xff] (!%p1218_p13)   ;;  %3100 = vmatprep.subr.bf16.mxu0 (!%p1218_p13), %v3348_v0  ;;  %v3353_v5 = vld [vmem:[%s4164_s21 + $0xc8] sm:$0xff] (!%p1218_p13)   ;;  %v3357_v9 = vld [vmem:[%s4164_s21 + $0xd0] sm:$0xff] (!%p1218_p13)   ;;  %s2935_s30 = sshll.u32 (!%p1218_p13), %s1251_s29, 3 }
  0xce   : > { %v3350_v2 = vld [vmem:[%s4164_s21] sm:$0xff] (!%p1218_p13)   ;;  %3122 = vmatprep.subr.bf16.mxu1 (!%p1218_p13), %v3349_v1  ;;  %v3354_v6 = vld [vmem:[%s4164_s21 + $0x8] sm:$0xff] (!%p1218_p13)   ;;  %v3358_v10 = vld [vmem:[%s4164_s21 + $0x10] sm:$0xff] (!%p1218_p13)   ;;  %s1253_s3 = scalar_lea.vmem (!%p1218_p13), [#allocation4], %s2935_s30 }
  0xcf   : > { %v3351_v3 = vld [vmem:[%s4164_s21 + $0x80] sm:$0xff] (!%p1218_p13)   ;;  %3101 = vmatpush3.bf16.msra.mxu0 (!%p1218_p13), %v3350_v2  ;;  %v3355_v7 = vld [vmem:[%s4164_s21 + $0x88] sm:$0xff] (!%p1218_p13)   ;;  %v3359_v11 = vld [vmem:[%s4164_s21 + $0x90] sm:$0xff] (!%p1218_p13)  }
  0xd0   : > { %3123 = vmatpush3.bf16.msra.mxu1 (!%p1218_p13), %v3351_v3  ;;  %3102 = vmatprep.subr.bf16.mxu0 (!%p1218_p13), %v3352_v4  ;;  %v3360_v12 = vld [vmem:[%s4164_s21 + $0x58] sm:$0xff] (!%p1218_p13)   ;;  %v3364_v16 = vld [vmem:[%s4164_s21 + $0x60] sm:$0xff] (!%p1218_p13)   ;;  %v3368_v20 = vld [vmem:[%s4164_s21 + $0x68] sm:$0xff] (!%p1218_p13)  }
  0xd1   : > { %3124 = vmatprep.subr.bf16.mxu1 %v3353_v5  ;;  %v3361_v13 = vld [vmem:[%s4164_s21 + $0xd8] sm:$0xff]   ;;  %v3365_v17 = vld [vmem:[%s4164_s21 + $0xe0] sm:$0xff]   ;;  %v3369_v21 = vld [vmem:[%s4164_s21 + $0xe8] sm:$0xff]   ;;  %s4370_s11 = smov (!%p1256_p0, %s2936_s11), 3  ;;  %s3094_s4 = sshll.u32 (%p3632_p9), %s3536_s14, 2 }
  0xd2   : > { %v3362_v14 = vld [vmem:[%s4164_s21 + $0x18] sm:$0xff]   ;;  %v3366_v18 = vld [vmem:[%s4164_s21 + $0x20] sm:$0xff]   ;;  %v3370_v22 = vld [vmem:[%s4164_s21 + $0x28] sm:$0xff]   ;;  %s3091_s22 = sshll.u32 %s4370_s11, 6  ;;  %s2788_s9 = sadd.s32 (%p3632_p9), %s3532_s13, %s3094_s4 }
  0xd3   : > { %3103 = vmatpush3.bf16.msra.mxu0 %v3354_v6  ;;  %v3363_v15 = vld [vmem:[%s4164_s21 + $0x98] sm:$0xff]   ;;  %v3367_v19 = vld [vmem:[%s4164_s21 + $0xa0] sm:$0xff]   ;;  %v3371_v23 = vld [vmem:[%s4164_s21 + $0xa8] sm:$0xff]   ;;  %s4200_s26 = scalar_lea.vmem %s4351_s0, %s3091_s22  ;;  %s3088_s5 = sshll.u32 (%p3632_p9), %s2788_s9, 2 }
  0xd4   : > { %3125 = vmatpush3.bf16.msra.mxu1 %v3355_v7  ;;  %3104 = vmatprep.subr.bf16.mxu0 %v3356_v8  ;;  %v3372_v24 = vld [vmem:[%s4164_s21 + $0x70] sm:$0xff]   ;;  %v3376_v28 = vld [vmem:[%s4164_s21 + $0x78] sm:$0xff]   ;;  %v1269_v32 = vld [vmem:[%s4200_s26] sm:$0xff]  ;;  %s2790_s8 = scalar_lea.vmem (%p3632_p9), %s4353_s2, %s3088_s5 }
  0xd5   : > { %3126 = vmatprep.subr.bf16.mxu1 %v3357_v9  ;;  %v3373_v25 = vld [vmem:[%s4164_s21 + $0xf0] sm:$0xff]   ;;  %v3377_v29 = vld [vmem:[%s4164_s21 + $0xf8] sm:$0xff]   ;;  %v1277_v33 = vld [vmem:[%s4200_s26 + $0x40] sm:$0xff] }
  0xd6   : > { %v3374_v26 = vld [vmem:[%s4164_s21 + $0x30] sm:$0xff]   ;;  %v3378_v30 = vld [vmem:[%s4164_s21 + $0x38] sm:$0xff]   ;;  %v1270_v34 = vld [vmem:[%s4200_s26 + $0x8] sm:$0xff]  ;;  %v2939_v35 = vcombine.low %v1269_v32, %v1277_v33  ;;  %v2940_v36 = vcombine.high %v1269_v32, %v1277_v33 }
  0xd7   : > { %3105 = vmatpush3.bf16.msra.mxu0 %v3358_v10  ;;  %v3375_v27 = vld [vmem:[%s4164_s21 + $0xb0] sm:$0xff]   ;;  %v3379_v31 = vld [vmem:[%s4164_s21 + $0xb8] sm:$0xff]   ;;  %v1278_v37 = vld [vmem:[%s4200_s26 + $0x48] sm:$0xff] }
  0xd8   : > { %3127 = vmatpush3.bf16.msra.mxu1 %v3359_v11  ;;  %3106 = vmatprep.subr.bf16.mxu0 %v3360_v12  ;;  %v2941_v38 = vcombine.low %v1270_v34, %v1278_v37  ;;  %v2942_v39 = vcombine.high %v1270_v34, %v1278_v37  ;;  %v3380_v40 = vld [vmem:[%s4164_s21 + $0x140] sm:$0xff]   ;;  %v3384_v44 = vld [vmem:[%s4164_s21 + $0x148] sm:$0xff]   ;;  %v3388_v48 = vld [vmem:[%s4164_s21 + $0x150] sm:$0xff]  }
  0xd9   : > { %3128 = vmatprep.subr.bf16.mxu1 %v3361_v13  ;;  %2421 = vmatprep.mubr.bf16.mxu0 %v2940_v36  ;;  %v3381_v41 = vld [vmem:[%s4164_s21 + $0x1c0] sm:$0xff]   ;;  %v3385_v45 = vld [vmem:[%s4164_s21 + $0x1c8] sm:$0xff]   ;;  %v3389_v49 = vld [vmem:[%s4164_s21 + $0x1d0] sm:$0xff]  }
  0xda   : > { %2462 = vmatprep.mubr.bf16.mxu1 %v2942_v39  ;;  %v3382_v42 = vld [vmem:[%s4164_s21 + $0x100] sm:$0xff]   ;;  %v3386_v46 = vld [vmem:[%s4164_s21 + $0x108] sm:$0xff]   ;;  %v3390_v50 = vld [vmem:[%s4164_s21 + $0x110] sm:$0xff]  }
  0xdb   : > { %3107 = vmatpush3.bf16.msra.mxu0 %v3362_v14  ;;  %v3383_v43 = vld [vmem:[%s4164_s21 + $0x180] sm:$0xff]   ;;  %v3387_v47 = vld [vmem:[%s4164_s21 + $0x188] sm:$0xff]   ;;  %v3391_v51 = vld [vmem:[%s4164_s21 + $0x190] sm:$0xff]  }
  0xdc   : > { %3129 = vmatpush3.bf16.msra.mxu1 %v3363_v15  ;;  %3108 = vmatprep.subr.bf16.mxu0 %v3364_v16  ;;  %v3392_v52 = vld [vmem:[%s4164_s21 + $0x158] sm:$0xff]   ;;  %v3396_v56 = vld [vmem:[%s4164_s21 + $0x160] sm:$0xff]   ;;  %v3400_v60 = vld [vmem:[%s4164_s21 + $0x168] sm:$0xff]  }
  0xdd   : > { %3130 = vmatprep.subr.bf16.mxu1 %v3365_v17  ;;  %v3393_v53 = vld [vmem:[%s4164_s21 + $0x1d8] sm:$0xff]   ;;  %v3397_v57 = vld [vmem:[%s4164_s21 + $0x1e0] sm:$0xff]   ;;  %v3401_v61 = vld [vmem:[%s4164_s21 + $0x1e8] sm:$0xff]  }
  0xde   : > { %v3394_v54 = vld [vmem:[%s4164_s21 + $0x118] sm:$0xff]   ;;  %v3398_v58 = vld [vmem:[%s4164_s21 + $0x120] sm:$0xff]   ;;  %v3402_v62 = vld [vmem:[%s4164_s21 + $0x128] sm:$0xff]  }
  0xdf   : > { %3109 = vmatpush3.bf16.msra.mxu0 %v3366_v18  ;;  %v3395_v55 = vld [vmem:[%s4164_s21 + $0x198] sm:$0xff]   ;;  %v3399_v59 = vld [vmem:[%s4164_s21 + $0x1a0] sm:$0xff]   ;;  %v3403_v63 = vld [vmem:[%s4164_s21 + $0x1a8] sm:$0xff]  }
  0xe0   : > { %3131 = vmatpush3.bf16.msra.mxu1 %v3367_v19  ;;  %3110 = vmatprep.subr.bf16.mxu0 %v3368_v20  ;;  %v3404_v0 = vld [vmem:[%s4164_s21 + $0x170] sm:$0xff]   ;;  %v3408_v4 = vld [vmem:[%s4164_s21 + $0x178] sm:$0xff]   ;;  %v3412_v16 = vld [vmem:[%s4164_s21 + $0x240] sm:$0xff]  }
  0xe1   : > { %3132 = vmatprep.subr.bf16.mxu1 %v3369_v21  ;;  %v3405_v1 = vld [vmem:[%s4164_s21 + $0x1f0] sm:$0xff]   ;;  %v3409_v5 = vld [vmem:[%s4164_s21 + $0x1f8] sm:$0xff]   ;;  %v3413_v17 = vld [vmem:[%s4164_s21 + $0x2c0] sm:$0xff]  }
  0xe2   : > { %v3406_v2 = vld [vmem:[%s4164_s21 + $0x130] sm:$0xff]   ;;  %v3410_v6 = vld [vmem:[%s4164_s21 + $0x138] sm:$0xff]   ;;  %v3414_v18 = vld [vmem:[%s4164_s21 + $0x200] sm:$0xff]  }
  0xe3   : > { %3111 = vmatpush3.bf16.msra.mxu0 %v3370_v22  ;;  %v3407_v3 = vld [vmem:[%s4164_s21 + $0x1b0] sm:$0xff]   ;;  %v3411_v7 = vld [vmem:[%s4164_s21 + $0x1b8] sm:$0xff]   ;;  %v3415_v19 = vld [vmem:[%s4164_s21 + $0x280] sm:$0xff]  }
  0xe4   : > { %3133 = vmatpush3.bf16.msra.mxu1 %v3371_v23  ;;  %3112 = vmatprep.subr.bf16.mxu0 %v3372_v24  ;;  %v1271_v8 = vld [vmem:[%s4200_s26 + $0x10] sm:$0xff]  ;;  %v1272_v12 = vld [vmem:[%s4200_s26 + $0x18] sm:$0xff]  ;;  %v3416_v20 = vld [vmem:[%s4164_s21 + $0x248] sm:$0xff]  }
  0xe5   : > { %3134 = vmatprep.subr.bf16.mxu1 %v3373_v25  ;;  %v1279_v9 = vld [vmem:[%s4200_s26 + $0x50] sm:$0xff]  ;;  %v1280_v13 = vld [vmem:[%s4200_s26 + $0x58] sm:$0xff]  ;;  %v3417_v21 = vld [vmem:[%s4164_s21 + $0x2c8] sm:$0xff]  }
  0xe6   : > { %v2943_v10 = vcombine.low %v1271_v8, %v1279_v9  ;;  %v2944_v11 = vcombine.high %v1271_v8, %v1279_v9  ;;  %v2945_v14 = vcombine.low %v1272_v12, %v1280_v13  ;;  %v2946_v15 = vcombine.high %v1272_v12, %v1280_v13  ;;  %v3418_v22 = vld [vmem:[%s4164_s21 + $0x208] sm:$0xff]   ;;  %v3420_v24 = vld [vmem:[%s4164_s21 + $0x250] sm:$0xff]   ;;  %v3428_v32 = vld [vmem:[%s4164_s21 + $0x260] sm:$0xff]  }
  0xe7   : > { %3113 = vmatpush3.bf16.msra.mxu0 %v3374_v26  ;;  %v3419_v23 = vld [vmem:[%s4164_s21 + $0x288] sm:$0xff]   ;;  %v3421_v25 = vld [vmem:[%s4164_s21 + $0x2d0] sm:$0xff]   ;;  %v3429_v33 = vld [vmem:[%s4164_s21 + $0x2e0] sm:$0xff]  }
  0xe8   : > { %3135 = vmatpush3.bf16.msra.mxu1 %v3375_v27  ;;  %3114 = vmatprep.subr.bf16.mxu0 %v3376_v28  ;;  %v3422_v26 = vld [vmem:[%s4164_s21 + $0x210] sm:$0xff]   ;;  %v3424_v28 = vld [vmem:[%s4164_s21 + $0x258] sm:$0xff]   ;;  %v3430_v34 = vld [vmem:[%s4164_s21 + $0x220] sm:$0xff]  }
  0xe9   : > { %3136 = vmatprep.subr.bf16.mxu1 %v3377_v29  ;;  %v3423_v27 = vld [vmem:[%s4164_s21 + $0x290] sm:$0xff]   ;;  %v3425_v29 = vld [vmem:[%s4164_s21 + $0x2d8] sm:$0xff]   ;;  %v3432_v36 = vld [vmem:[%s4164_s21 + $0x268] sm:$0xff]  }
  0xea   : > { %v3433_v37 = vld [vmem:[%s4164_s21 + $0x2e8] sm:$0xff]   ;;  %v3460_v8 = vld [vmem:[%s4164_s21 + $0x360] sm:$0xff]  }
  0xeb   : > { %3115 = vmatpush3.bf16.msra.mxu0 %v3378_v30  ;;  %v3426_v30 = vld [vmem:[%s4164_s21 + $0x218] sm:$0xff]   ;;  %v3435_v39 = vld [vmem:[%s4164_s21 + $0x2a8] sm:$0xff]   ;;  %v3461_v9 = vld [vmem:[%s4164_s21 + $0x3e0] sm:$0xff]  }
  0xec   : > { %3137 = vmatpush3.bf16.msra.mxu1 %v3379_v31  ;;  %3144 = vmatprep.subr.bf16.mxu0 %v3380_v40  ;;  %v3427_v31 = vld [vmem:[%s4164_s21 + $0x298] sm:$0xff]   ;;  %v3436_v40 = vld [vmem:[%s4164_s21 + $0x270] sm:$0xff]   ;;  %v3464_v12 = vld [vmem:[%s4164_s21 + $0x368] sm:$0xff]  }
  0xed   : > { %3166 = vmatprep.subr.bf16.mxu1 %v3381_v41  ;;  %v3437_v41 = vld [vmem:[%s4164_s21 + $0x2f0] sm:$0xff]   ;;  %v3465_v13 = vld [vmem:[%s4164_s21 + $0x3e8] sm:$0xff]  }
  0xee   : > { %2422 = vmatmul.mubr.bf16.vlgmr.msra.gmra.mrb[0].mxu0 %v2939_v35  ;;  %v3431_v35 = vld [vmem:[%s4164_s21 + $0x2a0] sm:$0xff]  }
  0xef   : > { %2463 = vmatmul.mubr.bf16.vlgmr.msra.gmra.mrb[0].mxu1 %v2941_v38  ;;  %3145 = vmatpush3.bf16.msra.mxu0 %v3382_v42  ;;  %v3434_v38 = vld [vmem:[%s4164_s21 + $0x228] sm:$0xff]   ;;  %v3438_v42 = vld [vmem:[%s4164_s21 + $0x230] sm:$0xff]  }
  0xf0   : > { %3167 = vmatpush3.bf16.msra.mxu1 %v3383_v43  ;;  %3146 = vmatprep.subr.bf16.mxu0 %v3384_v44  ;;  %v3439_v43 = vld [vmem:[%s4164_s21 + $0x2b0] sm:$0xff]   ;;  %v3440_v44 = vld [vmem:[%s4164_s21 + $0x278] sm:$0xff]  }
  0xf1   : > { %3168 = vmatprep.subr.bf16.mxu1 %v3385_v45  ;;  %2503 = vmatprep.mubr.bf16.mxu0 %v2944_v11  ;;  %v3441_v45 = vld [vmem:[%s4164_s21 + $0x2f8] sm:$0xff]   ;;  %v3463_v11 = vld [vmem:[%s4164_s21 + $0x3a0] sm:$0xff]  }
  0xf2   : > { %2544 = vmatprep.mubr.bf16.mxu1 %v2946_v15  ;;  %v3467_v15 = vld [vmem:[%s4164_s21 + $0x3a8] sm:$0xff]  }
  0xf3   : > { %3147 = vmatpush3.bf16.msra.mxu0 %v3386_v46  ;;  %v3442_v46 = vld [vmem:[%s4164_s21 + $0x238] sm:$0xff]  }
  0xf4   : > { %3169 = vmatpush3.bf16.msra.mxu1 %v3387_v47  ;;  %3148 = vmatprep.subr.bf16.mxu0 %v3388_v48  ;;  %v3443_v47 = vld [vmem:[%s4164_s21 + $0x2b8] sm:$0xff]   ;;  %v1273_v48 = vld [vmem:[%s4200_s26 + $0x20] sm:$0xff] }
  0xf5   : > { %3170 = vmatprep.subr.bf16.mxu1 %v3389_v49  ;;  %v1281_v49 = vld [vmem:[%s4200_s26 + $0x60] sm:$0xff] }
  0xf7   : > { %3149 = vmatpush3.bf16.msra.mxu0 %v3390_v50  ;;  %v1274_v50 = vld [vmem:[%s4200_s26 + $0x28] sm:$0xff] }
  0xf8   : > { %3171 = vmatpush3.bf16.msra.mxu1 %v3391_v51  ;;  %3150 = vmatprep.subr.bf16.mxu0 %v3392_v52  ;;  %v1282_v51 = vld [vmem:[%s4200_s26 + $0x68] sm:$0xff]  ;;  %v2947_v52 = vcombine.low %v1273_v48, %v1281_v49 }
  0xf9   : > { %3172 = vmatprep.subr.bf16.mxu1 %v3393_v53  ;;  %v2948_v53 = vcombine.high %v1273_v48, %v1281_v49 }
  0xfb   : > { %3151 = vmatpush3.bf16.msra.mxu0 %v3394_v54  ;;  %v2949_v54 = vcombine.low %v1274_v50, %v1282_v51 }
  0xfc   : > { %3173 = vmatpush3.bf16.msra.mxu1 %v3395_v55  ;;  %3152 = vmatprep.subr.bf16.mxu0 %v3396_v56  ;;  %v2950_v55 = vcombine.high %v1274_v50, %v1282_v51  ;;  %v3444_v56 = vld [vmem:[%s4164_s21 + $0x340] sm:$0xff]  }
  0xfd   : > { %3174 = vmatprep.subr.bf16.mxu1 %v3397_v57  ;;  %v3445_v57 = vld [vmem:[%s4164_s21 + $0x3c0] sm:$0xff]  }
  0xff   : > { %3153 = vmatpush3.bf16.msra.mxu0 %v3398_v58  ;;  %v3446_v58 = vld [vmem:[%s4164_s21 + $0x300] sm:$0xff]  }
 0x100   : > { %3175 = vmatpush3.bf16.msra.mxu1 %v3399_v59  ;;  %3154 = vmatprep.subr.bf16.mxu0 %v3400_v60  ;;  %v3447_v59 = vld [vmem:[%s4164_s21 + $0x380] sm:$0xff]   ;;  %v3448_v60 = vld [vmem:[%s4164_s21 + $0x348] sm:$0xff]  }
 0x101   : > { %3176 = vmatprep.subr.bf16.mxu1 %v3401_v61  ;;  %v3449_v61 = vld [vmem:[%s4164_s21 + $0x3c8] sm:$0xff]  }
 0x103   : > { %3155 = vmatpush3.bf16.msra.mxu0 %v3402_v62  ;;  %v3450_v62 = vld [vmem:[%s4164_s21 + $0x308] sm:$0xff]  }
 0x104   : > { %3177 = vmatpush3.bf16.msra.mxu1 %v3403_v63  ;;  %3156 = vmatprep.subr.bf16.mxu0 %v3404_v0  ;;  %v3451_v63 = vld [vmem:[%s4164_s21 + $0x388] sm:$0xff]   ;;  %v3452_v0 = vld [vmem:[%s4164_s21 + $0x350] sm:$0xff]  }
 0x105   : > { %3178 = vmatprep.subr.bf16.mxu1 %v3405_v1  ;;  %v3453_v1 = vld [vmem:[%s4164_s21 + $0x3d0] sm:$0xff]  }
 0x107   : > { %3157 = vmatpush3.bf16.msra.mxu0 %v3406_v2  ;;  %v3454_v2 = vld [vmem:[%s4164_s21 + $0x310] sm:$0xff]  }
 0x108   : > { %3179 = vmatpush3.bf16.msra.mxu1 %v3407_v3  ;;  %3158 = vmatprep.subr.bf16.mxu0 %v3408_v4  ;;  %v3455_v3 = vld [vmem:[%s4164_s21 + $0x390] sm:$0xff]   ;;  %v3456_v4 = vld [vmem:[%s4164_s21 + $0x358] sm:$0xff]  }
 0x109   : > { %3180 = vmatprep.subr.bf16.mxu1 %v3409_v5  ;;  %v3457_v5 = vld [vmem:[%s4164_s21 + $0x3d8] sm:$0xff]  }
 0x10b   : > { %3159 = vmatpush3.bf16.msra.mxu0 %v3410_v6  ;;  %v3458_v6 = vld [vmem:[%s4164_s21 + $0x318] sm:$0xff]  }
 0x10c   : > { %3181 = vmatpush3.bf16.msra.mxu1 %v3411_v7  ;;  %3188 = vmatprep.subr.bf16.mxu0 %v3412_v16  ;;  %v3459_v7 = vld [vmem:[%s4164_s21 + $0x398] sm:$0xff]   ;;  %v3468_v16 = vld [vmem:[%s4164_s21 + $0x370] sm:$0xff]  }
 0x10d   : > { %3210 = vmatprep.subr.bf16.mxu1 %v3413_v17  ;;  %v3469_v17 = vld [vmem:[%s4164_s21 + $0x3f0] sm:$0xff]  }
 0x10e   : > { %2504 = vmatmul.mubr.bf16.vlgmr.msra.gmra.mrb[4].mxu0 %v2943_v10  ;;  %v3462_v10 = vld [vmem:[%s4164_s21 + $0x320] sm:$0xff]  }
 0x10f   : > { %2545 = vmatmul.mubr.bf16.vlgmr.msra.gmra.mrb[4].mxu1 %v2945_v14  ;;  %3189 = vmatpush3.bf16.msra.mxu0 %v3414_v18  ;;  %v3466_v14 = vld [vmem:[%s4164_s21 + $0x328] sm:$0xff]   ;;  %v3470_v18 = vld [vmem:[%s4164_s21 + $0x330] sm:$0xff]  }
 0x110   : > { %3211 = vmatpush3.bf16.msra.mxu1 %v3415_v19  ;;  %3190 = vmatprep.subr.bf16.mxu0 %v3416_v20  ;;  %v3471_v19 = vld [vmem:[%s4164_s21 + $0x3b0] sm:$0xff]   ;;  %v3472_v20 = vld [vmem:[%s4164_s21 + $0x378] sm:$0xff]  }
 0x111   : > { %3212 = vmatprep.subr.bf16.mxu1 %v3417_v21  ;;  %2585 = vmatprep.mubr.bf16.mxu0 %v2948_v53  ;;  %v3473_v21 = vld [vmem:[%s4164_s21 + $0x3f8] sm:$0xff]  }
 0x112   : > { %2626 = vmatprep.mubr.bf16.mxu1 %v2950_v55 }
 0x113   : > { %3191 = vmatpush3.bf16.msra.mxu0 %v3418_v22  ;;  %v3474_v22 = vld [vmem:[%s4164_s21 + $0x338] sm:$0xff]  }
 0x114   : > { %3213 = vmatpush3.bf16.msra.mxu1 %v3419_v23  ;;  %3192 = vmatprep.subr.bf16.mxu0 %v3420_v24  ;;  %v3475_v23 = vld [vmem:[%s4164_s21 + $0x3b8] sm:$0xff]   ;;  %v1275_v24 = vld [vmem:[%s4200_s26 + $0x30] sm:$0xff] }
 0x115   : > { %3214 = vmatprep.subr.bf16.mxu1 %v3421_v25  ;;  %v1283_v25 = vld [vmem:[%s4200_s26 + $0x70] sm:$0xff] }
 0x117   : > { %3193 = vmatpush3.bf16.msra.mxu0 %v3422_v26  ;;  %v1276_v26 = vld [vmem:[%s4200_s26 + $0x38] sm:$0xff] }
 0x118   : > { %3215 = vmatpush3.bf16.msra.mxu1 %v3423_v27  ;;  %3194 = vmatprep.subr.bf16.mxu0 %v3424_v28  ;;  %v2951_v27 = vcombine.low %v1275_v24, %v1283_v25  ;;  %v2952_v28 = vcombine.high %v1275_v24, %v1283_v25 }
 0x119   : > { %3216 = vmatprep.subr.bf16.mxu1 %v3425_v29  ;;  %v1284_v29 = vld [vmem:[%s4200_s26 + $0x78] sm:$0xff] }
 0x11b   : > { %3195 = vmatpush3.bf16.msra.mxu0 %v3426_v30  ;;  %v2953_v30 = vcombine.low %v1276_v26, %v1284_v29 }
 0x11c   : > { %3217 = vmatpush3.bf16.msra.mxu1 %v3427_v31  ;;  %3196 = vmatprep.subr.bf16.mxu0 %v3428_v32  ;;  %v2954_v31 = vcombine.high %v1276_v26, %v1284_v29 }
 0x11d   : > { %3218 = vmatprep.subr.bf16.mxu1 %v3429_v33 }
 0x11f   : > { %3197 = vmatpush3.bf16.msra.mxu0 %v3430_v34 }
 0x120   : > { %3219 = vmatpush3.bf16.msra.mxu1 %v3431_v35  ;;  %3198 = vmatprep.subr.bf16.mxu0 %v3432_v36 }
 0x121   : > { %3220 = vmatprep.subr.bf16.mxu1 %v3433_v37 }
 0x123   : > { %3199 = vmatpush3.bf16.msra.mxu0 %v3434_v38 }
 0x124   : > { %3221 = vmatpush3.bf16.msra.mxu1 %v3435_v39  ;;  %3200 = vmatprep.subr.bf16.mxu0 %v3436_v40 }
 0x125   : > { %3222 = vmatprep.subr.bf16.mxu1 %v3437_v41 }
 0x127   : > { %3201 = vmatpush3.bf16.msra.mxu0 %v3438_v42 }
 0x128   : > { %3223 = vmatpush3.bf16.msra.mxu1 %v3439_v43  ;;  %3202 = vmatprep.subr.bf16.mxu0 %v3440_v44 }
 0x129   : > { %3224 = vmatprep.subr.bf16.mxu1 %v3441_v45 }
 0x12b   : > { %3203 = vmatpush3.bf16.msra.mxu0 %v3442_v46 }
 0x12c   : > { %3225 = vmatpush3.bf16.msra.mxu1 %v3443_v47  ;;  %3232 = vmatprep.subr.bf16.mxu0 %v3444_v56 }
 0x12d   : > { %3254 = vmatprep.subr.bf16.mxu1 %v3445_v57 }
 0x12e   : > { %2586 = vmatmul.mubr.bf16.vlgmr.msra.gmra.mrb[8].mxu0 %v2947_v52 }
 0x12f   : > { %2627 = vmatmul.mubr.bf16.vlgmr.msra.gmra.mrb[8].mxu1 %v2949_v54  ;;  %3233 = vmatpush3.bf16.msra.mxu0 %v3446_v58 }
 0x130   : > { %3255 = vmatpush3.bf16.msra.mxu1 %v3447_v59  ;;  %3234 = vmatprep.subr.bf16.mxu0 %v3448_v60 }
 0x131   : > { %3256 = vmatprep.subr.bf16.mxu1 %v3449_v61  ;;  %2667 = vmatprep.mubr.bf16.mxu0 %v2952_v28 }
 0x132   : > { %2708 = vmatprep.mubr.bf16.mxu1 %v2954_v31 }
 0x133   : > { %3235 = vmatpush3.bf16.msra.mxu0 %v3450_v62 }
 0x134   : > { %3257 = vmatpush3.bf16.msra.mxu1 %v3451_v63  ;;  %3236 = vmatprep.subr.bf16.mxu0 %v3452_v0 }
 0x135   : > { %3258 = vmatprep.subr.bf16.mxu1 %v3453_v1 }
 0x137   : > { %3237 = vmatpush3.bf16.msra.mxu0 %v3454_v2 }
 0x138   : > { %3259 = vmatpush3.bf16.msra.mxu1 %v3455_v3  ;;  %3238 = vmatprep.subr.bf16.mxu0 %v3456_v4 }
 0x139   : > { %3260 = vmatprep.subr.bf16.mxu1 %v3457_v5 }
 0x13b   : > { %3239 = vmatpush3.bf16.msra.mxu0 %v3458_v6 }
 0x13c   : > { %3261 = vmatpush3.bf16.msra.mxu1 %v3459_v7  ;;  %3240 = vmatprep.subr.bf16.mxu0 %v3460_v8 }
 0x13d   : > { %3262 = vmatprep.subr.bf16.mxu1 %v3461_v9 }
 0x13f   : > { %3241 = vmatpush3.bf16.msra.mxu0 %v3462_v10 }
 0x140   : > { %3263 = vmatpush3.bf16.msra.mxu1 %v3463_v11  ;;  %3242 = vmatprep.subr.bf16.mxu0 %v3464_v12 }
 0x141   : > { %3264 = vmatprep.subr.bf16.mxu1 %v3465_v13 }
 0x143   : > { %3243 = vmatpush3.bf16.msra.mxu0 %v3466_v14 }
 0x144   : > { %3265 = vmatpush3.bf16.msra.mxu1 %v3467_v15  ;;  %3244 = vmatprep.subr.bf16.mxu0 %v3468_v16 }
 0x145   : > { %3266 = vmatprep.subr.bf16.mxu1 %v3469_v17 }
 0x147   : > { %3245 = vmatpush3.bf16.msra.mxu0 %v3470_v18 }
 0x148   : > { %3267 = vmatpush3.bf16.msra.mxu1 %v3471_v19  ;;  %3246 = vmatprep.subr.bf16.mxu0 %v3472_v20 }
 0x149   : > { %3268 = vmatprep.subr.bf16.mxu1 %v3473_v21 }
 0x14b   : > { %3247 = vmatpush3.bf16.msra.mxu0 %v3474_v22 }
 0x14c   : > { %3269 = vmatpush3.bf16.msra.mxu1 %v3475_v23 }
 0x14e   : > { %2668 = vmatmul.mubr.bf16.vlgmr.msra.gmra.mrb[12].mxu0 %v2951_v27 }
 0x14f   : > { %2709 = vmatmul.mubr.bf16.vlgmr.msra.gmra.mrb[12].mxu1 %v2953_v30 }
 0x1c1   : > { %v3116_v32 = vpop.f32.mrb[0].mxu0 }
 0x1c2   : > { %v3138_v33 = vpop.f32.mrb[0].mxu1  ;;  %v3117_v34 = vpop.f32.mrb[1].mxu0 }
 0x1c3   : > { %v3118_v35 = vadd.f32 %v3117_v34, %v3116_v32  ;;  %v3139_v36 = vpop.f32.mrb[1].mxu1  ;;  %v3119_v37 = vpop.f32.mrb[2].mxu0 }
 0x1c4   : > { %v3140_v38 = vadd.f32 %v3139_v36, %v3138_v33  ;;  %v3141_v39 = vpop.f32.mrb[2].mxu1  ;;  %v3120_v40 = vpop.f32.mrb[3].mxu0 }
 0x1c5   : > { %v3121_v41 = vadd.f32 %v3120_v40, %v3119_v37  ;;  %v3142_v42 = vpop.f32.mrb[3].mxu1 }
 0x1c6   : > { %v2465_v43 = vadd.f32 %v3140_v38, %v3118_v35  ;;  %v3143_v44 = vadd.f32 %v3142_v42, %v3141_v39 }
 0x1c8   : > { %v2468_v45 = vadd.f32 %v3143_v44, %v3121_v41 }
 0x1e1   : > { %v3160_v46 = vpop.f32.mrb[4].mxu0 }
 0x1e2   : > { %v3182_v47 = vpop.f32.mrb[4].mxu1  ;;  %v3161_v48 = vpop.f32.mrb[5].mxu0 }
 0x1e3   : > { %v3162_v49 = vadd.f32 %v3161_v48, %v3160_v46  ;;  %v3183_v50 = vpop.f32.mrb[5].mxu1  ;;  %v3163_v51 = vpop.f32.mrb[6].mxu0 }
 0x1e4   : > { %v3184_v52 = vadd.f32 %v3183_v50, %v3182_v47  ;;  %v3185_v53 = vpop.f32.mrb[6].mxu1  ;;  %v3164_v54 = vpop.f32.mrb[7].mxu0 }
 0x1e5   : > { %v2506_v55 = vadd.f32 %v3162_v49, %v2465_v43  ;;  %v3165_v56 = vadd.f32 %v3164_v54, %v3163_v51  ;;  %v3186_v57 = vpop.f32.mrb[7].mxu1 }
 0x1e6   : > { %v3187_v58 = vadd.f32 %v3186_v57, %v3185_v53 }
 0x1e7   : > { %v2547_v59 = vadd.f32 %v3184_v52, %v2506_v55  ;;  %v2509_v60 = vadd.f32 %v3165_v56, %v2468_v45 }
 0x1e9   : > { %v2550_v61 = vadd.f32 %v3187_v58, %v2509_v60 }
 0x201   : > { %v3204_v62 = vpop.f32.mrb[8].mxu0 }
 0x202   : > { %v3226_v63 = vpop.f32.mrb[8].mxu1  ;;  %v3205_v0 = vpop.f32.mrb[9].mxu0 }
 0x203   : > { %v3227_v1 = vpop.f32.mrb[9].mxu1  ;;  %v3206_v2 = vadd.f32 %v3205_v0, %v3204_v62  ;;  %v3207_v4 = vpop.f32.mrb[10].mxu0 }
 0x204   : > { %v3228_v3 = vadd.f32 %v3227_v1, %v3226_v63  ;;  %v3229_v5 = vpop.f32.mrb[10].mxu1  ;;  %v3208_v6 = vpop.f32.mrb[11].mxu0 }
 0x205   : > { %v3230_v7 = vpop.f32.mrb[11].mxu1  ;;  %v2588_v8 = vadd.f32 %v3206_v2, %v2547_v59  ;;  %v3209_v9 = vadd.f32 %v3208_v6, %v3207_v4 }
 0x206   : > { %v3231_v10 = vadd.f32 %v3230_v7, %v3229_v5 }
 0x207   : > { %v2629_v11 = vadd.f32 %v3228_v3, %v2588_v8  ;;  %v2591_v12 = vadd.f32 %v3209_v9, %v2550_v61 }
 0x209   : > { %v2632_v13 = vadd.f32 %v3231_v10, %v2591_v12 }
 0x221   : > { %v3248_v14 = vpop.f32.mrb[12].mxu0 }
 0x222   : > { %v3270_v15 = vpop.f32.mrb[12].mxu1  ;;  %v3249_v16 = vpop.f32.mrb[13].mxu0 }
 0x223   : > { %v3250_v17 = vadd.f32 %v3249_v16, %v3248_v14  ;;  %v3271_v18 = vpop.f32.mrb[13].mxu1  ;;  %v3251_v19 = vpop.f32.mrb[14].mxu0 }
 0x224   : > { %v3272_v20 = vadd.f32 %v3271_v18, %v3270_v15  ;;  %v3273_v21 = vpop.f32.mrb[14].mxu1  ;;  %v3252_v22 = vpop.f32.mrb[15].mxu0 }
 0x225   : > { %v2670_v23 = vadd.f32 %v3250_v17, %v2629_v11  ;;  %v3253_v24 = vadd.f32 %v3252_v22, %v3251_v19  ;;  %v3274_v25 = vpop.f32.mrb[15].mxu1 }
 0x226   : > { %v3275_v26 = vadd.f32 %v3274_v25, %v3273_v21 }
 0x227   : > { %v2711_v27 = vadd.f32 %v3272_v20, %v2670_v23  ;;  %v2673_v28 = vadd.f32 %v3253_v24, %v2632_v13 }
 0x229   : > { %v2714_v29 = vadd.f32 %v3275_v26, %v2673_v28 }
 0x22b   : > { %v2738_v30 = vadd.f32 %v2714_v29, %v2711_v27 }
 0x22d   : > { %v2739_v31 = vrot.slane %v2738_v30, 4 }
 0x22f   : > { %v2740_v32 = vadd.f32 %v2739_v31, %v2738_v30 }
 0x231   : > { %v2741_v33 = vrot.slane %v2740_v32, 2 }
 0x233   : > { %v2742_v34 = vadd.f32 %v2741_v33, %v2740_v32 }
 0x235   : > { %v2743_v35 = vrot.slane %v2742_v34, 1 }
 0x237   : > { %v2744_v36 = vadd.f32 %v2743_v35, %v2742_v34 }
 0x239   : > { %v2746_v37 = vmul.f32 0.0625, %v2744_v36 }
 0x23b   : > { %v2747_v38 = vsub.f32 %v2711_v27, %v2746_v37  ;;  %v2748_v39 = vsub.f32 %v2714_v29, %v2746_v37 }
 0x23d   : > { %v2749_v40 = vmul.f32 %v2747_v38, %v2747_v38  ;;  %v2750_v41 = vmul.f32 %v2748_v39, %v2748_v39 }
 0x23f   : > { %v2751_v42 = vadd.f32 %v2750_v41, %v2749_v40 }
 0x241   : > { %v2752_v43 = vrot.slane %v2751_v42, 4 }
 0x243   : > { %v2753_v44 = vadd.f32 %v2752_v43, %v2751_v42 }
 0x245   : > { %v2754_v45 = vrot.slane %v2753_v44, 2 }
 0x247   : > { %v2755_v46 = vadd.f32 %v2754_v45, %v2753_v44 }
 0x249   : > { %v2756_v47 = vrot.slane %v2755_v46, 1 }
 0x24b   : > { %v2757_v48 = vadd.f32 %v2756_v47, %v2755_v46 }
 0x24d   : > { %v2758_v49 = vmul.f32 0.0625, %v2757_v48 }
 0x24f   : > { %v2759_v50 = vadd.f32 1e-05, %v2758_v49 }
 0x251   : > { %3476 = vrsqrt.f32 %v2759_v50 }
 0x25b   : > { %v3477_v51 = vpop.eup %3476 }
 0x25c   : > { %v2761_v52 = vmul.f32 %v3477_v51, %v2747_v38  ;;  %v2762_v53 = vmul.f32 %v3477_v51, %v2748_v39 }
 0x25d   : > { %2785 = sbr.rel (!%p3632_p9) target bundleno = 620 (0x26c), region = 85 }
 0x25e   : > { %vm2763_vm0 = vcmp.ge.f32.partialorder %v2761_v52, 0.0  ;;  %vm2764_vm1 = vcmp.ge.f32.partialorder %v2762_v53, 0.0  ;;  %v2765_v54 = vmul.f32 0.2, %v2761_v52  ;;  %v2766_v55 = vmul.f32 0.2, %v2762_v53 }
 0x260   : > { %v2767_v56 = vsel %vm2763_vm0, %v2761_v52, %v2765_v54  ;;  %v2768_v57 = vsel %vm2764_vm1, %v2762_v53, %v2766_v55 }
 0x261   : > { %v3098_v58 = vpack.c.bf16 %v2768_v57, %v2767_v56 }
 0x263   : > { %3099 = vst [vmem:[%s1253_s3] sm:$0xff] %v3098_v58  }
 0x26a   : > { %v2806_v59 = vld [vmem:[%s1253_s3] sm:$0xf]  ;;  %v2808_v60 = vld [vmem:[%s1253_s3 + $0x4] sm:$0xf] }
 0x26b   : > { %2807 = vst [vmem:[%s2790_s8] sm:$0xf] %v2806_v59  ;;  %2809 = vst [vmem:[%s2790_s8 + $0x8] sm:$0xf] %v2808_v60 }
 0x26c PF: > { %s12_s17 = sadd.s32 1, %s3548_s17   ;;  %s4355_s9 = smov %s3520_s10 }
 0x26d   : > { %p9_p1 = scmp.ge.s32.totalorder %s12_s17, 6   ;;  %s4356_s10 = smov %s3637_s28 }
 0x26e   : > { %s4357_s11 = smov %s3528_s12  ;;  %s4358_s12 = smov %s3626_s24 }
 0x26f   : > { %s4359_s13 = smov %s3540_s15  ;;  %s4360_s14 = smov %s3544_s16 }
 0x270   : > { %s4361_s15 = smov %s4364_s19  ;;  %s4362_s16 = smov %s4368_s20 }
 0x271   :  { %11 = sbr.rel (!%p9_p1) target bundleno = 5 (0x5), region = 160 }

// kernel: discriminator_forward.8
= control target key start
LH: loop header
LB: loop body
LE: loop exit
PB: predicated region body
PF: predicated region fallthrough
CT: control target
= control target key end

     0   :  { %s8586_s9 = smov 0   ;;  %s8588_s10 = smov 0   ;;  %s10028_s0 = inlined_call_operand.vmem [shape: bf16[32,4096], index: 0, kind: input, shape index: {}]   ;;  %s10029_s1 = inlined_call_operand.vmem [shape: bf16[4096,512], index: 1, kind: input, shape index: {}]   ;;  %s10030_s2 = inlined_call_operand.vmem [shape: bf16[32,512], index: 2, kind: output, shape index: {}]  }
   0x1   :  { %s8590_s11 = smov 0   ;;  %s8592_s12 = smov 0  }
   0x2   :  { %s8594_s13 = smov 0   ;;  %s8596_s14 = smov 0  }
   0x3   :  { %s8598_s15 = smov 0   ;;  %s8600_s16 = smov 0  }
   0x4   :  { %s8602_s17 = smov 0  }
   0x5 LB: > { %s7497_s18 = sadd.s32 4294967295, %s8568_s17   ;;  %s27_s19 = sadd.s32 1, %s8560_s15  ;;  %s8568_s17 = sphi %s8602_s17, %s12_s17   ;;  %s8564_s16 = sphi %s8600_s16, %s10039_s16   ;;  %s8560_s15 = sphi %s8598_s15, %s10038_s15   ;;  %s8556_s14 = sphi %s8596_s14, %s10037_s14   ;;  %s8552_s13 = sphi %s8594_s13, %s10036_s13   ;;  %s8548_s12 = sphi %s8592_s12, %s10035_s12   ;;  %s8544_s11 = sphi %s8590_s11, %s10034_s11   ;;  %s8540_s10 = sphi %s8588_s10, %s10033_s10   ;;  %s8536_s9 = sphi %s8586_s9, %s10032_s9  }
   0x6   : > { %p29_p0 = scmp.ge.s32.totalorder %s27_s19, 4  ;;  %s31_s20 = sadd.s32 1, %s8564_s16 }
   0x7   : > { %s68_s21 = sadd.s32 1, %s8548_s12  ;;  %p75_p1 = scmp.ne.s32.totalorder %s8548_s12, %s8544_s11 }
   0x8   : > { %s10041_s19 = smov (%p29_p0, %s27_s19), 0  ;;  %s10043_s20 = smov (!%p29_p0, %s31_s20), %s8564_s16 }
   0x9   : > { %s64_s22 = ssub.s32 %s8560_s15, %s10041_s19  ;;  %p76_p2 = scmp.eq.s32.totalorder %s8568_s17, 0 }
   0xa   : > { %p33_p3 = scmp.ge.s32.totalorder %s10043_s20, 2  ;;  %p66_p4 = scmp.eq.s32.totalorder %s64_s22, 0 }
   0xb   : > { %p77_p5 = por %p76_p2, %p75_p1  ;;  %s96_s23 = sadd.s32 1, %s8540_s10 }
   0xc   : > { %s10045_s20 = smov (%p33_p3, %s10043_s20), 0  ;;  %p106_p6 = scmp.ne.s32.totalorder %s8540_s10, %s8536_s9 }
   0xd   : > { %s8647_s24 = scalar_select %p66_p4, %s8548_s12, %s68_s21  }
   0xe   : > { %s91_s25 = ssub.s32 %s8564_s16, %s10045_s20  ;;  %p107_p7 = scmp.eq.s32.totalorder %s7497_s18, 7 }
   0xf   : > { %s93_s26 = sor.u32 %s91_s25, %s64_s22  ;;  %p7500_p10 = scmp.ge.s32.totalorder %s8568_s17, 8 }
  0x10   : > { %p94_p8 = scmp.eq.s32.totalorder %s93_s26, 0  ;;  %p8653_p9 = por %p107_p7, %p106_p6 }
  0x11   : > { %129 = sbr.rel (%p7500_p10) target bundleno = 369 (0x171), region = 16 }
  0x12   : > { %s8658_s28 = scalar_select %p94_p8, %s8540_s10, %s96_s23  }
  0x18   : > { %147 = sbr.rel (!%p77_p5) target bundleno = 369 (0x171), region = 24  ;;  %s149_s29 = sand.u32 (%p77_p5), 1, %s8548_s12  }
  0x19   : > { %s7502_s30 = sshll.u32 (%p77_p5), %s8560_s15, 2  ;;  %s7501_s3 = sshll.u32 (%p77_p5), %s149_s29, 11 }
  0x1a   : > { %s8666_s6 = scalar_lea.vmem (%p77_p5), %s10029_s1, %s7502_s30  ;;  %s8670_s7 = scalar_lea.vmem (%p77_p5), [#allocation3], %s7501_s3 }
  0x1b   : > { %v172_v0 = vld [vmem:[%s8666_s6] sm:$0xf] (%p77_p5)  ;;  %v174_v1 = vld [vmem:[%s8666_s6 + $0x10] sm:$0xf] (%p77_p5) }
  0x1c   : > { %173 = vst [vmem:[%s8670_s7] sm:$0xf] (%p77_p5), %v172_v0  ;;  %175 = vst [vmem:[%s8670_s7 + $0x4] sm:$0xf] (%p77_p5), %v174_v1  ;;  %v176_v2 = vld [vmem:[%s8666_s6 + $0x20] sm:$0xf] (%p77_p5) }
  0x1d   : > { %v178_v3 = vld [vmem:[%s8666_s6 + $0x30] sm:$0xf] (%p77_p5)  ;;  %v180_v4 = vld [vmem:[%s8666_s6 + $0x40] sm:$0xf] (%p77_p5)  ;;  %177 = vst [vmem:[%s8670_s7 + $0x8] sm:$0xf] (%p77_p5), %v176_v2 }
  0x1e   : > { %179 = vst [vmem:[%s8670_s7 + $0xc] sm:$0xf] (%p77_p5), %v178_v3  ;;  %181 = vst [vmem:[%s8670_s7 + $0x10] sm:$0xf] (%p77_p5), %v180_v4  ;;  %v182_v5 = vld [vmem:[%s8666_s6 + $0x50] sm:$0xf] (%p77_p5) }
  0x1f   : > { %v184_v6 = vld [vmem:[%s8666_s6 + $0x60] sm:$0xf]  ;;  %v186_v7 = vld [vmem:[%s8666_s6 + $0x70] sm:$0xf]  ;;  %183 = vst [vmem:[%s8670_s7 + $0x14] sm:$0xf] %v182_v5 }
  0x20   : > { %185 = vst [vmem:[%s8670_s7 + $0x18] sm:$0xf] %v184_v6  ;;  %187 = vst [vmem:[%s8670_s7 + $0x1c] sm:$0xf] %v186_v7  ;;  %v188_v8 = vld [vmem:[%s8666_s6 + $0x80] sm:$0xf] }
  0x21   : > { %v190_v9 = vld [vmem:[%s8666_s6 + $0x90] sm:$0xf]  ;;  %v192_v10 = vld [vmem:[%s8666_s6 + $0xa0] sm:$0xf]  ;;  %189 = vst [vmem:[%s8670_s7 + $0x20] sm:$0xf] %v188_v8 }
  0x22   : > { %191 = vst [vmem:[%s8670_s7 + $0x24] sm:$0xf] %v190_v9  ;;  %193 = vst [vmem:[%s8670_s7 + $0x28] sm:$0xf] %v192_v10  ;;  %v194_v11 = vld [vmem:[%s8666_s6 + $0xb0] sm:$0xf] }
  0x23   : > { %v196_v12 = vld [vmem:[%s8666_s6 + $0xc0] sm:$0xf]  ;;  %v198_v13 = vld [vmem:[%s8666_s6 + $0xd0] sm:$0xf]  ;;  %195 = vst [vmem:[%s8670_s7 + $0x2c] sm:$0xf] %v194_v11 }
  0x24   : > { %197 = vst [vmem:[%s8670_s7 + $0x30] sm:$0xf] %v196_v12  ;;  %199 = vst [vmem:[%s8670_s7 + $0x34] sm:$0xf] %v198_v13  ;;  %v200_v14 = vld [vmem:[%s8666_s6 + $0xe0] sm:$0xf] }
  0x25   : > { %v202_v15 = vld [vmem:[%s8666_s6 + $0xf0] sm:$0xf]  ;;  %v204_v16 = vld [vmem:[%s8666_s6 + $0x100] sm:$0xf]  ;;  %201 = vst [vmem:[%s8670_s7 + $0x38] sm:$0xf] %v200_v14 }
  0x26   : > { %203 = vst [vmem:[%s8670_s7 + $0x3c] sm:$0xf] %v202_v15  ;;  %205 = vst [vmem:[%s8670_s7 + $0x40] sm:$0xf] %v204_v16  ;;  %v206_v17 = vld [vmem:[%s8666_s6 + $0x110] sm:$0xf] }
  0x27   : > { %v208_v18 = vld [vmem:[%s8666_s6 + $0x120] sm:$0xf]  ;;  %v210_v19 = vld [vmem:[%s8666_s6 + $0x130] sm:$0xf]  ;;  %207 = vst [vmem:[%s8670_s7 + $0x44] sm:$0xf] %v206_v17 }
  0x28   : > { %209 = vst [vmem:[%s8670_s7 + $0x48] sm:$0xf] %v208_v18  ;;  %211 = vst [vmem:[%s8670_s7 + $0x4c] sm:$0xf] %v210_v19  ;;  %v212_v20 = vld [vmem:[%s8666_s6 + $0x140] sm:$0xf] }
  0x29   : > { %v214_v21 = vld [vmem:[%s8666_s6 + $0x150] sm:$0xf]  ;;  %v216_v22 = vld [vmem:[%s8666_s6 + $0x160] sm:$0xf]  ;;  %213 = vst [vmem:[%s8670_s7 + $0x50] sm:$0xf] %v212_v20 }
  0x2a   : > { %215 = vst [vmem:[%s8670_s7 + $0x54] sm:$0xf] %v214_v21  ;;  %217 = vst [vmem:[%s8670_s7 + $0x58] sm:$0xf] %v216_v22  ;;  %v218_v23 = vld [vmem:[%s8666_s6 + $0x170] sm:$0xf] }
  0x2b   : > { %v220_v24 = vld [vmem:[%s8666_s6 + $0x180] sm:$0xf]  ;;  %v222_v25 = vld [vmem:[%s8666_s6 + $0x190] sm:$0xf]  ;;  %219 = vst [vmem:[%s8670_s7 + $0x5c] sm:$0xf] %v218_v23 }
  0x2c   : > { %221 = vst [vmem:[%s8670_s7 + $0x60] sm:$0xf] %v220_v24  ;;  %223 = vst [vmem:[%s8670_s7 + $0x64] sm:$0xf] %v222_v25  ;;  %v224_v26 = vld [vmem:[%s8666_s6 + $0x1a0] sm:$0xf] }
  0x2d   : > { %v226_v27 = vld [vmem:[%s8666_s6 + $0x1b0] sm:$0xf]  ;;  %v228_v28 = vld [vmem:[%s8666_s6 + $0x1c0] sm:$0xf]  ;;  %225 = vst [vmem:[%s8670_s7 + $0x68] sm:$0xf] %v224_v26 }
  0x2e   : > { %227 = vst [vmem:[%s8670_s7 + $0x6c] sm:$0xf] %v226_v27  ;;  %229 = vst [vmem:[%s8670_s7 + $0x70] sm:$0xf] %v228_v28  ;;  %v230_v29 = vld [vmem:[%s8666_s6 + $0x1d0] sm:$0xf] }
  0x2f   : > { %v232_v30 = vld [vmem:[%s8666_s6 + $0x1e0] sm:$0xf]  ;;  %v234_v31 = vld [vmem:[%s8666_s6 + $0x1f0] sm:$0xf]  ;;  %231 = vst [vmem:[%s8670_s7 + $0x74] sm:$0xf] %v230_v29 }
  0x30   : > { %233 = vst [vmem:[%s8670_s7 + $0x78] sm:$0xf] %v232_v30  ;;  %235 = vst [vmem:[%s8670_s7 + $0x7c] sm:$0xf] %v234_v31  ;;  %v236_v32 = vld [vmem:[%s8666_s6 + $0x200] sm:$0xf] }
  0x31   : > { %v238_v33 = vld [vmem:[%s8666_s6 + $0x210] sm:$0xf]  ;;  %v240_v34 = vld [vmem:[%s8666_s6 + $0x220] sm:$0xf]  ;;  %237 = vst [vmem:[%s8670_s7 + $0x80] sm:$0xf] %v236_v32 }
  0x32   : > { %239 = vst [vmem:[%s8670_s7 + $0x84] sm:$0xf] %v238_v33  ;;  %241 = vst [vmem:[%s8670_s7 + $0x88] sm:$0xf] %v240_v34  ;;  %v242_v35 = vld [vmem:[%s8666_s6 + $0x230] sm:$0xf] }
  0x33   : > { %v244_v36 = vld [vmem:[%s8666_s6 + $0x240] sm:$0xf]  ;;  %v246_v37 = vld [vmem:[%s8666_s6 + $0x250] sm:$0xf]  ;;  %243 = vst [vmem:[%s8670_s7 + $0x8c] sm:$0xf] %v242_v35 }
  0x34   : > { %245 = vst [vmem:[%s8670_s7 + $0x90] sm:$0xf] %v244_v36  ;;  %247 = vst [vmem:[%s8670_s7 + $0x94] sm:$0xf] %v246_v37  ;;  %v248_v38 = vld [vmem:[%s8666_s6 + $0x260] sm:$0xf] }
  0x35   : > { %v250_v39 = vld [vmem:[%s8666_s6 + $0x270] sm:$0xf]  ;;  %v252_v40 = vld [vmem:[%s8666_s6 + $0x280] sm:$0xf]  ;;  %249 = vst [vmem:[%s8670_s7 + $0x98] sm:$0xf] %v248_v38 }
  0x36   : > { %251 = vst [vmem:[%s8670_s7 + $0x9c] sm:$0xf] %v250_v39  ;;  %253 = vst [vmem:[%s8670_s7 + $0xa0] sm:$0xf] %v252_v40  ;;  %v254_v41 = vld [vmem:[%s8666_s6 + $0x290] sm:$0xf] }
  0x37   : > { %v256_v42 = vld [vmem:[%s8666_s6 + $0x2a0] sm:$0xf]  ;;  %v258_v43 = vld [vmem:[%s8666_s6 + $0x2b0] sm:$0xf]  ;;  %255 = vst [vmem:[%s8670_s7 + $0xa4] sm:$0xf] %v254_v41 }
  0x38   : > { %257 = vst [vmem:[%s8670_s7 + $0xa8] sm:$0xf] %v256_v42  ;;  %259 = vst [vmem:[%s8670_s7 + $0xac] sm:$0xf] %v258_v43  ;;  %v260_v44 = vld [vmem:[%s8666_s6 + $0x2c0] sm:$0xf] }
  0x39   : > { %v262_v45 = vld [vmem:[%s8666_s6 + $0x2d0] sm:$0xf]  ;;  %v264_v46 = vld [vmem:[%s8666_s6 + $0x2e0] sm:$0xf]  ;;  %261 = vst [vmem:[%s8670_s7 + $0xb0] sm:$0xf] %v260_v44 }
  0x3a   : > { %263 = vst [vmem:[%s8670_s7 + $0xb4] sm:$0xf] %v262_v45  ;;  %265 = vst [vmem:[%s8670_s7 + $0xb8] sm:$0xf] %v264_v46  ;;  %v266_v47 = vld [vmem:[%s8666_s6 + $0x2f0] sm:$0xf] }
  0x3b   : > { %v268_v48 = vld [vmem:[%s8666_s6 + $0x300] sm:$0xf]  ;;  %v270_v49 = vld [vmem:[%s8666_s6 + $0x310] sm:$0xf]  ;;  %267 = vst [vmem:[%s8670_s7 + $0xbc] sm:$0xf] %v266_v47 }
  0x3c   : > { %269 = vst [vmem:[%s8670_s7 + $0xc0] sm:$0xf] %v268_v48  ;;  %271 = vst [vmem:[%s8670_s7 + $0xc4] sm:$0xf] %v270_v49  ;;  %v272_v50 = vld [vmem:[%s8666_s6 + $0x320] sm:$0xf] }
  0x3d   : > { %v274_v51 = vld [vmem:[%s8666_s6 + $0x330] sm:$0xf]  ;;  %v276_v52 = vld [vmem:[%s8666_s6 + $0x340] sm:$0xf]  ;;  %273 = vst [vmem:[%s8670_s7 + $0xc8] sm:$0xf] %v272_v50 }
  0x3e   : > { %275 = vst [vmem:[%s8670_s7 + $0xcc] sm:$0xf] %v274_v51  ;;  %277 = vst [vmem:[%s8670_s7 + $0xd0] sm:$0xf] %v276_v52  ;;  %v278_v53 = vld [vmem:[%s8666_s6 + $0x350] sm:$0xf] }
  0x3f   : > { %v280_v54 = vld [vmem:[%s8666_s6 + $0x360] sm:$0xf]  ;;  %v282_v55 = vld [vmem:[%s8666_s6 + $0x370] sm:$0xf]  ;;  %279 = vst [vmem:[%s8670_s7 + $0xd4] sm:$0xf] %v278_v53 }
  0x40   : > { %281 = vst [vmem:[%s8670_s7 + $0xd8] sm:$0xf] %v280_v54  ;;  %283 = vst [vmem:[%s8670_s7 + $0xdc] sm:$0xf] %v282_v55  ;;  %v284_v56 = vld [vmem:[%s8666_s6 + $0x380] sm:$0xf] }
  0x41   : > { %v286_v57 = vld [vmem:[%s8666_s6 + $0x390] sm:$0xf]  ;;  %v288_v58 = vld [vmem:[%s8666_s6 + $0x3a0] sm:$0xf]  ;;  %285 = vst [vmem:[%s8670_s7 + $0xe0] sm:$0xf] %v284_v56 }
  0x42   : > { %287 = vst [vmem:[%s8670_s7 + $0xe4] sm:$0xf] %v286_v57  ;;  %289 = vst [vmem:[%s8670_s7 + $0xe8] sm:$0xf] %v288_v58  ;;  %v290_v59 = vld [vmem:[%s8666_s6 + $0x3b0] sm:$0xf] }
  0x43   : > { %v292_v60 = vld [vmem:[%s8666_s6 + $0x3c0] sm:$0xf]  ;;  %v294_v61 = vld [vmem:[%s8666_s6 + $0x3d0] sm:$0xf]  ;;  %291 = vst [vmem:[%s8670_s7 + $0xec] sm:$0xf] %v290_v59 }
  0x44   : > { %293 = vst [vmem:[%s8670_s7 + $0xf0] sm:$0xf] %v292_v60  ;;  %295 = vst [vmem:[%s8670_s7 + $0xf4] sm:$0xf] %v294_v61  ;;  %v296_v62 = vld [vmem:[%s8666_s6 + $0x3e0] sm:$0xf] }
  0x45   : > { %v298_v63 = vld [vmem:[%s8666_s6 + $0x3f0] sm:$0xf]  ;;  %v300_v0 = vld [vmem:[%s8666_s6 + $0x400] sm:$0xf]  ;;  %297 = vst [vmem:[%s8670_s7 + $0xf8] sm:$0xf] %v296_v62 }
  0x46   : > { %299 = vst [vmem:[%s8670_s7 + $0xfc] sm:$0xf] %v298_v63  ;;  %301 = vst [vmem:[%s8670_s7 + $0x100] sm:$0xf] %v300_v0  ;;  %v302_v1 = vld [vmem:[%s8666_s6 + $0x410] sm:$0xf] }
  0x47   : > { %v304_v2 = vld [vmem:[%s8666_s6 + $0x420] sm:$0xf]  ;;  %v306_v3 = vld [vmem:[%s8666_s6 + $0x430] sm:$0xf]  ;;  %303 = vst [vmem:[%s8670_s7 + $0x104] sm:$0xf] %v302_v1 }
  0x48   : > { %305 = vst [vmem:[%s8670_s7 + $0x108] sm:$0xf] %v304_v2  ;;  %307 = vst [vmem:[%s8670_s7 + $0x10c] sm:$0xf] %v306_v3  ;;  %v308_v4 = vld [vmem:[%s8666_s6 + $0x440] sm:$0xf] }
  0x49   : > { %v310_v5 = vld [vmem:[%s8666_s6 + $0x450] sm:$0xf]  ;;  %v312_v6 = vld [vmem:[%s8666_s6 + $0x460] sm:$0xf]  ;;  %309 = vst [vmem:[%s8670_s7 + $0x110] sm:$0xf] %v308_v4 }
  0x4a   : > { %311 = vst [vmem:[%s8670_s7 + $0x114] sm:$0xf] %v310_v5  ;;  %313 = vst [vmem:[%s8670_s7 + $0x118] sm:$0xf] %v312_v6  ;;  %v314_v7 = vld [vmem:[%s8666_s6 + $0x470] sm:$0xf] }
  0x4b   : > { %v316_v8 = vld [vmem:[%s8666_s6 + $0x480] sm:$0xf]  ;;  %v318_v9 = vld [vmem:[%s8666_s6 + $0x490] sm:$0xf]  ;;  %315 = vst [vmem:[%s8670_s7 + $0x11c] sm:$0xf] %v314_v7 }
  0x4c   : > { %317 = vst [vmem:[%s8670_s7 + $0x120] sm:$0xf] %v316_v8  ;;  %319 = vst [vmem:[%s8670_s7 + $0x124] sm:$0xf] %v318_v9  ;;  %v320_v10 = vld [vmem:[%s8666_s6 + $0x4a0] sm:$0xf] }
  0x4d   : > { %v322_v11 = vld [vmem:[%s8666_s6 + $0x4b0] sm:$0xf]  ;;  %v324_v12 = vld [vmem:[%s8666_s6 + $0x4c0] sm:$0xf]  ;;  %321 = vst [vmem:[%s8670_s7 + $0x128] sm:$0xf] %v320_v10 }
  0x4e   : > { %323 = vst [vmem:[%s8670_s7 + $0x12c] sm:$0xf] %v322_v11  ;;  %325 = vst [vmem:[%s8670_s7 + $0x130] sm:$0xf] %v324_v12  ;;  %v326_v13 = vld [vmem:[%s8666_s6 + $0x4d0] sm:$0xf] }
  0x4f   : > { %v328_v14 = vld [vmem:[%s8666_s6 + $0x4e0] sm:$0xf]  ;;  %v330_v15 = vld [vmem:[%s8666_s6 + $0x4f0] sm:$0xf]  ;;  %327 = vst [vmem:[%s8670_s7 + $0x134] sm:$0xf] %v326_v13 }
  0x50   : > { %329 = vst [vmem:[%s8670_s7 + $0x138] sm:$0xf] %v328_v14  ;;  %331 = vst [vmem:[%s8670_s7 + $0x13c] sm:$0xf] %v330_v15  ;;  %v332_v16 = vld [vmem:[%s8666_s6 + $0x500] sm:$0xf] }
  0x51   : > { %v334_v17 = vld [vmem:[%s8666_s6 + $0x510] sm:$0xf]  ;;  %v336_v18 = vld [vmem:[%s8666_s6 + $0x520] sm:$0xf]  ;;  %333 = vst [vmem:[%s8670_s7 + $0x140] sm:$0xf] %v332_v16 }
  0x52   : > { %335 = vst [vmem:[%s8670_s7 + $0x144] sm:$0xf] %v334_v17  ;;  %337 = vst [vmem:[%s8670_s7 + $0x148] sm:$0xf] %v336_v18  ;;  %v338_v19 = vld [vmem:[%s8666_s6 + $0x530] sm:$0xf] }
  0x53   : > { %v340_v20 = vld [vmem:[%s8666_s6 + $0x540] sm:$0xf]  ;;  %v342_v21 = vld [vmem:[%s8666_s6 + $0x550] sm:$0xf]  ;;  %339 = vst [vmem:[%s8670_s7 + $0x14c] sm:$0xf] %v338_v19 }
  0x54   : > { %341 = vst [vmem:[%s8670_s7 + $0x150] sm:$0xf] %v340_v20  ;;  %343 = vst [vmem:[%s8670_s7 + $0x154] sm:$0xf] %v342_v21  ;;  %v344_v22 = vld [vmem:[%s8666_s6 + $0x560] sm:$0xf] }
  0x55   : > { %v346_v23 = vld [vmem:[%s8666_s6 + $0x570] sm:$0xf]  ;;  %v348_v24 = vld [vmem:[%s8666_s6 + $0x580] sm:$0xf]  ;;  %345 = vst [vmem:[%s8670_s7 + $0x158] sm:$0xf] %v344_v22 }
  0x56   : > { %347 = vst [vmem:[%s8670_s7 + $0x15c] sm:$0xf] %v346_v23  ;;  %349 = vst [vmem:[%s8670_s7 + $0x160] sm:$0xf] %v348_v24  ;;  %v350_v25 = vld [vmem:[%s8666_s6 + $0x590] sm:$0xf] }
  0x57   : > { %v352_v26 = vld [vmem:[%s8666_s6 + $0x5a0] sm:$0xf]  ;;  %v354_v27 = vld [vmem:[%s8666_s6 + $0x5b0] sm:$0xf]  ;;  %351 = vst [vmem:[%s8670_s7 + $0x164] sm:$0xf] %v350_v25 }
  0x58   : > { %353 = vst [vmem:[%s8670_s7 + $0x168] sm:$0xf] %v352_v26  ;;  %355 = vst [vmem:[%s8670_s7 + $0x16c] sm:$0xf] %v354_v27  ;;  %v356_v28 = vld [vmem:[%s8666_s6 + $0x5c0] sm:$0xf] }
  0x59   : > { %v358_v29 = vld [vmem:[%s8666_s6 + $0x5d0] sm:$0xf]  ;;  %v360_v30 = vld [vmem:[%s8666_s6 + $0x5e0] sm:$0xf]  ;;  %357 = vst [vmem:[%s8670_s7 + $0x170] sm:$0xf] %v356_v28 }
  0x5a   : > { %359 = vst [vmem:[%s8670_s7 + $0x174] sm:$0xf] %v358_v29  ;;  %361 = vst [vmem:[%s8670_s7 + $0x178] sm:$0xf] %v360_v30  ;;  %v362_v31 = vld [vmem:[%s8666_s6 + $0x5f0] sm:$0xf] }
  0x5b   : > { %v364_v32 = vld [vmem:[%s8666_s6 + $0x600] sm:$0xf]  ;;  %v366_v33 = vld [vmem:[%s8666_s6 + $0x610] sm:$0xf]  ;;  %363 = vst [vmem:[%s8670_s7 + $0x17c] sm:$0xf] %v362_v31 }
  0x5c   : > { %365 = vst [vmem:[%s8670_s7 + $0x180] sm:$0xf] %v364_v32  ;;  %367 = vst [vmem:[%s8670_s7 + $0x184] sm:$0xf] %v366_v33  ;;  %v368_v34 = vld [vmem:[%s8666_s6 + $0x620] sm:$0xf] }
  0x5d   : > { %v370_v35 = vld [vmem:[%s8666_s6 + $0x630] sm:$0xf]  ;;  %v372_v36 = vld [vmem:[%s8666_s6 + $0x640] sm:$0xf]  ;;  %369 = vst [vmem:[%s8670_s7 + $0x188] sm:$0xf] %v368_v34 }
  0x5e   : > { %371 = vst [vmem:[%s8670_s7 + $0x18c] sm:$0xf] %v370_v35  ;;  %373 = vst [vmem:[%s8670_s7 + $0x190] sm:$0xf] %v372_v36  ;;  %v374_v37 = vld [vmem:[%s8666_s6 + $0x650] sm:$0xf] }
  0x5f   : > { %v376_v38 = vld [vmem:[%s8666_s6 + $0x660] sm:$0xf]  ;;  %v378_v39 = vld [vmem:[%s8666_s6 + $0x670] sm:$0xf]  ;;  %375 = vst [vmem:[%s8670_s7 + $0x194] sm:$0xf] %v374_v37 }
  0x60   : > { %377 = vst [vmem:[%s8670_s7 + $0x198] sm:$0xf] %v376_v38  ;;  %379 = vst [vmem:[%s8670_s7 + $0x19c] sm:$0xf] %v378_v39  ;;  %v380_v40 = vld [vmem:[%s8666_s6 + $0x680] sm:$0xf] }
  0x61   : > { %v382_v41 = vld [vmem:[%s8666_s6 + $0x690] sm:$0xf]  ;;  %v384_v42 = vld [vmem:[%s8666_s6 + $0x6a0] sm:$0xf]  ;;  %381 = vst [vmem:[%s8670_s7 + $0x1a0] sm:$0xf] %v380_v40 }
  0x62   : > { %383 = vst [vmem:[%s8670_s7 + $0x1a4] sm:$0xf] %v382_v41  ;;  %385 = vst [vmem:[%s8670_s7 + $0x1a8] sm:$0xf] %v384_v42  ;;  %v386_v43 = vld [vmem:[%s8666_s6 + $0x6b0] sm:$0xf] }
  0x63   : > { %v388_v44 = vld [vmem:[%s8666_s6 + $0x6c0] sm:$0xf]  ;;  %v390_v45 = vld [vmem:[%s8666_s6 + $0x6d0] sm:$0xf]  ;;  %387 = vst [vmem:[%s8670_s7 + $0x1ac] sm:$0xf] %v386_v43 }
  0x64   : > { %389 = vst [vmem:[%s8670_s7 + $0x1b0] sm:$0xf] %v388_v44  ;;  %391 = vst [vmem:[%s8670_s7 + $0x1b4] sm:$0xf] %v390_v45  ;;  %v392_v46 = vld [vmem:[%s8666_s6 + $0x6e0] sm:$0xf] }
  0x65   : > { %v394_v47 = vld [vmem:[%s8666_s6 + $0x6f0] sm:$0xf]  ;;  %v396_v48 = vld [vmem:[%s8666_s6 + $0x700] sm:$0xf]  ;;  %393 = vst [vmem:[%s8670_s7 + $0x1b8] sm:$0xf] %v392_v46 }
  0x66   : > { %395 = vst [vmem:[%s8670_s7 + $0x1bc] sm:$0xf] %v394_v47  ;;  %397 = vst [vmem:[%s8670_s7 + $0x1c0] sm:$0xf] %v396_v48  ;;  %v398_v49 = vld [vmem:[%s8666_s6 + $0x710] sm:$0xf] }
  0x67   : > { %v400_v50 = vld [vmem:[%s8666_s6 + $0x720] sm:$0xf]  ;;  %v402_v51 = vld [vmem:[%s8666_s6 + $0x730] sm:$0xf]  ;;  %399 = vst [vmem:[%s8670_s7 + $0x1c4] sm:$0xf] %v398_v49 }
  0x68   : > { %401 = vst [vmem:[%s8670_s7 + $0x1c8] sm:$0xf] %v400_v50  ;;  %403 = vst [vmem:[%s8670_s7 + $0x1cc] sm:$0xf] %v402_v51  ;;  %v404_v52 = vld [vmem:[%s8666_s6 + $0x740] sm:$0xf] }
  0x69   : > { %v406_v53 = vld [vmem:[%s8666_s6 + $0x750] sm:$0xf]  ;;  %v408_v54 = vld [vmem:[%s8666_s6 + $0x760] sm:$0xf]  ;;  %405 = vst [vmem:[%s8670_s7 + $0x1d0] sm:$0xf] %v404_v52 }
  0x6a   : > { %407 = vst [vmem:[%s8670_s7 + $0x1d4] sm:$0xf] %v406_v53  ;;  %409 = vst [vmem:[%s8670_s7 + $0x1d8] sm:$0xf] %v408_v54  ;;  %v410_v55 = vld [vmem:[%s8666_s6 + $0x770] sm:$0xf] }
  0x6b   : > { %v412_v56 = vld [vmem:[%s8666_s6 + $0x780] sm:$0xf]  ;;  %v414_v57 = vld [vmem:[%s8666_s6 + $0x790] sm:$0xf]  ;;  %411 = vst [vmem:[%s8670_s7 + $0x1dc] sm:$0xf] %v410_v55 }
  0x6c   : > { %413 = vst [vmem:[%s8670_s7 + $0x1e0] sm:$0xf] %v412_v56  ;;  %415 = vst [vmem:[%s8670_s7 + $0x1e4] sm:$0xf] %v414_v57  ;;  %v416_v58 = vld [vmem:[%s8666_s6 + $0x7a0] sm:$0xf] }
  0x6d   : > { %v418_v59 = vld [vmem:[%s8666_s6 + $0x7b0] sm:$0xf]  ;;  %v420_v60 = vld [vmem:[%s8666_s6 + $0x7c0] sm:$0xf]  ;;  %417 = vst [vmem:[%s8670_s7 + $0x1e8] sm:$0xf] %v416_v58 }
  0x6e   : > { %419 = vst [vmem:[%s8670_s7 + $0x1ec] sm:$0xf] %v418_v59  ;;  %421 = vst [vmem:[%s8670_s7 + $0x1f0] sm:$0xf] %v420_v60  ;;  %v422_v61 = vld [vmem:[%s8666_s6 + $0x7d0] sm:$0xf] }
  0x6f   : > { %v424_v62 = vld [vmem:[%s8666_s6 + $0x7e0] sm:$0xf]  ;;  %v426_v63 = vld [vmem:[%s8666_s6 + $0x7f0] sm:$0xf]  ;;  %423 = vst [vmem:[%s8670_s7 + $0x1f4] sm:$0xf] %v422_v61 }
  0x70   : > { %425 = vst [vmem:[%s8670_s7 + $0x1f8] sm:$0xf] %v424_v62  ;;  %427 = vst [vmem:[%s8670_s7 + $0x1fc] sm:$0xf] %v426_v63  ;;  %v428_v0 = vld [vmem:[%s8666_s6 + $0x800] sm:$0xf] }
  0x71   : > { %v430_v1 = vld [vmem:[%s8666_s6 + $0x810] sm:$0xf]  ;;  %v432_v2 = vld [vmem:[%s8666_s6 + $0x820] sm:$0xf]  ;;  %429 = vst [vmem:[%s8670_s7 + $0x200] sm:$0xf] %v428_v0 }
  0x72   : > { %431 = vst [vmem:[%s8670_s7 + $0x204] sm:$0xf] %v430_v1  ;;  %433 = vst [vmem:[%s8670_s7 + $0x208] sm:$0xf] %v432_v2  ;;  %v434_v3 = vld [vmem:[%s8666_s6 + $0x830] sm:$0xf] }
  0x73   : > { %v436_v4 = vld [vmem:[%s8666_s6 + $0x840] sm:$0xf]  ;;  %v438_v5 = vld [vmem:[%s8666_s6 + $0x850] sm:$0xf]  ;;  %435 = vst [vmem:[%s8670_s7 + $0x20c] sm:$0xf] %v434_v3 }
  0x74   : > { %437 = vst [vmem:[%s8670_s7 + $0x210] sm:$0xf] %v436_v4  ;;  %439 = vst [vmem:[%s8670_s7 + $0x214] sm:$0xf] %v438_v5  ;;  %v440_v6 = vld [vmem:[%s8666_s6 + $0x860] sm:$0xf] }
  0x75   : > { %v442_v7 = vld [vmem:[%s8666_s6 + $0x870] sm:$0xf]  ;;  %v444_v8 = vld [vmem:[%s8666_s6 + $0x880] sm:$0xf]  ;;  %441 = vst [vmem:[%s8670_s7 + $0x218] sm:$0xf] %v440_v6 }
  0x76   : > { %443 = vst [vmem:[%s8670_s7 + $0x21c] sm:$0xf] %v442_v7  ;;  %445 = vst [vmem:[%s8670_s7 + $0x220] sm:$0xf] %v444_v8  ;;  %v446_v9 = vld [vmem:[%s8666_s6 + $0x890] sm:$0xf] }
  0x77   : > { %v448_v10 = vld [vmem:[%s8666_s6 + $0x8a0] sm:$0xf]  ;;  %v450_v11 = vld [vmem:[%s8666_s6 + $0x8b0] sm:$0xf]  ;;  %447 = vst [vmem:[%s8670_s7 + $0x224] sm:$0xf] %v446_v9 }
  0x78   : > { %449 = vst [vmem:[%s8670_s7 + $0x228] sm:$0xf] %v448_v10  ;;  %451 = vst [vmem:[%s8670_s7 + $0x22c] sm:$0xf] %v450_v11  ;;  %v452_v12 = vld [vmem:[%s8666_s6 + $0x8c0] sm:$0xf] }
  0x79   : > { %v454_v13 = vld [vmem:[%s8666_s6 + $0x8d0] sm:$0xf]  ;;  %v456_v14 = vld [vmem:[%s8666_s6 + $0x8e0] sm:$0xf]  ;;  %453 = vst [vmem:[%s8670_s7 + $0x230] sm:$0xf] %v452_v12 }
  0x7a   : > { %455 = vst [vmem:[%s8670_s7 + $0x234] sm:$0xf] %v454_v13  ;;  %457 = vst [vmem:[%s8670_s7 + $0x238] sm:$0xf] %v456_v14  ;;  %v458_v15 = vld [vmem:[%s8666_s6 + $0x8f0] sm:$0xf] }
  0x7b   : > { %v460_v16 = vld [vmem:[%s8666_s6 + $0x900] sm:$0xf]  ;;  %v462_v17 = vld [vmem:[%s8666_s6 + $0x910] sm:$0xf]  ;;  %459 = vst [vmem:[%s8670_s7 + $0x23c] sm:$0xf] %v458_v15 }
  0x7c   : > { %461 = vst [vmem:[%s8670_s7 + $0x240] sm:$0xf] %v460_v16  ;;  %463 = vst [vmem:[%s8670_s7 + $0x244] sm:$0xf] %v462_v17  ;;  %v464_v18 = vld [vmem:[%s8666_s6 + $0x920] sm:$0xf] }
  0x7d   : > { %v466_v19 = vld [vmem:[%s8666_s6 + $0x930] sm:$0xf]  ;;  %v468_v20 = vld [vmem:[%s8666_s6 + $0x940] sm:$0xf]  ;;  %465 = vst [vmem:[%s8670_s7 + $0x248] sm:$0xf] %v464_v18 }
  0x7e   : > { %467 = vst [vmem:[%s8670_s7 + $0x24c] sm:$0xf] %v466_v19  ;;  %469 = vst [vmem:[%s8670_s7 + $0x250] sm:$0xf] %v468_v20  ;;  %v470_v21 = vld [vmem:[%s8666_s6 + $0x950] sm:$0xf] }
  0x7f   : > { %v472_v22 = vld [vmem:[%s8666_s6 + $0x960] sm:$0xf]  ;;  %v474_v23 = vld [vmem:[%s8666_s6 + $0x970] sm:$0xf]  ;;  %471 = vst [vmem:[%s8670_s7 + $0x254] sm:$0xf] %v470_v21 }
  0x80   : > { %473 = vst [vmem:[%s8670_s7 + $0x258] sm:$0xf] %v472_v22  ;;  %475 = vst [vmem:[%s8670_s7 + $0x25c] sm:$0xf] %v474_v23  ;;  %v476_v24 = vld [vmem:[%s8666_s6 + $0x980] sm:$0xf] }
  0x81   : > { %v478_v25 = vld [vmem:[%s8666_s6 + $0x990] sm:$0xf]  ;;  %v480_v26 = vld [vmem:[%s8666_s6 + $0x9a0] sm:$0xf]  ;;  %477 = vst [vmem:[%s8670_s7 + $0x260] sm:$0xf] %v476_v24 }
  0x82   : > { %479 = vst [vmem:[%s8670_s7 + $0x264] sm:$0xf] %v478_v25  ;;  %481 = vst [vmem:[%s8670_s7 + $0x268] sm:$0xf] %v480_v26  ;;  %v482_v27 = vld [vmem:[%s8666_s6 + $0x9b0] sm:$0xf] }
  0x83   : > { %v484_v28 = vld [vmem:[%s8666_s6 + $0x9c0] sm:$0xf]  ;;  %v486_v29 = vld [vmem:[%s8666_s6 + $0x9d0] sm:$0xf]  ;;  %483 = vst [vmem:[%s8670_s7 + $0x26c] sm:$0xf] %v482_v27 }
  0x84   : > { %485 = vst [vmem:[%s8670_s7 + $0x270] sm:$0xf] %v484_v28  ;;  %487 = vst [vmem:[%s8670_s7 + $0x274] sm:$0xf] %v486_v29  ;;  %v488_v30 = vld [vmem:[%s8666_s6 + $0x9e0] sm:$0xf] }
  0x85   : > { %v490_v31 = vld [vmem:[%s8666_s6 + $0x9f0] sm:$0xf]  ;;  %v492_v32 = vld [vmem:[%s8666_s6 + $0xa00] sm:$0xf]  ;;  %489 = vst [vmem:[%s8670_s7 + $0x278] sm:$0xf] %v488_v30 }
  0x86   : > { %491 = vst [vmem:[%s8670_s7 + $0x27c] sm:$0xf] %v490_v31  ;;  %493 = vst [vmem:[%s8670_s7 + $0x280] sm:$0xf] %v492_v32  ;;  %v494_v33 = vld [vmem:[%s8666_s6 + $0xa10] sm:$0xf] }
  0x87   : > { %v496_v34 = vld [vmem:[%s8666_s6 + $0xa20] sm:$0xf]  ;;  %v498_v35 = vld [vmem:[%s8666_s6 + $0xa30] sm:$0xf]  ;;  %495 = vst [vmem:[%s8670_s7 + $0x284] sm:$0xf] %v494_v33 }
  0x88   : > { %497 = vst [vmem:[%s8670_s7 + $0x288] sm:$0xf] %v496_v34  ;;  %499 = vst [vmem:[%s8670_s7 + $0x28c] sm:$0xf] %v498_v35  ;;  %v500_v36 = vld [vmem:[%s8666_s6 + $0xa40] sm:$0xf] }
  0x89   : > { %v502_v37 = vld [vmem:[%s8666_s6 + $0xa50] sm:$0xf]  ;;  %v504_v38 = vld [vmem:[%s8666_s6 + $0xa60] sm:$0xf]  ;;  %501 = vst [vmem:[%s8670_s7 + $0x290] sm:$0xf] %v500_v36 }
  0x8a   : > { %503 = vst [vmem:[%s8670_s7 + $0x294] sm:$0xf] %v502_v37  ;;  %505 = vst [vmem:[%s8670_s7 + $0x298] sm:$0xf] %v504_v38  ;;  %v506_v39 = vld [vmem:[%s8666_s6 + $0xa70] sm:$0xf] }
  0x8b   : > { %v508_v40 = vld [vmem:[%s8666_s6 + $0xa80] sm:$0xf]  ;;  %v510_v41 = vld [vmem:[%s8666_s6 + $0xa90] sm:$0xf]  ;;  %507 = vst [vmem:[%s8670_s7 + $0x29c] sm:$0xf] %v506_v39 }
  0x8c   : > { %509 = vst [vmem:[%s8670_s7 + $0x2a0] sm:$0xf] %v508_v40  ;;  %511 = vst [vmem:[%s8670_s7 + $0x2a4] sm:$0xf] %v510_v41  ;;  %v512_v42 = vld [vmem:[%s8666_s6 + $0xaa0] sm:$0xf] }
  0x8d   : > { %v514_v43 = vld [vmem:[%s8666_s6 + $0xab0] sm:$0xf]  ;;  %v516_v44 = vld [vmem:[%s8666_s6 + $0xac0] sm:$0xf]  ;;  %513 = vst [vmem:[%s8670_s7 + $0x2a8] sm:$0xf] %v512_v42 }
  0x8e   : > { %515 = vst [vmem:[%s8670_s7 + $0x2ac] sm:$0xf] %v514_v43  ;;  %517 = vst [vmem:[%s8670_s7 + $0x2b0] sm:$0xf] %v516_v44  ;;  %v518_v45 = vld [vmem:[%s8666_s6 + $0xad0] sm:$0xf] }
  0x8f   : > { %v520_v46 = vld [vmem:[%s8666_s6 + $0xae0] sm:$0xf]  ;;  %v522_v47 = vld [vmem:[%s8666_s6 + $0xaf0] sm:$0xf]  ;;  %519 = vst [vmem:[%s8670_s7 + $0x2b4] sm:$0xf] %v518_v45 }
  0x90   : > { %521 = vst [vmem:[%s8670_s7 + $0x2b8] sm:$0xf] %v520_v46  ;;  %523 = vst [vmem:[%s8670_s7 + $0x2bc] sm:$0xf] %v522_v47  ;;  %v524_v48 = vld [vmem:[%s8666_s6 + $0xb00] sm:$0xf] }
  0x91   : > { %v526_v49 = vld [vmem:[%s8666_s6 + $0xb10] sm:$0xf]  ;;  %v528_v50 = vld [vmem:[%s8666_s6 + $0xb20] sm:$0xf]  ;;  %525 = vst [vmem:[%s8670_s7 + $0x2c0] sm:$0xf] %v524_v48 }
  0x92   : > { %527 = vst [vmem:[%s8670_s7 + $0x2c4] sm:$0xf] %v526_v49  ;;  %529 = vst [vmem:[%s8670_s7 + $0x2c8] sm:$0xf] %v528_v50  ;;  %v530_v51 = vld [vmem:[%s8666_s6 + $0xb30] sm:$0xf] }
  0x93   : > { %v532_v52 = vld [vmem:[%s8666_s6 + $0xb40] sm:$0xf]  ;;  %v534_v53 = vld [vmem:[%s8666_s6 + $0xb50] sm:$0xf]  ;;  %531 = vst [vmem:[%s8670_s7 + $0x2cc] sm:$0xf] %v530_v51 }
  0x94   : > { %533 = vst [vmem:[%s8670_s7 + $0x2d0] sm:$0xf] %v532_v52  ;;  %535 = vst [vmem:[%s8670_s7 + $0x2d4] sm:$0xf] %v534_v53  ;;  %v536_v54 = vld [vmem:[%s8666_s6 + $0xb60] sm:$0xf] }
  0x95   : > { %v538_v55 = vld [vmem:[%s8666_s6 + $0xb70] sm:$0xf]  ;;  %v540_v56 = vld [vmem:[%s8666_s6 + $0xb80] sm:$0xf]  ;;  %537 = vst [vmem:[%s8670_s7 + $0x2d8] sm:$0xf] %v536_v54 }
  0x96   : > { %539 = vst [vmem:[%s8670_s7 + $0x2dc] sm:$0xf] %v538_v55  ;;  %541 = vst [vmem:[%s8670_s7 + $0x2e0] sm:$0xf] %v540_v56  ;;  %v542_v57 = vld [vmem:[%s8666_s6 + $0xb90] sm:$0xf] }
  0x97   : > { %v544_v58 = vld [vmem:[%s8666_s6 + $0xba0] sm:$0xf]  ;;  %v546_v59 = vld [vmem:[%s8666_s6 + $0xbb0] sm:$0xf]  ;;  %543 = vst [vmem:[%s8670_s7 + $0x2e4] sm:$0xf] %v542_v57 }
  0x98   : > { %545 = vst [vmem:[%s8670_s7 + $0x2e8] sm:$0xf] %v544_v58  ;;  %547 = vst [vmem:[%s8670_s7 + $0x2ec] sm:$0xf] %v546_v59  ;;  %v548_v60 = vld [vmem:[%s8666_s6 + $0xbc0] sm:$0xf] }
  0x99   : > { %v550_v61 = vld [vmem:[%s8666_s6 + $0xbd0] sm:$0xf]  ;;  %v552_v62 = vld [vmem:[%s8666_s6 + $0xbe0] sm:$0xf]  ;;  %549 = vst [vmem:[%s8670_s7 + $0x2f0] sm:$0xf] %v548_v60 }
  0x9a   : > { %551 = vst [vmem:[%s8670_s7 + $0x2f4] sm:$0xf] %v550_v61  ;;  %553 = vst [vmem:[%s8670_s7 + $0x2f8] sm:$0xf] %v552_v62  ;;  %v554_v63 = vld [vmem:[%s8666_s6 + $0xbf0] sm:$0xf] }
  0x9b   : > { %v556_v0 = vld [vmem:[%s8666_s6 + $0xc00] sm:$0xf]  ;;  %v558_v1 = vld [vmem:[%s8666_s6 + $0xc10] sm:$0xf]  ;;  %555 = vst [vmem:[%s8670_s7 + $0x2fc] sm:$0xf] %v554_v63 }
  0x9c   : > { %557 = vst [vmem:[%s8670_s7 + $0x300] sm:$0xf] %v556_v0  ;;  %559 = vst [vmem:[%s8670_s7 + $0x304] sm:$0xf] %v558_v1  ;;  %v560_v2 = vld [vmem:[%s8666_s6 + $0xc20] sm:$0xf] }
  0x9d   : > { %v562_v3 = vld [vmem:[%s8666_s6 + $0xc30] sm:$0xf]  ;;  %v564_v4 = vld [vmem:[%s8666_s6 + $0xc40] sm:$0xf]  ;;  %561 = vst [vmem:[%s8670_s7 + $0x308] sm:$0xf] %v560_v2 }
  0x9e   : > { %563 = vst [vmem:[%s8670_s7 + $0x30c] sm:$0xf] %v562_v3  ;;  %565 = vst [vmem:[%s8670_s7 + $0x310] sm:$0xf] %v564_v4  ;;  %v566_v5 = vld [vmem:[%s8666_s6 + $0xc50] sm:$0xf] }
  0x9f   : > { %v568_v6 = vld [vmem:[%s8666_s6 + $0xc60] sm:$0xf]  ;;  %v570_v7 = vld [vmem:[%s8666_s6 + $0xc70] sm:$0xf]  ;;  %567 = vst [vmem:[%s8670_s7 + $0x314] sm:$0xf] %v566_v5 }
  0xa0   : > { %569 = vst [vmem:[%s8670_s7 + $0x318] sm:$0xf] %v568_v6  ;;  %571 = vst [vmem:[%s8670_s7 + $0x31c] sm:$0xf] %v570_v7  ;;  %v572_v8 = vld [vmem:[%s8666_s6 + $0xc80] sm:$0xf] }
  0xa1   : > { %v574_v9 = vld [vmem:[%s8666_s6 + $0xc90] sm:$0xf]  ;;  %v576_v10 = vld [vmem:[%s8666_s6 + $0xca0] sm:$0xf]  ;;  %573 = vst [vmem:[%s8670_s7 + $0x320] sm:$0xf] %v572_v8 }
  0xa2   : > { %575 = vst [vmem:[%s8670_s7 + $0x324] sm:$0xf] %v574_v9  ;;  %577 = vst [vmem:[%s8670_s7 + $0x328] sm:$0xf] %v576_v10  ;;  %v578_v11 = vld [vmem:[%s8666_s6 + $0xcb0] sm:$0xf] }
  0xa3   : > { %v580_v12 = vld [vmem:[%s8666_s6 + $0xcc0] sm:$0xf]  ;;  %v582_v13 = vld [vmem:[%s8666_s6 + $0xcd0] sm:$0xf]  ;;  %579 = vst [vmem:[%s8670_s7 + $0x32c] sm:$0xf] %v578_v11 }
  0xa4   : > { %581 = vst [vmem:[%s8670_s7 + $0x330] sm:$0xf] %v580_v12  ;;  %583 = vst [vmem:[%s8670_s7 + $0x334] sm:$0xf] %v582_v13  ;;  %v584_v14 = vld [vmem:[%s8666_s6 + $0xce0] sm:$0xf] }
  0xa5   : > { %v586_v15 = vld [vmem:[%s8666_s6 + $0xcf0] sm:$0xf]  ;;  %v588_v16 = vld [vmem:[%s8666_s6 + $0xd00] sm:$0xf]  ;;  %585 = vst [vmem:[%s8670_s7 + $0x338] sm:$0xf] %v584_v14 }
  0xa6   : > { %587 = vst [vmem:[%s8670_s7 + $0x33c] sm:$0xf] %v586_v15  ;;  %589 = vst [vmem:[%s8670_s7 + $0x340] sm:$0xf] %v588_v16  ;;  %v590_v17 = vld [vmem:[%s8666_s6 + $0xd10] sm:$0xf] }
  0xa7   : > { %v592_v18 = vld [vmem:[%s8666_s6 + $0xd20] sm:$0xf]  ;;  %v594_v19 = vld [vmem:[%s8666_s6 + $0xd30] sm:$0xf]  ;;  %591 = vst [vmem:[%s8670_s7 + $0x344] sm:$0xf] %v590_v17 }
  0xa8   : > { %593 = vst [vmem:[%s8670_s7 + $0x348] sm:$0xf] %v592_v18  ;;  %595 = vst [vmem:[%s8670_s7 + $0x34c] sm:$0xf] %v594_v19  ;;  %v596_v20 = vld [vmem:[%s8666_s6 + $0xd40] sm:$0xf] }
  0xa9   : > { %v598_v21 = vld [vmem:[%s8666_s6 + $0xd50] sm:$0xf]  ;;  %v600_v22 = vld [vmem:[%s8666_s6 + $0xd60] sm:$0xf]  ;;  %597 = vst [vmem:[%s8670_s7 + $0x350] sm:$0xf] %v596_v20 }
  0xaa   : > { %599 = vst [vmem:[%s8670_s7 + $0x354] sm:$0xf] %v598_v21  ;;  %601 = vst [vmem:[%s8670_s7 + $0x358] sm:$0xf] %v600_v22  ;;  %v602_v23 = vld [vmem:[%s8666_s6 + $0xd70] sm:$0xf] }
  0xab   : > { %v604_v24 = vld [vmem:[%s8666_s6 + $0xd80] sm:$0xf]  ;;  %v606_v25 = vld [vmem:[%s8666_s6 + $0xd90] sm:$0xf]  ;;  %603 = vst [vmem:[%s8670_s7 + $0x35c] sm:$0xf] %v602_v23 }
  0xac   : > { %605 = vst [vmem:[%s8670_s7 + $0x360] sm:$0xf] %v604_v24  ;;  %607 = vst [vmem:[%s8670_s7 + $0x364] sm:$0xf] %v606_v25  ;;  %v608_v26 = vld [vmem:[%s8666_s6 + $0xda0] sm:$0xf] }
  0xad   : > { %v610_v27 = vld [vmem:[%s8666_s6 + $0xdb0] sm:$0xf]  ;;  %v612_v28 = vld [vmem:[%s8666_s6 + $0xdc0] sm:$0xf]  ;;  %609 = vst [vmem:[%s8670_s7 + $0x368] sm:$0xf] %v608_v26 }
  0xae   : > { %611 = vst [vmem:[%s8670_s7 + $0x36c] sm:$0xf] %v610_v27  ;;  %613 = vst [vmem:[%s8670_s7 + $0x370] sm:$0xf] %v612_v28  ;;  %v614_v29 = vld [vmem:[%s8666_s6 + $0xdd0] sm:$0xf] }
  0xaf   : > { %v616_v30 = vld [vmem:[%s8666_s6 + $0xde0] sm:$0xf]  ;;  %v618_v31 = vld [vmem:[%s8666_s6 + $0xdf0] sm:$0xf]  ;;  %615 = vst [vmem:[%s8670_s7 + $0x374] sm:$0xf] %v614_v29 }
  0xb0   : > { %617 = vst [vmem:[%s8670_s7 + $0x378] sm:$0xf] %v616_v30  ;;  %619 = vst [vmem:[%s8670_s7 + $0x37c] sm:$0xf] %v618_v31  ;;  %v620_v32 = vld [vmem:[%s8666_s6 + $0xe00] sm:$0xf] }
  0xb1   : > { %v622_v33 = vld [vmem:[%s8666_s6 + $0xe10] sm:$0xf]  ;;  %v624_v34 = vld [vmem:[%s8666_s6 + $0xe20] sm:$0xf]  ;;  %621 = vst [vmem:[%s8670_s7 + $0x380] sm:$0xf] %v620_v32 }
  0xb2   : > { %623 = vst [vmem:[%s8670_s7 + $0x384] sm:$0xf] %v622_v33  ;;  %625 = vst [vmem:[%s8670_s7 + $0x388] sm:$0xf] %v624_v34  ;;  %v626_v35 = vld [vmem:[%s8666_s6 + $0xe30] sm:$0xf] }
  0xb3   : > { %v628_v36 = vld [vmem:[%s8666_s6 + $0xe40] sm:$0xf]  ;;  %v630_v37 = vld [vmem:[%s8666_s6 + $0xe50] sm:$0xf]  ;;  %627 = vst [vmem:[%s8670_s7 + $0x38c] sm:$0xf] %v626_v35 }
  0xb4   : > { %629 = vst [vmem:[%s8670_s7 + $0x390] sm:$0xf] %v628_v36  ;;  %631 = vst [vmem:[%s8670_s7 + $0x394] sm:$0xf] %v630_v37  ;;  %v632_v38 = vld [vmem:[%s8666_s6 + $0xe60] sm:$0xf] }
  0xb5   : > { %v634_v39 = vld [vmem:[%s8666_s6 + $0xe70] sm:$0xf]  ;;  %v636_v40 = vld [vmem:[%s8666_s6 + $0xe80] sm:$0xf]  ;;  %633 = vst [vmem:[%s8670_s7 + $0x398] sm:$0xf] %v632_v38 }
  0xb6   : > { %635 = vst [vmem:[%s8670_s7 + $0x39c] sm:$0xf] %v634_v39  ;;  %637 = vst [vmem:[%s8670_s7 + $0x3a0] sm:$0xf] %v636_v40  ;;  %v638_v41 = vld [vmem:[%s8666_s6 + $0xe90] sm:$0xf] }
  0xb7   : > { %v640_v42 = vld [vmem:[%s8666_s6 + $0xea0] sm:$0xf]  ;;  %v642_v43 = vld [vmem:[%s8666_s6 + $0xeb0] sm:$0xf]  ;;  %639 = vst [vmem:[%s8670_s7 + $0x3a4] sm:$0xf] %v638_v41 }
  0xb8   : > { %641 = vst [vmem:[%s8670_s7 + $0x3a8] sm:$0xf] %v640_v42  ;;  %643 = vst [vmem:[%s8670_s7 + $0x3ac] sm:$0xf] %v642_v43  ;;  %v644_v44 = vld [vmem:[%s8666_s6 + $0xec0] sm:$0xf] }
  0xb9   : > { %v646_v45 = vld [vmem:[%s8666_s6 + $0xed0] sm:$0xf]  ;;  %v648_v46 = vld [vmem:[%s8666_s6 + $0xee0] sm:$0xf]  ;;  %645 = vst [vmem:[%s8670_s7 + $0x3b0] sm:$0xf] %v644_v44 }
  0xba   : > { %647 = vst [vmem:[%s8670_s7 + $0x3b4] sm:$0xf] %v646_v45  ;;  %649 = vst [vmem:[%s8670_s7 + $0x3b8] sm:$0xf] %v648_v46  ;;  %v650_v47 = vld [vmem:[%s8666_s6 + $0xef0] sm:$0xf] }
  0xbb   : > { %v652_v48 = vld [vmem:[%s8666_s6 + $0xf00] sm:$0xf]  ;;  %v654_v49 = vld [vmem:[%s8666_s6 + $0xf10] sm:$0xf]  ;;  %651 = vst [vmem:[%s8670_s7 + $0x3bc] sm:$0xf] %v650_v47 }
  0xbc   : > { %653 = vst [vmem:[%s8670_s7 + $0x3c0] sm:$0xf] %v652_v48  ;;  %655 = vst [vmem:[%s8670_s7 + $0x3c4] sm:$0xf] %v654_v49  ;;  %v656_v50 = vld [vmem:[%s8666_s6 + $0xf20] sm:$0xf] }
  0xbd   : > { %v658_v51 = vld [vmem:[%s8666_s6 + $0xf30] sm:$0xf]  ;;  %v660_v52 = vld [vmem:[%s8666_s6 + $0xf40] sm:$0xf]  ;;  %657 = vst [vmem:[%s8670_s7 + $0x3c8] sm:$0xf] %v656_v50 }
  0xbe   : > { %659 = vst [vmem:[%s8670_s7 + $0x3cc] sm:$0xf] %v658_v51  ;;  %661 = vst [vmem:[%s8670_s7 + $0x3d0] sm:$0xf] %v660_v52  ;;  %v662_v53 = vld [vmem:[%s8666_s6 + $0xf50] sm:$0xf] }
  0xbf   : > { %v664_v54 = vld [vmem:[%s8666_s6 + $0xf60] sm:$0xf]  ;;  %v666_v55 = vld [vmem:[%s8666_s6 + $0xf70] sm:$0xf]  ;;  %663 = vst [vmem:[%s8670_s7 + $0x3d4] sm:$0xf] %v662_v53 }
  0xc0   : > { %665 = vst [vmem:[%s8670_s7 + $0x3d8] sm:$0xf] %v664_v54  ;;  %667 = vst [vmem:[%s8670_s7 + $0x3dc] sm:$0xf] %v666_v55  ;;  %v668_v56 = vld [vmem:[%s8666_s6 + $0xf80] sm:$0xf] }
  0xc1   : > { %v670_v57 = vld [vmem:[%s8666_s6 + $0xf90] sm:$0xf]  ;;  %v672_v58 = vld [vmem:[%s8666_s6 + $0xfa0] sm:$0xf]  ;;  %669 = vst [vmem:[%s8670_s7 + $0x3e0] sm:$0xf] %v668_v56 }
  0xc2   : > { %671 = vst [vmem:[%s8670_s7 + $0x3e4] sm:$0xf] %v670_v57  ;;  %673 = vst [vmem:[%s8670_s7 + $0x3e8] sm:$0xf] %v672_v58  ;;  %v674_v59 = vld [vmem:[%s8666_s6 + $0xfb0] sm:$0xf] }
  0xc3   : > { %v676_v60 = vld [vmem:[%s8666_s6 + $0xfc0] sm:$0xf]  ;;  %v678_v61 = vld [vmem:[%s8666_s6 + $0xfd0] sm:$0xf]  ;;  %675 = vst [vmem:[%s8670_s7 + $0x3ec] sm:$0xf] %v674_v59 }
  0xc4   : > { %677 = vst [vmem:[%s8670_s7 + $0x3f0] sm:$0xf] %v676_v60  ;;  %679 = vst [vmem:[%s8670_s7 + $0x3f4] sm:$0xf] %v678_v61  ;;  %v680_v62 = vld [vmem:[%s8666_s6 + $0xfe0] sm:$0xf] }
  0xc5   : > { %v682_v63 = vld [vmem:[%s8666_s6 + $0xff0] sm:$0xf]  ;;  %v684_v0 = vld [vmem:[%s8666_s6 + $0x1000] sm:$0xf]  ;;  %681 = vst [vmem:[%s8670_s7 + $0x3f8] sm:$0xf] %v680_v62 }
  0xc6   : > { %683 = vst [vmem:[%s8670_s7 + $0x3fc] sm:$0xf] %v682_v63  ;;  %685 = vst [vmem:[%s8670_s7 + $0x400] sm:$0xf] %v684_v0  ;;  %v686_v1 = vld [vmem:[%s8666_s6 + $0x1010] sm:$0xf] }
  0xc7   : > { %v688_v2 = vld [vmem:[%s8666_s6 + $0x1020] sm:$0xf]  ;;  %v690_v3 = vld [vmem:[%s8666_s6 + $0x1030] sm:$0xf]  ;;  %687 = vst [vmem:[%s8670_s7 + $0x404] sm:$0xf] %v686_v1 }
  0xc8   : > { %689 = vst [vmem:[%s8670_s7 + $0x408] sm:$0xf] %v688_v2  ;;  %691 = vst [vmem:[%s8670_s7 + $0x40c] sm:$0xf] %v690_v3  ;;  %v692_v4 = vld [vmem:[%s8666_s6 + $0x1040] sm:$0xf] }
  0xc9   : > { %v694_v5 = vld [vmem:[%s8666_s6 + $0x1050] sm:$0xf]  ;;  %v696_v6 = vld [vmem:[%s8666_s6 + $0x1060] sm:$0xf]  ;;  %693 = vst [vmem:[%s8670_s7 + $0x410] sm:$0xf] %v692_v4 }
  0xca   : > { %695 = vst [vmem:[%s8670_s7 + $0x414] sm:$0xf] %v694_v5  ;;  %697 = vst [vmem:[%s8670_s7 + $0x418] sm:$0xf] %v696_v6  ;;  %v698_v7 = vld [vmem:[%s8666_s6 + $0x1070] sm:$0xf] }
  0xcb   : > { %v700_v8 = vld [vmem:[%s8666_s6 + $0x1080] sm:$0xf]  ;;  %v702_v9 = vld [vmem:[%s8666_s6 + $0x1090] sm:$0xf]  ;;  %699 = vst [vmem:[%s8670_s7 + $0x41c] sm:$0xf] %v698_v7 }
  0xcc   : > { %701 = vst [vmem:[%s8670_s7 + $0x420] sm:$0xf] %v700_v8  ;;  %703 = vst [vmem:[%s8670_s7 + $0x424] sm:$0xf] %v702_v9  ;;  %v704_v10 = vld [vmem:[%s8666_s6 + $0x10a0] sm:$0xf] }
  0xcd   : > { %v706_v11 = vld [vmem:[%s8666_s6 + $0x10b0] sm:$0xf]  ;;  %v708_v12 = vld [vmem:[%s8666_s6 + $0x10c0] sm:$0xf]  ;;  %705 = vst [vmem:[%s8670_s7 + $0x428] sm:$0xf] %v704_v10 }
  0xce   : > { %707 = vst [vmem:[%s8670_s7 + $0x42c] sm:$0xf] %v706_v11  ;;  %709 = vst [vmem:[%s8670_s7 + $0x430] sm:$0xf] %v708_v12  ;;  %v710_v13 = vld [vmem:[%s8666_s6 + $0x10d0] sm:$0xf] }
  0xcf   : > { %v712_v14 = vld [vmem:[%s8666_s6 + $0x10e0] sm:$0xf]  ;;  %v714_v15 = vld [vmem:[%s8666_s6 + $0x10f0] sm:$0xf]  ;;  %711 = vst [vmem:[%s8670_s7 + $0x434] sm:$0xf] %v710_v13 }
  0xd0   : > { %713 = vst [vmem:[%s8670_s7 + $0x438] sm:$0xf] %v712_v14  ;;  %715 = vst [vmem:[%s8670_s7 + $0x43c] sm:$0xf] %v714_v15  ;;  %v716_v16 = vld [vmem:[%s8666_s6 + $0x1100] sm:$0xf] }
  0xd1   : > { %v718_v17 = vld [vmem:[%s8666_s6 + $0x1110] sm:$0xf]  ;;  %v720_v18 = vld [vmem:[%s8666_s6 + $0x1120] sm:$0xf]  ;;  %717 = vst [vmem:[%s8670_s7 + $0x440] sm:$0xf] %v716_v16 }
  0xd2   : > { %719 = vst [vmem:[%s8670_s7 + $0x444] sm:$0xf] %v718_v17  ;;  %721 = vst [vmem:[%s8670_s7 + $0x448] sm:$0xf] %v720_v18  ;;  %v722_v19 = vld [vmem:[%s8666_s6 + $0x1130] sm:$0xf] }
  0xd3   : > { %v724_v20 = vld [vmem:[%s8666_s6 + $0x1140] sm:$0xf]  ;;  %v726_v21 = vld [vmem:[%s8666_s6 + $0x1150] sm:$0xf]  ;;  %723 = vst [vmem:[%s8670_s7 + $0x44c] sm:$0xf] %v722_v19 }
  0xd4   : > { %725 = vst [vmem:[%s8670_s7 + $0x450] sm:$0xf] %v724_v20  ;;  %727 = vst [vmem:[%s8670_s7 + $0x454] sm:$0xf] %v726_v21  ;;  %v728_v22 = vld [vmem:[%s8666_s6 + $0x1160] sm:$0xf] }
  0xd5   : > { %v730_v23 = vld [vmem:[%s8666_s6 + $0x1170] sm:$0xf]  ;;  %v732_v24 = vld [vmem:[%s8666_s6 + $0x1180] sm:$0xf]  ;;  %729 = vst [vmem:[%s8670_s7 + $0x458] sm:$0xf] %v728_v22 }
  0xd6   : > { %731 = vst [vmem:[%s8670_s7 + $0x45c] sm:$0xf] %v730_v23  ;;  %733 = vst [vmem:[%s8670_s7 + $0x460] sm:$0xf] %v732_v24  ;;  %v734_v25 = vld [vmem:[%s8666_s6 + $0x1190] sm:$0xf] }
  0xd7   : > { %v736_v26 = vld [vmem:[%s8666_s6 + $0x11a0] sm:$0xf]  ;;  %v738_v27 = vld [vmem:[%s8666_s6 + $0x11b0] sm:$0xf]  ;;  %735 = vst [vmem:[%s8670_s7 + $0x464] sm:$0xf] %v734_v25 }
  0xd8   : > { %737 = vst [vmem:[%s8670_s7 + $0x468] sm:$0xf] %v736_v26  ;;  %739 = vst [vmem:[%s8670_s7 + $0x46c] sm:$0xf] %v738_v27  ;;  %v740_v28 = vld [vmem:[%s8666_s6 + $0x11c0] sm:$0xf] }
  0xd9   : > { %v742_v29 = vld [vmem:[%s8666_s6 + $0x11d0] sm:$0xf]  ;;  %v744_v30 = vld [vmem:[%s8666_s6 + $0x11e0] sm:$0xf]  ;;  %741 = vst [vmem:[%s8670_s7 + $0x470] sm:$0xf] %v740_v28 }
  0xda   : > { %743 = vst [vmem:[%s8670_s7 + $0x474] sm:$0xf] %v742_v29  ;;  %745 = vst [vmem:[%s8670_s7 + $0x478] sm:$0xf] %v744_v30  ;;  %v746_v31 = vld [vmem:[%s8666_s6 + $0x11f0] sm:$0xf] }
  0xdb   : > { %v748_v32 = vld [vmem:[%s8666_s6 + $0x1200] sm:$0xf]  ;;  %v750_v33 = vld [vmem:[%s8666_s6 + $0x1210] sm:$0xf]  ;;  %747 = vst [vmem:[%s8670_s7 + $0x47c] sm:$0xf] %v746_v31 }
  0xdc   : > { %749 = vst [vmem:[%s8670_s7 + $0x480] sm:$0xf] %v748_v32  ;;  %751 = vst [vmem:[%s8670_s7 + $0x484] sm:$0xf] %v750_v33  ;;  %v752_v34 = vld [vmem:[%s8666_s6 + $0x1220] sm:$0xf] }
  0xdd   : > { %v754_v35 = vld [vmem:[%s8666_s6 + $0x1230] sm:$0xf]  ;;  %v756_v36 = vld [vmem:[%s8666_s6 + $0x1240] sm:$0xf]  ;;  %753 = vst [vmem:[%s8670_s7 + $0x488] sm:$0xf] %v752_v34 }
  0xde   : > { %755 = vst [vmem:[%s8670_s7 + $0x48c] sm:$0xf] %v754_v35  ;;  %757 = vst [vmem:[%s8670_s7 + $0x490] sm:$0xf] %v756_v36  ;;  %v758_v37 = vld [vmem:[%s8666_s6 + $0x1250] sm:$0xf] }
  0xdf   : > { %v760_v38 = vld [vmem:[%s8666_s6 + $0x1260] sm:$0xf]  ;;  %v762_v39 = vld [vmem:[%s8666_s6 + $0x1270] sm:$0xf]  ;;  %759 = vst [vmem:[%s8670_s7 + $0x494] sm:$0xf] %v758_v37 }
  0xe0   : > { %761 = vst [vmem:[%s8670_s7 + $0x498] sm:$0xf] %v760_v38  ;;  %763 = vst [vmem:[%s8670_s7 + $0x49c] sm:$0xf] %v762_v39  ;;  %v764_v40 = vld [vmem:[%s8666_s6 + $0x1280] sm:$0xf] }
  0xe1   : > { %v766_v41 = vld [vmem:[%s8666_s6 + $0x1290] sm:$0xf]  ;;  %v768_v42 = vld [vmem:[%s8666_s6 + $0x12a0] sm:$0xf]  ;;  %765 = vst [vmem:[%s8670_s7 + $0x4a0] sm:$0xf] %v764_v40 }
  0xe2   : > { %767 = vst [vmem:[%s8670_s7 + $0x4a4] sm:$0xf] %v766_v41  ;;  %769 = vst [vmem:[%s8670_s7 + $0x4a8] sm:$0xf] %v768_v42  ;;  %v770_v43 = vld [vmem:[%s8666_s6 + $0x12b0] sm:$0xf] }
  0xe3   : > { %v772_v44 = vld [vmem:[%s8666_s6 + $0x12c0] sm:$0xf]  ;;  %v774_v45 = vld [vmem:[%s8666_s6 + $0x12d0] sm:$0xf]  ;;  %771 = vst [vmem:[%s8670_s7 + $0x4ac] sm:$0xf] %v770_v43 }
  0xe4   : > { %773 = vst [vmem:[%s8670_s7 + $0x4b0] sm:$0xf] %v772_v44  ;;  %775 = vst [vmem:[%s8670_s7 + $0x4b4] sm:$0xf] %v774_v45  ;;  %v776_v46 = vld [vmem:[%s8666_s6 + $0x12e0] sm:$0xf] }
  0xe5   : > { %v778_v47 = vld [vmem:[%s8666_s6 + $0x12f0] sm:$0xf]  ;;  %v780_v48 = vld [vmem:[%s8666_s6 + $0x1300] sm:$0xf]  ;;  %777 = vst [vmem:[%s8670_s7 + $0x4b8] sm:$0xf] %v776_v46 }
  0xe6   : > { %779 = vst [vmem:[%s8670_s7 + $0x4bc] sm:$0xf] %v778_v47  ;;  %781 = vst [vmem:[%s8670_s7 + $0x4c0] sm:$0xf] %v780_v48  ;;  %v782_v49 = vld [vmem:[%s8666_s6 + $0x1310] sm:$0xf] }
  0xe7   : > { %v784_v50 = vld [vmem:[%s8666_s6 + $0x1320] sm:$0xf]  ;;  %v786_v51 = vld [vmem:[%s8666_s6 + $0x1330] sm:$0xf]  ;;  %783 = vst [vmem:[%s8670_s7 + $0x4c4] sm:$0xf] %v782_v49 }
  0xe8   : > { %785 = vst [vmem:[%s8670_s7 + $0x4c8] sm:$0xf] %v784_v50  ;;  %787 = vst [vmem:[%s8670_s7 + $0x4cc] sm:$0xf] %v786_v51  ;;  %v788_v52 = vld [vmem:[%s8666_s6 + $0x1340] sm:$0xf] }
  0xe9   : > { %v790_v53 = vld [vmem:[%s8666_s6 + $0x1350] sm:$0xf]  ;;  %v792_v54 = vld [vmem:[%s8666_s6 + $0x1360] sm:$0xf]  ;;  %789 = vst [vmem:[%s8670_s7 + $0x4d0] sm:$0xf] %v788_v52 }
  0xea   : > { %791 = vst [vmem:[%s8670_s7 + $0x4d4] sm:$0xf] %v790_v53  ;;  %793 = vst [vmem:[%s8670_s7 + $0x4d8] sm:$0xf] %v792_v54  ;;  %v794_v55 = vld [vmem:[%s8666_s6 + $0x1370] sm:$0xf] }
  0xeb   : > { %v796_v56 = vld [vmem:[%s8666_s6 + $0x1380] sm:$0xf]  ;;  %v798_v57 = vld [vmem:[%s8666_s6 + $0x1390] sm:$0xf]  ;;  %795 = vst [vmem:[%s8670_s7 + $0x4dc] sm:$0xf] %v794_v55 }
  0xec   : > { %797 = vst [vmem:[%s8670_s7 + $0x4e0] sm:$0xf] %v796_v56  ;;  %799 = vst [vmem:[%s8670_s7 + $0x4e4] sm:$0xf] %v798_v57  ;;  %v800_v58 = vld [vmem:[%s8666_s6 + $0x13a0] sm:$0xf] }
  0xed   : > { %v802_v59 = vld [vmem:[%s8666_s6 + $0x13b0] sm:$0xf]  ;;  %v804_v60 = vld [vmem:[%s8666_s6 + $0x13c0] sm:$0xf]  ;;  %801 = vst [vmem:[%s8670_s7 + $0x4e8] sm:$0xf] %v800_v58 }
  0xee   : > { %803 = vst [vmem:[%s8670_s7 + $0x4ec] sm:$0xf] %v802_v59  ;;  %805 = vst [vmem:[%s8670_s7 + $0x4f0] sm:$0xf] %v804_v60  ;;  %v806_v61 = vld [vmem:[%s8666_s6 + $0x13d0] sm:$0xf] }
  0xef   : > { %v808_v62 = vld [vmem:[%s8666_s6 + $0x13e0] sm:$0xf]  ;;  %v810_v63 = vld [vmem:[%s8666_s6 + $0x13f0] sm:$0xf]  ;;  %807 = vst [vmem:[%s8670_s7 + $0x4f4] sm:$0xf] %v806_v61 }
  0xf0   : > { %809 = vst [vmem:[%s8670_s7 + $0x4f8] sm:$0xf] %v808_v62  ;;  %811 = vst [vmem:[%s8670_s7 + $0x4fc] sm:$0xf] %v810_v63  ;;  %v812_v0 = vld [vmem:[%s8666_s6 + $0x1400] sm:$0xf] }
  0xf1   : > { %v814_v1 = vld [vmem:[%s8666_s6 + $0x1410] sm:$0xf]  ;;  %v816_v2 = vld [vmem:[%s8666_s6 + $0x1420] sm:$0xf]  ;;  %813 = vst [vmem:[%s8670_s7 + $0x500] sm:$0xf] %v812_v0 }
  0xf2   : > { %815 = vst [vmem:[%s8670_s7 + $0x504] sm:$0xf] %v814_v1  ;;  %817 = vst [vmem:[%s8670_s7 + $0x508] sm:$0xf] %v816_v2  ;;  %v818_v3 = vld [vmem:[%s8666_s6 + $0x1430] sm:$0xf] }
  0xf3   : > { %v820_v4 = vld [vmem:[%s8666_s6 + $0x1440] sm:$0xf]  ;;  %v822_v5 = vld [vmem:[%s8666_s6 + $0x1450] sm:$0xf]  ;;  %819 = vst [vmem:[%s8670_s7 + $0x50c] sm:$0xf] %v818_v3 }
  0xf4   : > { %821 = vst [vmem:[%s8670_s7 + $0x510] sm:$0xf] %v820_v4  ;;  %823 = vst [vmem:[%s8670_s7 + $0x514] sm:$0xf] %v822_v5  ;;  %v824_v6 = vld [vmem:[%s8666_s6 + $0x1460] sm:$0xf] }
  0xf5   : > { %v826_v7 = vld [vmem:[%s8666_s6 + $0x1470] sm:$0xf]  ;;  %v828_v8 = vld [vmem:[%s8666_s6 + $0x1480] sm:$0xf]  ;;  %825 = vst [vmem:[%s8670_s7 + $0x518] sm:$0xf] %v824_v6 }
  0xf6   : > { %827 = vst [vmem:[%s8670_s7 + $0x51c] sm:$0xf] %v826_v7  ;;  %829 = vst [vmem:[%s8670_s7 + $0x520] sm:$0xf] %v828_v8  ;;  %v830_v9 = vld [vmem:[%s8666_s6 + $0x1490] sm:$0xf] }
  0xf7   : > { %v832_v10 = vld [vmem:[%s8666_s6 + $0x14a0] sm:$0xf]  ;;  %v834_v11 = vld [vmem:[%s8666_s6 + $0x14b0] sm:$0xf]  ;;  %831 = vst [vmem:[%s8670_s7 + $0x524] sm:$0xf] %v830_v9 }
  0xf8   : > { %833 = vst [vmem:[%s8670_s7 + $0x528] sm:$0xf] %v832_v10  ;;  %835 = vst [vmem:[%s8670_s7 + $0x52c] sm:$0xf] %v834_v11  ;;  %v836_v12 = vld [vmem:[%s8666_s6 + $0x14c0] sm:$0xf] }
  0xf9   : > { %v838_v13 = vld [vmem:[%s8666_s6 + $0x14d0] sm:$0xf]  ;;  %v840_v14 = vld [vmem:[%s8666_s6 + $0x14e0] sm:$0xf]  ;;  %837 = vst [vmem:[%s8670_s7 + $0x530] sm:$0xf] %v836_v12 }
  0xfa   : > { %839 = vst [vmem:[%s8670_s7 + $0x534] sm:$0xf] %v838_v13  ;;  %841 = vst [vmem:[%s8670_s7 + $0x538] sm:$0xf] %v840_v14  ;;  %v842_v15 = vld [vmem:[%s8666_s6 + $0x14f0] sm:$0xf] }
  0xfb   : > { %v844_v16 = vld [vmem:[%s8666_s6 + $0x1500] sm:$0xf]  ;;  %v846_v17 = vld [vmem:[%s8666_s6 + $0x1510] sm:$0xf]  ;;  %843 = vst [vmem:[%s8670_s7 + $0x53c] sm:$0xf] %v842_v15 }
  0xfc   : > { %845 = vst [vmem:[%s8670_s7 + $0x540] sm:$0xf] %v844_v16  ;;  %847 = vst [vmem:[%s8670_s7 + $0x544] sm:$0xf] %v846_v17  ;;  %v848_v18 = vld [vmem:[%s8666_s6 + $0x1520] sm:$0xf] }
  0xfd   : > { %v850_v19 = vld [vmem:[%s8666_s6 + $0x1530] sm:$0xf]  ;;  %v852_v20 = vld [vmem:[%s8666_s6 + $0x1540] sm:$0xf]  ;;  %849 = vst [vmem:[%s8670_s7 + $0x548] sm:$0xf] %v848_v18 }
  0xfe   : > { %851 = vst [vmem:[%s8670_s7 + $0x54c] sm:$0xf] %v850_v19  ;;  %853 = vst [vmem:[%s8670_s7 + $0x550] sm:$0xf] %v852_v20  ;;  %v854_v21 = vld [vmem:[%s8666_s6 + $0x1550] sm:$0xf] }
  0xff   : > { %v856_v22 = vld [vmem:[%s8666_s6 + $0x1560] sm:$0xf]  ;;  %v858_v23 = vld [vmem:[%s8666_s6 + $0x1570] sm:$0xf]  ;;  %855 = vst [vmem:[%s8670_s7 + $0x554] sm:$0xf] %v854_v21 }
 0x100   : > { %857 = vst [vmem:[%s8670_s7 + $0x558] sm:$0xf] %v856_v22  ;;  %859 = vst [vmem:[%s8670_s7 + $0x55c] sm:$0xf] %v858_v23  ;;  %v860_v24 = vld [vmem:[%s8666_s6 + $0x1580] sm:$0xf] }
 0x101   : > { %v862_v25 = vld [vmem:[%s8666_s6 + $0x1590] sm:$0xf]  ;;  %v864_v26 = vld [vmem:[%s8666_s6 + $0x15a0] sm:$0xf]  ;;  %861 = vst [vmem:[%s8670_s7 + $0x560] sm:$0xf] %v860_v24 }
 0x102   : > { %863 = vst [vmem:[%s8670_s7 + $0x564] sm:$0xf] %v862_v25  ;;  %865 = vst [vmem:[%s8670_s7 + $0x568] sm:$0xf] %v864_v26  ;;  %v866_v27 = vld [vmem:[%s8666_s6 + $0x15b0] sm:$0xf] }
 0x103   : > { %v868_v28 = vld [vmem:[%s8666_s6 + $0x15c0] sm:$0xf]  ;;  %v870_v29 = vld [vmem:[%s8666_s6 + $0x15d0] sm:$0xf]  ;;  %867 = vst [vmem:[%s8670_s7 + $0x56c] sm:$0xf] %v866_v27 }
 0x104   : > { %869 = vst [vmem:[%s8670_s7 + $0x570] sm:$0xf] %v868_v28  ;;  %871 = vst [vmem:[%s8670_s7 + $0x574] sm:$0xf] %v870_v29  ;;  %v872_v30 = vld [vmem:[%s8666_s6 + $0x15e0] sm:$0xf] }
 0x105   : > { %v874_v31 = vld [vmem:[%s8666_s6 + $0x15f0] sm:$0xf]  ;;  %v876_v32 = vld [vmem:[%s8666_s6 + $0x1600] sm:$0xf]  ;;  %873 = vst [vmem:[%s8670_s7 + $0x578] sm:$0xf] %v872_v30 }
 0x106   : > { %875 = vst [vmem:[%s8670_s7 + $0x57c] sm:$0xf] %v874_v31  ;;  %877 = vst [vmem:[%s8670_s7 + $0x580] sm:$0xf] %v876_v32  ;;  %v878_v33 = vld [vmem:[%s8666_s6 + $0x1610] sm:$0xf] }
 0x107   : > { %v880_v34 = vld [vmem:[%s8666_s6 + $0x1620] sm:$0xf]  ;;  %v882_v35 = vld [vmem:[%s8666_s6 + $0x1630] sm:$0xf]  ;;  %879 = vst [vmem:[%s8670_s7 + $0x584] sm:$0xf] %v878_v33 }
 0x108   : > { %881 = vst [vmem:[%s8670_s7 + $0x588] sm:$0xf] %v880_v34  ;;  %883 = vst [vmem:[%s8670_s7 + $0x58c] sm:$0xf] %v882_v35  ;;  %v884_v36 = vld [vmem:[%s8666_s6 + $0x1640] sm:$0xf] }
 0x109   : > { %v886_v37 = vld [vmem:[%s8666_s6 + $0x1650] sm:$0xf]  ;;  %v888_v38 = vld [vmem:[%s8666_s6 + $0x1660] sm:$0xf]  ;;  %885 = vst [vmem:[%s8670_s7 + $0x590] sm:$0xf] %v884_v36 }
 0x10a   : > { %887 = vst [vmem:[%s8670_s7 + $0x594] sm:$0xf] %v886_v37  ;;  %889 = vst [vmem:[%s8670_s7 + $0x598] sm:$0xf] %v888_v38  ;;  %v890_v39 = vld [vmem:[%s8666_s6 + $0x1670] sm:$0xf] }
 0x10b   : > { %v892_v40 = vld [vmem:[%s8666_s6 + $0x1680] sm:$0xf]  ;;  %v894_v41 = vld [vmem:[%s8666_s6 + $0x1690] sm:$0xf]  ;;  %891 = vst [vmem:[%s8670_s7 + $0x59c] sm:$0xf] %v890_v39 }
 0x10c   : > { %893 = vst [vmem:[%s8670_s7 + $0x5a0] sm:$0xf] %v892_v40  ;;  %895 = vst [vmem:[%s8670_s7 + $0x5a4] sm:$0xf] %v894_v41  ;;  %v896_v42 = vld [vmem:[%s8666_s6 + $0x16a0] sm:$0xf] }
 0x10d   : > { %v898_v43 = vld [vmem:[%s8666_s6 + $0x16b0] sm:$0xf]  ;;  %v900_v44 = vld [vmem:[%s8666_s6 + $0x16c0] sm:$0xf]  ;;  %897 = vst [vmem:[%s8670_s7 + $0x5a8] sm:$0xf] %v896_v42 }
 0x10e   : > { %899 = vst [vmem:[%s8670_s7 + $0x5ac] sm:$0xf] %v898_v43  ;;  %901 = vst [vmem:[%s8670_s7 + $0x5b0] sm:$0xf] %v900_v44  ;;  %v902_v45 = vld [vmem:[%s8666_s6 + $0x16d0] sm:$0xf] }
 0x10f   : > { %v904_v46 = vld [vmem:[%s8666_s6 + $0x16e0] sm:$0xf]  ;;  %v906_v47 = vld [vmem:[%s8666_s6 + $0x16f0] sm:$0xf]  ;;  %903 = vst [vmem:[%s8670_s7 + $0x5b4] sm:$0xf] %v902_v45 }
 0x110   : > { %905 = vst [vmem:[%s8670_s7 + $0x5b8] sm:$0xf] %v904_v46  ;;  %907 = vst [vmem:[%s8670_s7 + $0x5bc] sm:$0xf] %v906_v47  ;;  %v908_v48 = vld [vmem:[%s8666_s6 + $0x1700] sm:$0xf] }
 0x111   : > { %v910_v49 = vld [vmem:[%s8666_s6 + $0x1710] sm:$0xf]  ;;  %v912_v50 = vld [vmem:[%s8666_s6 + $0x1720] sm:$0xf]  ;;  %909 = vst [vmem:[%s8670_s7 + $0x5c0] sm:$0xf] %v908_v48 }
 0x112   : > { %911 = vst [vmem:[%s8670_s7 + $0x5c4] sm:$0xf] %v910_v49  ;;  %913 = vst [vmem:[%s8670_s7 + $0x5c8] sm:$0xf] %v912_v50  ;;  %v914_v51 = vld [vmem:[%s8666_s6 + $0x1730] sm:$0xf] }
 0x113   : > { %v916_v52 = vld [vmem:[%s8666_s6 + $0x1740] sm:$0xf]  ;;  %v918_v53 = vld [vmem:[%s8666_s6 + $0x1750] sm:$0xf]  ;;  %915 = vst [vmem:[%s8670_s7 + $0x5cc] sm:$0xf] %v914_v51 }
 0x114   : > { %917 = vst [vmem:[%s8670_s7 + $0x5d0] sm:$0xf] %v916_v52  ;;  %919 = vst [vmem:[%s8670_s7 + $0x5d4] sm:$0xf] %v918_v53  ;;  %v920_v54 = vld [vmem:[%s8666_s6 + $0x1760] sm:$0xf] }
 0x115   : > { %v922_v55 = vld [vmem:[%s8666_s6 + $0x1770] sm:$0xf]  ;;  %v924_v56 = vld [vmem:[%s8666_s6 + $0x1780] sm:$0xf]  ;;  %921 = vst [vmem:[%s8670_s7 + $0x5d8] sm:$0xf] %v920_v54 }
 0x116   : > { %923 = vst [vmem:[%s8670_s7 + $0x5dc] sm:$0xf] %v922_v55  ;;  %925 = vst [vmem:[%s8670_s7 + $0x5e0] sm:$0xf] %v924_v56  ;;  %v926_v57 = vld [vmem:[%s8666_s6 + $0x1790] sm:$0xf] }
 0x117   : > { %v928_v58 = vld [vmem:[%s8666_s6 + $0x17a0] sm:$0xf]  ;;  %v930_v59 = vld [vmem:[%s8666_s6 + $0x17b0] sm:$0xf]  ;;  %927 = vst [vmem:[%s8670_s7 + $0x5e4] sm:$0xf] %v926_v57 }
 0x118   : > { %929 = vst [vmem:[%s8670_s7 + $0x5e8] sm:$0xf] %v928_v58  ;;  %931 = vst [vmem:[%s8670_s7 + $0x5ec] sm:$0xf] %v930_v59  ;;  %v932_v60 = vld [vmem:[%s8666_s6 + $0x17c0] sm:$0xf] }
 0x119   : > { %v934_v61 = vld [vmem:[%s8666_s6 + $0x17d0] sm:$0xf]  ;;  %v936_v62 = vld [vmem:[%s8666_s6 + $0x17e0] sm:$0xf]  ;;  %933 = vst [vmem:[%s8670_s7 + $0x5f0] sm:$0xf] %v932_v60 }
 0x11a   : > { %935 = vst [vmem:[%s8670_s7 + $0x5f4] sm:$0xf] %v934_v61  ;;  %937 = vst [vmem:[%s8670_s7 + $0x5f8] sm:$0xf] %v936_v62  ;;  %v938_v63 = vld [vmem:[%s8666_s6 + $0x17f0] sm:$0xf] }
 0x11b   : > { %v940_v0 = vld [vmem:[%s8666_s6 + $0x1800] sm:$0xf]  ;;  %v942_v1 = vld [vmem:[%s8666_s6 + $0x1810] sm:$0xf]  ;;  %939 = vst [vmem:[%s8670_s7 + $0x5fc] sm:$0xf] %v938_v63 }
 0x11c   : > { %941 = vst [vmem:[%s8670_s7 + $0x600] sm:$0xf] %v940_v0  ;;  %943 = vst [vmem:[%s8670_s7 + $0x604] sm:$0xf] %v942_v1  ;;  %v944_v2 = vld [vmem:[%s8666_s6 + $0x1820] sm:$0xf] }
 0x11d   : > { %v946_v3 = vld [vmem:[%s8666_s6 + $0x1830] sm:$0xf]  ;;  %v948_v4 = vld [vmem:[%s8666_s6 + $0x1840] sm:$0xf]  ;;  %945 = vst [vmem:[%s8670_s7 + $0x608] sm:$0xf] %v944_v2 }
 0x11e   : > { %947 = vst [vmem:[%s8670_s7 + $0x60c] sm:$0xf] %v946_v3  ;;  %949 = vst [vmem:[%s8670_s7 + $0x610] sm:$0xf] %v948_v4  ;;  %v950_v5 = vld [vmem:[%s8666_s6 + $0x1850] sm:$0xf] }
 0x11f   : > { %v952_v6 = vld [vmem:[%s8666_s6 + $0x1860] sm:$0xf]  ;;  %v954_v7 = vld [vmem:[%s8666_s6 + $0x1870] sm:$0xf]  ;;  %951 = vst [vmem:[%s8670_s7 + $0x614] sm:$0xf] %v950_v5 }
 0x120   : > { %953 = vst [vmem:[%s8670_s7 + $0x618] sm:$0xf] %v952_v6  ;;  %955 = vst [vmem:[%s8670_s7 + $0x61c] sm:$0xf] %v954_v7  ;;  %v956_v8 = vld [vmem:[%s8666_s6 + $0x1880] sm:$0xf] }
 0x121   : > { %v958_v9 = vld [vmem:[%s8666_s6 + $0x1890] sm:$0xf]  ;;  %v960_v10 = vld [vmem:[%s8666_s6 + $0x18a0] sm:$0xf]  ;;  %957 = vst [vmem:[%s8670_s7 + $0x620] sm:$0xf] %v956_v8 }
 0x122   : > { %959 = vst [vmem:[%s8670_s7 + $0x624] sm:$0xf] %v958_v9  ;;  %961 = vst [vmem:[%s8670_s7 + $0x628] sm:$0xf] %v960_v10  ;;  %v962_v11 = vld [vmem:[%s8666_s6 + $0x18b0] sm:$0xf] }
 0x123   : > { %v964_v12 = vld [vmem:[%s8666_s6 + $0x18c0] sm:$0xf]  ;;  %v966_v13 = vld [vmem:[%s8666_s6 + $0x18d0] sm:$0xf]  ;;  %963 = vst [vmem:[%s8670_s7 + $0x62c] sm:$0xf] %v962_v11 }
 0x124   : > { %965 = vst [vmem:[%s8670_s7 + $0x630] sm:$0xf] %v964_v12  ;;  %967 = vst [vmem:[%s8670_s7 + $0x634] sm:$0xf] %v966_v13  ;;  %v968_v14 = vld [vmem:[%s8666_s6 + $0x18e0] sm:$0xf] }
 0x125   : > { %v970_v15 = vld [vmem:[%s8666_s6 + $0x18f0] sm:$0xf]  ;;  %v972_v16 = vld [vmem:[%s8666_s6 + $0x1900] sm:$0xf]  ;;  %969 = vst [vmem:[%s8670_s7 + $0x638] sm:$0xf] %v968_v14 }
 0x126   : > { %971 = vst [vmem:[%s8670_s7 + $0x63c] sm:$0xf] %v970_v15  ;;  %973 = vst [vmem:[%s8670_s7 + $0x640] sm:$0xf] %v972_v16  ;;  %v974_v17 = vld [vmem:[%s8666_s6 + $0x1910] sm:$0xf] }
 0x127   : > { %v976_v18 = vld [vmem:[%s8666_s6 + $0x1920] sm:$0xf]  ;;  %v978_v19 = vld [vmem:[%s8666_s6 + $0x1930] sm:$0xf]  ;;  %975 = vst [vmem:[%s8670_s7 + $0x644] sm:$0xf] %v974_v17 }
 0x128   : > { %977 = vst [vmem:[%s8670_s7 + $0x648] sm:$0xf] %v976_v18  ;;  %979 = vst [vmem:[%s8670_s7 + $0x64c] sm:$0xf] %v978_v19  ;;  %v980_v20 = vld [vmem:[%s8666_s6 + $0x1940] sm:$0xf] }
 0x129   : > { %v982_v21 = vld [vmem:[%s8666_s6 + $0x1950] sm:$0xf]  ;;  %v984_v22 = vld [vmem:[%s8666_s6 + $0x1960] sm:$0xf]  ;;  %981 = vst [vmem:[%s8670_s7 + $0x650] sm:$0xf] %v980_v20 }
 0x12a   : > { %983 = vst [vmem:[%s8670_s7 + $0x654] sm:$0xf] %v982_v21  ;;  %985 = vst [vmem:[%s8670_s7 + $0x658] sm:$0xf] %v984_v22  ;;  %v986_v23 = vld [vmem:[%s8666_s6 + $0x1970] sm:$0xf] }
 0x12b   : > { %v988_v24 = vld [vmem:[%s8666_s6 + $0x1980] sm:$0xf]  ;;  %v990_v25 = vld [vmem:[%s8666_s6 + $0x1990] sm:$0xf]  ;;  %987 = vst [vmem:[%s8670_s7 + $0x65c] sm:$0xf] %v986_v23 }
 0x12c   : > { %989 = vst [vmem:[%s8670_s7 + $0x660] sm:$0xf] %v988_v24  ;;  %991 = vst [vmem:[%s8670_s7 + $0x664] sm:$0xf] %v990_v25  ;;  %v992_v26 = vld [vmem:[%s8666_s6 + $0x19a0] sm:$0xf] }
 0x12d   : > { %v994_v27 = vld [vmem:[%s8666_s6 + $0x19b0] sm:$0xf]  ;;  %v996_v28 = vld [vmem:[%s8666_s6 + $0x19c0] sm:$0xf]  ;;  %993 = vst [vmem:[%s8670_s7 + $0x668] sm:$0xf] %v992_v26 }
 0x12e   : > { %995 = vst [vmem:[%s8670_s7 + $0x66c] sm:$0xf] %v994_v27  ;;  %997 = vst [vmem:[%s8670_s7 + $0x670] sm:$0xf] %v996_v28  ;;  %v998_v29 = vld [vmem:[%s8666_s6 + $0x19d0] sm:$0xf] }
 0x12f   : > { %v1000_v30 = vld [vmem:[%s8666_s6 + $0x19e0] sm:$0xf]  ;;  %v1002_v31 = vld [vmem:[%s8666_s6 + $0x19f0] sm:$0xf]  ;;  %999 = vst [vmem:[%s8670_s7 + $0x674] sm:$0xf] %v998_v29 }
 0x130   : > { %1001 = vst [vmem:[%s8670_s7 + $0x678] sm:$0xf] %v1000_v30  ;;  %1003 = vst [vmem:[%s8670_s7 + $0x67c] sm:$0xf] %v1002_v31  ;;  %v1004_v32 = vld [vmem:[%s8666_s6 + $0x1a00] sm:$0xf] }
 0x131   : > { %v1006_v33 = vld [vmem:[%s8666_s6 + $0x1a10] sm:$0xf]  ;;  %v1008_v34 = vld [vmem:[%s8666_s6 + $0x1a20] sm:$0xf]  ;;  %1005 = vst [vmem:[%s8670_s7 + $0x680] sm:$0xf] %v1004_v32 }
 0x132   : > { %1007 = vst [vmem:[%s8670_s7 + $0x684] sm:$0xf] %v1006_v33  ;;  %1009 = vst [vmem:[%s8670_s7 + $0x688] sm:$0xf] %v1008_v34  ;;  %v1010_v35 = vld [vmem:[%s8666_s6 + $0x1a30] sm:$0xf] }
 0x133   : > { %v1012_v36 = vld [vmem:[%s8666_s6 + $0x1a40] sm:$0xf]  ;;  %v1014_v37 = vld [vmem:[%s8666_s6 + $0x1a50] sm:$0xf]  ;;  %1011 = vst [vmem:[%s8670_s7 + $0x68c] sm:$0xf] %v1010_v35 }
 0x134   : > { %1013 = vst [vmem:[%s8670_s7 + $0x690] sm:$0xf] %v1012_v36  ;;  %1015 = vst [vmem:[%s8670_s7 + $0x694] sm:$0xf] %v1014_v37  ;;  %v1016_v38 = vld [vmem:[%s8666_s6 + $0x1a60] sm:$0xf] }
 0x135   : > { %v1018_v39 = vld [vmem:[%s8666_s6 + $0x1a70] sm:$0xf]  ;;  %v1020_v40 = vld [vmem:[%s8666_s6 + $0x1a80] sm:$0xf]  ;;  %1017 = vst [vmem:[%s8670_s7 + $0x698] sm:$0xf] %v1016_v38 }
 0x136   : > { %1019 = vst [vmem:[%s8670_s7 + $0x69c] sm:$0xf] %v1018_v39  ;;  %1021 = vst [vmem:[%s8670_s7 + $0x6a0] sm:$0xf] %v1020_v40  ;;  %v1022_v41 = vld [vmem:[%s8666_s6 + $0x1a90] sm:$0xf] }
 0x137   : > { %v1024_v42 = vld [vmem:[%s8666_s6 + $0x1aa0] sm:$0xf]  ;;  %v1026_v43 = vld [vmem:[%s8666_s6 + $0x1ab0] sm:$0xf]  ;;  %1023 = vst [vmem:[%s8670_s7 + $0x6a4] sm:$0xf] %v1022_v41 }
 0x138   : > { %1025 = vst [vmem:[%s8670_s7 + $0x6a8] sm:$0xf] %v1024_v42  ;;  %1027 = vst [vmem:[%s8670_s7 + $0x6ac] sm:$0xf] %v1026_v43  ;;  %v1028_v44 = vld [vmem:[%s8666_s6 + $0x1ac0] sm:$0xf] }
 0x139   : > { %v1030_v45 = vld [vmem:[%s8666_s6 + $0x1ad0] sm:$0xf]  ;;  %v1032_v46 = vld [vmem:[%s8666_s6 + $0x1ae0] sm:$0xf]  ;;  %1029 = vst [vmem:[%s8670_s7 + $0x6b0] sm:$0xf] %v1028_v44 }
 0x13a   : > { %1031 = vst [vmem:[%s8670_s7 + $0x6b4] sm:$0xf] %v1030_v45  ;;  %1033 = vst [vmem:[%s8670_s7 + $0x6b8] sm:$0xf] %v1032_v46  ;;  %v1034_v47 = vld [vmem:[%s8666_s6 + $0x1af0] sm:$0xf] }
 0x13b   : > { %v1036_v48 = vld [vmem:[%s8666_s6 + $0x1b00] sm:$0xf]  ;;  %v1038_v49 = vld [vmem:[%s8666_s6 + $0x1b10] sm:$0xf]  ;;  %1035 = vst [vmem:[%s8670_s7 + $0x6bc] sm:$0xf] %v1034_v47 }
 0x13c   : > { %1037 = vst [vmem:[%s8670_s7 + $0x6c0] sm:$0xf] %v1036_v48  ;;  %1039 = vst [vmem:[%s8670_s7 + $0x6c4] sm:$0xf] %v1038_v49  ;;  %v1040_v50 = vld [vmem:[%s8666_s6 + $0x1b20] sm:$0xf] }
 0x13d   : > { %v1042_v51 = vld [vmem:[%s8666_s6 + $0x1b30] sm:$0xf]  ;;  %v1044_v52 = vld [vmem:[%s8666_s6 + $0x1b40] sm:$0xf]  ;;  %1041 = vst [vmem:[%s8670_s7 + $0x6c8] sm:$0xf] %v1040_v50 }
 0x13e   : > { %1043 = vst [vmem:[%s8670_s7 + $0x6cc] sm:$0xf] %v1042_v51  ;;  %1045 = vst [vmem:[%s8670_s7 + $0x6d0] sm:$0xf] %v1044_v52  ;;  %v1046_v53 = vld [vmem:[%s8666_s6 + $0x1b50] sm:$0xf] }
 0x13f   : > { %v1048_v54 = vld [vmem:[%s8666_s6 + $0x1b60] sm:$0xf]  ;;  %v1050_v55 = vld [vmem:[%s8666_s6 + $0x1b70] sm:$0xf]  ;;  %1047 = vst [vmem:[%s8670_s7 + $0x6d4] sm:$0xf] %v1046_v53 }
 0x140   : > { %1049 = vst [vmem:[%s8670_s7 + $0x6d8] sm:$0xf] %v1048_v54  ;;  %1051 = vst [vmem:[%s8670_s7 + $0x6dc] sm:$0xf] %v1050_v55  ;;  %v1052_v56 = vld [vmem:[%s8666_s6 + $0x1b80] sm:$0xf] }
 0x141   : > { %v1054_v57 = vld [vmem:[%s8666_s6 + $0x1b90] sm:$0xf]  ;;  %v1056_v58 = vld [vmem:[%s8666_s6 + $0x1ba0] sm:$0xf]  ;;  %1053 = vst [vmem:[%s8670_s7 + $0x6e0] sm:$0xf] %v1052_v56 }
 0x142   : > { %1055 = vst [vmem:[%s8670_s7 + $0x6e4] sm:$0xf] %v1054_v57  ;;  %1057 = vst [vmem:[%s8670_s7 + $0x6e8] sm:$0xf] %v1056_v58  ;;  %v1058_v59 = vld [vmem:[%s8666_s6 + $0x1bb0] sm:$0xf] }
 0x143   : > { %v1060_v60 = vld [vmem:[%s8666_s6 + $0x1bc0] sm:$0xf]  ;;  %v1062_v61 = vld [vmem:[%s8666_s6 + $0x1bd0] sm:$0xf]  ;;  %1059 = vst [vmem:[%s8670_s7 + $0x6ec] sm:$0xf] %v1058_v59 }
 0x144   : > { %1061 = vst [vmem:[%s8670_s7 + $0x6f0] sm:$0xf] %v1060_v60  ;;  %1063 = vst [vmem:[%s8670_s7 + $0x6f4] sm:$0xf] %v1062_v61  ;;  %v1064_v62 = vld [vmem:[%s8666_s6 + $0x1be0] sm:$0xf] }
 0x145   : > { %v1066_v63 = vld [vmem:[%s8666_s6 + $0x1bf0] sm:$0xf]  ;;  %v1068_v0 = vld [vmem:[%s8666_s6 + $0x1c00] sm:$0xf]  ;;  %1065 = vst [vmem:[%s8670_s7 + $0x6f8] sm:$0xf] %v1064_v62 }
 0x146   : > { %1067 = vst [vmem:[%s8670_s7 + $0x6fc] sm:$0xf] %v1066_v63  ;;  %1069 = vst [vmem:[%s8670_s7 + $0x700] sm:$0xf] %v1068_v0  ;;  %v1070_v1 = vld [vmem:[%s8666_s6 + $0x1c10] sm:$0xf] }
 0x147   : > { %v1072_v2 = vld [vmem:[%s8666_s6 + $0x1c20] sm:$0xf]  ;;  %v1074_v3 = vld [vmem:[%s8666_s6 + $0x1c30] sm:$0xf]  ;;  %1071 = vst [vmem:[%s8670_s7 + $0x704] sm:$0xf] %v1070_v1 }
 0x148   : > { %1073 = vst [vmem:[%s8670_s7 + $0x708] sm:$0xf] %v1072_v2  ;;  %1075 = vst [vmem:[%s8670_s7 + $0x70c] sm:$0xf] %v1074_v3  ;;  %v1076_v4 = vld [vmem:[%s8666_s6 + $0x1c40] sm:$0xf] }
 0x149   : > { %v1078_v5 = vld [vmem:[%s8666_s6 + $0x1c50] sm:$0xf]  ;;  %v1080_v6 = vld [vmem:[%s8666_s6 + $0x1c60] sm:$0xf]  ;;  %1077 = vst [vmem:[%s8670_s7 + $0x710] sm:$0xf] %v1076_v4 }
 0x14a   : > { %1079 = vst [vmem:[%s8670_s7 + $0x714] sm:$0xf] %v1078_v5  ;;  %1081 = vst [vmem:[%s8670_s7 + $0x718] sm:$0xf] %v1080_v6  ;;  %v1082_v7 = vld [vmem:[%s8666_s6 + $0x1c70] sm:$0xf] }
 0x14b   : > { %v1084_v8 = vld [vmem:[%s8666_s6 + $0x1c80] sm:$0xf]  ;;  %v1086_v9 = vld [vmem:[%s8666_s6 + $0x1c90] sm:$0xf]  ;;  %1083 = vst [vmem:[%s8670_s7 + $0x71c] sm:$0xf] %v1082_v7 }
 0x14c   : > { %1085 = vst [vmem:[%s8670_s7 + $0x720] sm:$0xf] %v1084_v8  ;;  %1087 = vst [vmem:[%s8670_s7 + $0x724] sm:$0xf] %v1086_v9  ;;  %v1088_v10 = vld [vmem:[%s8666_s6 + $0x1ca0] sm:$0xf] }
 0x14d   : > { %v1090_v11 = vld [vmem:[%s8666_s6 + $0x1cb0] sm:$0xf]  ;;  %v1092_v12 = vld [vmem:[%s8666_s6 + $0x1cc0] sm:$0xf]  ;;  %1089 = vst [vmem:[%s8670_s7 + $0x728] sm:$0xf] %v1088_v10 }
 0x14e   : > { %1091 = vst [vmem:[%s8670_s7 + $0x72c] sm:$0xf] %v1090_v11  ;;  %1093 = vst [vmem:[%s8670_s7 + $0x730] sm:$0xf] %v1092_v12  ;;  %v1094_v13 = vld [vmem:[%s8666_s6 + $0x1cd0] sm:$0xf] }
 0x14f   : > { %v1096_v14 = vld [vmem:[%s8666_s6 + $0x1ce0] sm:$0xf]  ;;  %v1098_v15 = vld [vmem:[%s8666_s6 + $0x1cf0] sm:$0xf]  ;;  %1095 = vst [vmem:[%s8670_s7 + $0x734] sm:$0xf] %v1094_v13 }
 0x150   : > { %1097 = vst [vmem:[%s8670_s7 + $0x738] sm:$0xf] %v1096_v14  ;;  %1099 = vst [vmem:[%s8670_s7 + $0x73c] sm:$0xf] %v1098_v15  ;;  %v1100_v16 = vld [vmem:[%s8666_s6 + $0x1d00] sm:$0xf] }
 0x151   : > { %v1102_v17 = vld [vmem:[%s8666_s6 + $0x1d10] sm:$0xf]  ;;  %v1104_v18 = vld [vmem:[%s8666_s6 + $0x1d20] sm:$0xf]  ;;  %1101 = vst [vmem:[%s8670_s7 + $0x740] sm:$0xf] %v1100_v16 }
 0x152   : > { %1103 = vst [vmem:[%s8670_s7 + $0x744] sm:$0xf] %v1102_v17  ;;  %1105 = vst [vmem:[%s8670_s7 + $0x748] sm:$0xf] %v1104_v18  ;;  %v1106_v19 = vld [vmem:[%s8666_s6 + $0x1d30] sm:$0xf] }
 0x153   : > { %v1108_v20 = vld [vmem:[%s8666_s6 + $0x1d40] sm:$0xf]  ;;  %v1110_v21 = vld [vmem:[%s8666_s6 + $0x1d50] sm:$0xf]  ;;  %1107 = vst [vmem:[%s8670_s7 + $0x74c] sm:$0xf] %v1106_v19 }
 0x154   : > { %1109 = vst [vmem:[%s8670_s7 + $0x750] sm:$0xf] %v1108_v20  ;;  %1111 = vst [vmem:[%s8670_s7 + $0x754] sm:$0xf] %v1110_v21  ;;  %v1112_v22 = vld [vmem:[%s8666_s6 + $0x1d60] sm:$0xf] }
 0x155   : > { %v1114_v23 = vld [vmem:[%s8666_s6 + $0x1d70] sm:$0xf]  ;;  %v1116_v24 = vld [vmem:[%s8666_s6 + $0x1d80] sm:$0xf]  ;;  %1113 = vst [vmem:[%s8670_s7 + $0x758] sm:$0xf] %v1112_v22 }
 0x156   : > { %1115 = vst [vmem:[%s8670_s7 + $0x75c] sm:$0xf] %v1114_v23  ;;  %1117 = vst [vmem:[%s8670_s7 + $0x760] sm:$0xf] %v1116_v24  ;;  %v1118_v25 = vld [vmem:[%s8666_s6 + $0x1d90] sm:$0xf] }
 0x157   : > { %v1120_v26 = vld [vmem:[%s8666_s6 + $0x1da0] sm:$0xf]  ;;  %v1122_v27 = vld [vmem:[%s8666_s6 + $0x1db0] sm:$0xf]  ;;  %1119 = vst [vmem:[%s8670_s7 + $0x764] sm:$0xf] %v1118_v25 }
 0x158   : > { %1121 = vst [vmem:[%s8670_s7 + $0x768] sm:$0xf] %v1120_v26  ;;  %1123 = vst [vmem:[%s8670_s7 + $0x76c] sm:$0xf] %v1122_v27  ;;  %v1124_v28 = vld [vmem:[%s8666_s6 + $0x1dc0] sm:$0xf] }
 0x159   : > { %v1126_v29 = vld [vmem:[%s8666_s6 + $0x1dd0] sm:$0xf]  ;;  %v1128_v30 = vld [vmem:[%s8666_s6 + $0x1de0] sm:$0xf]  ;;  %1125 = vst [vmem:[%s8670_s7 + $0x770] sm:$0xf] %v1124_v28 }
 0x15a   : > { %1127 = vst [vmem:[%s8670_s7 + $0x774] sm:$0xf] %v1126_v29  ;;  %1129 = vst [vmem:[%s8670_s7 + $0x778] sm:$0xf] %v1128_v30  ;;  %v1130_v31 = vld [vmem:[%s8666_s6 + $0x1df0] sm:$0xf] }
 0x15b   : > { %v1132_v32 = vld [vmem:[%s8666_s6 + $0x1e00] sm:$0xf]  ;;  %v1134_v33 = vld [vmem:[%s8666_s6 + $0x1e10] sm:$0xf]  ;;  %1131 = vst [vmem:[%s8670_s7 + $0x77c] sm:$0xf] %v1130_v31 }
 0x15c   : > { %1133 = vst [vmem:[%s8670_s7 + $0x780] sm:$0xf] %v1132_v32  ;;  %1135 = vst [vmem:[%s8670_s7 + $0x784] sm:$0xf] %v1134_v33  ;;  %v1136_v34 = vld [vmem:[%s8666_s6 + $0x1e20] sm:$0xf] }
 0x15d   : > { %v1138_v35 = vld [vmem:[%s8666_s6 + $0x1e30] sm:$0xf]  ;;  %v1140_v36 = vld [vmem:[%s8666_s6 + $0x1e40] sm:$0xf]  ;;  %1137 = vst [vmem:[%s8670_s7 + $0x788] sm:$0xf] %v1136_v34 }
 0x15e   : > { %1139 = vst [vmem:[%s8670_s7 + $0x78c] sm:$0xf] %v1138_v35  ;;  %1141 = vst [vmem:[%s8670_s7 + $0x790] sm:$0xf] %v1140_v36  ;;  %v1142_v37 = vld [vmem:[%s8666_s6 + $0x1e50] sm:$0xf] }
 0x15f   : > { %v1144_v38 = vld [vmem:[%s8666_s6 + $0x1e60] sm:$0xf]  ;;  %v1146_v39 = vld [vmem:[%s8666_s6 + $0x1e70] sm:$0xf]  ;;  %1143 = vst [vmem:[%s8670_s7 + $0x794] sm:$0xf] %v1142_v37 }
 0x160   : > { %1145 = vst [vmem:[%s8670_s7 + $0x798] sm:$0xf] %v1144_v38  ;;  %1147 = vst [vmem:[%s8670_s7 + $0x79c] sm:$0xf] %v1146_v39  ;;  %v1148_v40 = vld [vmem:[%s8666_s6 + $0x1e80] sm:$0xf] }
 0x161   : > { %v1150_v41 = vld [vmem:[%s8666_s6 + $0x1e90] sm:$0xf]  ;;  %v1152_v42 = vld [vmem:[%s8666_s6 + $0x1ea0] sm:$0xf]  ;;  %1149 = vst [vmem:[%s8670_s7 + $0x7a0] sm:$0xf] %v1148_v40 }
 0x162   : > { %1151 = vst [vmem:[%s8670_s7 + $0x7a4] sm:$0xf] %v1150_v41  ;;  %1153 = vst [vmem:[%s8670_s7 + $0x7a8] sm:$0xf] %v1152_v42  ;;  %v1154_v43 = vld [vmem:[%s8666_s6 + $0x1eb0] sm:$0xf] }
 0x163   : > { %v1156_v44 = vld [vmem:[%s8666_s6 + $0x1ec0] sm:$0xf]  ;;  %v1158_v45 = vld [vmem:[%s8666_s6 + $0x1ed0] sm:$0xf]  ;;  %1155 = vst [vmem:[%s8670_s7 + $0x7ac] sm:$0xf] %v1154_v43 }
 0x164   : > { %1157 = vst [vmem:[%s8670_s7 + $0x7b0] sm:$0xf] %v1156_v44  ;;  %1159 = vst [vmem:[%s8670_s7 + $0x7b4] sm:$0xf] %v1158_v45  ;;  %v1160_v46 = vld [vmem:[%s8666_s6 + $0x1ee0] sm:$0xf] }
 0x165   : > { %v1162_v47 = vld [vmem:[%s8666_s6 + $0x1ef0] sm:$0xf]  ;;  %v1164_v48 = vld [vmem:[%s8666_s6 + $0x1f00] sm:$0xf]  ;;  %1161 = vst [vmem:[%s8670_s7 + $0x7b8] sm:$0xf] %v1160_v46 }
 0x166   : > { %1163 = vst [vmem:[%s8670_s7 + $0x7bc] sm:$0xf] %v1162_v47  ;;  %1165 = vst [vmem:[%s8670_s7 + $0x7c0] sm:$0xf] %v1164_v48  ;;  %v1166_v49 = vld [vmem:[%s8666_s6 + $0x1f10] sm:$0xf] }
 0x167   : > { %v1168_v50 = vld [vmem:[%s8666_s6 + $0x1f20] sm:$0xf]  ;;  %v1170_v51 = vld [vmem:[%s8666_s6 + $0x1f30] sm:$0xf]  ;;  %1167 = vst [vmem:[%s8670_s7 + $0x7c4] sm:$0xf] %v1166_v49 }
 0x168   : > { %1169 = vst [vmem:[%s8670_s7 + $0x7c8] sm:$0xf] %v1168_v50  ;;  %1171 = vst [vmem:[%s8670_s7 + $0x7cc] sm:$0xf] %v1170_v51  ;;  %v1172_v52 = vld [vmem:[%s8666_s6 + $0x1f40] sm:$0xf] }
 0x169   : > { %v1174_v53 = vld [vmem:[%s8666_s6 + $0x1f50] sm:$0xf]  ;;  %v1176_v54 = vld [vmem:[%s8666_s6 + $0x1f60] sm:$0xf]  ;;  %1173 = vst [vmem:[%s8670_s7 + $0x7d0] sm:$0xf] %v1172_v52 }
 0x16a   : > { %1175 = vst [vmem:[%s8670_s7 + $0x7d4] sm:$0xf] %v1174_v53  ;;  %1177 = vst [vmem:[%s8670_s7 + $0x7d8] sm:$0xf] %v1176_v54  ;;  %v1178_v55 = vld [vmem:[%s8666_s6 + $0x1f70] sm:$0xf] }
 0x16b   : > { %v1180_v56 = vld [vmem:[%s8666_s6 + $0x1f80] sm:$0xf]  ;;  %v1182_v57 = vld [vmem:[%s8666_s6 + $0x1f90] sm:$0xf]  ;;  %1179 = vst [vmem:[%s8670_s7 + $0x7dc] sm:$0xf] %v1178_v55 }
 0x16c   : > { %1181 = vst [vmem:[%s8670_s7 + $0x7e0] sm:$0xf] %v1180_v56  ;;  %1183 = vst [vmem:[%s8670_s7 + $0x7e4] sm:$0xf] %v1182_v57  ;;  %v1184_v58 = vld [vmem:[%s8666_s6 + $0x1fa0] sm:$0xf] }
 0x16d   : > { %v1186_v59 = vld [vmem:[%s8666_s6 + $0x1fb0] sm:$0xf]  ;;  %v1188_v60 = vld [vmem:[%s8666_s6 + $0x1fc0] sm:$0xf]  ;;  %1185 = vst [vmem:[%s8670_s7 + $0x7e8] sm:$0xf] %v1184_v58 }
 0x16e   : > { %1187 = vst [vmem:[%s8670_s7 + $0x7ec] sm:$0xf] %v1186_v59  ;;  %1189 = vst [vmem:[%s8670_s7 + $0x7f0] sm:$0xf] %v1188_v60  ;;  %v1190_v61 = vld [vmem:[%s8666_s6 + $0x1fd0] sm:$0xf] }
 0x16f   : > { %v1192_v62 = vld [vmem:[%s8666_s6 + $0x1fe0] sm:$0xf]  ;;  %v1194_v63 = vld [vmem:[%s8666_s6 + $0x1ff0] sm:$0xf]  ;;  %1191 = vst [vmem:[%s8670_s7 + $0x7f4] sm:$0xf] %v1190_v61 }
 0x170   : > { %1193 = vst [vmem:[%s8670_s7 + $0x7f8] sm:$0xf] %v1192_v62  ;;  %1195 = vst [vmem:[%s8670_s7 + $0x7fc] sm:$0xf] %v1194_v63 }
 0x171 PF: > { %p7503_p11 = scmp.ge.s32.totalorder %s8568_s17, 1  ;;  %p4319_p12 = scmp.lt.s32.totalorder %s8568_s17, 9 }
 0x173   : > { %p4320_p13 = pnand %p7503_p11, %p4319_p12 }
 0x174   : > { %s4326_s8 = sand.u32 (!%p4320_p13), 1, %s8544_s11   ;;  %s7506_s11 = sshll.u32 (!%p4320_p13), %s8556_s14, 1 }
 0x175   : > { %4323 = sbr.rel (%p4320_p13) target bundleno = 923 (0x39b), region = 76  ;;  %s7504_s18 = sshll.u32 (!%p4320_p13), %s4326_s8, 11 }
 0x176   : > { %s9697_s21 = scalar_lea.vmem (!%p4320_p13), [#allocation3], %s7504_s18  ;;  %p4358_p0 = scmp.lt.s32.totalorder (!%p4320_p13), %s7506_s11, 3 }
 0x177   : > { %v8240_v0 = vld [vmem:[%s9697_s21 + $0x40] sm:$0xff] (!%p4320_p13)   ;;  %v8244_v4 = vld [vmem:[%s9697_s21 + $0x48] sm:$0xff] (!%p4320_p13)   ;;  %v8248_v8 = vld [vmem:[%s9697_s21 + $0x50] sm:$0xff] (!%p4320_p13)   ;;  %s4353_s29 = sand.u32 (!%p4320_p13), 1, %s8536_s9  }
 0x178   : > { %v8241_v1 = vld [vmem:[%s9697_s21 + $0xc0] sm:$0xff] (!%p4320_p13)   ;;  %7815 = vmatprep.subr.bf16.mxu0 (!%p4320_p13), %v8240_v0  ;;  %v8245_v5 = vld [vmem:[%s9697_s21 + $0xc8] sm:$0xff] (!%p4320_p13)   ;;  %v8249_v9 = vld [vmem:[%s9697_s21 + $0xd0] sm:$0xff] (!%p4320_p13)   ;;  %s7505_s30 = sshll.u32 (!%p4320_p13), %s4353_s29, 3 }
 0x179   : > { %v8242_v2 = vld [vmem:[%s9697_s21] sm:$0xff] (!%p4320_p13)   ;;  %7837 = vmatprep.subr.bf16.mxu1 (!%p4320_p13), %v8241_v1  ;;  %v8246_v6 = vld [vmem:[%s9697_s21 + $0x8] sm:$0xff] (!%p4320_p13)   ;;  %v8250_v10 = vld [vmem:[%s9697_s21 + $0x10] sm:$0xff] (!%p4320_p13)   ;;  %s4355_s3 = scalar_lea.vmem (!%p4320_p13), [#allocation4], %s7505_s30 }
 0x17a   : > { %v8243_v3 = vld [vmem:[%s9697_s21 + $0x80] sm:$0xff] (!%p4320_p13)   ;;  %7816 = vmatpush3.bf16.msra.mxu0 (!%p4320_p13), %v8242_v2  ;;  %v8247_v7 = vld [vmem:[%s9697_s21 + $0x88] sm:$0xff] (!%p4320_p13)   ;;  %v8251_v11 = vld [vmem:[%s9697_s21 + $0x90] sm:$0xff] (!%p4320_p13)  }
 0x17b   : > { %7838 = vmatpush3.bf16.msra.mxu1 (!%p4320_p13), %v8243_v3  ;;  %7817 = vmatprep.subr.bf16.mxu0 (!%p4320_p13), %v8244_v4  ;;  %v8252_v12 = vld [vmem:[%s9697_s21 + $0x58] sm:$0xff] (!%p4320_p13)   ;;  %v8256_v16 = vld [vmem:[%s9697_s21 + $0x60] sm:$0xff] (!%p4320_p13)   ;;  %v8260_v20 = vld [vmem:[%s9697_s21 + $0x68] sm:$0xff] (!%p4320_p13)  }
 0x17c   : > { %7839 = vmatprep.subr.bf16.mxu1 %v8245_v5  ;;  %v8253_v13 = vld [vmem:[%s9697_s21 + $0xd8] sm:$0xff]   ;;  %v8257_v17 = vld [vmem:[%s9697_s21 + $0xe0] sm:$0xff]   ;;  %v8261_v21 = vld [vmem:[%s9697_s21 + $0xe8] sm:$0xff]   ;;  %s10047_s11 = smov (!%p4358_p0, %s7506_s11), 3  ;;  %s7809_s4 = sshll.u32 (%p8653_p9), %s8556_s14, 3 }
 0x17d   : > { %v8254_v14 = vld [vmem:[%s9697_s21 + $0x18] sm:$0xff]   ;;  %v8258_v18 = vld [vmem:[%s9697_s21 + $0x20] sm:$0xff]   ;;  %v8262_v22 = vld [vmem:[%s9697_s21 + $0x28] sm:$0xff]   ;;  %s7806_s22 = sshll.u32 %s10047_s11, 7  ;;  %s7350_s9 = sadd.s32 (%p8653_p9), %s8552_s13, %s7809_s4 }
 0x17e   : > { %7818 = vmatpush3.bf16.msra.mxu0 %v8246_v6  ;;  %v8255_v15 = vld [vmem:[%s9697_s21 + $0x98] sm:$0xff]   ;;  %v8259_v19 = vld [vmem:[%s9697_s21 + $0xa0] sm:$0xff]   ;;  %v8263_v23 = vld [vmem:[%s9697_s21 + $0xa8] sm:$0xff]   ;;  %s9733_s26 = scalar_lea.vmem %s10028_s0, %s7806_s22  ;;  %s7803_s5 = sshll.u32 (%p8653_p9), %s7350_s9, 2 }
 0x17f   : > { %7840 = vmatpush3.bf16.msra.mxu1 %v8247_v7  ;;  %7819 = vmatprep.subr.bf16.mxu0 %v8248_v8  ;;  %v8264_v24 = vld [vmem:[%s9697_s21 + $0x70] sm:$0xff]   ;;  %v8268_v28 = vld [vmem:[%s9697_s21 + $0x78] sm:$0xff]   ;;  %v4371_v32 = vld [vmem:[%s9733_s26] sm:$0xff]  ;;  %s7352_s8 = scalar_lea.vmem (%p8653_p9), %s10030_s2, %s7803_s5 }
 0x180   : > { %7841 = vmatprep.subr.bf16.mxu1 %v8249_v9  ;;  %v8265_v25 = vld [vmem:[%s9697_s21 + $0xf0] sm:$0xff]   ;;  %v8269_v29 = vld [vmem:[%s9697_s21 + $0xf8] sm:$0xff]   ;;  %v4387_v33 = vld [vmem:[%s9733_s26 + $0x80] sm:$0xff] }
 0x181   : > { %v8266_v26 = vld [vmem:[%s9697_s21 + $0x30] sm:$0xff]   ;;  %v8270_v30 = vld [vmem:[%s9697_s21 + $0x38] sm:$0xff]   ;;  %v4372_v34 = vld [vmem:[%s9733_s26 + $0x8] sm:$0xff]  ;;  %v7509_v35 = vcombine.low %v4371_v32, %v4387_v33  ;;  %v7510_v36 = vcombine.high %v4371_v32, %v4387_v33 }
 0x182   : > { %7820 = vmatpush3.bf16.msra.mxu0 %v8250_v10  ;;  %v8267_v27 = vld [vmem:[%s9697_s21 + $0xb0] sm:$0xff]   ;;  %v8271_v31 = vld [vmem:[%s9697_s21 + $0xb8] sm:$0xff]   ;;  %v4388_v37 = vld [vmem:[%s9733_s26 + $0x88] sm:$0xff] }
 0x183   : > { %7842 = vmatpush3.bf16.msra.mxu1 %v8251_v11  ;;  %7821 = vmatprep.subr.bf16.mxu0 %v8252_v12  ;;  %v7511_v38 = vcombine.low %v4372_v34, %v4388_v37  ;;  %v7512_v39 = vcombine.high %v4372_v34, %v4388_v37  ;;  %v8272_v40 = vld [vmem:[%s9697_s21 + $0x140] sm:$0xff]   ;;  %v8276_v44 = vld [vmem:[%s9697_s21 + $0x148] sm:$0xff]   ;;  %v8280_v48 = vld [vmem:[%s9697_s21 + $0x150] sm:$0xff]  }
 0x184   : > { %7843 = vmatprep.subr.bf16.mxu1 %v8253_v13  ;;  %6643 = vmatprep.mubr.bf16.mxu0 %v7510_v36  ;;  %v8273_v41 = vld [vmem:[%s9697_s21 + $0x1c0] sm:$0xff]   ;;  %v8277_v45 = vld [vmem:[%s9697_s21 + $0x1c8] sm:$0xff]   ;;  %v8281_v49 = vld [vmem:[%s9697_s21 + $0x1d0] sm:$0xff]  }
 0x185   : > { %6684 = vmatprep.mubr.bf16.mxu1 %v7512_v39  ;;  %v8274_v42 = vld [vmem:[%s9697_s21 + $0x100] sm:$0xff]   ;;  %v8278_v46 = vld [vmem:[%s9697_s21 + $0x108] sm:$0xff]   ;;  %v8282_v50 = vld [vmem:[%s9697_s21 + $0x110] sm:$0xff]  }
 0x186   : > { %7822 = vmatpush3.bf16.msra.mxu0 %v8254_v14  ;;  %v8275_v43 = vld [vmem:[%s9697_s21 + $0x180] sm:$0xff]   ;;  %v8279_v47 = vld [vmem:[%s9697_s21 + $0x188] sm:$0xff]   ;;  %v8283_v51 = vld [vmem:[%s9697_s21 + $0x190] sm:$0xff]  }
 0x187   : > { %7844 = vmatpush3.bf16.msra.mxu1 %v8255_v15  ;;  %7823 = vmatprep.subr.bf16.mxu0 %v8256_v16  ;;  %v8284_v52 = vld [vmem:[%s9697_s21 + $0x158] sm:$0xff]   ;;  %v8288_v56 = vld [vmem:[%s9697_s21 + $0x160] sm:$0xff]   ;;  %v8292_v60 = vld [vmem:[%s9697_s21 + $0x168] sm:$0xff]  }
 0x188   : > { %7845 = vmatprep.subr.bf16.mxu1 %v8257_v17  ;;  %v8285_v53 = vld [vmem:[%s9697_s21 + $0x1d8] sm:$0xff]   ;;  %v8289_v57 = vld [vmem:[%s9697_s21 + $0x1e0] sm:$0xff]   ;;  %v8293_v61 = vld [vmem:[%s9697_s21 + $0x1e8] sm:$0xff]  }
 0x189   : > { %v8286_v54 = vld [vmem:[%s9697_s21 + $0x118] sm:$0xff]   ;;  %v8290_v58 = vld [vmem:[%s9697_s21 + $0x120] sm:$0xff]   ;;  %v8294_v62 = vld [vmem:[%s9697_s21 + $0x128] sm:$0xff]  }
 0x18a   : > { %7824 = vmatpush3.bf16.msra.mxu0 %v8258_v18  ;;  %v8287_v55 = vld [vmem:[%s9697_s21 + $0x198] sm:$0xff]   ;;  %v8291_v59 = vld [vmem:[%s9697_s21 + $0x1a0] sm:$0xff]   ;;  %v8295_v63 = vld [vmem:[%s9697_s21 + $0x1a8] sm:$0xff]  }
 0x18b   : > { %7846 = vmatpush3.bf16.msra.mxu1 %v8259_v19  ;;  %7825 = vmatprep.subr.bf16.mxu0 %v8260_v20  ;;  %v8296_v0 = vld [vmem:[%s9697_s21 + $0x170] sm:$0xff]   ;;  %v8300_v4 = vld [vmem:[%s9697_s21 + $0x178] sm:$0xff]   ;;  %v8304_v16 = vld [vmem:[%s9697_s21 + $0x240] sm:$0xff]  }
 0x18c   : > { %7847 = vmatprep.subr.bf16.mxu1 %v8261_v21  ;;  %v8297_v1 = vld [vmem:[%s9697_s21 + $0x1f0] sm:$0xff]   ;;  %v8301_v5 = vld [vmem:[%s9697_s21 + $0x1f8] sm:$0xff]   ;;  %v8305_v17 = vld [vmem:[%s9697_s21 + $0x2c0] sm:$0xff]  }
 0x18d   : > { %v8298_v2 = vld [vmem:[%s9697_s21 + $0x130] sm:$0xff]   ;;  %v8302_v6 = vld [vmem:[%s9697_s21 + $0x138] sm:$0xff]   ;;  %v8306_v18 = vld [vmem:[%s9697_s21 + $0x200] sm:$0xff]  }
 0x18e   : > { %7826 = vmatpush3.bf16.msra.mxu0 %v8262_v22  ;;  %v8299_v3 = vld [vmem:[%s9697_s21 + $0x1b0] sm:$0xff]   ;;  %v8303_v7 = vld [vmem:[%s9697_s21 + $0x1b8] sm:$0xff]   ;;  %v8307_v19 = vld [vmem:[%s9697_s21 + $0x280] sm:$0xff]  }
 0x18f   : > { %7848 = vmatpush3.bf16.msra.mxu1 %v8263_v23  ;;  %7827 = vmatprep.subr.bf16.mxu0 %v8264_v24  ;;  %v4373_v8 = vld [vmem:[%s9733_s26 + $0x10] sm:$0xff]  ;;  %v4374_v12 = vld [vmem:[%s9733_s26 + $0x18] sm:$0xff]  ;;  %v8308_v20 = vld [vmem:[%s9697_s21 + $0x248] sm:$0xff]  }
 0x190   : > { %7849 = vmatprep.subr.bf16.mxu1 %v8265_v25  ;;  %v4389_v9 = vld [vmem:[%s9733_s26 + $0x90] sm:$0xff]  ;;  %v4390_v13 = vld [vmem:[%s9733_s26 + $0x98] sm:$0xff]  ;;  %v8309_v21 = vld [vmem:[%s9697_s21 + $0x2c8] sm:$0xff]  }
 0x191   : > { %v7513_v10 = vcombine.low %v4373_v8, %v4389_v9  ;;  %v7514_v11 = vcombine.high %v4373_v8, %v4389_v9  ;;  %v7515_v14 = vcombine.low %v4374_v12, %v4390_v13  ;;  %v7516_v15 = vcombine.high %v4374_v12, %v4390_v13  ;;  %v8310_v22 = vld [vmem:[%s9697_s21 + $0x208] sm:$0xff]   ;;  %v8312_v24 = vld [vmem:[%s9697_s21 + $0x250] sm:$0xff]   ;;  %v8320_v32 = vld [vmem:[%s9697_s21 + $0x260] sm:$0xff]  }
 0x192   : > { %7828 = vmatpush3.bf16.msra.mxu0 %v8266_v26  ;;  %v8311_v23 = vld [vmem:[%s9697_s21 + $0x288] sm:$0xff]   ;;  %v8313_v25 = vld [vmem:[%s9697_s21 + $0x2d0] sm:$0xff]   ;;  %v8321_v33 = vld [vmem:[%s9697_s21 + $0x2e0] sm:$0xff]  }
 0x193   : > { %7850 = vmatpush3.bf16.msra.mxu1 %v8267_v27  ;;  %7829 = vmatprep.subr.bf16.mxu0 %v8268_v28  ;;  %v8314_v26 = vld [vmem:[%s9697_s21 + $0x210] sm:$0xff]   ;;  %v8316_v28 = vld [vmem:[%s9697_s21 + $0x258] sm:$0xff]   ;;  %v8322_v34 = vld [vmem:[%s9697_s21 + $0x220] sm:$0xff]  }
 0x194   : > { %7851 = vmatprep.subr.bf16.mxu1 %v8269_v29  ;;  %v8315_v27 = vld [vmem:[%s9697_s21 + $0x290] sm:$0xff]   ;;  %v8317_v29 = vld [vmem:[%s9697_s21 + $0x2d8] sm:$0xff]   ;;  %v8324_v36 = vld [vmem:[%s9697_s21 + $0x268] sm:$0xff]  }
 0x195   : > { %v8325_v37 = vld [vmem:[%s9697_s21 + $0x2e8] sm:$0xff]   ;;  %v8352_v8 = vld [vmem:[%s9697_s21 + $0x360] sm:$0xff]  }
 0x196   : > { %7830 = vmatpush3.bf16.msra.mxu0 %v8270_v30  ;;  %v8318_v30 = vld [vmem:[%s9697_s21 + $0x218] sm:$0xff]   ;;  %v8327_v39 = vld [vmem:[%s9697_s21 + $0x2a8] sm:$0xff]   ;;  %v8353_v9 = vld [vmem:[%s9697_s21 + $0x3e0] sm:$0xff]  }
 0x197   : > { %7852 = vmatpush3.bf16.msra.mxu1 %v8271_v31  ;;  %7859 = vmatprep.subr.bf16.mxu0 %v8272_v40  ;;  %v8319_v31 = vld [vmem:[%s9697_s21 + $0x298] sm:$0xff]   ;;  %v8328_v40 = vld [vmem:[%s9697_s21 + $0x270] sm:$0xff]   ;;  %v8356_v12 = vld [vmem:[%s9697_s21 + $0x368] sm:$0xff]  }
 0x198   : > { %7881 = vmatprep.subr.bf16.mxu1 %v8273_v41  ;;  %v8329_v41 = vld [vmem:[%s9697_s21 + $0x2f0] sm:$0xff]   ;;  %v8357_v13 = vld [vmem:[%s9697_s21 + $0x3e8] sm:$0xff]  }
 0x199   : > { %6644 = vmatmul.mubr.bf16.vlgmr.msra.gmra.mrb[0].mxu0 %v7509_v35  ;;  %v8323_v35 = vld [vmem:[%s9697_s21 + $0x2a0] sm:$0xff]  }
 0x19a   : > { %6685 = vmatmul.mubr.bf16.vlgmr.msra.gmra.mrb[0].mxu1 %v7511_v38  ;;  %7860 = vmatpush3.bf16.msra.mxu0 %v8274_v42  ;;  %v8326_v38 = vld [vmem:[%s9697_s21 + $0x228] sm:$0xff]   ;;  %v8330_v42 = vld [vmem:[%s9697_s21 + $0x230] sm:$0xff]  }
 0x19b   : > { %7882 = vmatpush3.bf16.msra.mxu1 %v8275_v43  ;;  %7861 = vmatprep.subr.bf16.mxu0 %v8276_v44  ;;  %v8331_v43 = vld [vmem:[%s9697_s21 + $0x2b0] sm:$0xff]   ;;  %v8332_v44 = vld [vmem:[%s9697_s21 + $0x278] sm:$0xff]  }
 0x19c   : > { %7883 = vmatprep.subr.bf16.mxu1 %v8277_v45  ;;  %6725 = vmatprep.mubr.bf16.mxu0 %v7514_v11  ;;  %v8333_v45 = vld [vmem:[%s9697_s21 + $0x2f8] sm:$0xff]   ;;  %v8355_v11 = vld [vmem:[%s9697_s21 + $0x3a0] sm:$0xff]  }
 0x19d   : > { %6766 = vmatprep.mubr.bf16.mxu1 %v7516_v15  ;;  %v8359_v15 = vld [vmem:[%s9697_s21 + $0x3a8] sm:$0xff]  }
 0x19e   : > { %7862 = vmatpush3.bf16.msra.mxu0 %v8278_v46  ;;  %v8334_v46 = vld [vmem:[%s9697_s21 + $0x238] sm:$0xff]  }
 0x19f   : > { %7884 = vmatpush3.bf16.msra.mxu1 %v8279_v47  ;;  %7863 = vmatprep.subr.bf16.mxu0 %v8280_v48  ;;  %v8335_v47 = vld [vmem:[%s9697_s21 + $0x2b8] sm:$0xff]   ;;  %v4375_v48 = vld [vmem:[%s9733_s26 + $0x20] sm:$0xff] }
 0x1a0   : > { %7885 = vmatprep.subr.bf16.mxu1 %v8281_v49  ;;  %v4391_v49 = vld [vmem:[%s9733_s26 + $0xa0] sm:$0xff] }
 0x1a2   : > { %7864 = vmatpush3.bf16.msra.mxu0 %v8282_v50  ;;  %v4376_v50 = vld [vmem:[%s9733_s26 + $0x28] sm:$0xff] }
 0x1a3   : > { %7886 = vmatpush3.bf16.msra.mxu1 %v8283_v51  ;;  %7865 = vmatprep.subr.bf16.mxu0 %v8284_v52  ;;  %v4392_v51 = vld [vmem:[%s9733_s26 + $0xa8] sm:$0xff]  ;;  %v7517_v52 = vcombine.low %v4375_v48, %v4391_v49 }
 0x1a4   : > { %7887 = vmatprep.subr.bf16.mxu1 %v8285_v53  ;;  %v7518_v53 = vcombine.high %v4375_v48, %v4391_v49  ;;  %v8384_v48 = vld [vmem:[%s9697_s21 + $0x460] sm:$0xff]  }
 0x1a5   : > { %v8385_v49 = vld [vmem:[%s9697_s21 + $0x4e0] sm:$0xff]  }
 0x1a6   : > { %7866 = vmatpush3.bf16.msra.mxu0 %v8286_v54  ;;  %v7519_v54 = vcombine.low %v4376_v50, %v4392_v51 }
 0x1a7   : > { %7888 = vmatpush3.bf16.msra.mxu1 %v8287_v55  ;;  %7867 = vmatprep.subr.bf16.mxu0 %v8288_v56  ;;  %v7520_v55 = vcombine.high %v4376_v50, %v4392_v51  ;;  %v8336_v56 = vld [vmem:[%s9697_s21 + $0x340] sm:$0xff]  }
 0x1a8   : > { %7889 = vmatprep.subr.bf16.mxu1 %v8289_v57  ;;  %v8337_v57 = vld [vmem:[%s9697_s21 + $0x3c0] sm:$0xff]  }
 0x1a9   : > { %v8386_v50 = vld [vmem:[%s9697_s21 + $0x420] sm:$0xff]  }
 0x1aa   : > { %7868 = vmatpush3.bf16.msra.mxu0 %v8290_v58  ;;  %v8338_v58 = vld [vmem:[%s9697_s21 + $0x300] sm:$0xff]  }
 0x1ab   : > { %7890 = vmatpush3.bf16.msra.mxu1 %v8291_v59  ;;  %7869 = vmatprep.subr.bf16.mxu0 %v8292_v60  ;;  %v8339_v59 = vld [vmem:[%s9697_s21 + $0x380] sm:$0xff]   ;;  %v8340_v60 = vld [vmem:[%s9697_s21 + $0x348] sm:$0xff]  }
 0x1ac   : > { %7891 = vmatprep.subr.bf16.mxu1 %v8293_v61  ;;  %v8341_v61 = vld [vmem:[%s9697_s21 + $0x3c8] sm:$0xff]   ;;  %v8387_v51 = vld [vmem:[%s9697_s21 + $0x4a0] sm:$0xff]  }
 0x1ae   : > { %7870 = vmatpush3.bf16.msra.mxu0 %v8294_v62  ;;  %v8342_v62 = vld [vmem:[%s9697_s21 + $0x308] sm:$0xff]  }
 0x1af   : > { %7892 = vmatpush3.bf16.msra.mxu1 %v8295_v63  ;;  %7871 = vmatprep.subr.bf16.mxu0 %v8296_v0  ;;  %v8343_v63 = vld [vmem:[%s9697_s21 + $0x388] sm:$0xff]   ;;  %v8344_v0 = vld [vmem:[%s9697_s21 + $0x350] sm:$0xff]  }
 0x1b0   : > { %7893 = vmatprep.subr.bf16.mxu1 %v8297_v1  ;;  %v8345_v1 = vld [vmem:[%s9697_s21 + $0x3d0] sm:$0xff]  }
 0x1b2   : > { %7872 = vmatpush3.bf16.msra.mxu0 %v8298_v2  ;;  %v8346_v2 = vld [vmem:[%s9697_s21 + $0x310] sm:$0xff]  }
 0x1b3   : > { %7894 = vmatpush3.bf16.msra.mxu1 %v8299_v3  ;;  %7873 = vmatprep.subr.bf16.mxu0 %v8300_v4  ;;  %v8347_v3 = vld [vmem:[%s9697_s21 + $0x390] sm:$0xff]   ;;  %v8348_v4 = vld [vmem:[%s9697_s21 + $0x358] sm:$0xff]  }
 0x1b4   : > { %7895 = vmatprep.subr.bf16.mxu1 %v8301_v5  ;;  %v8349_v5 = vld [vmem:[%s9697_s21 + $0x3d8] sm:$0xff]  }
 0x1b6   : > { %7874 = vmatpush3.bf16.msra.mxu0 %v8302_v6  ;;  %v8350_v6 = vld [vmem:[%s9697_s21 + $0x318] sm:$0xff]  }
 0x1b7   : > { %7896 = vmatpush3.bf16.msra.mxu1 %v8303_v7  ;;  %7903 = vmatprep.subr.bf16.mxu0 %v8304_v16  ;;  %v8351_v7 = vld [vmem:[%s9697_s21 + $0x398] sm:$0xff]   ;;  %v8360_v16 = vld [vmem:[%s9697_s21 + $0x370] sm:$0xff]  }
 0x1b8   : > { %7925 = vmatprep.subr.bf16.mxu1 %v8305_v17  ;;  %v8361_v17 = vld [vmem:[%s9697_s21 + $0x3f0] sm:$0xff]  }
 0x1b9   : > { %6726 = vmatmul.mubr.bf16.vlgmr.msra.gmra.mrb[4].mxu0 %v7513_v10  ;;  %v8354_v10 = vld [vmem:[%s9697_s21 + $0x320] sm:$0xff]  }
 0x1ba   : > { %6767 = vmatmul.mubr.bf16.vlgmr.msra.gmra.mrb[4].mxu1 %v7515_v14  ;;  %7904 = vmatpush3.bf16.msra.mxu0 %v8306_v18  ;;  %v8358_v14 = vld [vmem:[%s9697_s21 + $0x328] sm:$0xff]   ;;  %v8362_v18 = vld [vmem:[%s9697_s21 + $0x330] sm:$0xff]  }
 0x1bb   : > { %7926 = vmatpush3.bf16.msra.mxu1 %v8307_v19  ;;  %7905 = vmatprep.subr.bf16.mxu0 %v8308_v20  ;;  %v8363_v19 = vld [vmem:[%s9697_s21 + $0x3b0] sm:$0xff]   ;;  %v8364_v20 = vld [vmem:[%s9697_s21 + $0x378] sm:$0xff]  }
 0x1bc   : > { %7927 = vmatprep.subr.bf16.mxu1 %v8309_v21  ;;  %6807 = vmatprep.mubr.bf16.mxu0 %v7518_v53  ;;  %v8365_v21 = vld [vmem:[%s9697_s21 + $0x3f8] sm:$0xff]   ;;  %v8389_v53 = vld [vmem:[%s9697_s21 + $0x4e8] sm:$0xff]  }
 0x1bd   : > { %6848 = vmatprep.mubr.bf16.mxu1 %v7520_v55  ;;  %v8391_v55 = vld [vmem:[%s9697_s21 + $0x4a8] sm:$0xff]  }
 0x1be   : > { %7906 = vmatpush3.bf16.msra.mxu0 %v8310_v22  ;;  %v8366_v22 = vld [vmem:[%s9697_s21 + $0x338] sm:$0xff]  }
 0x1bf   : > { %7928 = vmatpush3.bf16.msra.mxu1 %v8311_v23  ;;  %7907 = vmatprep.subr.bf16.mxu0 %v8312_v24  ;;  %v8367_v23 = vld [vmem:[%s9697_s21 + $0x3b8] sm:$0xff]   ;;  %v4377_v24 = vld [vmem:[%s9733_s26 + $0x30] sm:$0xff] }
 0x1c0   : > { %7929 = vmatprep.subr.bf16.mxu1 %v8313_v25  ;;  %v4393_v25 = vld [vmem:[%s9733_s26 + $0xb0] sm:$0xff] }
 0x1c2   : > { %7908 = vmatpush3.bf16.msra.mxu0 %v8314_v26  ;;  %v4378_v26 = vld [vmem:[%s9733_s26 + $0x38] sm:$0xff] }
 0x1c3   : > { %7930 = vmatpush3.bf16.msra.mxu1 %v8315_v27  ;;  %7909 = vmatprep.subr.bf16.mxu0 %v8316_v28  ;;  %v7521_v27 = vcombine.low %v4377_v24, %v4393_v25  ;;  %v7522_v28 = vcombine.high %v4377_v24, %v4393_v25  ;;  %v8416_v24 = vld [vmem:[%s9697_s21 + $0x560] sm:$0xff]  }
 0x1c4   : > { %7931 = vmatprep.subr.bf16.mxu1 %v8317_v29  ;;  %v4394_v29 = vld [vmem:[%s9733_s26 + $0xb8] sm:$0xff]  ;;  %v8417_v25 = vld [vmem:[%s9697_s21 + $0x5e0] sm:$0xff]  }
 0x1c6   : > { %7910 = vmatpush3.bf16.msra.mxu0 %v8318_v30  ;;  %v7523_v30 = vcombine.low %v4378_v26, %v4394_v29 }
 0x1c7   : > { %7932 = vmatpush3.bf16.msra.mxu1 %v8319_v31  ;;  %7911 = vmatprep.subr.bf16.mxu0 %v8320_v32  ;;  %v7524_v31 = vcombine.high %v4378_v26, %v4394_v29  ;;  %v8368_v32 = vld [vmem:[%s9697_s21 + $0x440] sm:$0xff]   ;;  %v8421_v29 = vld [vmem:[%s9697_s21 + $0x5e8] sm:$0xff]  }
 0x1c8   : > { %7933 = vmatprep.subr.bf16.mxu1 %v8321_v33  ;;  %v8369_v33 = vld [vmem:[%s9697_s21 + $0x4c0] sm:$0xff]  }
 0x1c9   : > { %v8418_v26 = vld [vmem:[%s9697_s21 + $0x520] sm:$0xff]  }
 0x1ca   : > { %7912 = vmatpush3.bf16.msra.mxu0 %v8322_v34  ;;  %v8370_v34 = vld [vmem:[%s9697_s21 + $0x400] sm:$0xff]  }
 0x1cb   : > { %7934 = vmatpush3.bf16.msra.mxu1 %v8323_v35  ;;  %7913 = vmatprep.subr.bf16.mxu0 %v8324_v36  ;;  %v8371_v35 = vld [vmem:[%s9697_s21 + $0x480] sm:$0xff]   ;;  %v8372_v36 = vld [vmem:[%s9697_s21 + $0x448] sm:$0xff]  }
 0x1cc   : > { %7935 = vmatprep.subr.bf16.mxu1 %v8325_v37  ;;  %v8373_v37 = vld [vmem:[%s9697_s21 + $0x4c8] sm:$0xff]  }
 0x1ce   : > { %7914 = vmatpush3.bf16.msra.mxu0 %v8326_v38  ;;  %v8374_v38 = vld [vmem:[%s9697_s21 + $0x408] sm:$0xff]  }
 0x1cf   : > { %7936 = vmatpush3.bf16.msra.mxu1 %v8327_v39  ;;  %7915 = vmatprep.subr.bf16.mxu0 %v8328_v40  ;;  %v8375_v39 = vld [vmem:[%s9697_s21 + $0x488] sm:$0xff]   ;;  %v8376_v40 = vld [vmem:[%s9697_s21 + $0x450] sm:$0xff]  }
 0x1d0   : > { %7937 = vmatprep.subr.bf16.mxu1 %v8329_v41  ;;  %v8377_v41 = vld [vmem:[%s9697_s21 + $0x4d0] sm:$0xff]  }
 0x1d2   : > { %7916 = vmatpush3.bf16.msra.mxu0 %v8330_v42  ;;  %v8378_v42 = vld [vmem:[%s9697_s21 + $0x410] sm:$0xff]  }
 0x1d3   : > { %7938 = vmatpush3.bf16.msra.mxu1 %v8331_v43  ;;  %7917 = vmatprep.subr.bf16.mxu0 %v8332_v44  ;;  %v8379_v43 = vld [vmem:[%s9697_s21 + $0x490] sm:$0xff]   ;;  %v8380_v44 = vld [vmem:[%s9697_s21 + $0x458] sm:$0xff]  }
 0x1d4   : > { %7939 = vmatprep.subr.bf16.mxu1 %v8333_v45  ;;  %v8381_v45 = vld [vmem:[%s9697_s21 + $0x4d8] sm:$0xff]  }
 0x1d6   : > { %7918 = vmatpush3.bf16.msra.mxu0 %v8334_v46  ;;  %v8382_v46 = vld [vmem:[%s9697_s21 + $0x418] sm:$0xff]  }
 0x1d7   : > { %7940 = vmatpush3.bf16.msra.mxu1 %v8335_v47  ;;  %7947 = vmatprep.subr.bf16.mxu0 %v8336_v56  ;;  %v8383_v47 = vld [vmem:[%s9697_s21 + $0x498] sm:$0xff]   ;;  %v8392_v56 = vld [vmem:[%s9697_s21 + $0x470] sm:$0xff]  }
 0x1d8   : > { %7969 = vmatprep.subr.bf16.mxu1 %v8337_v57  ;;  %v8393_v57 = vld [vmem:[%s9697_s21 + $0x4f0] sm:$0xff]  }
 0x1d9   : > { %6808 = vmatmul.mubr.bf16.vlgmr.msra.gmra.mrb[8].mxu0 %v7517_v52  ;;  %v8388_v52 = vld [vmem:[%s9697_s21 + $0x468] sm:$0xff]  }
 0x1da   : > { %6849 = vmatmul.mubr.bf16.vlgmr.msra.gmra.mrb[8].mxu1 %v7519_v54  ;;  %7948 = vmatpush3.bf16.msra.mxu0 %v8338_v58  ;;  %v8390_v54 = vld [vmem:[%s9697_s21 + $0x428] sm:$0xff]   ;;  %v8394_v58 = vld [vmem:[%s9697_s21 + $0x430] sm:$0xff]  }
 0x1db   : > { %7970 = vmatpush3.bf16.msra.mxu1 %v8339_v59  ;;  %7949 = vmatprep.subr.bf16.mxu0 %v8340_v60  ;;  %v8395_v59 = vld [vmem:[%s9697_s21 + $0x4b0] sm:$0xff]   ;;  %v8396_v60 = vld [vmem:[%s9697_s21 + $0x478] sm:$0xff]  }
 0x1dc   : > { %7971 = vmatprep.subr.bf16.mxu1 %v8341_v61  ;;  %6889 = vmatprep.mubr.bf16.mxu0 %v7522_v28  ;;  %v8397_v61 = vld [vmem:[%s9697_s21 + $0x4f8] sm:$0xff]   ;;  %v8420_v28 = vld [vmem:[%s9697_s21 + $0x568] sm:$0xff]  }
 0x1dd   : > { %6930 = vmatprep.mubr.bf16.mxu1 %v7524_v31  ;;  %v8423_v31 = vld [vmem:[%s9697_s21 + $0x5a8] sm:$0xff]  }
 0x1de   : > { %7950 = vmatpush3.bf16.msra.mxu0 %v8342_v62  ;;  %v8398_v62 = vld [vmem:[%s9697_s21 + $0x438] sm:$0xff]  }
 0x1df   : > { %7972 = vmatpush3.bf16.msra.mxu1 %v8343_v63  ;;  %7951 = vmatprep.subr.bf16.mxu0 %v8344_v0  ;;  %v8399_v63 = vld [vmem:[%s9697_s21 + $0x4b8] sm:$0xff]   ;;  %v4379_v0 = vld [vmem:[%s9733_s26 + $0x40] sm:$0xff] }
 0x1e0   : > { %7973 = vmatprep.subr.bf16.mxu1 %v8345_v1  ;;  %v4395_v1 = vld [vmem:[%s9733_s26 + $0xc0] sm:$0xff] }
 0x1e2   : > { %7952 = vmatpush3.bf16.msra.mxu0 %v8346_v2  ;;  %v7525_v2 = vcombine.low %v4379_v0, %v4395_v1 }
 0x1e3   : > { %7974 = vmatpush3.bf16.msra.mxu1 %v8347_v3  ;;  %7953 = vmatprep.subr.bf16.mxu0 %v8348_v4  ;;  %v7526_v3 = vcombine.high %v4379_v0, %v4395_v1  ;;  %v4380_v4 = vld [vmem:[%s9733_s26 + $0x48] sm:$0xff]  ;;  %v8448_v0 = vld [vmem:[%s9697_s21 + $0x660] sm:$0xff]  }
 0x1e4   : > { %7975 = vmatprep.subr.bf16.mxu1 %v8349_v5  ;;  %v4396_v5 = vld [vmem:[%s9733_s26 + $0xc8] sm:$0xff]  ;;  %v8449_v1 = vld [vmem:[%s9697_s21 + $0x6e0] sm:$0xff]  }
 0x1e6   : > { %7954 = vmatpush3.bf16.msra.mxu0 %v8350_v6  ;;  %v7527_v6 = vcombine.low %v4380_v4, %v4396_v5 }
 0x1e7   : > { %7976 = vmatpush3.bf16.msra.mxu1 %v8351_v7  ;;  %7955 = vmatprep.subr.bf16.mxu0 %v8352_v8  ;;  %v7528_v7 = vcombine.high %v4380_v4, %v4396_v5  ;;  %v8400_v8 = vld [vmem:[%s9697_s21 + $0x540] sm:$0xff]   ;;  %v8452_v4 = vld [vmem:[%s9697_s21 + $0x668] sm:$0xff]  }
 0x1e8   : > { %7977 = vmatprep.subr.bf16.mxu1 %v8353_v9  ;;  %v8401_v9 = vld [vmem:[%s9697_s21 + $0x5c0] sm:$0xff]   ;;  %v8453_v5 = vld [vmem:[%s9697_s21 + $0x6e8] sm:$0xff]  }
 0x1ea   : > { %7956 = vmatpush3.bf16.msra.mxu0 %v8354_v10  ;;  %v8402_v10 = vld [vmem:[%s9697_s21 + $0x500] sm:$0xff]  }
 0x1eb   : > { %7978 = vmatpush3.bf16.msra.mxu1 %v8355_v11  ;;  %7957 = vmatprep.subr.bf16.mxu0 %v8356_v12  ;;  %v8403_v11 = vld [vmem:[%s9697_s21 + $0x580] sm:$0xff]   ;;  %v8404_v12 = vld [vmem:[%s9697_s21 + $0x548] sm:$0xff]  }
 0x1ec   : > { %7979 = vmatprep.subr.bf16.mxu1 %v8357_v13  ;;  %v8405_v13 = vld [vmem:[%s9697_s21 + $0x5c8] sm:$0xff]  }
 0x1ee   : > { %7958 = vmatpush3.bf16.msra.mxu0 %v8358_v14  ;;  %v8406_v14 = vld [vmem:[%s9697_s21 + $0x508] sm:$0xff]  }
 0x1ef   : > { %7980 = vmatpush3.bf16.msra.mxu1 %v8359_v15  ;;  %7959 = vmatprep.subr.bf16.mxu0 %v8360_v16  ;;  %v8407_v15 = vld [vmem:[%s9697_s21 + $0x588] sm:$0xff]   ;;  %v8408_v16 = vld [vmem:[%s9697_s21 + $0x550] sm:$0xff]  }
 0x1f0   : > { %7981 = vmatprep.subr.bf16.mxu1 %v8361_v17  ;;  %v8409_v17 = vld [vmem:[%s9697_s21 + $0x5d0] sm:$0xff]  }
 0x1f2   : > { %7960 = vmatpush3.bf16.msra.mxu0 %v8362_v18  ;;  %v8410_v18 = vld [vmem:[%s9697_s21 + $0x510] sm:$0xff]  }
 0x1f3   : > { %7982 = vmatpush3.bf16.msra.mxu1 %v8363_v19  ;;  %7961 = vmatprep.subr.bf16.mxu0 %v8364_v20  ;;  %v8411_v19 = vld [vmem:[%s9697_s21 + $0x590] sm:$0xff]   ;;  %v8412_v20 = vld [vmem:[%s9697_s21 + $0x558] sm:$0xff]  }
 0x1f4   : > { %7983 = vmatprep.subr.bf16.mxu1 %v8365_v21  ;;  %v8413_v21 = vld [vmem:[%s9697_s21 + $0x5d8] sm:$0xff]  }
 0x1f6   : > { %7962 = vmatpush3.bf16.msra.mxu0 %v8366_v22  ;;  %v8414_v22 = vld [vmem:[%s9697_s21 + $0x518] sm:$0xff]  }
 0x1f7   : > { %7984 = vmatpush3.bf16.msra.mxu1 %v8367_v23  ;;  %7991 = vmatprep.subr.bf16.mxu0 %v8368_v32  ;;  %v8415_v23 = vld [vmem:[%s9697_s21 + $0x598] sm:$0xff]   ;;  %v8424_v32 = vld [vmem:[%s9697_s21 + $0x570] sm:$0xff]  }
 0x1f8   : > { %8013 = vmatprep.subr.bf16.mxu1 %v8369_v33  ;;  %v8425_v33 = vld [vmem:[%s9697_s21 + $0x5f0] sm:$0xff]  }
 0x1f9   : > { %6890 = vmatmul.mubr.bf16.vlgmr.msra.gmra.mrb[12].mxu0 %v7521_v27  ;;  %v8419_v27 = vld [vmem:[%s9697_s21 + $0x5a0] sm:$0xff]  }
 0x1fa   : > { %6931 = vmatmul.mubr.bf16.vlgmr.msra.gmra.mrb[12].mxu1 %v7523_v30  ;;  %7992 = vmatpush3.bf16.msra.mxu0 %v8370_v34  ;;  %v8422_v30 = vld [vmem:[%s9697_s21 + $0x528] sm:$0xff]   ;;  %v8426_v34 = vld [vmem:[%s9697_s21 + $0x530] sm:$0xff]  }
 0x1fb   : > { %8014 = vmatpush3.bf16.msra.mxu1 %v8371_v35  ;;  %7993 = vmatprep.subr.bf16.mxu0 %v8372_v36  ;;  %v8427_v35 = vld [vmem:[%s9697_s21 + $0x5b0] sm:$0xff]   ;;  %v8428_v36 = vld [vmem:[%s9697_s21 + $0x578] sm:$0xff]  }
 0x1fc   : > { %8015 = vmatprep.subr.bf16.mxu1 %v8373_v37  ;;  %6971 = vmatprep.mubr.bf16.mxu0 %v7526_v3  ;;  %v8429_v37 = vld [vmem:[%s9697_s21 + $0x5f8] sm:$0xff]   ;;  %v8451_v3 = vld [vmem:[%s9697_s21 + $0x6a0] sm:$0xff]  }
 0x1fd   : > { %7012 = vmatprep.mubr.bf16.mxu1 %v7528_v7  ;;  %v8455_v7 = vld [vmem:[%s9697_s21 + $0x6a8] sm:$0xff]  }
 0x1fe   : > { %7994 = vmatpush3.bf16.msra.mxu0 %v8374_v38  ;;  %v8430_v38 = vld [vmem:[%s9697_s21 + $0x538] sm:$0xff]  }
 0x1ff   : > { %8016 = vmatpush3.bf16.msra.mxu1 %v8375_v39  ;;  %7995 = vmatprep.subr.bf16.mxu0 %v8376_v40  ;;  %v8431_v39 = vld [vmem:[%s9697_s21 + $0x5b8] sm:$0xff]   ;;  %v4381_v40 = vld [vmem:[%s9733_s26 + $0x50] sm:$0xff] }
 0x200   : > { %8017 = vmatprep.subr.bf16.mxu1 %v8377_v41  ;;  %v4397_v41 = vld [vmem:[%s9733_s26 + $0xd0] sm:$0xff] }
 0x202   : > { %7996 = vmatpush3.bf16.msra.mxu0 %v8378_v42  ;;  %v4382_v42 = vld [vmem:[%s9733_s26 + $0x58] sm:$0xff] }
 0x203   : > { %8018 = vmatpush3.bf16.msra.mxu1 %v8379_v43  ;;  %7997 = vmatprep.subr.bf16.mxu0 %v8380_v44  ;;  %v4398_v43 = vld [vmem:[%s9733_s26 + $0xd8] sm:$0xff]  ;;  %v7529_v44 = vcombine.low %v4381_v40, %v4397_v41 }
 0x204   : > { %8019 = vmatprep.subr.bf16.mxu1 %v8381_v45  ;;  %v7530_v45 = vcombine.high %v4381_v40, %v4397_v41  ;;  %v8479_v41 = vld [vmem:[%s9697_s21 + $0x798] sm:$0xff]  }
 0x206   : > { %7998 = vmatpush3.bf16.msra.mxu0 %v8382_v46  ;;  %v7531_v46 = vcombine.low %v4382_v42, %v4398_v43 }
 0x207   : > { %8020 = vmatpush3.bf16.msra.mxu1 %v8383_v47  ;;  %7999 = vmatprep.subr.bf16.mxu0 %v8384_v48  ;;  %v7532_v47 = vcombine.high %v4382_v42, %v4398_v43  ;;  %v8432_v48 = vld [vmem:[%s9697_s21 + $0x640] sm:$0xff]  }
 0x208   : > { %8021 = vmatprep.subr.bf16.mxu1 %v8385_v49  ;;  %v8433_v49 = vld [vmem:[%s9697_s21 + $0x6c0] sm:$0xff]  }
 0x209   : > { %v8480_v43 = vld [vmem:[%s9697_s21 + $0x760] sm:$0xff]  }
 0x20a   : > { %8000 = vmatpush3.bf16.msra.mxu0 %v8386_v50  ;;  %v8434_v50 = vld [vmem:[%s9697_s21 + $0x600] sm:$0xff]  }
 0x20b   : > { %8022 = vmatpush3.bf16.msra.mxu1 %v8387_v51  ;;  %8001 = vmatprep.subr.bf16.mxu0 %v8388_v52  ;;  %v8435_v51 = vld [vmem:[%s9697_s21 + $0x680] sm:$0xff]   ;;  %v8436_v52 = vld [vmem:[%s9697_s21 + $0x648] sm:$0xff]  }
 0x20c   : > { %8023 = vmatprep.subr.bf16.mxu1 %v8389_v53  ;;  %v8437_v53 = vld [vmem:[%s9697_s21 + $0x6c8] sm:$0xff]  }
 0x20e   : > { %8002 = vmatpush3.bf16.msra.mxu0 %v8390_v54  ;;  %v8438_v54 = vld [vmem:[%s9697_s21 + $0x608] sm:$0xff]  }
 0x20f   : > { %8024 = vmatpush3.bf16.msra.mxu1 %v8391_v55  ;;  %8003 = vmatprep.subr.bf16.mxu0 %v8392_v56  ;;  %v8439_v55 = vld [vmem:[%s9697_s21 + $0x688] sm:$0xff]   ;;  %v8440_v56 = vld [vmem:[%s9697_s21 + $0x650] sm:$0xff]  }
 0x210   : > { %8025 = vmatprep.subr.bf16.mxu1 %v8393_v57  ;;  %v8441_v57 = vld [vmem:[%s9697_s21 + $0x6d0] sm:$0xff]  }
 0x212   : > { %8004 = vmatpush3.bf16.msra.mxu0 %v8394_v58  ;;  %v8442_v58 = vld [vmem:[%s9697_s21 + $0x610] sm:$0xff]  }
 0x213   : > { %8026 = vmatpush3.bf16.msra.mxu1 %v8395_v59  ;;  %8005 = vmatprep.subr.bf16.mxu0 %v8396_v60  ;;  %v8443_v59 = vld [vmem:[%s9697_s21 + $0x690] sm:$0xff]   ;;  %v8444_v60 = vld [vmem:[%s9697_s21 + $0x658] sm:$0xff]  }
 0x214   : > { %8027 = vmatprep.subr.bf16.mxu1 %v8397_v61  ;;  %v8445_v61 = vld [vmem:[%s9697_s21 + $0x6d8] sm:$0xff]  }
 0x216   : > { %8006 = vmatpush3.bf16.msra.mxu0 %v8398_v62  ;;  %v8446_v62 = vld [vmem:[%s9697_s21 + $0x618] sm:$0xff]  }
 0x217   : > { %8028 = vmatpush3.bf16.msra.mxu1 %v8399_v63  ;;  %8035 = vmatprep.subr.bf16.mxu0 %v8400_v8  ;;  %v8447_v63 = vld [vmem:[%s9697_s21 + $0x698] sm:$0xff]   ;;  %v8456_v8 = vld [vmem:[%s9697_s21 + $0x670] sm:$0xff]  }
 0x218   : > { %8057 = vmatprep.subr.bf16.mxu1 %v8401_v9  ;;  %v8457_v9 = vld [vmem:[%s9697_s21 + $0x6f0] sm:$0xff]  }
 0x219   : > { %6972 = vmatmul.mubr.bf16.vlgmr.msra.gmra.mrb[16].mxu0 %v7525_v2  ;;  %v8450_v2 = vld [vmem:[%s9697_s21 + $0x620] sm:$0xff]  }
 0x21a   : > { %7013 = vmatmul.mubr.bf16.vlgmr.msra.gmra.mrb[16].mxu1 %v7527_v6  ;;  %8036 = vmatpush3.bf16.msra.mxu0 %v8402_v10  ;;  %v8454_v6 = vld [vmem:[%s9697_s21 + $0x628] sm:$0xff]   ;;  %v8458_v10 = vld [vmem:[%s9697_s21 + $0x630] sm:$0xff]  }
 0x21b   : > { %8058 = vmatpush3.bf16.msra.mxu1 %v8403_v11  ;;  %8037 = vmatprep.subr.bf16.mxu0 %v8404_v12  ;;  %v8459_v11 = vld [vmem:[%s9697_s21 + $0x6b0] sm:$0xff]   ;;  %v8460_v12 = vld [vmem:[%s9697_s21 + $0x678] sm:$0xff]  }
 0x21c   : > { %8059 = vmatprep.subr.bf16.mxu1 %v8405_v13  ;;  %7053 = vmatprep.mubr.bf16.mxu0 %v7530_v45  ;;  %v8461_v13 = vld [vmem:[%s9697_s21 + $0x6f8] sm:$0xff]  }
 0x21d   : > { %7094 = vmatprep.mubr.bf16.mxu1 %v7532_v47 }
 0x21e   : > { %8038 = vmatpush3.bf16.msra.mxu0 %v8406_v14  ;;  %v8462_v14 = vld [vmem:[%s9697_s21 + $0x638] sm:$0xff]  }
 0x21f   : > { %8060 = vmatpush3.bf16.msra.mxu1 %v8407_v15  ;;  %8039 = vmatprep.subr.bf16.mxu0 %v8408_v16  ;;  %v8463_v15 = vld [vmem:[%s9697_s21 + $0x6b8] sm:$0xff]   ;;  %v4383_v16 = vld [vmem:[%s9733_s26 + $0x60] sm:$0xff] }
 0x220   : > { %8061 = vmatprep.subr.bf16.mxu1 %v8409_v17  ;;  %v4399_v17 = vld [vmem:[%s9733_s26 + $0xe0] sm:$0xff] }
 0x222   : > { %8040 = vmatpush3.bf16.msra.mxu0 %v8410_v18  ;;  %v4384_v18 = vld [vmem:[%s9733_s26 + $0x68] sm:$0xff] }
 0x223   : > { %8062 = vmatpush3.bf16.msra.mxu1 %v8411_v19  ;;  %8041 = vmatprep.subr.bf16.mxu0 %v8412_v20  ;;  %v7533_v19 = vcombine.low %v4383_v16, %v4399_v17  ;;  %v7534_v20 = vcombine.high %v4383_v16, %v4399_v17 }
 0x224   : > { %8063 = vmatprep.subr.bf16.mxu1 %v8413_v21  ;;  %v4400_v21 = vld [vmem:[%s9733_s26 + $0xe8] sm:$0xff] }
 0x226   : > { %8042 = vmatpush3.bf16.msra.mxu0 %v8414_v22  ;;  %v7535_v22 = vcombine.low %v4384_v18, %v4400_v21 }
 0x227   : > { %8064 = vmatpush3.bf16.msra.mxu1 %v8415_v23  ;;  %8043 = vmatprep.subr.bf16.mxu0 %v8416_v24  ;;  %v7536_v23 = vcombine.high %v4384_v18, %v4400_v21  ;;  %v8464_v24 = vld [vmem:[%s9697_s21 + $0x740] sm:$0xff]  }
 0x228   : > { %8065 = vmatprep.subr.bf16.mxu1 %v8417_v25  ;;  %v8465_v25 = vld [vmem:[%s9697_s21 + $0x7c0] sm:$0xff]  }
 0x22a   : > { %8044 = vmatpush3.bf16.msra.mxu0 %v8418_v26  ;;  %v8466_v26 = vld [vmem:[%s9697_s21 + $0x700] sm:$0xff]  }
 0x22b   : > { %8066 = vmatpush3.bf16.msra.mxu1 %v8419_v27  ;;  %8045 = vmatprep.subr.bf16.mxu0 %v8420_v28  ;;  %v8467_v27 = vld [vmem:[%s9697_s21 + $0x780] sm:$0xff]   ;;  %v8468_v28 = vld [vmem:[%s9697_s21 + $0x748] sm:$0xff]  }
 0x22c   : > { %8067 = vmatprep.subr.bf16.mxu1 %v8421_v29  ;;  %v8469_v29 = vld [vmem:[%s9697_s21 + $0x7c8] sm:$0xff]  }
 0x22e   : > { %8046 = vmatpush3.bf16.msra.mxu0 %v8422_v30  ;;  %v8470_v30 = vld [vmem:[%s9697_s21 + $0x708] sm:$0xff]  }
 0x22f   : > { %8068 = vmatpush3.bf16.msra.mxu1 %v8423_v31  ;;  %8047 = vmatprep.subr.bf16.mxu0 %v8424_v32  ;;  %v8471_v31 = vld [vmem:[%s9697_s21 + $0x788] sm:$0xff]   ;;  %v8472_v32 = vld [vmem:[%s9697_s21 + $0x750] sm:$0xff]  }
 0x230   : > { %8069 = vmatprep.subr.bf16.mxu1 %v8425_v33  ;;  %v8473_v33 = vld [vmem:[%s9697_s21 + $0x7d0] sm:$0xff]  }
 0x232   : > { %8048 = vmatpush3.bf16.msra.mxu0 %v8426_v34  ;;  %v8474_v34 = vld [vmem:[%s9697_s21 + $0x710] sm:$0xff]  }
 0x233   : > { %8070 = vmatpush3.bf16.msra.mxu1 %v8427_v35  ;;  %8049 = vmatprep.subr.bf16.mxu0 %v8428_v36  ;;  %v8475_v35 = vld [vmem:[%s9697_s21 + $0x790] sm:$0xff]   ;;  %v8476_v36 = vld [vmem:[%s9697_s21 + $0x758] sm:$0xff]  }
 0x234   : > { %8071 = vmatprep.subr.bf16.mxu1 %v8429_v37  ;;  %v8477_v37 = vld [vmem:[%s9697_s21 + $0x7d8] sm:$0xff]  }
 0x236   : > { %8050 = vmatpush3.bf16.msra.mxu0 %v8430_v38 }
 0x237   : > { %8072 = vmatpush3.bf16.msra.mxu1 %v8431_v39  ;;  %8079 = vmatprep.subr.bf16.mxu0 %v8432_v48  ;;  %v8478_v39 = vld [vmem:[%s9697_s21 + $0x718] sm:$0xff]  }
 0x238   : > { %8101 = vmatprep.subr.bf16.mxu1 %v8433_v49  ;;  %v8482_v49 = vld [vmem:[%s9697_s21 + $0x720] sm:$0xff]  }
 0x239   : > { %7054 = vmatmul.mubr.bf16.vlgmr.msra.gmra.mrb[20].mxu0 %v7529_v44 }
 0x23a   : > { %7095 = vmatmul.mubr.bf16.vlgmr.msra.gmra.mrb[20].mxu1 %v7531_v46  ;;  %8080 = vmatpush3.bf16.msra.mxu0 %v8434_v50  ;;  %v8481_v46 = vld [vmem:[%s9697_s21 + $0x7e0] sm:$0xff]  }
 0x23b   : > { %8102 = vmatpush3.bf16.msra.mxu1 %v8435_v51  ;;  %8081 = vmatprep.subr.bf16.mxu0 %v8436_v52  ;;  %v8483_v51 = vld [vmem:[%s9697_s21 + $0x7a0] sm:$0xff]  }
 0x23c   : > { %8103 = vmatprep.subr.bf16.mxu1 %v8437_v53  ;;  %7135 = vmatprep.mubr.bf16.mxu0 %v7534_v20 }
 0x23d   : > { %7176 = vmatprep.mubr.bf16.mxu1 %v7536_v23 }
 0x23e   : > { %8082 = vmatpush3.bf16.msra.mxu0 %v8438_v54  ;;  %v8484_v54 = vld [vmem:[%s9697_s21 + $0x768] sm:$0xff]  }
 0x23f   : > { %8104 = vmatpush3.bf16.msra.mxu1 %v8439_v55  ;;  %8083 = vmatprep.subr.bf16.mxu0 %v8440_v56 }
 0x240   : > { %8105 = vmatprep.subr.bf16.mxu1 %v8441_v57  ;;  %v8485_v57 = vld [vmem:[%s9697_s21 + $0x7e8] sm:$0xff]  }
 0x242   : > { %8084 = vmatpush3.bf16.msra.mxu0 %v8442_v58 }
 0x243   : > { %8106 = vmatpush3.bf16.msra.mxu1 %v8443_v59  ;;  %8085 = vmatprep.subr.bf16.mxu0 %v8444_v60  ;;  %v8486_v59 = vld [vmem:[%s9697_s21 + $0x728] sm:$0xff]  }
 0x244   : > { %8107 = vmatprep.subr.bf16.mxu1 %v8445_v61  ;;  %v8487_v60 = vld [vmem:[%s9697_s21 + $0x7a8] sm:$0xff]  }
 0x246   : > { %8086 = vmatpush3.bf16.msra.mxu0 %v8446_v62  ;;  %v8488_v62 = vld [vmem:[%s9697_s21 + $0x770] sm:$0xff]  }
 0x247   : > { %8108 = vmatpush3.bf16.msra.mxu1 %v8447_v63  ;;  %8087 = vmatprep.subr.bf16.mxu0 %v8448_v0  ;;  %v8489_v63 = vld [vmem:[%s9697_s21 + $0x7f0] sm:$0xff]  }
 0x248   : > { %8109 = vmatprep.subr.bf16.mxu1 %v8449_v1  ;;  %v8490_v0 = vld [vmem:[%s9697_s21 + $0x730] sm:$0xff]  }
 0x249   : > { %v8491_v1 = vld [vmem:[%s9697_s21 + $0x7b0] sm:$0xff]  }
 0x24a   : > { %8088 = vmatpush3.bf16.msra.mxu0 %v8450_v2  ;;  %v8492_v2 = vld [vmem:[%s9697_s21 + $0x778] sm:$0xff]  }
 0x24b   : > { %8110 = vmatpush3.bf16.msra.mxu1 %v8451_v3  ;;  %8089 = vmatprep.subr.bf16.mxu0 %v8452_v4  ;;  %v8493_v3 = vld [vmem:[%s9697_s21 + $0x7f8] sm:$0xff]  }
 0x24c   : > { %8111 = vmatprep.subr.bf16.mxu1 %v8453_v5  ;;  %v8494_v4 = vld [vmem:[%s9697_s21 + $0x738] sm:$0xff]  }
 0x24d   : > { %v8495_v5 = vld [vmem:[%s9697_s21 + $0x7b8] sm:$0xff]  }
 0x24e   : > { %8090 = vmatpush3.bf16.msra.mxu0 %v8454_v6  ;;  %v4385_v6 = vld [vmem:[%s9733_s26 + $0x70] sm:$0xff] }
 0x24f   : > { %8112 = vmatpush3.bf16.msra.mxu1 %v8455_v7  ;;  %8091 = vmatprep.subr.bf16.mxu0 %v8456_v8  ;;  %v4401_v7 = vld [vmem:[%s9733_s26 + $0xf0] sm:$0xff] }
 0x250   : > { %8113 = vmatprep.subr.bf16.mxu1 %v8457_v9  ;;  %v7537_v8 = vcombine.low %v4385_v6, %v4401_v7  ;;  %v7538_v9 = vcombine.high %v4385_v6, %v4401_v7 }
 0x252   : > { %8092 = vmatpush3.bf16.msra.mxu0 %v8458_v10  ;;  %v4386_v10 = vld [vmem:[%s9733_s26 + $0x78] sm:$0xff] }
 0x253   : > { %8114 = vmatpush3.bf16.msra.mxu1 %v8459_v11  ;;  %8093 = vmatprep.subr.bf16.mxu0 %v8460_v12  ;;  %v4402_v11 = vld [vmem:[%s9733_s26 + $0xf8] sm:$0xff] }
 0x254   : > { %8115 = vmatprep.subr.bf16.mxu1 %v8461_v13  ;;  %v7539_v12 = vcombine.low %v4386_v10, %v4402_v11  ;;  %v7540_v13 = vcombine.high %v4386_v10, %v4402_v11 }
 0x256   : > { %8094 = vmatpush3.bf16.msra.mxu0 %v8462_v14 }
 0x257   : > { %8116 = vmatpush3.bf16.msra.mxu1 %v8463_v15  ;;  %8123 = vmatprep.subr.bf16.mxu0 %v8464_v24 }
 0x258   : > { %8145 = vmatprep.subr.bf16.mxu1 %v8465_v25 }
 0x259   : > { %7136 = vmatmul.mubr.bf16.vlgmr.msra.gmra.mrb[24].mxu0 %v7533_v19 }
 0x25a   : > { %7177 = vmatmul.mubr.bf16.vlgmr.msra.gmra.mrb[24].mxu1 %v7535_v22  ;;  %8124 = vmatpush3.bf16.msra.mxu0 %v8466_v26 }
 0x25b   : > { %8146 = vmatpush3.bf16.msra.mxu1 %v8467_v27  ;;  %8125 = vmatprep.subr.bf16.mxu0 %v8468_v28 }
 0x25c   : > { %8147 = vmatprep.subr.bf16.mxu1 %v8469_v29  ;;  %7217 = vmatprep.mubr.bf16.mxu0 %v7538_v9 }
 0x25d   : > { %7258 = vmatprep.mubr.bf16.mxu1 %v7540_v13 }
 0x25e   : > { %8126 = vmatpush3.bf16.msra.mxu0 %v8470_v30 }
 0x25f   : > { %8148 = vmatpush3.bf16.msra.mxu1 %v8471_v31  ;;  %8127 = vmatprep.subr.bf16.mxu0 %v8472_v32 }
 0x260   : > { %8149 = vmatprep.subr.bf16.mxu1 %v8473_v33 }
 0x262   : > { %8128 = vmatpush3.bf16.msra.mxu0 %v8474_v34 }
 0x263   : > { %8150 = vmatpush3.bf16.msra.mxu1 %v8475_v35  ;;  %8129 = vmatprep.subr.bf16.mxu0 %v8476_v36 }
 0x264   : > { %8151 = vmatprep.subr.bf16.mxu1 %v8477_v37 }
 0x266   : > { %8130 = vmatpush3.bf16.msra.mxu0 %v8478_v39 }
 0x267   : > { %8152 = vmatpush3.bf16.msra.mxu1 %v8479_v41  ;;  %8131 = vmatprep.subr.bf16.mxu0 %v8480_v43 }
 0x268   : > { %8153 = vmatprep.subr.bf16.mxu1 %v8481_v46 }
 0x26a   : > { %8132 = vmatpush3.bf16.msra.mxu0 %v8482_v49 }
 0x26b   : > { %8154 = vmatpush3.bf16.msra.mxu1 %v8483_v51  ;;  %8133 = vmatprep.subr.bf16.mxu0 %v8484_v54 }
 0x26c   : > { %v7831_v38 = vpop.f32.mrb[0].mxu0  ;;  %8155 = vmatprep.subr.bf16.mxu1 %v8485_v57 }
 0x26d   : > { %v7853_v40 = vpop.f32.mrb[0].mxu1  ;;  %v7832_v42 = vpop.f32.mrb[1].mxu0 }
 0x26e   : > { %v7833_v44 = vadd.f32 %v7832_v42, %v7831_v38  ;;  %v7854_v45 = vpop.f32.mrb[1].mxu1  ;;  %v7834_v48 = vpop.f32.mrb[2].mxu0  ;;  %8134 = vmatpush3.bf16.msra.mxu0 %v8486_v59 }
 0x26f   : > { %v7855_v47 = vadd.f32 %v7854_v45, %v7853_v40  ;;  %v7856_v50 = vpop.f32.mrb[2].mxu1  ;;  %v7835_v53 = vpop.f32.mrb[3].mxu0  ;;  %8156 = vmatpush3.bf16.msra.mxu1 %v8487_v60  ;;  %8135 = vmatprep.subr.bf16.mxu0 %v8488_v62 }
 0x270   : > { %v7836_v55 = vadd.f32 %v7835_v53, %v7834_v48  ;;  %v7857_v56 = vpop.f32.mrb[3].mxu1  ;;  %8157 = vmatprep.subr.bf16.mxu1 %v8489_v63 }
 0x271   : > { %v6687_v52 = vadd.f32 %v7855_v47, %v7833_v44  ;;  %v7858_v58 = vadd.f32 %v7857_v56, %v7856_v50 }
 0x272   : > { %8136 = vmatpush3.bf16.msra.mxu0 %v8490_v0 }
 0x273   : > { %v6690_v61 = vadd.f32 %v7858_v58, %v7836_v55  ;;  %8158 = vmatpush3.bf16.msra.mxu1 %v8491_v1  ;;  %8137 = vmatprep.subr.bf16.mxu0 %v8492_v2 }
 0x274   : > { %8159 = vmatprep.subr.bf16.mxu1 %v8493_v3 }
 0x276   : > { %8138 = vmatpush3.bf16.msra.mxu0 %v8494_v4 }
 0x277   : > { %8160 = vmatpush3.bf16.msra.mxu1 %v8495_v5 }
 0x279   : > { %7218 = vmatmul.mubr.bf16.vlgmr.msra.gmra.mrb[28].mxu0 %v7537_v8 }
 0x27a   : > { %7259 = vmatmul.mubr.bf16.vlgmr.msra.gmra.mrb[28].mxu1 %v7539_v12 }
 0x28c   : > { %v7875_v14 = vpop.f32.mrb[4].mxu0 }
 0x28d   : > { %v7897_v15 = vpop.f32.mrb[4].mxu1  ;;  %v7876_v16 = vpop.f32.mrb[5].mxu0 }
 0x28e   : > { %v7877_v17 = vadd.f32 %v7876_v16, %v7875_v14  ;;  %v7898_v18 = vpop.f32.mrb[5].mxu1  ;;  %v7878_v19 = vpop.f32.mrb[6].mxu0 }
 0x28f   : > { %v7899_v20 = vadd.f32 %v7898_v18, %v7897_v15  ;;  %v7900_v21 = vpop.f32.mrb[6].mxu1  ;;  %v7879_v22 = vpop.f32.mrb[7].mxu0 }
 0x290   : > { %v6728_v23 = vadd.f32 %v7877_v17, %v6687_v52  ;;  %v7880_v24 = vadd.f32 %v7879_v22, %v7878_v19  ;;  %v7901_v25 = vpop.f32.mrb[7].mxu1 }
 0x291   : > { %v7902_v26 = vadd.f32 %v7901_v25, %v7900_v21 }
 0x292   : > { %v6769_v27 = vadd.f32 %v7899_v20, %v6728_v23  ;;  %v6731_v28 = vadd.f32 %v7880_v24, %v6690_v61 }
 0x294   : > { %v6772_v29 = vadd.f32 %v7902_v26, %v6731_v28 }
 0x2ac   : > { %v7919_v30 = vpop.f32.mrb[8].mxu0 }
 0x2ad   : > { %v7941_v31 = vpop.f32.mrb[8].mxu1  ;;  %v7920_v32 = vpop.f32.mrb[9].mxu0 }
 0x2ae   : > { %v7942_v33 = vpop.f32.mrb[9].mxu1  ;;  %v7921_v34 = vadd.f32 %v7920_v32, %v7919_v30  ;;  %v7922_v36 = vpop.f32.mrb[10].mxu0 }
 0x2af   : > { %v7943_v35 = vadd.f32 %v7942_v33, %v7941_v31  ;;  %v7944_v37 = vpop.f32.mrb[10].mxu1  ;;  %v7923_v38 = vpop.f32.mrb[11].mxu0 }
 0x2b0   : > { %v7945_v39 = vpop.f32.mrb[11].mxu1  ;;  %v6810_v40 = vadd.f32 %v7921_v34, %v6769_v27  ;;  %v7924_v41 = vadd.f32 %v7923_v38, %v7922_v36 }
 0x2b1   : > { %v7946_v42 = vadd.f32 %v7945_v39, %v7944_v37 }
 0x2b2   : > { %v6851_v43 = vadd.f32 %v7943_v35, %v6810_v40  ;;  %v6813_v44 = vadd.f32 %v7924_v41, %v6772_v29 }
 0x2b4   : > { %v6854_v45 = vadd.f32 %v7946_v42, %v6813_v44 }
 0x2cc   : > { %v7963_v46 = vpop.f32.mrb[12].mxu0 }
 0x2cd   : > { %v7985_v47 = vpop.f32.mrb[12].mxu1  ;;  %v7964_v48 = vpop.f32.mrb[13].mxu0 }
 0x2ce   : > { %v7965_v49 = vadd.f32 %v7964_v48, %v7963_v46  ;;  %v7986_v50 = vpop.f32.mrb[13].mxu1  ;;  %v7966_v51 = vpop.f32.mrb[14].mxu0  ;;  %v7288_v46 = vlaneseq }
 0x2cf   : > { %v7987_v52 = vadd.f32 %v7986_v50, %v7985_v47  ;;  %v7988_v53 = vpop.f32.mrb[14].mxu1  ;;  %v7967_v54 = vpop.f32.mrb[15].mxu0 }
 0x2d0   : > { %v6892_v55 = vadd.f32 %v7965_v49, %v6851_v43  ;;  %v7968_v56 = vadd.f32 %v7967_v54, %v7966_v51  ;;  %v7989_v57 = vpop.f32.mrb[15].mxu1  ;;  %v7289_v47 = vshrl.u32 %v7288_v46, 7 }
 0x2d1   : > { %v7990_v58 = vadd.f32 %v7989_v57, %v7988_v53 }
 0x2d2   : > { %v6933_v59 = vadd.f32 %v7987_v52, %v6892_v55  ;;  %v6895_v60 = vadd.f32 %v7968_v56, %v6854_v45  ;;  %v7290_v49 = vadd.s32 8, %v7289_v47 }
 0x2d4   : > { %v6936_v61 = vadd.f32 %v7990_v58, %v6895_v60  ;;  %vm7292_vm0 = vcmp.lt.s32.totalorder %v7290_v49, 9 }
 0x2ec   : > { %v8007_v62 = vpop.f32.mrb[16].mxu0 }
 0x2ed   : > { %v8029_v63 = vpop.f32.mrb[16].mxu1  ;;  %v8008_v0 = vpop.f32.mrb[17].mxu0 }
 0x2ee   : > { %v8009_v1 = vadd.f32 %v8008_v0, %v8007_v62  ;;  %v8030_v2 = vpop.f32.mrb[17].mxu1  ;;  %v8010_v3 = vpop.f32.mrb[18].mxu0  ;;  %v8570_v0 = vmov 0.0  }
 0x2ef   : > { %v8031_v4 = vadd.f32 %v8030_v2, %v8029_v63  ;;  %v8032_v5 = vpop.f32.mrb[18].mxu1  ;;  %v8011_v6 = vpop.f32.mrb[19].mxu0 }
 0x2f0   : > { %v6974_v7 = vadd.f32 %v8009_v1, %v6933_v59  ;;  %v8012_v8 = vadd.f32 %v8011_v6, %v8010_v3  ;;  %v8033_v9 = vpop.f32.mrb[19].mxu1  ;;  %v7797_v1 = vsel %vm7292_vm0, 1.0, %v8570_v0 }
 0x2f1   : > { %v8034_v10 = vadd.f32 %v8033_v9, %v8032_v5 }
 0x2f2   : > { %v7015_v11 = vadd.f32 %v8031_v4, %v6974_v7  ;;  %v6977_v12 = vadd.f32 %v8012_v8, %v6936_v61 }
 0x2f4   : > { %v7018_v13 = vadd.f32 %v8034_v10, %v6977_v12 }
 0x30c   : > { %v8051_v14 = vpop.f32.mrb[20].mxu0 }
 0x30d   : > { %v8073_v15 = vpop.f32.mrb[20].mxu1  ;;  %v8052_v16 = vpop.f32.mrb[21].mxu0 }
 0x30e   : > { %v8074_v17 = vpop.f32.mrb[21].mxu1  ;;  %v8053_v18 = vadd.f32 %v8052_v16, %v8051_v14  ;;  %v8054_v20 = vpop.f32.mrb[22].mxu0 }
 0x30f   : > { %v8075_v19 = vadd.f32 %v8074_v17, %v8073_v15  ;;  %v8076_v21 = vpop.f32.mrb[22].mxu1  ;;  %v8055_v22 = vpop.f32.mrb[23].mxu0 }
 0x310   : > { %v8077_v23 = vpop.f32.mrb[23].mxu1  ;;  %v7056_v24 = vadd.f32 %v8053_v18, %v7015_v11  ;;  %v8056_v25 = vadd.f32 %v8055_v22, %v8054_v20 }
 0x311   : > { %v8078_v26 = vadd.f32 %v8077_v23, %v8076_v21 }
 0x312   : > { %v7097_v27 = vadd.f32 %v8075_v19, %v7056_v24  ;;  %v7059_v28 = vadd.f32 %v8056_v25, %v7018_v13 }
 0x314   : > { %v7100_v29 = vadd.f32 %v8078_v26, %v7059_v28 }
 0x32c   : > { %v8095_v30 = vpop.f32.mrb[24].mxu0 }
 0x32d   : > { %v8117_v31 = vpop.f32.mrb[24].mxu1  ;;  %v8096_v32 = vpop.f32.mrb[25].mxu0 }
 0x32e   : > { %v8097_v33 = vadd.f32 %v8096_v32, %v8095_v30  ;;  %v8118_v34 = vpop.f32.mrb[25].mxu1  ;;  %v8098_v35 = vpop.f32.mrb[26].mxu0 }
 0x32f   : > { %v8119_v36 = vadd.f32 %v8118_v34, %v8117_v31  ;;  %v8120_v37 = vpop.f32.mrb[26].mxu1  ;;  %v8099_v38 = vpop.f32.mrb[27].mxu0 }
 0x330   : > { %v7138_v39 = vadd.f32 %v8097_v33, %v7097_v27  ;;  %v8100_v40 = vadd.f32 %v8099_v38, %v8098_v35  ;;  %v8121_v41 = vpop.f32.mrb[27].mxu1 }
 0x331   : > { %v8122_v42 = vadd.f32 %v8121_v41, %v8120_v37 }
 0x332   : > { %v7179_v43 = vadd.f32 %v8119_v36, %v7138_v39  ;;  %v7141_v44 = vadd.f32 %v8100_v40, %v7100_v29 }
 0x334   : > { %v7182_v45 = vadd.f32 %v8122_v42, %v7141_v44 }
 0x34c   : > { %v8139_v48 = vpop.f32.mrb[28].mxu0 }
 0x34d   : > { %v8161_v50 = vpop.f32.mrb[28].mxu1  ;;  %v8140_v51 = vpop.f32.mrb[29].mxu0 }
 0x34e   : > { %v8141_v52 = vadd.f32 %v8140_v51, %v8139_v48  ;;  %v8162_v53 = vpop.f32.mrb[29].mxu1  ;;  %v8142_v54 = vpop.f32.mrb[30].mxu0 }
 0x34f   : > { %v8163_v55 = vadd.f32 %v8162_v53, %v8161_v50  ;;  %v8164_v56 = vpop.f32.mrb[30].mxu1  ;;  %v8143_v57 = vpop.f32.mrb[31].mxu0 }
 0x350   : > { %v7220_v58 = vadd.f32 %v8141_v52, %v7179_v43  ;;  %v8144_v59 = vadd.f32 %v8143_v57, %v8142_v54  ;;  %v8165_v60 = vpop.f32.mrb[31].mxu1 }
 0x351   : > { %v8166_v61 = vadd.f32 %v8165_v60, %v8164_v56 }
 0x352   : > { %v7261_v62 = vadd.f32 %v8163_v55, %v7220_v58  ;;  %v7223_v63 = vadd.f32 %v8144_v59, %v7182_v45 }
 0x354   : > { %v7264_v2 = vadd.f32 %v8166_v61, %v7223_v63 }
 0x356   : > { %v7298_v3 = vmul.f32 %v7797_v1, %v7264_v2 }
 0x358   : > { %v7299_v4 = vadd.f32 %v7298_v3, %v7261_v62 }
 0x35a   : > { %v7300_v5 = vrot.slane %v7299_v4, 4 }
 0x35c   : > { %v7301_v6 = vadd.f32 %v7300_v5, %v7299_v4 }
 0x35e   : > { %v7302_v7 = vrot.slane %v7301_v6, 2 }
 0x360   : > { %v7303_v8 = vadd.f32 %v7302_v7, %v7301_v6 }
 0x362   : > { %v7304_v9 = vrot.slane %v7303_v8, 1 }
 0x364   : > { %v7305_v10 = vadd.f32 %v7304_v9, %v7303_v8 }
 0x366   : > { %v7306_v11 = vmul.f32 0.11111111, %v7305_v10 }
 0x368   : > { %v7307_v12 = vsub.f32 %v7261_v62, %v7306_v11  ;;  %v7308_v13 = vsub.f32 %v7264_v2, %v7306_v11 }
 0x36a   : > { %v7310_v14 = vmul.f32 %v7308_v13, %v7308_v13  ;;  %v7309_v15 = vmul.f32 %v7307_v12, %v7307_v12 }
 0x36c   : > { %v7312_v16 = vmul.f32 %v7797_v1, %v7310_v14 }
 0x36e   : > { %v7313_v17 = vadd.f32 %v7312_v16, %v7309_v15 }
 0x370   : > { %v7314_v18 = vrot.slane %v7313_v17, 4 }
 0x372   : > { %v7315_v19 = vadd.f32 %v7314_v18, %v7313_v17 }
 0x374   : > { %v7316_v20 = vrot.slane %v7315_v19, 2 }
 0x376   : > { %v7317_v21 = vadd.f32 %v7316_v20, %v7315_v19 }
 0x378   : > { %v7318_v22 = vrot.slane %v7317_v21, 1 }
 0x37a   : > { %v7319_v23 = vadd.f32 %v7318_v22, %v7317_v21 }
 0x37c   : > { %v7320_v24 = vmul.f32 0.11111111, %v7319_v23 }
 0x37e   : > { %v7321_v25 = vadd.f32 1e-05, %v7320_v24 }
 0x380   : > { %8496 = vrsqrt.f32 %v7321_v25 }
 0x38a   : > { %v8497_v26 = vpop.eup %8496 }
 0x38b   : > { %v7323_v27 = vmul.f32 %v8497_v26, %v7307_v12  ;;  %v7324_v28 = vmul.f32 %v8497_v26, %v7308_v13 }
 0x38c   : > { %7347 = sbr.rel (!%p8653_p9) target bundleno = 923 (0x39b), region = 96 }
 0x38d   : > { %vm7325_vm1 = vcmp.ge.f32.partialorder %v7323_v27, 0.0  ;;  %vm7326_vm2 = vcmp.ge.f32.partialorder %v7324_v28, 0.0  ;;  %v7327_v29 = vmul.f32 0.2, %v7323_v27  ;;  %v7328_v30 = vmul.f32 0.2, %v7324_v28 }
 0x38f   : > { %v7329_v31 = vsel %vm7325_vm1, %v7323_v27, %v7327_v29  ;;  %v7330_v32 = vsel %vm7326_vm2, %v7324_v28, %v7328_v30 }
 0x390   : > { %v7813_v33 = vpack.c.bf16 %v7330_v32, %v7329_v31 }
 0x392   : > { %7814 = vst [vmem:[%s4355_s3] sm:$0xff] %v7813_v33  }
 0x399   : > { %v7368_v34 = vld [vmem:[%s4355_s3] sm:$0xf]  ;;  %v7370_v35 = vld [vmem:[%s4355_s3 + $0x4] sm:$0xf] }
 0x39a   : > { %7369 = vst [vmem:[%s7352_s8] sm:$0xf] %v7368_v34  ;;  %7371 = vst [vmem:[%s7352_s8 + $0x10] sm:$0xf] %v7370_v35 }
 0x39b PF: > { %s12_s17 = sadd.s32 1, %s8568_s17   ;;  %s10032_s9 = smov %s8540_s10 }
 0x39c   : > { %p9_p1 = scmp.ge.s32.totalorder %s12_s17, 10   ;;  %s10033_s10 = smov %s8658_s28 }
 0x39d   : > { %s10034_s11 = smov %s8548_s12  ;;  %s10035_s12 = smov %s8647_s24 }
 0x39e   : > { %s10036_s13 = smov %s8560_s15  ;;  %s10037_s14 = smov %s8564_s16 }
 0x39f   : > { %s10038_s15 = smov %s10041_s19  ;;  %s10039_s16 = smov %s10045_s20 }
 0x3a0   :  { %11 = sbr.rel (!%p9_p1) target bundleno = 5 (0x5), region = 175 }

// kernel: discriminator_forward.9
= control target key start
LH: loop header
LB: loop body
LE: loop exit
PB: predicated region body
PF: predicated region fallthrough
CT: control target
= control target key end

     0   :  { %s9198_s1 = inlined_call_operand.vmem [shape: bf16[8192,128], index: 1, kind: input, shape index: {}]   ;;  %s9199_s0 = inlined_call_operand.vmem [shape: bf16[8,8192], index: 0, kind: input, shape index: {}]   ;;  %s9200_s2 = inlined_call_operand.vmem [shape: f32[1,128], index: 2, kind: input, shape index: {}]   ;;  %s9201_s3 = inlined_call_operand.vmem [shape: f32[8,128], index: 3, kind: output, shape index: {}]  }
   0x1   :  { %v6940_v0 = vld [vmem:[%s9198_s1 + $0x40] sm:$0xff]   ;;  %v6944_v4 = vld [vmem:[%s9198_s1 + $0x48] sm:$0xff]   ;;  %v6948_v8 = vld [vmem:[%s9198_s1 + $0x50] sm:$0xff]  }
   0x2   :  { %v6941_v1 = vld [vmem:[%s9198_s1 + $0xc0] sm:$0xff]   ;;  %6236 = vmatprep.subr.bf16.mxu0 %v6940_v0  ;;  %v6945_v5 = vld [vmem:[%s9198_s1 + $0xc8] sm:$0xff]   ;;  %v6949_v9 = vld [vmem:[%s9198_s1 + $0xd0] sm:$0xff]  }
   0x3   :  { %v6942_v2 = vld [vmem:[%s9198_s1] sm:$0xff]   ;;  %6258 = vmatprep.subr.bf16.mxu1 %v6941_v1  ;;  %v6946_v6 = vld [vmem:[%s9198_s1 + $0x8] sm:$0xff]   ;;  %v6950_v10 = vld [vmem:[%s9198_s1 + $0x10] sm:$0xff]  }
   0x4   :  { %v6943_v3 = vld [vmem:[%s9198_s1 + $0x80] sm:$0xff]   ;;  %6237 = vmatpush3.bf16.msra.mxu0 %v6942_v2  ;;  %v6947_v7 = vld [vmem:[%s9198_s1 + $0x88] sm:$0xff]   ;;  %v6951_v11 = vld [vmem:[%s9198_s1 + $0x90] sm:$0xff]  }
   0x5   :  { %6259 = vmatpush3.bf16.msra.mxu1 %v6943_v3  ;;  %6238 = vmatprep.subr.bf16.mxu0 %v6944_v4  ;;  %v6952_v12 = vld [vmem:[%s9198_s1 + $0x58] sm:$0xff]   ;;  %v6956_v16 = vld [vmem:[%s9198_s1 + $0x60] sm:$0xff]   ;;  %v6960_v20 = vld [vmem:[%s9198_s1 + $0x68] sm:$0xff]  }
   0x6   :  { %6260 = vmatprep.subr.bf16.mxu1 %v6945_v5  ;;  %v6953_v13 = vld [vmem:[%s9198_s1 + $0xd8] sm:$0xff]   ;;  %v6957_v17 = vld [vmem:[%s9198_s1 + $0xe0] sm:$0xff]   ;;  %v6961_v21 = vld [vmem:[%s9198_s1 + $0xe8] sm:$0xff]  }
   0x7   :  { %v6954_v14 = vld [vmem:[%s9198_s1 + $0x18] sm:$0xff]   ;;  %v6958_v18 = vld [vmem:[%s9198_s1 + $0x20] sm:$0xff]   ;;  %v6962_v22 = vld [vmem:[%s9198_s1 + $0x28] sm:$0xff]  }
   0x8   :  { %6239 = vmatpush3.bf16.msra.mxu0 %v6946_v6  ;;  %v6955_v15 = vld [vmem:[%s9198_s1 + $0x98] sm:$0xff]   ;;  %v6959_v19 = vld [vmem:[%s9198_s1 + $0xa0] sm:$0xff]   ;;  %v6963_v23 = vld [vmem:[%s9198_s1 + $0xa8] sm:$0xff]  }
   0x9   :  { %6261 = vmatpush3.bf16.msra.mxu1 %v6947_v7  ;;  %6240 = vmatprep.subr.bf16.mxu0 %v6948_v8  ;;  %v6964_v24 = vld [vmem:[%s9198_s1 + $0x70] sm:$0xff]   ;;  %v6968_v28 = vld [vmem:[%s9198_s1 + $0x78] sm:$0xff]   ;;  %v15_v32 = vld [vmem:[%s9199_s0] sm:$0xff] }
   0xa   :  { %6262 = vmatprep.subr.bf16.mxu1 %v6949_v9  ;;  %v6965_v25 = vld [vmem:[%s9198_s1 + $0xf0] sm:$0xff]   ;;  %v6969_v29 = vld [vmem:[%s9198_s1 + $0xf8] sm:$0xff]   ;;  %v16_v33 = vld [vmem:[%s9199_s0 + $0x8] sm:$0xff]  ;;  %v5660_v34 = vcombine.low %v15_v32, %v15_v32  ;;  %v5661_v35 = vcombine.high %v15_v32, %v15_v32 }
   0xb   :  { %v6966_v26 = vld [vmem:[%s9198_s1 + $0x30] sm:$0xff]   ;;  %v6970_v30 = vld [vmem:[%s9198_s1 + $0x38] sm:$0xff]   ;;  %v5662_v36 = vcombine.low %v16_v33, %v16_v33  ;;  %v5663_v37 = vcombine.high %v16_v33, %v16_v33  ;;  %v6976_v38 = vld [vmem:[%s9198_s1 + $0x140] sm:$0xff]  }
   0xc   :  { %6241 = vmatpush3.bf16.msra.mxu0 %v6950_v10  ;;  %v6967_v27 = vld [vmem:[%s9198_s1 + $0xb0] sm:$0xff]   ;;  %v6971_v31 = vld [vmem:[%s9198_s1 + $0xb8] sm:$0xff]   ;;  %v6977_v39 = vld [vmem:[%s9198_s1 + $0x1c0] sm:$0xff]   ;;  %4406 = vmatprep.mubr.bf16.mxu0 %v5661_v35 }
   0xd   :  { %6263 = vmatpush3.bf16.msra.mxu1 %v6951_v11  ;;  %6242 = vmatprep.subr.bf16.mxu0 %v6952_v12  ;;  %v6978_v40 = vld [vmem:[%s9198_s1 + $0x100] sm:$0xff]   ;;  %v6980_v42 = vld [vmem:[%s9198_s1 + $0x148] sm:$0xff]   ;;  %v6984_v46 = vld [vmem:[%s9198_s1 + $0x150] sm:$0xff]  }
   0xe   :  { %6264 = vmatprep.subr.bf16.mxu1 %v6953_v13  ;;  %4446 = vmatprep.mubr.bf16.mxu1 %v5663_v37  ;;  %v6979_v41 = vld [vmem:[%s9198_s1 + $0x180] sm:$0xff]   ;;  %v6981_v43 = vld [vmem:[%s9198_s1 + $0x1c8] sm:$0xff]   ;;  %v6985_v47 = vld [vmem:[%s9198_s1 + $0x1d0] sm:$0xff]  }
   0xf   :  { %v6982_v44 = vld [vmem:[%s9198_s1 + $0x108] sm:$0xff]   ;;  %v6986_v48 = vld [vmem:[%s9198_s1 + $0x110] sm:$0xff]   ;;  %v6988_v50 = vld [vmem:[%s9198_s1 + $0x158] sm:$0xff]  }
  0x10   :  { %6243 = vmatpush3.bf16.msra.mxu0 %v6954_v14  ;;  %v6983_v45 = vld [vmem:[%s9198_s1 + $0x188] sm:$0xff]   ;;  %v6987_v49 = vld [vmem:[%s9198_s1 + $0x190] sm:$0xff]   ;;  %v6989_v51 = vld [vmem:[%s9198_s1 + $0x1d8] sm:$0xff]  }
  0x11   :  { %6265 = vmatpush3.bf16.msra.mxu1 %v6955_v15  ;;  %6244 = vmatprep.subr.bf16.mxu0 %v6956_v16  ;;  %v6990_v52 = vld [vmem:[%s9198_s1 + $0x118] sm:$0xff]   ;;  %v6992_v54 = vld [vmem:[%s9198_s1 + $0x160] sm:$0xff]   ;;  %v6996_v58 = vld [vmem:[%s9198_s1 + $0x168] sm:$0xff]  }
  0x12   :  { %6266 = vmatprep.subr.bf16.mxu1 %v6957_v17  ;;  %v6991_v53 = vld [vmem:[%s9198_s1 + $0x198] sm:$0xff]   ;;  %v6993_v55 = vld [vmem:[%s9198_s1 + $0x1e0] sm:$0xff]   ;;  %v6997_v59 = vld [vmem:[%s9198_s1 + $0x1e8] sm:$0xff]  }
  0x13   :  { %v6994_v56 = vld [vmem:[%s9198_s1 + $0x120] sm:$0xff]   ;;  %v6998_v60 = vld [vmem:[%s9198_s1 + $0x128] sm:$0xff]   ;;  %v7000_v62 = vld [vmem:[%s9198_s1 + $0x170] sm:$0xff]  }
  0x14   :  { %6245 = vmatpush3.bf16.msra.mxu0 %v6958_v18  ;;  %v6995_v57 = vld [vmem:[%s9198_s1 + $0x1a0] sm:$0xff]   ;;  %v6999_v61 = vld [vmem:[%s9198_s1 + $0x1a8] sm:$0xff]   ;;  %v7001_v63 = vld [vmem:[%s9198_s1 + $0x1f0] sm:$0xff]  }
  0x15   :  { %6267 = vmatpush3.bf16.msra.mxu1 %v6959_v19  ;;  %6246 = vmatprep.subr.bf16.mxu0 %v6960_v20  ;;  %v7002_v0 = vld [vmem:[%s9198_s1 + $0x130] sm:$0xff]   ;;  %v7004_v2 = vld [vmem:[%s9198_s1 + $0x178] sm:$0xff]   ;;  %v7012_v12 = vld [vmem:[%s9198_s1 + $0x240] sm:$0xff]  }
  0x16   :  { %6268 = vmatprep.subr.bf16.mxu1 %v6961_v21  ;;  %v7003_v1 = vld [vmem:[%s9198_s1 + $0x1b0] sm:$0xff]   ;;  %v7005_v3 = vld [vmem:[%s9198_s1 + $0x1f8] sm:$0xff]   ;;  %v7013_v13 = vld [vmem:[%s9198_s1 + $0x2c0] sm:$0xff]  }
  0x17   :  { %v7006_v4 = vld [vmem:[%s9198_s1 + $0x138] sm:$0xff]   ;;  %v17_v6 = vld [vmem:[%s9199_s0 + $0x10] sm:$0xff]  ;;  %v7014_v14 = vld [vmem:[%s9198_s1 + $0x200] sm:$0xff]  }
  0x18   :  { %6247 = vmatpush3.bf16.msra.mxu0 %v6962_v22  ;;  %v7007_v5 = vld [vmem:[%s9198_s1 + $0x1b8] sm:$0xff]   ;;  %v5664_v7 = vcombine.low %v17_v6, %v17_v6  ;;  %v5665_v8 = vcombine.high %v17_v6, %v17_v6  ;;  %v7015_v15 = vld [vmem:[%s9198_s1 + $0x280] sm:$0xff]   ;;  %v7016_v16 = vld [vmem:[%s9198_s1 + $0x248] sm:$0xff]  }
  0x19   :  { %6269 = vmatpush3.bf16.msra.mxu1 %v6963_v23  ;;  %6248 = vmatprep.subr.bf16.mxu0 %v6964_v24  ;;  %v18_v9 = vld [vmem:[%s9199_s0 + $0x18] sm:$0xff]  ;;  %v7017_v17 = vld [vmem:[%s9198_s1 + $0x2c8] sm:$0xff]   ;;  %v7020_v20 = vld [vmem:[%s9198_s1 + $0x250] sm:$0xff]  }
  0x1a   :  { %6270 = vmatprep.subr.bf16.mxu1 %v6965_v25  ;;  %v5666_v10 = vcombine.low %v18_v9, %v18_v9  ;;  %v5667_v11 = vcombine.high %v18_v9, %v18_v9  ;;  %v7018_v18 = vld [vmem:[%s9198_s1 + $0x208] sm:$0xff]   ;;  %v7021_v21 = vld [vmem:[%s9198_s1 + $0x2d0] sm:$0xff]   ;;  %v7024_v24 = vld [vmem:[%s9198_s1 + $0x258] sm:$0xff]  }
  0x1b   :  { %v7019_v19 = vld [vmem:[%s9198_s1 + $0x288] sm:$0xff]   ;;  %v7022_v22 = vld [vmem:[%s9198_s1 + $0x210] sm:$0xff]   ;;  %v7025_v25 = vld [vmem:[%s9198_s1 + $0x2d8] sm:$0xff]  }
  0x1c   :  { %6249 = vmatpush3.bf16.msra.mxu0 %v6966_v26  ;;  %v7023_v23 = vld [vmem:[%s9198_s1 + $0x290] sm:$0xff]   ;;  %v7026_v26 = vld [vmem:[%s9198_s1 + $0x218] sm:$0xff]   ;;  %v7032_v32 = vld [vmem:[%s9198_s1 + $0x268] sm:$0xff]  }
  0x1d   :  { %6271 = vmatpush3.bf16.msra.mxu1 %v6967_v27  ;;  %6250 = vmatprep.subr.bf16.mxu0 %v6968_v28  ;;  %v7027_v27 = vld [vmem:[%s9198_s1 + $0x298] sm:$0xff]   ;;  %v7028_v28 = vld [vmem:[%s9198_s1 + $0x260] sm:$0xff]   ;;  %v7033_v33 = vld [vmem:[%s9198_s1 + $0x2e8] sm:$0xff]  }
  0x1e   :  { %6272 = vmatprep.subr.bf16.mxu1 %v6969_v29  ;;  %v7029_v29 = vld [vmem:[%s9198_s1 + $0x2e0] sm:$0xff]   ;;  %v7035_v35 = vld [vmem:[%s9198_s1 + $0x2a8] sm:$0xff]   ;;  %v7037_v37 = vld [vmem:[%s9198_s1 + $0x2f0] sm:$0xff]  }
  0x1f   :  { %v7068_v6 = vld [vmem:[%s9198_s1 + $0x368] sm:$0xff]  }
  0x20   :  { %6251 = vmatpush3.bf16.msra.mxu0 %v6970_v30  ;;  %v7030_v30 = vld [vmem:[%s9198_s1 + $0x220] sm:$0xff]   ;;  %v7071_v9 = vld [vmem:[%s9198_s1 + $0x3a8] sm:$0xff]  }
  0x21   :  { %6273 = vmatpush3.bf16.msra.mxu1 %v6971_v31  ;;  %6280 = vmatprep.subr.bf16.mxu0 %v6976_v38  ;;  %v7031_v31 = vld [vmem:[%s9198_s1 + $0x2a0] sm:$0xff]   ;;  %v7038_v38 = vld [vmem:[%s9198_s1 + $0x230] sm:$0xff]  }
  0x22   :  { %6302 = vmatprep.subr.bf16.mxu1 %v6977_v39  ;;  %v7039_v39 = vld [vmem:[%s9198_s1 + $0x2b0] sm:$0xff]  }
  0x23   :  { %4407 = vmatmul.mubr.bf16.vlgmr.msra.gmra.mrb[0].mxu0 %v5660_v34  ;;  %v7034_v34 = vld [vmem:[%s9198_s1 + $0x228] sm:$0xff]  }
  0x24   :  { %4447 = vmatmul.mubr.bf16.vlgmr.msra.gmra.mrb[0].mxu1 %v5662_v36  ;;  %6281 = vmatpush3.bf16.msra.mxu0 %v6978_v40  ;;  %v7036_v36 = vld [vmem:[%s9198_s1 + $0x270] sm:$0xff]   ;;  %v7040_v40 = vld [vmem:[%s9198_s1 + $0x278] sm:$0xff]  }
  0x25   :  { %6303 = vmatpush3.bf16.msra.mxu1 %v6979_v41  ;;  %6282 = vmatprep.subr.bf16.mxu0 %v6980_v42  ;;  %v7041_v41 = vld [vmem:[%s9198_s1 + $0x2f8] sm:$0xff]  }
  0x26   :  { %6304 = vmatprep.subr.bf16.mxu1 %v6981_v43  ;;  %4486 = vmatprep.mubr.bf16.mxu0 %v5665_v8  ;;  %v7042_v42 = vld [vmem:[%s9198_s1 + $0x238] sm:$0xff]   ;;  %v7070_v8 = vld [vmem:[%s9198_s1 + $0x328] sm:$0xff]  }
  0x27   :  { %4526 = vmatprep.mubr.bf16.mxu1 %v5667_v11  ;;  %v7043_v43 = vld [vmem:[%s9198_s1 + $0x2b8] sm:$0xff]   ;;  %v7073_v11 = vld [vmem:[%s9198_s1 + $0x3f0] sm:$0xff]  }
  0x28   :  { %6283 = vmatpush3.bf16.msra.mxu0 %v6982_v44  ;;  %v19_v44 = vld [vmem:[%s9199_s0 + $0x20] sm:$0xff] }
  0x29   :  { %6305 = vmatpush3.bf16.msra.mxu1 %v6983_v45  ;;  %6284 = vmatprep.subr.bf16.mxu0 %v6984_v46  ;;  %v20_v45 = vld [vmem:[%s9199_s0 + $0x28] sm:$0xff]  ;;  %v5668_v46 = vcombine.low %v19_v44, %v19_v44 }
  0x2a   :  { %6306 = vmatprep.subr.bf16.mxu1 %v6985_v47  ;;  %v5669_v47 = vcombine.high %v19_v44, %v19_v44  ;;  %v7104_v44 = vld [vmem:[%s9198_s1 + $0x468] sm:$0xff]  }
  0x2c   :  { %6285 = vmatpush3.bf16.msra.mxu0 %v6986_v48  ;;  %v5670_v48 = vcombine.low %v20_v45, %v20_v45 }
  0x2d   :  { %6307 = vmatpush3.bf16.msra.mxu1 %v6987_v49  ;;  %6286 = vmatprep.subr.bf16.mxu0 %v6988_v50  ;;  %v5671_v49 = vcombine.high %v20_v45, %v20_v45  ;;  %v7048_v50 = vld [vmem:[%s9198_s1 + $0x340] sm:$0xff]   ;;  %v7105_v45 = vld [vmem:[%s9198_s1 + $0x4e8] sm:$0xff]  }
  0x2e   :  { %6308 = vmatprep.subr.bf16.mxu1 %v6989_v51  ;;  %v7049_v51 = vld [vmem:[%s9198_s1 + $0x3c0] sm:$0xff]  }
  0x30   :  { %6287 = vmatpush3.bf16.msra.mxu0 %v6990_v52  ;;  %v7050_v52 = vld [vmem:[%s9198_s1 + $0x300] sm:$0xff]  }
  0x31   :  { %6309 = vmatpush3.bf16.msra.mxu1 %v6991_v53  ;;  %6288 = vmatprep.subr.bf16.mxu0 %v6992_v54  ;;  %v7051_v53 = vld [vmem:[%s9198_s1 + $0x380] sm:$0xff]   ;;  %v7052_v54 = vld [vmem:[%s9198_s1 + $0x348] sm:$0xff]  }
  0x32   :  { %6310 = vmatprep.subr.bf16.mxu1 %v6993_v55  ;;  %v7053_v55 = vld [vmem:[%s9198_s1 + $0x3c8] sm:$0xff]  }
  0x34   :  { %6289 = vmatpush3.bf16.msra.mxu0 %v6994_v56  ;;  %v7054_v56 = vld [vmem:[%s9198_s1 + $0x308] sm:$0xff]  }
  0x35   :  { %6311 = vmatpush3.bf16.msra.mxu1 %v6995_v57  ;;  %6290 = vmatprep.subr.bf16.mxu0 %v6996_v58  ;;  %v7055_v57 = vld [vmem:[%s9198_s1 + $0x388] sm:$0xff]   ;;  %v7056_v58 = vld [vmem:[%s9198_s1 + $0x350] sm:$0xff]  }
  0x36   :  { %6312 = vmatprep.subr.bf16.mxu1 %v6997_v59  ;;  %v7057_v59 = vld [vmem:[%s9198_s1 + $0x3d0] sm:$0xff]  }
  0x38   :  { %6291 = vmatpush3.bf16.msra.mxu0 %v6998_v60  ;;  %v7058_v60 = vld [vmem:[%s9198_s1 + $0x310] sm:$0xff]  }
  0x39   :  { %6313 = vmatpush3.bf16.msra.mxu1 %v6999_v61  ;;  %6292 = vmatprep.subr.bf16.mxu0 %v7000_v62  ;;  %v7059_v61 = vld [vmem:[%s9198_s1 + $0x390] sm:$0xff]   ;;  %v7060_v62 = vld [vmem:[%s9198_s1 + $0x358] sm:$0xff]  }
  0x3a   :  { %6314 = vmatprep.subr.bf16.mxu1 %v7001_v63  ;;  %v7061_v63 = vld [vmem:[%s9198_s1 + $0x3d8] sm:$0xff]  }
  0x3c   :  { %6293 = vmatpush3.bf16.msra.mxu0 %v7002_v0  ;;  %v7062_v0 = vld [vmem:[%s9198_s1 + $0x318] sm:$0xff]  }
  0x3d   :  { %6315 = vmatpush3.bf16.msra.mxu1 %v7003_v1  ;;  %6294 = vmatprep.subr.bf16.mxu0 %v7004_v2  ;;  %v7063_v1 = vld [vmem:[%s9198_s1 + $0x398] sm:$0xff]   ;;  %v7064_v2 = vld [vmem:[%s9198_s1 + $0x360] sm:$0xff]  }
  0x3e   :  { %6316 = vmatprep.subr.bf16.mxu1 %v7005_v3  ;;  %v7065_v3 = vld [vmem:[%s9198_s1 + $0x3e0] sm:$0xff]  }
  0x40   :  { %6295 = vmatpush3.bf16.msra.mxu0 %v7006_v4  ;;  %v7066_v4 = vld [vmem:[%s9198_s1 + $0x320] sm:$0xff]  }
  0x41   :  { %6317 = vmatpush3.bf16.msra.mxu1 %v7007_v5  ;;  %6324 = vmatprep.subr.bf16.mxu0 %v7012_v12  ;;  %v7067_v5 = vld [vmem:[%s9198_s1 + $0x3a0] sm:$0xff]   ;;  %v7074_v12 = vld [vmem:[%s9198_s1 + $0x330] sm:$0xff]  }
  0x42   :  { %6346 = vmatprep.subr.bf16.mxu1 %v7013_v13  ;;  %v7075_v13 = vld [vmem:[%s9198_s1 + $0x3b0] sm:$0xff]  }
  0x43   :  { %4487 = vmatmul.mubr.bf16.vlgmr.msra.gmra.mrb[4].mxu0 %v5664_v7  ;;  %v7069_v7 = vld [vmem:[%s9198_s1 + $0x3e8] sm:$0xff]  }
  0x44   :  { %4527 = vmatmul.mubr.bf16.vlgmr.msra.gmra.mrb[4].mxu1 %v5666_v10  ;;  %6325 = vmatpush3.bf16.msra.mxu0 %v7014_v14  ;;  %v7072_v10 = vld [vmem:[%s9198_s1 + $0x370] sm:$0xff]   ;;  %v7076_v14 = vld [vmem:[%s9198_s1 + $0x378] sm:$0xff]  }
  0x45   :  { %6347 = vmatpush3.bf16.msra.mxu1 %v7015_v15  ;;  %6326 = vmatprep.subr.bf16.mxu0 %v7016_v16  ;;  %v7077_v15 = vld [vmem:[%s9198_s1 + $0x3f8] sm:$0xff]  }
  0x46   :  { %6348 = vmatprep.subr.bf16.mxu1 %v7017_v17  ;;  %4566 = vmatprep.mubr.bf16.mxu0 %v5669_v47  ;;  %v7078_v16 = vld [vmem:[%s9198_s1 + $0x338] sm:$0xff]   ;;  %v7107_v47 = vld [vmem:[%s9198_s1 + $0x4a8] sm:$0xff]  }
  0x47   :  { %4606 = vmatprep.mubr.bf16.mxu1 %v5671_v49  ;;  %v7079_v17 = vld [vmem:[%s9198_s1 + $0x3b8] sm:$0xff]   ;;  %v7109_v49 = vld [vmem:[%s9198_s1 + $0x4f0] sm:$0xff]  }
  0x48   :  { %6327 = vmatpush3.bf16.msra.mxu0 %v7018_v18  ;;  %v21_v18 = vld [vmem:[%s9199_s0 + $0x30] sm:$0xff] }
  0x49   :  { %6349 = vmatpush3.bf16.msra.mxu1 %v7019_v19  ;;  %6328 = vmatprep.subr.bf16.mxu0 %v7020_v20  ;;  %v22_v19 = vld [vmem:[%s9199_s0 + $0x38] sm:$0xff]  ;;  %v5672_v20 = vcombine.low %v21_v18, %v21_v18 }
  0x4a   :  { %6350 = vmatprep.subr.bf16.mxu1 %v7021_v21  ;;  %v5673_v21 = vcombine.high %v21_v18, %v21_v18  ;;  %v7140_v18 = vld [vmem:[%s9198_s1 + $0x568] sm:$0xff]  }
  0x4c   :  { %6329 = vmatpush3.bf16.msra.mxu0 %v7022_v22  ;;  %v5674_v22 = vcombine.low %v22_v19, %v22_v19 }
  0x4d   :  { %6351 = vmatpush3.bf16.msra.mxu1 %v7023_v23  ;;  %6330 = vmatprep.subr.bf16.mxu0 %v7024_v24  ;;  %v7084_v23 = vld [vmem:[%s9198_s1 + $0x440] sm:$0xff]   ;;  %v5675_v24 = vcombine.high %v22_v19, %v22_v19  ;;  %v7141_v19 = vld [vmem:[%s9198_s1 + $0x5e8] sm:$0xff]  }
  0x4e   :  { %6352 = vmatprep.subr.bf16.mxu1 %v7025_v25  ;;  %v7085_v25 = vld [vmem:[%s9198_s1 + $0x4c0] sm:$0xff]  }
  0x50   :  { %6331 = vmatpush3.bf16.msra.mxu0 %v7026_v26  ;;  %v7086_v26 = vld [vmem:[%s9198_s1 + $0x400] sm:$0xff]  }
  0x51   :  { %6353 = vmatpush3.bf16.msra.mxu1 %v7027_v27  ;;  %6332 = vmatprep.subr.bf16.mxu0 %v7028_v28  ;;  %v7087_v27 = vld [vmem:[%s9198_s1 + $0x480] sm:$0xff]   ;;  %v7088_v28 = vld [vmem:[%s9198_s1 + $0x448] sm:$0xff]  }
  0x52   :  { %6354 = vmatprep.subr.bf16.mxu1 %v7029_v29  ;;  %v7089_v29 = vld [vmem:[%s9198_s1 + $0x4c8] sm:$0xff]  }
  0x54   :  { %6333 = vmatpush3.bf16.msra.mxu0 %v7030_v30  ;;  %v7090_v30 = vld [vmem:[%s9198_s1 + $0x408] sm:$0xff]  }
  0x55   :  { %6355 = vmatpush3.bf16.msra.mxu1 %v7031_v31  ;;  %6334 = vmatprep.subr.bf16.mxu0 %v7032_v32  ;;  %v7091_v31 = vld [vmem:[%s9198_s1 + $0x488] sm:$0xff]   ;;  %v7092_v32 = vld [vmem:[%s9198_s1 + $0x450] sm:$0xff]  }
  0x56   :  { %6356 = vmatprep.subr.bf16.mxu1 %v7033_v33  ;;  %v7093_v33 = vld [vmem:[%s9198_s1 + $0x4d0] sm:$0xff]  }
  0x58   :  { %6335 = vmatpush3.bf16.msra.mxu0 %v7034_v34  ;;  %v7094_v34 = vld [vmem:[%s9198_s1 + $0x410] sm:$0xff]  }
  0x59   :  { %6357 = vmatpush3.bf16.msra.mxu1 %v7035_v35  ;;  %6336 = vmatprep.subr.bf16.mxu0 %v7036_v36  ;;  %v7095_v35 = vld [vmem:[%s9198_s1 + $0x490] sm:$0xff]   ;;  %v7096_v36 = vld [vmem:[%s9198_s1 + $0x458] sm:$0xff]  }
  0x5a   :  { %6358 = vmatprep.subr.bf16.mxu1 %v7037_v37  ;;  %v7097_v37 = vld [vmem:[%s9198_s1 + $0x4d8] sm:$0xff]  }
  0x5c   :  { %6337 = vmatpush3.bf16.msra.mxu0 %v7038_v38  ;;  %v7098_v38 = vld [vmem:[%s9198_s1 + $0x418] sm:$0xff]  }
  0x5d   :  { %6359 = vmatpush3.bf16.msra.mxu1 %v7039_v39  ;;  %6338 = vmatprep.subr.bf16.mxu0 %v7040_v40  ;;  %v7099_v39 = vld [vmem:[%s9198_s1 + $0x498] sm:$0xff]   ;;  %v7100_v40 = vld [vmem:[%s9198_s1 + $0x460] sm:$0xff]  }
  0x5e   :  { %6360 = vmatprep.subr.bf16.mxu1 %v7041_v41  ;;  %v7101_v41 = vld [vmem:[%s9198_s1 + $0x4e0] sm:$0xff]  }
  0x60   :  { %6339 = vmatpush3.bf16.msra.mxu0 %v7042_v42  ;;  %v7102_v42 = vld [vmem:[%s9198_s1 + $0x420] sm:$0xff]  }
  0x61   :  { %6361 = vmatpush3.bf16.msra.mxu1 %v7043_v43  ;;  %6368 = vmatprep.subr.bf16.mxu0 %v7048_v50  ;;  %v7103_v43 = vld [vmem:[%s9198_s1 + $0x4a0] sm:$0xff]   ;;  %v7110_v50 = vld [vmem:[%s9198_s1 + $0x430] sm:$0xff]  }
  0x62   :  { %6390 = vmatprep.subr.bf16.mxu1 %v7049_v51  ;;  %v7111_v51 = vld [vmem:[%s9198_s1 + $0x4b0] sm:$0xff]  }
  0x63   :  { %4567 = vmatmul.mubr.bf16.vlgmr.msra.gmra.mrb[8].mxu0 %v5668_v46  ;;  %v7106_v46 = vld [vmem:[%s9198_s1 + $0x428] sm:$0xff]  }
  0x64   :  { %4607 = vmatmul.mubr.bf16.vlgmr.msra.gmra.mrb[8].mxu1 %v5670_v48  ;;  %6369 = vmatpush3.bf16.msra.mxu0 %v7050_v52  ;;  %v7108_v48 = vld [vmem:[%s9198_s1 + $0x470] sm:$0xff]   ;;  %v7112_v52 = vld [vmem:[%s9198_s1 + $0x478] sm:$0xff]  }
  0x65   :  { %6391 = vmatpush3.bf16.msra.mxu1 %v7051_v53  ;;  %6370 = vmatprep.subr.bf16.mxu0 %v7052_v54  ;;  %v7113_v53 = vld [vmem:[%s9198_s1 + $0x4f8] sm:$0xff]  }
  0x66   :  { %6392 = vmatprep.subr.bf16.mxu1 %v7053_v55  ;;  %4646 = vmatprep.mubr.bf16.mxu0 %v5673_v21  ;;  %v7114_v54 = vld [vmem:[%s9198_s1 + $0x438] sm:$0xff]   ;;  %v7143_v21 = vld [vmem:[%s9198_s1 + $0x5a8] sm:$0xff]  }
  0x67   :  { %4686 = vmatprep.mubr.bf16.mxu1 %v5675_v24  ;;  %v7115_v55 = vld [vmem:[%s9198_s1 + $0x4b8] sm:$0xff]   ;;  %v7146_v24 = vld [vmem:[%s9198_s1 + $0x530] sm:$0xff]  }
  0x68   :  { %6371 = vmatpush3.bf16.msra.mxu0 %v7054_v56  ;;  %v23_v56 = vld [vmem:[%s9199_s0 + $0x40] sm:$0xff] }
  0x69   :  { %6393 = vmatpush3.bf16.msra.mxu1 %v7055_v57  ;;  %6372 = vmatprep.subr.bf16.mxu0 %v7056_v58  ;;  %v5676_v57 = vcombine.low %v23_v56, %v23_v56  ;;  %v5677_v58 = vcombine.high %v23_v56, %v23_v56  ;;  %v7176_v56 = vld [vmem:[%s9198_s1 + $0x668] sm:$0xff]  }
  0x6a   :  { %6394 = vmatprep.subr.bf16.mxu1 %v7057_v59  ;;  %v24_v59 = vld [vmem:[%s9199_s0 + $0x48] sm:$0xff] }
  0x6c   :  { %6373 = vmatpush3.bf16.msra.mxu0 %v7058_v60  ;;  %v5678_v60 = vcombine.low %v24_v59, %v24_v59 }
  0x6d   :  { %6395 = vmatpush3.bf16.msra.mxu1 %v7059_v61  ;;  %6374 = vmatprep.subr.bf16.mxu0 %v7060_v62  ;;  %v5679_v61 = vcombine.high %v24_v59, %v24_v59  ;;  %v7120_v62 = vld [vmem:[%s9198_s1 + $0x540] sm:$0xff]   ;;  %v7179_v59 = vld [vmem:[%s9198_s1 + $0x6a8] sm:$0xff]  }
  0x6e   :  { %6396 = vmatprep.subr.bf16.mxu1 %v7061_v63  ;;  %v7121_v63 = vld [vmem:[%s9198_s1 + $0x5c0] sm:$0xff]  }
  0x70   :  { %6375 = vmatpush3.bf16.msra.mxu0 %v7062_v0  ;;  %v7122_v0 = vld [vmem:[%s9198_s1 + $0x500] sm:$0xff]  }
  0x71   :  { %6397 = vmatpush3.bf16.msra.mxu1 %v7063_v1  ;;  %6376 = vmatprep.subr.bf16.mxu0 %v7064_v2  ;;  %v7123_v1 = vld [vmem:[%s9198_s1 + $0x580] sm:$0xff]   ;;  %v7124_v2 = vld [vmem:[%s9198_s1 + $0x548] sm:$0xff]  }
  0x72   :  { %6398 = vmatprep.subr.bf16.mxu1 %v7065_v3  ;;  %v7125_v3 = vld [vmem:[%s9198_s1 + $0x5c8] sm:$0xff]  }
  0x74   :  { %6377 = vmatpush3.bf16.msra.mxu0 %v7066_v4  ;;  %v7126_v4 = vld [vmem:[%s9198_s1 + $0x508] sm:$0xff]  }
  0x75   :  { %6399 = vmatpush3.bf16.msra.mxu1 %v7067_v5  ;;  %6378 = vmatprep.subr.bf16.mxu0 %v7068_v6  ;;  %v7127_v5 = vld [vmem:[%s9198_s1 + $0x588] sm:$0xff]   ;;  %v7128_v6 = vld [vmem:[%s9198_s1 + $0x550] sm:$0xff]  }
  0x76   :  { %6400 = vmatprep.subr.bf16.mxu1 %v7069_v7  ;;  %v7129_v7 = vld [vmem:[%s9198_s1 + $0x5d0] sm:$0xff]  }
  0x78   :  { %6379 = vmatpush3.bf16.msra.mxu0 %v7070_v8  ;;  %v7130_v8 = vld [vmem:[%s9198_s1 + $0x510] sm:$0xff]  }
  0x79   :  { %6401 = vmatpush3.bf16.msra.mxu1 %v7071_v9  ;;  %6380 = vmatprep.subr.bf16.mxu0 %v7072_v10  ;;  %v7131_v9 = vld [vmem:[%s9198_s1 + $0x590] sm:$0xff]   ;;  %v7132_v10 = vld [vmem:[%s9198_s1 + $0x558] sm:$0xff]  }
  0x7a   :  { %6402 = vmatprep.subr.bf16.mxu1 %v7073_v11  ;;  %v7133_v11 = vld [vmem:[%s9198_s1 + $0x5d8] sm:$0xff]  }
  0x7c   :  { %6381 = vmatpush3.bf16.msra.mxu0 %v7074_v12  ;;  %v7134_v12 = vld [vmem:[%s9198_s1 + $0x518] sm:$0xff]  }
  0x7d   :  { %6403 = vmatpush3.bf16.msra.mxu1 %v7075_v13  ;;  %6382 = vmatprep.subr.bf16.mxu0 %v7076_v14  ;;  %v7135_v13 = vld [vmem:[%s9198_s1 + $0x598] sm:$0xff]   ;;  %v7136_v14 = vld [vmem:[%s9198_s1 + $0x560] sm:$0xff]  }
  0x7e   :  { %6404 = vmatprep.subr.bf16.mxu1 %v7077_v15  ;;  %v7137_v15 = vld [vmem:[%s9198_s1 + $0x5e0] sm:$0xff]  }
  0x80   :  { %6383 = vmatpush3.bf16.msra.mxu0 %v7078_v16  ;;  %v7138_v16 = vld [vmem:[%s9198_s1 + $0x520] sm:$0xff]  }
  0x81   :  { %6405 = vmatpush3.bf16.msra.mxu1 %v7079_v17  ;;  %6412 = vmatprep.subr.bf16.mxu0 %v7084_v23  ;;  %v7139_v17 = vld [vmem:[%s9198_s1 + $0x5a0] sm:$0xff]   ;;  %v7145_v23 = vld [vmem:[%s9198_s1 + $0x5f0] sm:$0xff]  }
  0x82   :  { %6434 = vmatprep.subr.bf16.mxu1 %v7085_v25  ;;  %v7147_v25 = vld [vmem:[%s9198_s1 + $0x5b0] sm:$0xff]  }
  0x83   :  { %4647 = vmatmul.mubr.bf16.vlgmr.msra.gmra.mrb[12].mxu0 %v5672_v20  ;;  %v7142_v20 = vld [vmem:[%s9198_s1 + $0x528] sm:$0xff]  }
  0x84   :  { %4687 = vmatmul.mubr.bf16.vlgmr.msra.gmra.mrb[12].mxu1 %v5674_v22  ;;  %6413 = vmatpush3.bf16.msra.mxu0 %v7086_v26  ;;  %v7144_v22 = vld [vmem:[%s9198_s1 + $0x570] sm:$0xff]   ;;  %v7148_v26 = vld [vmem:[%s9198_s1 + $0x578] sm:$0xff]  }
  0x85   :  { %6435 = vmatpush3.bf16.msra.mxu1 %v7087_v27  ;;  %6414 = vmatprep.subr.bf16.mxu0 %v7088_v28  ;;  %v7149_v27 = vld [vmem:[%s9198_s1 + $0x5f8] sm:$0xff]  }
  0x86   :  { %6436 = vmatprep.subr.bf16.mxu1 %v7089_v29  ;;  %4726 = vmatprep.mubr.bf16.mxu0 %v5677_v58  ;;  %v7150_v28 = vld [vmem:[%s9198_s1 + $0x538] sm:$0xff]   ;;  %v7178_v58 = vld [vmem:[%s9198_s1 + $0x628] sm:$0xff]  }
  0x87   :  { %4766 = vmatprep.mubr.bf16.mxu1 %v5679_v61  ;;  %v7151_v29 = vld [vmem:[%s9198_s1 + $0x5b8] sm:$0xff]   ;;  %v7181_v61 = vld [vmem:[%s9198_s1 + $0x6f0] sm:$0xff]  }
  0x88   :  { %6415 = vmatpush3.bf16.msra.mxu0 %v7090_v30  ;;  %v25_v30 = vld [vmem:[%s9199_s0 + $0x50] sm:$0xff] }
  0x89   :  { %6437 = vmatpush3.bf16.msra.mxu1 %v7091_v31  ;;  %6416 = vmatprep.subr.bf16.mxu0 %v7092_v32  ;;  %v26_v31 = vld [vmem:[%s9199_s0 + $0x58] sm:$0xff]  ;;  %v5680_v32 = vcombine.low %v25_v30, %v25_v30 }
  0x8a   :  { %6438 = vmatprep.subr.bf16.mxu1 %v7093_v33  ;;  %v5681_v33 = vcombine.high %v25_v30, %v25_v30  ;;  %v7211_v30 = vld [vmem:[%s9198_s1 + $0x7a0] sm:$0xff]  }
  0x8c   :  { %6417 = vmatpush3.bf16.msra.mxu0 %v7094_v34  ;;  %v5682_v34 = vcombine.low %v26_v31, %v26_v31 }
  0x8d   :  { %6439 = vmatpush3.bf16.msra.mxu1 %v7095_v35  ;;  %6418 = vmatprep.subr.bf16.mxu0 %v7096_v36  ;;  %v5683_v35 = vcombine.high %v26_v31, %v26_v31  ;;  %v7156_v36 = vld [vmem:[%s9198_s1 + $0x640] sm:$0xff]  }
  0x8e   :  { %6440 = vmatprep.subr.bf16.mxu1 %v7097_v37  ;;  %v7157_v37 = vld [vmem:[%s9198_s1 + $0x6c0] sm:$0xff]  }
  0x90   :  { %6419 = vmatpush3.bf16.msra.mxu0 %v7098_v38  ;;  %v7158_v38 = vld [vmem:[%s9198_s1 + $0x600] sm:$0xff]  }
  0x91   :  { %6441 = vmatpush3.bf16.msra.mxu1 %v7099_v39  ;;  %6420 = vmatprep.subr.bf16.mxu0 %v7100_v40  ;;  %v7159_v39 = vld [vmem:[%s9198_s1 + $0x680] sm:$0xff]   ;;  %v7160_v40 = vld [vmem:[%s9198_s1 + $0x648] sm:$0xff]  }
  0x92   :  { %6442 = vmatprep.subr.bf16.mxu1 %v7101_v41  ;;  %v7161_v41 = vld [vmem:[%s9198_s1 + $0x6c8] sm:$0xff]  }
  0x94   :  { %6421 = vmatpush3.bf16.msra.mxu0 %v7102_v42  ;;  %v7162_v42 = vld [vmem:[%s9198_s1 + $0x608] sm:$0xff]  }
  0x95   :  { %6443 = vmatpush3.bf16.msra.mxu1 %v7103_v43  ;;  %6422 = vmatprep.subr.bf16.mxu0 %v7104_v44  ;;  %v7163_v43 = vld [vmem:[%s9198_s1 + $0x688] sm:$0xff]   ;;  %v7164_v44 = vld [vmem:[%s9198_s1 + $0x650] sm:$0xff]  }
  0x96   :  { %6444 = vmatprep.subr.bf16.mxu1 %v7105_v45  ;;  %v7165_v45 = vld [vmem:[%s9198_s1 + $0x6d0] sm:$0xff]  }
  0x98   :  { %6423 = vmatpush3.bf16.msra.mxu0 %v7106_v46  ;;  %v7166_v46 = vld [vmem:[%s9198_s1 + $0x610] sm:$0xff]  }
  0x99   :  { %6445 = vmatpush3.bf16.msra.mxu1 %v7107_v47  ;;  %6424 = vmatprep.subr.bf16.mxu0 %v7108_v48  ;;  %v7167_v47 = vld [vmem:[%s9198_s1 + $0x690] sm:$0xff]   ;;  %v7168_v48 = vld [vmem:[%s9198_s1 + $0x658] sm:$0xff]  }
  0x9a   :  { %6446 = vmatprep.subr.bf16.mxu1 %v7109_v49  ;;  %v7169_v49 = vld [vmem:[%s9198_s1 + $0x6d8] sm:$0xff]  }
  0x9c   :  { %6425 = vmatpush3.bf16.msra.mxu0 %v7110_v50  ;;  %v7170_v50 = vld [vmem:[%s9198_s1 + $0x618] sm:$0xff]  }
  0x9d   :  { %6447 = vmatpush3.bf16.msra.mxu1 %v7111_v51  ;;  %6426 = vmatprep.subr.bf16.mxu0 %v7112_v52  ;;  %v7171_v51 = vld [vmem:[%s9198_s1 + $0x698] sm:$0xff]   ;;  %v7172_v52 = vld [vmem:[%s9198_s1 + $0x660] sm:$0xff]  }
  0x9e   :  { %6448 = vmatprep.subr.bf16.mxu1 %v7113_v53  ;;  %v7173_v53 = vld [vmem:[%s9198_s1 + $0x6e0] sm:$0xff]  }
  0xa0   :  { %6427 = vmatpush3.bf16.msra.mxu0 %v7114_v54  ;;  %v7174_v54 = vld [vmem:[%s9198_s1 + $0x620] sm:$0xff]  }
  0xa1   :  { %6449 = vmatpush3.bf16.msra.mxu1 %v7115_v55  ;;  %6456 = vmatprep.subr.bf16.mxu0 %v7120_v62  ;;  %v7175_v55 = vld [vmem:[%s9198_s1 + $0x6a0] sm:$0xff]   ;;  %v7182_v62 = vld [vmem:[%s9198_s1 + $0x630] sm:$0xff]  }
  0xa2   :  { %6478 = vmatprep.subr.bf16.mxu1 %v7121_v63  ;;  %v7183_v63 = vld [vmem:[%s9198_s1 + $0x6b0] sm:$0xff]  }
  0xa3   :  { %4727 = vmatmul.mubr.bf16.vlgmr.msra.gmra.mrb[16].mxu0 %v5676_v57  ;;  %v7177_v57 = vld [vmem:[%s9198_s1 + $0x6e8] sm:$0xff]  }
  0xa4   :  { %4767 = vmatmul.mubr.bf16.vlgmr.msra.gmra.mrb[16].mxu1 %v5678_v60  ;;  %6457 = vmatpush3.bf16.msra.mxu0 %v7122_v0  ;;  %v7180_v60 = vld [vmem:[%s9198_s1 + $0x670] sm:$0xff]   ;;  %v7184_v0 = vld [vmem:[%s9198_s1 + $0x678] sm:$0xff]  }
  0xa5   :  { %6479 = vmatpush3.bf16.msra.mxu1 %v7123_v1  ;;  %6458 = vmatprep.subr.bf16.mxu0 %v7124_v2  ;;  %v7185_v1 = vld [vmem:[%s9198_s1 + $0x6f8] sm:$0xff]  }
  0xa6   :  { %6480 = vmatprep.subr.bf16.mxu1 %v7125_v3  ;;  %4806 = vmatprep.mubr.bf16.mxu0 %v5681_v33  ;;  %v7186_v2 = vld [vmem:[%s9198_s1 + $0x638] sm:$0xff]  }
  0xa7   :  { %4846 = vmatprep.mubr.bf16.mxu1 %v5683_v35  ;;  %v7187_v3 = vld [vmem:[%s9198_s1 + $0x6b8] sm:$0xff]  }
  0xa8   :  { %6459 = vmatpush3.bf16.msra.mxu0 %v7126_v4  ;;  %v27_v4 = vld [vmem:[%s9199_s0 + $0x60] sm:$0xff] }
  0xa9   :  { %6481 = vmatpush3.bf16.msra.mxu1 %v7127_v5  ;;  %6460 = vmatprep.subr.bf16.mxu0 %v7128_v6  ;;  %v28_v5 = vld [vmem:[%s9199_s0 + $0x68] sm:$0xff]  ;;  %v5684_v6 = vcombine.low %v27_v4, %v27_v4 }
  0xaa   :  { %6482 = vmatprep.subr.bf16.mxu1 %v7129_v7  ;;  %v5685_v7 = vcombine.high %v27_v4, %v27_v4  ;;  %v7235_v4 = vld [vmem:[%s9198_s1 + $0x888] sm:$0xff]  }
  0xac   :  { %6461 = vmatpush3.bf16.msra.mxu0 %v7130_v8  ;;  %v5686_v8 = vcombine.low %v28_v5, %v28_v5 }
  0xad   :  { %6483 = vmatpush3.bf16.msra.mxu1 %v7131_v9  ;;  %6462 = vmatprep.subr.bf16.mxu0 %v7132_v10  ;;  %v7192_v9 = vld [vmem:[%s9198_s1 + $0x740] sm:$0xff]   ;;  %v5687_v10 = vcombine.high %v28_v5, %v28_v5  ;;  %v7236_v5 = vld [vmem:[%s9198_s1 + $0x850] sm:$0xff]  }
  0xae   :  { %6484 = vmatprep.subr.bf16.mxu1 %v7133_v11  ;;  %v7193_v11 = vld [vmem:[%s9198_s1 + $0x7c0] sm:$0xff]  }
  0xb0   :  { %6463 = vmatpush3.bf16.msra.mxu0 %v7134_v12  ;;  %v7194_v12 = vld [vmem:[%s9198_s1 + $0x700] sm:$0xff]  }
  0xb1   :  { %6485 = vmatpush3.bf16.msra.mxu1 %v7135_v13  ;;  %6464 = vmatprep.subr.bf16.mxu0 %v7136_v14  ;;  %v7195_v13 = vld [vmem:[%s9198_s1 + $0x780] sm:$0xff]   ;;  %v7196_v14 = vld [vmem:[%s9198_s1 + $0x748] sm:$0xff]  }
  0xb2   :  { %6486 = vmatprep.subr.bf16.mxu1 %v7137_v15  ;;  %v7197_v15 = vld [vmem:[%s9198_s1 + $0x7c8] sm:$0xff]  }
  0xb4   :  { %6465 = vmatpush3.bf16.msra.mxu0 %v7138_v16  ;;  %v7198_v16 = vld [vmem:[%s9198_s1 + $0x708] sm:$0xff]  }
  0xb5   :  { %6487 = vmatpush3.bf16.msra.mxu1 %v7139_v17  ;;  %6466 = vmatprep.subr.bf16.mxu0 %v7140_v18  ;;  %v7199_v17 = vld [vmem:[%s9198_s1 + $0x788] sm:$0xff]   ;;  %v7200_v18 = vld [vmem:[%s9198_s1 + $0x750] sm:$0xff]  }
  0xb6   :  { %6488 = vmatprep.subr.bf16.mxu1 %v7141_v19  ;;  %v7201_v19 = vld [vmem:[%s9198_s1 + $0x7d0] sm:$0xff]  }
  0xb8   :  { %6467 = vmatpush3.bf16.msra.mxu0 %v7142_v20  ;;  %v7202_v20 = vld [vmem:[%s9198_s1 + $0x710] sm:$0xff]  }
  0xb9   :  { %6489 = vmatpush3.bf16.msra.mxu1 %v7143_v21  ;;  %6468 = vmatprep.subr.bf16.mxu0 %v7144_v22  ;;  %v7203_v21 = vld [vmem:[%s9198_s1 + $0x790] sm:$0xff]   ;;  %v7204_v22 = vld [vmem:[%s9198_s1 + $0x758] sm:$0xff]  }
  0xba   :  { %6490 = vmatprep.subr.bf16.mxu1 %v7145_v23  ;;  %v7205_v23 = vld [vmem:[%s9198_s1 + $0x7d8] sm:$0xff]  }
  0xbc   :  { %6469 = vmatpush3.bf16.msra.mxu0 %v7146_v24  ;;  %v7206_v24 = vld [vmem:[%s9198_s1 + $0x718] sm:$0xff]  }
  0xbd   :  { %6491 = vmatpush3.bf16.msra.mxu1 %v7147_v25  ;;  %6470 = vmatprep.subr.bf16.mxu0 %v7148_v26  ;;  %v7207_v25 = vld [vmem:[%s9198_s1 + $0x798] sm:$0xff]   ;;  %v7208_v26 = vld [vmem:[%s9198_s1 + $0x760] sm:$0xff]  }
  0xbe   :  { %6492 = vmatprep.subr.bf16.mxu1 %v7149_v27  ;;  %v7209_v27 = vld [vmem:[%s9198_s1 + $0x7e0] sm:$0xff]  }
  0xc0   :  { %6471 = vmatpush3.bf16.msra.mxu0 %v7150_v28  ;;  %v7210_v28 = vld [vmem:[%s9198_s1 + $0x720] sm:$0xff]  }
  0xc1   :  { %6493 = vmatpush3.bf16.msra.mxu1 %v7151_v29  ;;  %6500 = vmatprep.subr.bf16.mxu0 %v7156_v36 }
  0xc2   :  { %6522 = vmatprep.subr.bf16.mxu1 %v7157_v37  ;;  %v7212_v37 = vld [vmem:[%s9198_s1 + $0x768] sm:$0xff]  }
  0xc3   :  { %4807 = vmatmul.mubr.bf16.vlgmr.msra.gmra.mrb[20].mxu0 %v5680_v32  ;;  %v5659_v32 = vld [vmem:[%s9200_s2] ss:$0 sm:$0xff] }
  0xc4   :  { %4847 = vmatmul.mubr.bf16.vlgmr.msra.gmra.mrb[20].mxu1 %v5682_v34  ;;  %6501 = vmatpush3.bf16.msra.mxu0 %v7158_v38 }
  0xc5   :  { %6523 = vmatpush3.bf16.msra.mxu1 %v7159_v39  ;;  %6502 = vmatprep.subr.bf16.mxu0 %v7160_v40  ;;  %v7213_v39 = vld [vmem:[%s9198_s1 + $0x7e8] sm:$0xff]  }
  0xc6   :  { %6524 = vmatprep.subr.bf16.mxu1 %v7161_v41  ;;  %4886 = vmatprep.mubr.bf16.mxu0 %v5685_v7  ;;  %v7238_v7 = vld [vmem:[%s9198_s1 + $0x810] sm:$0xff]  }
  0xc7   :  { %4926 = vmatprep.mubr.bf16.mxu1 %v5687_v10  ;;  %v7241_v10 = vld [vmem:[%s9198_s1 + $0x8d8] sm:$0xff]  }
  0xc8   :  { %6503 = vmatpush3.bf16.msra.mxu0 %v7162_v42  ;;  %v7214_v42 = vld [vmem:[%s9198_s1 + $0x728] sm:$0xff]  }
  0xc9   :  { %6525 = vmatpush3.bf16.msra.mxu1 %v7163_v43  ;;  %6504 = vmatprep.subr.bf16.mxu0 %v7164_v44  ;;  %v7215_v44 = vld [vmem:[%s9198_s1 + $0x7a8] sm:$0xff]  }
  0xca   :  { %6526 = vmatprep.subr.bf16.mxu1 %v7165_v45 }
  0xcc   :  { %6505 = vmatpush3.bf16.msra.mxu0 %v7166_v46 }
  0xcd   :  { %6527 = vmatpush3.bf16.msra.mxu1 %v7167_v47  ;;  %6506 = vmatprep.subr.bf16.mxu0 %v7168_v48  ;;  %v7216_v47 = vld [vmem:[%s9198_s1 + $0x770] sm:$0xff]  }
  0xce   :  { %6528 = vmatprep.subr.bf16.mxu1 %v7169_v49  ;;  %v7217_v48 = vld [vmem:[%s9198_s1 + $0x7f0] sm:$0xff]  }
  0xcf   :  { %v7218_v49 = vld [vmem:[%s9198_s1 + $0x730] sm:$0xff]  }
  0xd0   :  { %6507 = vmatpush3.bf16.msra.mxu0 %v7170_v50  ;;  %v7219_v50 = vld [vmem:[%s9198_s1 + $0x7b0] sm:$0xff]  }
  0xd1   :  { %6529 = vmatpush3.bf16.msra.mxu1 %v7171_v51  ;;  %6508 = vmatprep.subr.bf16.mxu0 %v7172_v52  ;;  %v7220_v51 = vld [vmem:[%s9198_s1 + $0x778] sm:$0xff]  }
  0xd2   :  { %6530 = vmatprep.subr.bf16.mxu1 %v7173_v53  ;;  %v7221_v52 = vld [vmem:[%s9198_s1 + $0x7f8] sm:$0xff]  }
  0xd3   :  { %v7222_v53 = vld [vmem:[%s9198_s1 + $0x738] sm:$0xff]  }
  0xd4   :  { %6509 = vmatpush3.bf16.msra.mxu0 %v7174_v54  ;;  %v7223_v54 = vld [vmem:[%s9198_s1 + $0x7b8] sm:$0xff]  }
  0xd5   :  { %6531 = vmatpush3.bf16.msra.mxu1 %v7175_v55  ;;  %6510 = vmatprep.subr.bf16.mxu0 %v7176_v56  ;;  %v29_v55 = vld [vmem:[%s9199_s0 + $0x70] sm:$0xff]  ;;  %v30_v56 = vld [vmem:[%s9199_s0 + $0x78] sm:$0xff] }
  0xd6   :  { %6532 = vmatprep.subr.bf16.mxu1 %v7177_v57  ;;  %v5688_v57 = vcombine.low %v29_v55, %v29_v55 }
  0xd8   :  { %6511 = vmatpush3.bf16.msra.mxu0 %v7178_v58  ;;  %v5689_v58 = vcombine.high %v29_v55, %v29_v55  ;;  %v7272_v55 = vld [vmem:[%s9198_s1 + $0x950] sm:$0xff]  }
  0xd9   :  { %6533 = vmatpush3.bf16.msra.mxu1 %v7179_v59  ;;  %6512 = vmatprep.subr.bf16.mxu0 %v7180_v60  ;;  %v5690_v59 = vcombine.low %v30_v56, %v30_v56  ;;  %v5691_v60 = vcombine.high %v30_v56, %v30_v56  ;;  %v7273_v56 = vld [vmem:[%s9198_s1 + $0x9d0] sm:$0xff]  }
  0xda   :  { %6534 = vmatprep.subr.bf16.mxu1 %v7181_v61  ;;  %v7228_v61 = vld [vmem:[%s9198_s1 + $0x840] sm:$0xff]  }
  0xdc   :  { %6513 = vmatpush3.bf16.msra.mxu0 %v7182_v62  ;;  %v7229_v62 = vld [vmem:[%s9198_s1 + $0x8c0] sm:$0xff]  }
  0xdd   :  { %6535 = vmatpush3.bf16.msra.mxu1 %v7183_v63  ;;  %6514 = vmatprep.subr.bf16.mxu0 %v7184_v0  ;;  %v7230_v63 = vld [vmem:[%s9198_s1 + $0x800] sm:$0xff]  }
  0xde   :  { %6536 = vmatprep.subr.bf16.mxu1 %v7185_v1  ;;  %v7231_v0 = vld [vmem:[%s9198_s1 + $0x880] sm:$0xff]   ;;  %v7232_v1 = vld [vmem:[%s9198_s1 + $0x848] sm:$0xff]  }
  0xe0   :  { %6515 = vmatpush3.bf16.msra.mxu0 %v7186_v2  ;;  %v7233_v2 = vld [vmem:[%s9198_s1 + $0x8c8] sm:$0xff]  }
  0xe1   :  { %6537 = vmatpush3.bf16.msra.mxu1 %v7187_v3  ;;  %6544 = vmatprep.subr.bf16.mxu0 %v7192_v9  ;;  %v7234_v3 = vld [vmem:[%s9198_s1 + $0x808] sm:$0xff]   ;;  %v7240_v9 = vld [vmem:[%s9198_s1 + $0x858] sm:$0xff]  }
  0xe2   :  { %6566 = vmatprep.subr.bf16.mxu1 %v7193_v11  ;;  %v7242_v11 = vld [vmem:[%s9198_s1 + $0x818] sm:$0xff]  }
  0xe3   :  { %4887 = vmatmul.mubr.bf16.vlgmr.msra.gmra.mrb[24].mxu0 %v5684_v6  ;;  %v7237_v6 = vld [vmem:[%s9198_s1 + $0x8d0] sm:$0xff]  }
  0xe4   :  { %4927 = vmatmul.mubr.bf16.vlgmr.msra.gmra.mrb[24].mxu1 %v5686_v8  ;;  %6545 = vmatpush3.bf16.msra.mxu0 %v7194_v12  ;;  %v7239_v8 = vld [vmem:[%s9198_s1 + $0x890] sm:$0xff]   ;;  %v7243_v12 = vld [vmem:[%s9198_s1 + $0x898] sm:$0xff]  }
  0xe5   :  { %6567 = vmatpush3.bf16.msra.mxu1 %v7195_v13  ;;  %6546 = vmatprep.subr.bf16.mxu0 %v7196_v14  ;;  %v7244_v13 = vld [vmem:[%s9198_s1 + $0x860] sm:$0xff]  }
  0xe6   :  { %6568 = vmatprep.subr.bf16.mxu1 %v7197_v15  ;;  %4966 = vmatprep.mubr.bf16.mxu0 %v5689_v58  ;;  %v7245_v14 = vld [vmem:[%s9198_s1 + $0x8e0] sm:$0xff]   ;;  %v7275_v58 = vld [vmem:[%s9198_s1 + $0x990] sm:$0xff]  }
  0xe7   :  { %5006 = vmatprep.mubr.bf16.mxu1 %v5691_v60  ;;  %v7246_v15 = vld [vmem:[%s9198_s1 + $0x820] sm:$0xff]   ;;  %v7277_v60 = vld [vmem:[%s9198_s1 + $0x9d8] sm:$0xff]  }
  0xe8   :  { %6547 = vmatpush3.bf16.msra.mxu0 %v7198_v16 }
  0xe9   :  { %6569 = vmatpush3.bf16.msra.mxu1 %v7199_v17  ;;  %6548 = vmatprep.subr.bf16.mxu0 %v7200_v18  ;;  %v7247_v17 = vld [vmem:[%s9198_s1 + $0x8a0] sm:$0xff]  }
  0xea   :  { %6570 = vmatprep.subr.bf16.mxu1 %v7201_v19 }
  0xec   :  { %6549 = vmatpush3.bf16.msra.mxu0 %v7202_v20 }
  0xed   :  { %6571 = vmatpush3.bf16.msra.mxu1 %v7203_v21  ;;  %6550 = vmatprep.subr.bf16.mxu0 %v7204_v22 }
  0xee   :  { %6572 = vmatprep.subr.bf16.mxu1 %v7205_v23  ;;  %v7248_v23 = vld [vmem:[%s9198_s1 + $0x868] sm:$0xff]  }
  0xf0   :  { %6551 = vmatpush3.bf16.msra.mxu0 %v7206_v24 }
  0xf1   :  { %6573 = vmatpush3.bf16.msra.mxu1 %v7207_v25  ;;  %6552 = vmatprep.subr.bf16.mxu0 %v7208_v26  ;;  %v7249_v25 = vld [vmem:[%s9198_s1 + $0x8e8] sm:$0xff]  }
  0xf2   :  { %6574 = vmatprep.subr.bf16.mxu1 %v7209_v27 }
  0xf4   :  { %6553 = vmatpush3.bf16.msra.mxu0 %v7210_v28  ;;  %v7250_v28 = vld [vmem:[%s9198_s1 + $0x828] sm:$0xff]  }
  0xf5   :  { %6575 = vmatpush3.bf16.msra.mxu1 %v7211_v30  ;;  %6554 = vmatprep.subr.bf16.mxu0 %v7212_v37  ;;  %v7251_v30 = vld [vmem:[%s9198_s1 + $0x8a8] sm:$0xff]   ;;  %v7256_v37 = vld [vmem:[%s9198_s1 + $0x878] sm:$0xff]  }
  0xf6   :  { %v6252_v29 = vpop.f32.mrb[0].mxu0  ;;  %6576 = vmatprep.subr.bf16.mxu1 %v7213_v39  ;;  %v7258_v39 = vld [vmem:[%s9198_s1 + $0x838] sm:$0xff]  }
  0xf7   :  { %v6274_v31 = vpop.f32.mrb[0].mxu1  ;;  %v6253_v33 = vpop.f32.mrb[1].mxu0 }
  0xf8   :  { %v6275_v34 = vpop.f32.mrb[1].mxu1  ;;  %v6254_v35 = vadd.f32 %v6253_v33, %v6252_v29  ;;  %v6255_v38 = vpop.f32.mrb[2].mxu0  ;;  %6555 = vmatpush3.bf16.msra.mxu0 %v7214_v42  ;;  %v7252_v33 = vld [vmem:[%s9198_s1 + $0x870] sm:$0xff]   ;;  %v32_v42 = vld [vmem:[%s9199_s0 + $0x88] sm:$0xff] }
  0xf9   :  { %v6276_v36 = vadd.f32 %v6275_v34, %v6274_v31  ;;  %v6277_v40 = vpop.f32.mrb[2].mxu1  ;;  %v6256_v43 = vpop.f32.mrb[3].mxu0  ;;  %6577 = vmatpush3.bf16.msra.mxu1 %v7215_v44  ;;  %6556 = vmatprep.subr.bf16.mxu0 %v7216_v47  ;;  %v7253_v34 = vld [vmem:[%s9198_s1 + $0x8f0] sm:$0xff]   ;;  %v7257_v38 = vld [vmem:[%s9198_s1 + $0x8f8] sm:$0xff]   ;;  %v7264_v47 = vld [vmem:[%s9198_s1 + $0x940] sm:$0xff]  }
  0xfa   :  { %v4409_v41 = vadd.f32 %v6254_v35, %v5659_v32  ;;  %v6278_v45 = vpop.f32.mrb[3].mxu1  ;;  %6578 = vmatprep.subr.bf16.mxu1 %v7217_v48  ;;  %v7254_v35 = vld [vmem:[%s9198_s1 + $0x830] sm:$0xff]   ;;  %v7259_v40 = vld [vmem:[%s9198_s1 + $0x8b8] sm:$0xff]   ;;  %v7265_v48 = vld [vmem:[%s9198_s1 + $0x9c0] sm:$0xff]  }
  0xfb   :  { %v5694_v45 = vcombine.low %v32_v42, %v32_v42 }
  0xfc   :  { %v8325_v46 = vadd.f32 %v6276_v36, %v4409_v41  ;;  %6557 = vmatpush3.bf16.msra.mxu0 %v7218_v49  ;;  %v7255_v36 = vld [vmem:[%s9198_s1 + $0x8b0] sm:$0xff]   ;;  %v31_v41 = vld [vmem:[%s9199_s0 + $0x80] sm:$0xff] }
  0xfd   :  { %6579 = vmatpush3.bf16.msra.mxu1 %v7219_v50  ;;  %6558 = vmatprep.subr.bf16.mxu0 %v7220_v51  ;;  %v5692_v43 = vcombine.low %v31_v41, %v31_v41  ;;  %v5693_v44 = vcombine.high %v31_v41, %v31_v41  ;;  %v7266_v49 = vld [vmem:[%s9198_s1 + $0x900] sm:$0xff]   ;;  %v7268_v51 = vld [vmem:[%s9198_s1 + $0x948] sm:$0xff]   ;;  %v7308_v41 = vld [vmem:[%s9198_s1 + $0xa50] sm:$0xff]  }
  0xfe   :  { %6580 = vmatprep.subr.bf16.mxu1 %v7221_v52  ;;  %v7267_v50 = vld [vmem:[%s9198_s1 + $0x980] sm:$0xff]   ;;  %v7269_v52 = vld [vmem:[%s9198_s1 + $0x9c8] sm:$0xff]  }
 0x100   :  { %6559 = vmatpush3.bf16.msra.mxu0 %v7222_v53  ;;  %v7270_v53 = vld [vmem:[%s9198_s1 + $0x908] sm:$0xff]  }
 0x101   :  { %6581 = vmatpush3.bf16.msra.mxu1 %v7223_v54  ;;  %6588 = vmatprep.subr.bf16.mxu0 %v7228_v61  ;;  %v7271_v54 = vld [vmem:[%s9198_s1 + $0x988] sm:$0xff]   ;;  %v7278_v61 = vld [vmem:[%s9198_s1 + $0x918] sm:$0xff]  }
 0x102   :  { %6610 = vmatprep.subr.bf16.mxu1 %v7229_v62  ;;  %v7279_v62 = vld [vmem:[%s9198_s1 + $0x998] sm:$0xff]  }
 0x103   :  { %4967 = vmatmul.mubr.bf16.vlgmr.msra.gmra.mrb[28].mxu0 %v5688_v57  ;;  %v7274_v57 = vld [vmem:[%s9198_s1 + $0x910] sm:$0xff]  }
 0x104   :  { %5007 = vmatmul.mubr.bf16.vlgmr.msra.gmra.mrb[28].mxu1 %v5690_v59  ;;  %6589 = vmatpush3.bf16.msra.mxu0 %v7230_v63  ;;  %v7276_v59 = vld [vmem:[%s9198_s1 + $0x958] sm:$0xff]   ;;  %v7280_v63 = vld [vmem:[%s9198_s1 + $0x960] sm:$0xff]  }
 0x105   :  { %6611 = vmatpush3.bf16.msra.mxu1 %v7231_v0  ;;  %6590 = vmatprep.subr.bf16.mxu0 %v7232_v1  ;;  %v7281_v0 = vld [vmem:[%s9198_s1 + $0x9e0] sm:$0xff]  }
 0x106   :  { %6612 = vmatprep.subr.bf16.mxu1 %v7233_v2  ;;  %5046 = vmatprep.mubr.bf16.mxu0 %v5693_v44  ;;  %v7282_v2 = vld [vmem:[%s9198_s1 + $0x920] sm:$0xff]   ;;  %v7311_v44 = vld [vmem:[%s9198_s1 + $0xa90] sm:$0xff]  }
 0x108   :  { %6591 = vmatpush3.bf16.msra.mxu0 %v7234_v3 }
 0x109   :  { %6613 = vmatpush3.bf16.msra.mxu1 %v7235_v4  ;;  %6592 = vmatprep.subr.bf16.mxu0 %v7236_v5  ;;  %v7283_v4 = vld [vmem:[%s9198_s1 + $0x9a0] sm:$0xff]  }
 0x10a   :  { %6614 = vmatprep.subr.bf16.mxu1 %v7237_v6 }
 0x10c   :  { %6593 = vmatpush3.bf16.msra.mxu0 %v7238_v7 }
 0x10d   :  { %6615 = vmatpush3.bf16.msra.mxu1 %v7239_v8  ;;  %6594 = vmatprep.subr.bf16.mxu0 %v7240_v9  ;;  %v7284_v8 = vld [vmem:[%s9198_s1 + $0x968] sm:$0xff]  }
 0x10e   :  { %6616 = vmatprep.subr.bf16.mxu1 %v7241_v10  ;;  %v7285_v10 = vld [vmem:[%s9198_s1 + $0x9e8] sm:$0xff]  }
 0x110   :  { %6595 = vmatpush3.bf16.msra.mxu0 %v7242_v11 }
 0x111   :  { %6617 = vmatpush3.bf16.msra.mxu1 %v7243_v12  ;;  %6596 = vmatprep.subr.bf16.mxu0 %v7244_v13 }
 0x112   :  { %6618 = vmatprep.subr.bf16.mxu1 %v7245_v14  ;;  %v7286_v14 = vld [vmem:[%s9198_s1 + $0x928] sm:$0xff]  }
 0x114   :  { %6597 = vmatpush3.bf16.msra.mxu0 %v7246_v15  ;;  %v7287_v15 = vld [vmem:[%s9198_s1 + $0x9a8] sm:$0xff]  }
 0x115   :  { %6619 = vmatpush3.bf16.msra.mxu1 %v7247_v17  ;;  %6598 = vmatprep.subr.bf16.mxu0 %v7248_v23  ;;  %v7292_v23 = vld [vmem:[%s9198_s1 + $0x978] sm:$0xff]  }
 0x116   :  { %v6296_v16 = vpop.f32.mrb[4].mxu0  ;;  %6620 = vmatprep.subr.bf16.mxu1 %v7249_v25  ;;  %v7294_v25 = vld [vmem:[%s9198_s1 + $0x938] sm:$0xff]  }
 0x117   :  { %v6318_v18 = vpop.f32.mrb[4].mxu1  ;;  %v6297_v19 = vpop.f32.mrb[5].mxu0 }
 0x118   :  { %v6319_v20 = vpop.f32.mrb[5].mxu1  ;;  %v6298_v21 = vadd.f32 %v6297_v19, %v6296_v16  ;;  %v6299_v24 = vpop.f32.mrb[6].mxu0  ;;  %6599 = vmatpush3.bf16.msra.mxu0 %v7250_v28  ;;  %v7288_v19 = vld [vmem:[%s9198_s1 + $0x970] sm:$0xff]   ;;  %v34_v28 = vld [vmem:[%s9199_s0 + $0x98] sm:$0xff] }
 0x119   :  { %v6320_v22 = vadd.f32 %v6319_v20, %v6318_v18  ;;  %v6321_v26 = vpop.f32.mrb[6].mxu1  ;;  %v6300_v29 = vpop.f32.mrb[7].mxu0  ;;  %6621 = vmatpush3.bf16.msra.mxu1 %v7251_v30  ;;  %6600 = vmatprep.subr.bf16.mxu0 %v7252_v33  ;;  %v7289_v20 = vld [vmem:[%s9198_s1 + $0x9f0] sm:$0xff]   ;;  %v7293_v24 = vld [vmem:[%s9198_s1 + $0x9f8] sm:$0xff]   ;;  %v5699_v33 = vcombine.high %v34_v28, %v34_v28 }
 0x11a   :  { %v4489_v27 = vadd.f32 %v6298_v21, %v8325_v46  ;;  %v6322_v31 = vpop.f32.mrb[7].mxu1  ;;  %6622 = vmatprep.subr.bf16.mxu1 %v7253_v34  ;;  %v5695_v46 = vcombine.high %v32_v42, %v32_v42  ;;  %v7290_v21 = vld [vmem:[%s9198_s1 + $0x930] sm:$0xff]   ;;  %v7295_v26 = vld [vmem:[%s9198_s1 + $0x9b8] sm:$0xff]   ;;  %v7301_v34 = vld [vmem:[%s9198_s1 + $0xac0] sm:$0xff]  }
 0x11b   :  { %v5698_v31 = vcombine.low %v34_v28, %v34_v28  ;;  %v7309_v42 = vld [vmem:[%s9198_s1 + $0xad0] sm:$0xff]  }
 0x11c   :  { %v8430_v32 = vadd.f32 %v6320_v22, %v4489_v27  ;;  %6601 = vmatpush3.bf16.msra.mxu0 %v7254_v35  ;;  %5086 = vmatprep.mubr.bf16.mxu1 %v5695_v46  ;;  %v7291_v22 = vld [vmem:[%s9198_s1 + $0x9b0] sm:$0xff]   ;;  %v7302_v35 = vld [vmem:[%s9198_s1 + $0xa00] sm:$0xff]   ;;  %v7313_v46 = vld [vmem:[%s9198_s1 + $0xad8] sm:$0xff]  }
 0x11d   :  { %6623 = vmatpush3.bf16.msra.mxu1 %v7255_v36  ;;  %6602 = vmatprep.subr.bf16.mxu0 %v7256_v37  ;;  %v33_v27 = vld [vmem:[%s9199_s0 + $0x90] sm:$0xff]  ;;  %v7303_v36 = vld [vmem:[%s9198_s1 + $0xa80] sm:$0xff]   ;;  %v7304_v37 = vld [vmem:[%s9198_s1 + $0xa48] sm:$0xff]  }
 0x11e   :  { %6624 = vmatprep.subr.bf16.mxu1 %v7257_v38  ;;  %v5696_v29 = vcombine.low %v33_v27, %v33_v27  ;;  %v5697_v30 = vcombine.high %v33_v27, %v33_v27  ;;  %v7305_v38 = vld [vmem:[%s9198_s1 + $0xac8] sm:$0xff]   ;;  %v7344_v27 = vld [vmem:[%s9198_s1 + $0xb50] sm:$0xff]  }
 0x11f   :  { %v7345_v28 = vld [vmem:[%s9198_s1 + $0xbd0] sm:$0xff]  }
 0x120   :  { %6603 = vmatpush3.bf16.msra.mxu0 %v7258_v39  ;;  %v7306_v39 = vld [vmem:[%s9198_s1 + $0xa08] sm:$0xff]  }
 0x121   :  { %6625 = vmatpush3.bf16.msra.mxu1 %v7259_v40  ;;  %6632 = vmatprep.subr.bf16.mxu0 %v7264_v47  ;;  %v7307_v40 = vld [vmem:[%s9198_s1 + $0xa88] sm:$0xff]   ;;  %v7314_v47 = vld [vmem:[%s9198_s1 + $0xa18] sm:$0xff]  }
 0x122   :  { %6654 = vmatprep.subr.bf16.mxu1 %v7265_v48  ;;  %v7315_v48 = vld [vmem:[%s9198_s1 + $0xa98] sm:$0xff]  }
 0x123   :  { %5047 = vmatmul.mubr.bf16.vlgmr.msra.gmra.mrb[32].mxu0 %v5692_v43  ;;  %v7310_v43 = vld [vmem:[%s9198_s1 + $0xa10] sm:$0xff]  }
 0x124   :  { %5087 = vmatmul.mubr.bf16.vlgmr.msra.gmra.mrb[32].mxu1 %v5694_v45  ;;  %6633 = vmatpush3.bf16.msra.mxu0 %v7266_v49  ;;  %v7312_v45 = vld [vmem:[%s9198_s1 + $0xa58] sm:$0xff]   ;;  %v7316_v49 = vld [vmem:[%s9198_s1 + $0xa60] sm:$0xff]  }
 0x125   :  { %6655 = vmatpush3.bf16.msra.mxu1 %v7267_v50  ;;  %6634 = vmatprep.subr.bf16.mxu0 %v7268_v51  ;;  %v7317_v50 = vld [vmem:[%s9198_s1 + $0xae0] sm:$0xff]  }
 0x126   :  { %6656 = vmatprep.subr.bf16.mxu1 %v7269_v52  ;;  %5126 = vmatprep.mubr.bf16.mxu0 %v5697_v30  ;;  %v7318_v52 = vld [vmem:[%s9198_s1 + $0xa20] sm:$0xff]   ;;  %v7347_v30 = vld [vmem:[%s9198_s1 + $0xb90] sm:$0xff]  }
 0x127   :  { %5166 = vmatprep.mubr.bf16.mxu1 %v5699_v33  ;;  %v7350_v33 = vld [vmem:[%s9198_s1 + $0xb18] sm:$0xff]  }
 0x128   :  { %6635 = vmatpush3.bf16.msra.mxu0 %v7270_v53 }
 0x129   :  { %6657 = vmatpush3.bf16.msra.mxu1 %v7271_v54  ;;  %6636 = vmatprep.subr.bf16.mxu0 %v7272_v55  ;;  %v7319_v54 = vld [vmem:[%s9198_s1 + $0xaa0] sm:$0xff]  }
 0x12a   :  { %6658 = vmatprep.subr.bf16.mxu1 %v7273_v56 }
 0x12c   :  { %6637 = vmatpush3.bf16.msra.mxu0 %v7274_v57  ;;  %v7320_v57 = vld [vmem:[%s9198_s1 + $0xa68] sm:$0xff]  }
 0x12d   :  { %6659 = vmatpush3.bf16.msra.mxu1 %v7275_v58  ;;  %6638 = vmatprep.subr.bf16.mxu0 %v7276_v59 }
 0x12e   :  { %6660 = vmatprep.subr.bf16.mxu1 %v7277_v60  ;;  %v7321_v60 = vld [vmem:[%s9198_s1 + $0xae8] sm:$0xff]  }
 0x130   :  { %6639 = vmatpush3.bf16.msra.mxu0 %v7278_v61 }
 0x131   :  { %6661 = vmatpush3.bf16.msra.mxu1 %v7279_v62  ;;  %6640 = vmatprep.subr.bf16.mxu0 %v7280_v63  ;;  %v7322_v63 = vld [vmem:[%s9198_s1 + $0xa28] sm:$0xff]  }
 0x132   :  { %6662 = vmatprep.subr.bf16.mxu1 %v7281_v0 }
 0x134   :  { %6641 = vmatpush3.bf16.msra.mxu0 %v7282_v2 }
 0x135   :  { %6663 = vmatpush3.bf16.msra.mxu1 %v7283_v4  ;;  %6642 = vmatprep.subr.bf16.mxu0 %v7284_v8  ;;  %v7324_v4 = vld [vmem:[%s9198_s1 + $0xa70] sm:$0xff]  }
 0x136   :  { %v6340_v1 = vpop.f32.mrb[8].mxu0  ;;  %6664 = vmatprep.subr.bf16.mxu1 %v7285_v10  ;;  %v7327_v8 = vld [vmem:[%s9198_s1 + $0xab0] sm:$0xff]   ;;  %v7329_v10 = vld [vmem:[%s9198_s1 + $0xaf8] sm:$0xff]  }
 0x137   :  { %v6362_v3 = vpop.f32.mrb[8].mxu1  ;;  %v6341_v5 = vpop.f32.mrb[9].mxu0 }
 0x138   :  { %v6342_v6 = vadd.f32 %v6341_v5, %v6340_v1  ;;  %v6363_v7 = vpop.f32.mrb[9].mxu1  ;;  %v6343_v11 = vpop.f32.mrb[10].mxu0  ;;  %6643 = vmatpush3.bf16.msra.mxu0 %v7286_v14  ;;  %v7323_v1 = vld [vmem:[%s9198_s1 + $0xaa8] sm:$0xff]  }
 0x139   :  { %v6364_v9 = vadd.f32 %v6363_v7, %v6362_v3  ;;  %v6365_v13 = vpop.f32.mrb[10].mxu1  ;;  %v6344_v16 = vpop.f32.mrb[11].mxu0  ;;  %6665 = vmatpush3.bf16.msra.mxu1 %v7287_v15  ;;  %6644 = vmatprep.subr.bf16.mxu0 %v7288_v19  ;;  %v7326_v7 = vld [vmem:[%s9198_s1 + $0xa30] sm:$0xff]   ;;  %v7330_v11 = vld [vmem:[%s9198_s1 + $0xa38] sm:$0xff]   ;;  %v7336_v19 = vld [vmem:[%s9198_s1 + $0xb40] sm:$0xff]  }
 0x13a   :  { %v4569_v12 = vadd.f32 %v6342_v6, %v8430_v32  ;;  %v6366_v18 = vpop.f32.mrb[11].mxu1  ;;  %6666 = vmatprep.subr.bf16.mxu1 %v7289_v20  ;;  %v7300_v32 = vld [vmem:[%s9198_s1 + $0xa40] sm:$0xff]   ;;  %v7325_v6 = vld [vmem:[%s9198_s1 + $0xaf0] sm:$0xff]   ;;  %v36_v16 = vld [vmem:[%s9199_s0 + $0xa8] sm:$0xff] }
 0x13b   :  { %v35_v13 = vld [vmem:[%s9199_s0 + $0xa0] sm:$0xff]  ;;  %v5703_v18 = vcombine.high %v36_v16, %v36_v16 }
 0x13c   :  { %v8535_v17 = vadd.f32 %v6364_v9, %v4569_v12  ;;  %6645 = vmatpush3.bf16.msra.mxu0 %v7290_v21  ;;  %v7328_v9 = vld [vmem:[%s9198_s1 + $0xa78] sm:$0xff]   ;;  %v5700_v14 = vcombine.low %v35_v13, %v35_v13  ;;  %v5701_v15 = vcombine.high %v35_v13, %v35_v13  ;;  %v7337_v20 = vld [vmem:[%s9198_s1 + $0xbc0] sm:$0xff]   ;;  %v7380_v13 = vld [vmem:[%s9198_s1 + $0xc50] sm:$0xff]  }
 0x13d   :  { %6667 = vmatpush3.bf16.msra.mxu1 %v7291_v22  ;;  %6646 = vmatprep.subr.bf16.mxu0 %v7292_v23  ;;  %v7331_v12 = vld [vmem:[%s9198_s1 + $0xab8] sm:$0xff]   ;;  %v7338_v21 = vld [vmem:[%s9198_s1 + $0xb00] sm:$0xff]   ;;  %v7340_v23 = vld [vmem:[%s9198_s1 + $0xb48] sm:$0xff]  }
 0x13e   :  { %6668 = vmatprep.subr.bf16.mxu1 %v7293_v24  ;;  %v7339_v22 = vld [vmem:[%s9198_s1 + $0xb80] sm:$0xff]   ;;  %v7341_v24 = vld [vmem:[%s9198_s1 + $0xbc8] sm:$0xff]  }
 0x140   :  { %6647 = vmatpush3.bf16.msra.mxu0 %v7294_v25  ;;  %v7342_v25 = vld [vmem:[%s9198_s1 + $0xb08] sm:$0xff]  }
 0x141   :  { %6669 = vmatpush3.bf16.msra.mxu1 %v7295_v26  ;;  %6676 = vmatprep.subr.bf16.mxu0 %v7300_v32  ;;  %v7343_v26 = vld [vmem:[%s9198_s1 + $0xb88] sm:$0xff]   ;;  %v7349_v32 = vld [vmem:[%s9198_s1 + $0xbd8] sm:$0xff]  }
 0x142   :  { %6698 = vmatprep.subr.bf16.mxu1 %v7301_v34  ;;  %v7351_v34 = vld [vmem:[%s9198_s1 + $0xb98] sm:$0xff]  }
 0x143   :  { %5127 = vmatmul.mubr.bf16.vlgmr.msra.gmra.mrb[36].mxu0 %v5696_v29  ;;  %v7346_v29 = vld [vmem:[%s9198_s1 + $0xb10] sm:$0xff]  }
 0x144   :  { %5167 = vmatmul.mubr.bf16.vlgmr.msra.gmra.mrb[36].mxu1 %v5698_v31  ;;  %6677 = vmatpush3.bf16.msra.mxu0 %v7302_v35  ;;  %v7348_v31 = vld [vmem:[%s9198_s1 + $0xb58] sm:$0xff]   ;;  %v7352_v35 = vld [vmem:[%s9198_s1 + $0xb60] sm:$0xff]  }
 0x145   :  { %6699 = vmatpush3.bf16.msra.mxu1 %v7303_v36  ;;  %6678 = vmatprep.subr.bf16.mxu0 %v7304_v37  ;;  %v7353_v36 = vld [vmem:[%s9198_s1 + $0xbe0] sm:$0xff]  }
 0x146   :  { %6700 = vmatprep.subr.bf16.mxu1 %v7305_v38  ;;  %5206 = vmatprep.mubr.bf16.mxu0 %v5701_v15  ;;  %v7354_v38 = vld [vmem:[%s9198_s1 + $0xb20] sm:$0xff]   ;;  %v7382_v15 = vld [vmem:[%s9198_s1 + $0xc10] sm:$0xff]  }
 0x147   :  { %5246 = vmatprep.mubr.bf16.mxu1 %v5703_v18  ;;  %v7385_v18 = vld [vmem:[%s9198_s1 + $0xcd8] sm:$0xff]  }
 0x148   :  { %6679 = vmatpush3.bf16.msra.mxu0 %v7306_v39 }
 0x149   :  { %6701 = vmatpush3.bf16.msra.mxu1 %v7307_v40  ;;  %6680 = vmatprep.subr.bf16.mxu0 %v7308_v41  ;;  %v7355_v40 = vld [vmem:[%s9198_s1 + $0xba0] sm:$0xff]  }
 0x14a   :  { %6702 = vmatprep.subr.bf16.mxu1 %v7309_v42 }
 0x14c   :  { %6681 = vmatpush3.bf16.msra.mxu0 %v7310_v43  ;;  %v7356_v43 = vld [vmem:[%s9198_s1 + $0xb68] sm:$0xff]  }
 0x14d   :  { %6703 = vmatpush3.bf16.msra.mxu1 %v7311_v44  ;;  %6682 = vmatprep.subr.bf16.mxu0 %v7312_v45 }
 0x14e   :  { %6704 = vmatprep.subr.bf16.mxu1 %v7313_v46  ;;  %v7357_v46 = vld [vmem:[%s9198_s1 + $0xbe8] sm:$0xff]  }
 0x150   :  { %6683 = vmatpush3.bf16.msra.mxu0 %v7314_v47 }
 0x151   :  { %6705 = vmatpush3.bf16.msra.mxu1 %v7315_v48  ;;  %6684 = vmatprep.subr.bf16.mxu0 %v7316_v49  ;;  %v7358_v49 = vld [vmem:[%s9198_s1 + $0xb28] sm:$0xff]  }
 0x152   :  { %6706 = vmatprep.subr.bf16.mxu1 %v7317_v50 }
 0x154   :  { %6685 = vmatpush3.bf16.msra.mxu0 %v7318_v52 }
 0x155   :  { %6707 = vmatpush3.bf16.msra.mxu1 %v7319_v54  ;;  %6686 = vmatprep.subr.bf16.mxu0 %v7320_v57  ;;  %v7360_v54 = vld [vmem:[%s9198_s1 + $0xb70] sm:$0xff]  }
 0x156   :  { %v6384_v51 = vpop.f32.mrb[12].mxu0  ;;  %6708 = vmatprep.subr.bf16.mxu1 %v7321_v60  ;;  %v7362_v57 = vld [vmem:[%s9198_s1 + $0xb30] sm:$0xff]   ;;  %v7365_v60 = vld [vmem:[%s9198_s1 + $0xbf8] sm:$0xff]  }
 0x157   :  { %v6406_v53 = vpop.f32.mrb[12].mxu1  ;;  %v6385_v55 = vpop.f32.mrb[13].mxu0 }
 0x158   :  { %v6407_v56 = vpop.f32.mrb[13].mxu1  ;;  %v6386_v58 = vadd.f32 %v6385_v55, %v6384_v51  ;;  %v6387_v61 = vpop.f32.mrb[14].mxu0  ;;  %6687 = vmatpush3.bf16.msra.mxu0 %v7322_v63  ;;  %v7359_v51 = vld [vmem:[%s9198_s1 + $0xba8] sm:$0xff]   ;;  %v37_v63 = vld [vmem:[%s9199_s0 + $0xb0] sm:$0xff] }
 0x159   :  { %v6408_v59 = vadd.f32 %v6407_v56, %v6406_v53  ;;  %v6409_v62 = vpop.f32.mrb[14].mxu1  ;;  %v6388_v2 = vpop.f32.mrb[15].mxu0  ;;  %6709 = vmatpush3.bf16.msra.mxu1 %v7323_v1  ;;  %6688 = vmatprep.subr.bf16.mxu0 %v7324_v4  ;;  %v7361_v56 = vld [vmem:[%s9198_s1 + $0xbf0] sm:$0xff]   ;;  %v7366_v61 = vld [vmem:[%s9198_s1 + $0xb38] sm:$0xff]   ;;  %v5704_v1 = vcombine.low %v37_v63, %v37_v63 }
 0x15a   :  { %v4649_v0 = vadd.f32 %v6386_v58, %v8535_v17  ;;  %v6410_v3 = vpop.f32.mrb[15].mxu1  ;;  %6710 = vmatprep.subr.bf16.mxu1 %v7325_v6  ;;  %v5702_v17 = vcombine.low %v36_v16, %v36_v16  ;;  %v7363_v58 = vld [vmem:[%s9198_s1 + $0xbb0] sm:$0xff]   ;;  %v7367_v62 = vld [vmem:[%s9198_s1 + $0xbb8] sm:$0xff]   ;;  %v5705_v2 = vcombine.high %v37_v63, %v37_v63  ;;  %v7373_v6 = vld [vmem:[%s9198_s1 + $0xcc0] sm:$0xff]  }
 0x15b   :  { %v7383_v16 = vld [vmem:[%s9198_s1 + $0xc90] sm:$0xff]  }
 0x15c   :  { %v8643_v5 = vadd.f32 %v6408_v59, %v4649_v0  ;;  %6689 = vmatpush3.bf16.msra.mxu0 %v7326_v7  ;;  %v7364_v59 = vld [vmem:[%s9198_s1 + $0xb78] sm:$0xff]   ;;  %v7374_v7 = vld [vmem:[%s9198_s1 + $0xc00] sm:$0xff]   ;;  %v7416_v63 = vld [vmem:[%s9198_s1 + $0xd50] sm:$0xff]  }
 0x15d   :  { %6711 = vmatpush3.bf16.msra.mxu1 %v7327_v8  ;;  %6690 = vmatprep.subr.bf16.mxu0 %v7328_v9  ;;  %v38_v0 = vld [vmem:[%s9199_s0 + $0xb8] sm:$0xff]  ;;  %v7375_v8 = vld [vmem:[%s9198_s1 + $0xc80] sm:$0xff]   ;;  %v7376_v9 = vld [vmem:[%s9198_s1 + $0xc48] sm:$0xff]  }
 0x15e   :  { %6712 = vmatprep.subr.bf16.mxu1 %v7329_v10  ;;  %v5706_v3 = vcombine.low %v38_v0, %v38_v0  ;;  %v5707_v4 = vcombine.high %v38_v0, %v38_v0  ;;  %v7377_v10 = vld [vmem:[%s9198_s1 + $0xcc8] sm:$0xff]   ;;  %v7417_v0 = vld [vmem:[%s9198_s1 + $0xdd0] sm:$0xff]  }
 0x160   :  { %6691 = vmatpush3.bf16.msra.mxu0 %v7330_v11  ;;  %v7378_v11 = vld [vmem:[%s9198_s1 + $0xc08] sm:$0xff]  }
 0x161   :  { %6713 = vmatpush3.bf16.msra.mxu1 %v7331_v12  ;;  %6720 = vmatprep.subr.bf16.mxu0 %v7336_v19  ;;  %v7379_v12 = vld [vmem:[%s9198_s1 + $0xc88] sm:$0xff]   ;;  %v7386_v19 = vld [vmem:[%s9198_s1 + $0xc18] sm:$0xff]  }
 0x162   :  { %6742 = vmatprep.subr.bf16.mxu1 %v7337_v20  ;;  %v7387_v20 = vld [vmem:[%s9198_s1 + $0xc98] sm:$0xff]  }
 0x163   :  { %5207 = vmatmul.mubr.bf16.vlgmr.msra.gmra.mrb[40].mxu0 %v5700_v14  ;;  %v7381_v14 = vld [vmem:[%s9198_s1 + $0xcd0] sm:$0xff]  }
 0x164   :  { %5247 = vmatmul.mubr.bf16.vlgmr.msra.gmra.mrb[40].mxu1 %v5702_v17  ;;  %6721 = vmatpush3.bf16.msra.mxu0 %v7338_v21  ;;  %v7384_v17 = vld [vmem:[%s9198_s1 + $0xc58] sm:$0xff]   ;;  %v7388_v21 = vld [vmem:[%s9198_s1 + $0xc60] sm:$0xff]  }
 0x165   :  { %6743 = vmatpush3.bf16.msra.mxu1 %v7339_v22  ;;  %6722 = vmatprep.subr.bf16.mxu0 %v7340_v23  ;;  %v7389_v22 = vld [vmem:[%s9198_s1 + $0xce0] sm:$0xff]  }
 0x166   :  { %6744 = vmatprep.subr.bf16.mxu1 %v7341_v24  ;;  %5286 = vmatprep.mubr.bf16.mxu0 %v5705_v2  ;;  %v7390_v24 = vld [vmem:[%s9198_s1 + $0xc20] sm:$0xff]   ;;  %v7419_v2 = vld [vmem:[%s9198_s1 + $0xd90] sm:$0xff]  }
 0x167   :  { %5326 = vmatprep.mubr.bf16.mxu1 %v5707_v4  ;;  %v7421_v4 = vld [vmem:[%s9198_s1 + $0xdd8] sm:$0xff]  }
 0x168   :  { %6723 = vmatpush3.bf16.msra.mxu0 %v7342_v25 }
 0x169   :  { %6745 = vmatpush3.bf16.msra.mxu1 %v7343_v26  ;;  %6724 = vmatprep.subr.bf16.mxu0 %v7344_v27  ;;  %v7391_v26 = vld [vmem:[%s9198_s1 + $0xca0] sm:$0xff]  }
 0x16a   :  { %6746 = vmatprep.subr.bf16.mxu1 %v7345_v28 }
 0x16c   :  { %6725 = vmatpush3.bf16.msra.mxu0 %v7346_v29 }
 0x16d   :  { %6747 = vmatpush3.bf16.msra.mxu1 %v7347_v30  ;;  %6726 = vmatprep.subr.bf16.mxu0 %v7348_v31  ;;  %v7392_v30 = vld [vmem:[%s9198_s1 + $0xc68] sm:$0xff]  }
 0x16e   :  { %6748 = vmatprep.subr.bf16.mxu1 %v7349_v32  ;;  %v7393_v32 = vld [vmem:[%s9198_s1 + $0xce8] sm:$0xff]  }
 0x170   :  { %6727 = vmatpush3.bf16.msra.mxu0 %v7350_v33 }
 0x171   :  { %6749 = vmatpush3.bf16.msra.mxu1 %v7351_v34  ;;  %6728 = vmatprep.subr.bf16.mxu0 %v7352_v35 }
 0x172   :  { %6750 = vmatprep.subr.bf16.mxu1 %v7353_v36  ;;  %v7394_v36 = vld [vmem:[%s9198_s1 + $0xc28] sm:$0xff]  }
 0x174   :  { %6729 = vmatpush3.bf16.msra.mxu0 %v7354_v38 }
 0x175   :  { %6751 = vmatpush3.bf16.msra.mxu1 %v7355_v40  ;;  %6730 = vmatprep.subr.bf16.mxu0 %v7356_v43  ;;  %v7398_v43 = vld [vmem:[%s9198_s1 + $0xc30] sm:$0xff]  }
 0x176   :  { %v6428_v37 = vpop.f32.mrb[16].mxu0  ;;  %6752 = vmatprep.subr.bf16.mxu1 %v7357_v46  ;;  %v7401_v46 = vld [vmem:[%s9198_s1 + $0xcf8] sm:$0xff]  }
 0x177   :  { %v6450_v39 = vpop.f32.mrb[16].mxu1  ;;  %v6429_v41 = vpop.f32.mrb[17].mxu0 }
 0x178   :  { %v6451_v42 = vpop.f32.mrb[17].mxu1  ;;  %v6430_v44 = vadd.f32 %v6429_v41, %v6428_v37  ;;  %v6431_v47 = vpop.f32.mrb[18].mxu0  ;;  %6731 = vmatpush3.bf16.msra.mxu0 %v7358_v49  ;;  %v7395_v37 = vld [vmem:[%s9198_s1 + $0xca8] sm:$0xff]   ;;  %v7396_v41 = vld [vmem:[%s9198_s1 + $0xc70] sm:$0xff]   ;;  %v39_v49 = vld [vmem:[%s9199_s0 + $0xc0] sm:$0xff] }
 0x179   :  { %v6452_v45 = vadd.f32 %v6451_v42, %v6450_v39  ;;  %v6453_v48 = vpop.f32.mrb[18].mxu1  ;;  %v6432_v52 = vpop.f32.mrb[19].mxu0  ;;  %6753 = vmatpush3.bf16.msra.mxu1 %v7359_v51  ;;  %6732 = vmatprep.subr.bf16.mxu0 %v7360_v54  ;;  %v7397_v42 = vld [vmem:[%s9198_s1 + $0xcf0] sm:$0xff]   ;;  %v7402_v47 = vld [vmem:[%s9198_s1 + $0xc38] sm:$0xff]   ;;  %v5708_v51 = vcombine.low %v39_v49, %v39_v49  ;;  %v7408_v54 = vld [vmem:[%s9198_s1 + $0xd40] sm:$0xff]  }
 0x17a   :  { %v4729_v50 = vadd.f32 %v6430_v44, %v8643_v5  ;;  %v6454_v53 = vpop.f32.mrb[19].mxu1  ;;  %6754 = vmatprep.subr.bf16.mxu1 %v7361_v56  ;;  %v7372_v5 = vld [vmem:[%s9198_s1 + $0xc40] sm:$0xff]   ;;  %v7399_v44 = vld [vmem:[%s9198_s1 + $0xcb0] sm:$0xff]   ;;  %v7403_v48 = vld [vmem:[%s9198_s1 + $0xcb8] sm:$0xff]   ;;  %v5709_v52 = vcombine.high %v39_v49, %v39_v49 }
 0x17b   :  { %v7409_v56 = vld [vmem:[%s9198_s1 + $0xdc0] sm:$0xff]   ;;  %v7452_v49 = vld [vmem:[%s9198_s1 + $0xe50] sm:$0xff]  }
 0x17c   :  { %v8748_v55 = vadd.f32 %v6452_v45, %v4729_v50  ;;  %6733 = vmatpush3.bf16.msra.mxu0 %v7362_v57  ;;  %v7400_v45 = vld [vmem:[%s9198_s1 + $0xc78] sm:$0xff]   ;;  %v40_v50 = vld [vmem:[%s9199_s0 + $0xc8] sm:$0xff]  ;;  %v7410_v57 = vld [vmem:[%s9198_s1 + $0xd00] sm:$0xff]  }
 0x17d   :  { %6755 = vmatpush3.bf16.msra.mxu1 %v7363_v58  ;;  %6734 = vmatprep.subr.bf16.mxu0 %v7364_v59  ;;  %v5710_v53 = vcombine.low %v40_v50, %v40_v50  ;;  %v7411_v58 = vld [vmem:[%s9198_s1 + $0xd80] sm:$0xff]   ;;  %v7412_v59 = vld [vmem:[%s9198_s1 + $0xd48] sm:$0xff]  }
 0x17e   :  { %6756 = vmatprep.subr.bf16.mxu1 %v7365_v60  ;;  %v7413_v60 = vld [vmem:[%s9198_s1 + $0xdc8] sm:$0xff]  }
 0x180   :  { %6735 = vmatpush3.bf16.msra.mxu0 %v7366_v61  ;;  %v7414_v61 = vld [vmem:[%s9198_s1 + $0xd08] sm:$0xff]  }
 0x181   :  { %6757 = vmatpush3.bf16.msra.mxu1 %v7367_v62  ;;  %6764 = vmatprep.subr.bf16.mxu0 %v7372_v5  ;;  %v7415_v62 = vld [vmem:[%s9198_s1 + $0xd88] sm:$0xff]   ;;  %v7422_v5 = vld [vmem:[%s9198_s1 + $0xd18] sm:$0xff]  }
 0x182   :  { %6786 = vmatprep.subr.bf16.mxu1 %v7373_v6  ;;  %v7423_v6 = vld [vmem:[%s9198_s1 + $0xd98] sm:$0xff]  }
 0x183   :  { %5287 = vmatmul.mubr.bf16.vlgmr.msra.gmra.mrb[44].mxu0 %v5704_v1  ;;  %v7418_v1 = vld [vmem:[%s9198_s1 + $0xd10] sm:$0xff]  }
 0x184   :  { %5327 = vmatmul.mubr.bf16.vlgmr.msra.gmra.mrb[44].mxu1 %v5706_v3  ;;  %6765 = vmatpush3.bf16.msra.mxu0 %v7374_v7  ;;  %v7420_v3 = vld [vmem:[%s9198_s1 + $0xd58] sm:$0xff]   ;;  %v7424_v7 = vld [vmem:[%s9198_s1 + $0xd60] sm:$0xff]  }
 0x185   :  { %6787 = vmatpush3.bf16.msra.mxu1 %v7375_v8  ;;  %6766 = vmatprep.subr.bf16.mxu0 %v7376_v9  ;;  %v7425_v8 = vld [vmem:[%s9198_s1 + $0xde0] sm:$0xff]  }
 0x186   :  { %6788 = vmatprep.subr.bf16.mxu1 %v7377_v10  ;;  %5366 = vmatprep.mubr.bf16.mxu0 %v5709_v52  ;;  %v7426_v10 = vld [vmem:[%s9198_s1 + $0xd20] sm:$0xff]   ;;  %v7455_v52 = vld [vmem:[%s9198_s1 + $0xe90] sm:$0xff]  }
 0x188   :  { %6767 = vmatpush3.bf16.msra.mxu0 %v7378_v11 }
 0x189   :  { %6789 = vmatpush3.bf16.msra.mxu1 %v7379_v12  ;;  %6768 = vmatprep.subr.bf16.mxu0 %v7380_v13  ;;  %v7427_v12 = vld [vmem:[%s9198_s1 + $0xda0] sm:$0xff]  }
 0x18a   :  { %6790 = vmatprep.subr.bf16.mxu1 %v7381_v14 }
 0x18c   :  { %6769 = vmatpush3.bf16.msra.mxu0 %v7382_v15  ;;  %v7428_v15 = vld [vmem:[%s9198_s1 + $0xd68] sm:$0xff]  }
 0x18d   :  { %6791 = vmatpush3.bf16.msra.mxu1 %v7383_v16  ;;  %6770 = vmatprep.subr.bf16.mxu0 %v7384_v17 }
 0x18e   :  { %6792 = vmatprep.subr.bf16.mxu1 %v7385_v18  ;;  %v7429_v18 = vld [vmem:[%s9198_s1 + $0xde8] sm:$0xff]  }
 0x190   :  { %6771 = vmatpush3.bf16.msra.mxu0 %v7386_v19 }
 0x191   :  { %6793 = vmatpush3.bf16.msra.mxu1 %v7387_v20  ;;  %6772 = vmatprep.subr.bf16.mxu0 %v7388_v21  ;;  %v7430_v21 = vld [vmem:[%s9198_s1 + $0xd28] sm:$0xff]  }
 0x192   :  { %6794 = vmatprep.subr.bf16.mxu1 %v7389_v22 }
 0x194   :  { %6773 = vmatpush3.bf16.msra.mxu0 %v7390_v24 }
 0x195   :  { %6795 = vmatpush3.bf16.msra.mxu1 %v7391_v26  ;;  %6774 = vmatprep.subr.bf16.mxu0 %v7392_v30  ;;  %v7432_v26 = vld [vmem:[%s9198_s1 + $0xd70] sm:$0xff]  }
 0x196   :  { %v6472_v23 = vpop.f32.mrb[20].mxu0  ;;  %6796 = vmatprep.subr.bf16.mxu1 %v7393_v32  ;;  %v7435_v30 = vld [vmem:[%s9198_s1 + $0xdb0] sm:$0xff]   ;;  %v7437_v32 = vld [vmem:[%s9198_s1 + $0xdf8] sm:$0xff]  }
 0x197   :  { %v6494_v25 = vpop.f32.mrb[20].mxu1  ;;  %v6473_v27 = vpop.f32.mrb[21].mxu0 }
 0x198   :  { %v6474_v28 = vadd.f32 %v6473_v27, %v6472_v23  ;;  %v6495_v29 = vpop.f32.mrb[21].mxu1  ;;  %v6475_v33 = vpop.f32.mrb[22].mxu0  ;;  %6775 = vmatpush3.bf16.msra.mxu0 %v7394_v36  ;;  %v7431_v23 = vld [vmem:[%s9198_s1 + $0xda8] sm:$0xff]  }
 0x199   :  { %v6496_v31 = vadd.f32 %v6495_v29, %v6494_v25  ;;  %v6497_v35 = vpop.f32.mrb[22].mxu1  ;;  %v6476_v38 = vpop.f32.mrb[23].mxu0  ;;  %6797 = vmatpush3.bf16.msra.mxu1 %v7395_v37  ;;  %6776 = vmatprep.subr.bf16.mxu0 %v7396_v41  ;;  %v7434_v29 = vld [vmem:[%s9198_s1 + $0xd30] sm:$0xff]   ;;  %v7438_v33 = vld [vmem:[%s9198_s1 + $0xd38] sm:$0xff]   ;;  %v7444_v41 = vld [vmem:[%s9198_s1 + $0xe40] sm:$0xff]  }
 0x19a   :  { %v4809_v34 = vadd.f32 %v6474_v28, %v8748_v55  ;;  %v6498_v40 = vpop.f32.mrb[23].mxu1  ;;  %6798 = vmatprep.subr.bf16.mxu1 %v7397_v42  ;;  %v5711_v55 = vcombine.high %v40_v50, %v40_v50  ;;  %v7433_v28 = vld [vmem:[%s9198_s1 + $0xdf0] sm:$0xff]   ;;  %v42_v38 = vld [vmem:[%s9199_s0 + $0xd8] sm:$0xff]  ;;  %v7445_v42 = vld [vmem:[%s9198_s1 + $0xec0] sm:$0xff]  }
 0x19b   :  { %v41_v35 = vld [vmem:[%s9199_s0 + $0xd0] sm:$0xff]  ;;  %v5715_v40 = vcombine.high %v42_v38, %v42_v38 }
 0x19c   :  { %v8850_v39 = vadd.f32 %v6496_v31, %v4809_v34  ;;  %6777 = vmatpush3.bf16.msra.mxu0 %v7398_v43  ;;  %5406 = vmatprep.mubr.bf16.mxu1 %v5711_v55  ;;  %v7436_v31 = vld [vmem:[%s9198_s1 + $0xd78] sm:$0xff]   ;;  %v5712_v36 = vcombine.low %v41_v35, %v41_v35  ;;  %v5713_v37 = vcombine.high %v41_v35, %v41_v35  ;;  %v7446_v43 = vld [vmem:[%s9198_s1 + $0xe00] sm:$0xff]   ;;  %v7453_v50 = vld [vmem:[%s9198_s1 + $0xed0] sm:$0xff]  }
 0x19d   :  { %6799 = vmatpush3.bf16.msra.mxu1 %v7399_v44  ;;  %6778 = vmatprep.subr.bf16.mxu0 %v7400_v45  ;;  %v7439_v34 = vld [vmem:[%s9198_s1 + $0xdb8] sm:$0xff]   ;;  %v7447_v44 = vld [vmem:[%s9198_s1 + $0xe80] sm:$0xff]   ;;  %v7448_v45 = vld [vmem:[%s9198_s1 + $0xe48] sm:$0xff]  }
 0x19e   :  { %6800 = vmatprep.subr.bf16.mxu1 %v7401_v46  ;;  %v7449_v46 = vld [vmem:[%s9198_s1 + $0xec8] sm:$0xff]   ;;  %v7458_v55 = vld [vmem:[%s9198_s1 + $0xe18] sm:$0xff]   ;;  %v7488_v35 = vld [vmem:[%s9198_s1 + $0xf50] sm:$0xff]  }
 0x1a0   :  { %6779 = vmatpush3.bf16.msra.mxu0 %v7402_v47  ;;  %v7450_v47 = vld [vmem:[%s9198_s1 + $0xe08] sm:$0xff]  }
 0x1a1   :  { %6801 = vmatpush3.bf16.msra.mxu1 %v7403_v48  ;;  %6808 = vmatprep.subr.bf16.mxu0 %v7408_v54  ;;  %v7451_v48 = vld [vmem:[%s9198_s1 + $0xe88] sm:$0xff]   ;;  %v7457_v54 = vld [vmem:[%s9198_s1 + $0xed8] sm:$0xff]  }
 0x1a2   :  { %6830 = vmatprep.subr.bf16.mxu1 %v7409_v56  ;;  %v7459_v56 = vld [vmem:[%s9198_s1 + $0xe98] sm:$0xff]  }
 0x1a3   :  { %5367 = vmatmul.mubr.bf16.vlgmr.msra.gmra.mrb[48].mxu0 %v5708_v51  ;;  %v7454_v51 = vld [vmem:[%s9198_s1 + $0xe10] sm:$0xff]  }
 0x1a4   :  { %5407 = vmatmul.mubr.bf16.vlgmr.msra.gmra.mrb[48].mxu1 %v5710_v53  ;;  %6809 = vmatpush3.bf16.msra.mxu0 %v7410_v57  ;;  %v7456_v53 = vld [vmem:[%s9198_s1 + $0xe58] sm:$0xff]   ;;  %v7460_v57 = vld [vmem:[%s9198_s1 + $0xe60] sm:$0xff]  }
 0x1a5   :  { %6831 = vmatpush3.bf16.msra.mxu1 %v7411_v58  ;;  %6810 = vmatprep.subr.bf16.mxu0 %v7412_v59  ;;  %v7461_v58 = vld [vmem:[%s9198_s1 + $0xee0] sm:$0xff]  }
 0x1a6   :  { %6832 = vmatprep.subr.bf16.mxu1 %v7413_v60  ;;  %5446 = vmatprep.mubr.bf16.mxu0 %v5713_v37  ;;  %v7462_v60 = vld [vmem:[%s9198_s1 + $0xe20] sm:$0xff]   ;;  %v7490_v37 = vld [vmem:[%s9198_s1 + $0xf10] sm:$0xff]  }
 0x1a7   :  { %5486 = vmatprep.mubr.bf16.mxu1 %v5715_v40  ;;  %v7493_v40 = vld [vmem:[%s9198_s1 + $0xfd8] sm:$0xff]  }
 0x1a8   :  { %6811 = vmatpush3.bf16.msra.mxu0 %v7414_v61 }
 0x1a9   :  { %6833 = vmatpush3.bf16.msra.mxu1 %v7415_v62  ;;  %6812 = vmatprep.subr.bf16.mxu0 %v7416_v63  ;;  %v7463_v62 = vld [vmem:[%s9198_s1 + $0xea0] sm:$0xff]  }
 0x1aa   :  { %6834 = vmatprep.subr.bf16.mxu1 %v7417_v0 }
 0x1ac   :  { %6813 = vmatpush3.bf16.msra.mxu0 %v7418_v1  ;;  %v7464_v1 = vld [vmem:[%s9198_s1 + $0xe68] sm:$0xff]  }
 0x1ad   :  { %6835 = vmatpush3.bf16.msra.mxu1 %v7419_v2  ;;  %6814 = vmatprep.subr.bf16.mxu0 %v7420_v3 }
 0x1ae   :  { %6836 = vmatprep.subr.bf16.mxu1 %v7421_v4  ;;  %v7465_v4 = vld [vmem:[%s9198_s1 + $0xee8] sm:$0xff]  }
 0x1b0   :  { %6815 = vmatpush3.bf16.msra.mxu0 %v7422_v5 }
 0x1b1   :  { %6837 = vmatpush3.bf16.msra.mxu1 %v7423_v6  ;;  %6816 = vmatprep.subr.bf16.mxu0 %v7424_v7  ;;  %v7466_v7 = vld [vmem:[%s9198_s1 + $0xe28] sm:$0xff]  }
 0x1b2   :  { %6838 = vmatprep.subr.bf16.mxu1 %v7425_v8 }
 0x1b4   :  { %6817 = vmatpush3.bf16.msra.mxu0 %v7426_v10 }
 0x1b5   :  { %6839 = vmatpush3.bf16.msra.mxu1 %v7427_v12  ;;  %6818 = vmatprep.subr.bf16.mxu0 %v7428_v15  ;;  %v7468_v12 = vld [vmem:[%s9198_s1 + $0xe70] sm:$0xff]  }
 0x1b6   :  { %v6516_v9 = vpop.f32.mrb[24].mxu0  ;;  %6840 = vmatprep.subr.bf16.mxu1 %v7429_v18  ;;  %v7470_v15 = vld [vmem:[%s9198_s1 + $0xe30] sm:$0xff]   ;;  %v7473_v18 = vld [vmem:[%s9198_s1 + $0xef8] sm:$0xff]  }
 0x1b7   :  { %v6538_v11 = vpop.f32.mrb[24].mxu1  ;;  %v6517_v13 = vpop.f32.mrb[25].mxu0 }
 0x1b8   :  { %v6539_v14 = vpop.f32.mrb[25].mxu1  ;;  %v6518_v16 = vadd.f32 %v6517_v13, %v6516_v9  ;;  %v6519_v19 = vpop.f32.mrb[26].mxu0  ;;  %6819 = vmatpush3.bf16.msra.mxu0 %v7430_v21  ;;  %v7467_v9 = vld [vmem:[%s9198_s1 + $0xea8] sm:$0xff]   ;;  %v43_v21 = vld [vmem:[%s9199_s0 + $0xe0] sm:$0xff] }
 0x1b9   :  { %v6540_v17 = vadd.f32 %v6539_v14, %v6538_v11  ;;  %v6541_v20 = vpop.f32.mrb[26].mxu1  ;;  %v6520_v24 = vpop.f32.mrb[27].mxu0  ;;  %6841 = vmatpush3.bf16.msra.mxu1 %v7431_v23  ;;  %6820 = vmatprep.subr.bf16.mxu0 %v7432_v26  ;;  %v7469_v14 = vld [vmem:[%s9198_s1 + $0xef0] sm:$0xff]   ;;  %v7474_v19 = vld [vmem:[%s9198_s1 + $0xe38] sm:$0xff]   ;;  %v5716_v23 = vcombine.low %v43_v21, %v43_v21 }
 0x1ba   :  { %v4889_v22 = vadd.f32 %v6518_v16, %v8850_v39  ;;  %v6542_v25 = vpop.f32.mrb[27].mxu1  ;;  %6842 = vmatprep.subr.bf16.mxu1 %v7433_v28  ;;  %v5714_v39 = vcombine.low %v42_v38, %v42_v38  ;;  %v7471_v16 = vld [vmem:[%s9198_s1 + $0xeb0] sm:$0xff]   ;;  %v7475_v20 = vld [vmem:[%s9198_s1 + $0xeb8] sm:$0xff]   ;;  %v5717_v24 = vcombine.high %v43_v21, %v43_v21  ;;  %v7481_v28 = vld [vmem:[%s9198_s1 + $0xfc0] sm:$0xff]  }
 0x1bb   :  { %v7491_v38 = vld [vmem:[%s9198_s1 + $0xf90] sm:$0xff]  }
 0x1bc   :  { %v8958_v27 = vadd.f32 %v6540_v17, %v4889_v22  ;;  %6821 = vmatpush3.bf16.msra.mxu0 %v7434_v29  ;;  %v7472_v17 = vld [vmem:[%s9198_s1 + $0xe78] sm:$0xff]   ;;  %v44_v22 = vld [vmem:[%s9199_s0 + $0xe8] sm:$0xff]  ;;  %v7482_v29 = vld [vmem:[%s9198_s1 + $0xf00] sm:$0xff]  }
 0x1bd   :  { %6843 = vmatpush3.bf16.msra.mxu1 %v7435_v30  ;;  %6822 = vmatprep.subr.bf16.mxu0 %v7436_v31  ;;  %v5718_v25 = vcombine.low %v44_v22, %v44_v22  ;;  %v5719_v26 = vcombine.high %v44_v22, %v44_v22  ;;  %v7483_v30 = vld [vmem:[%s9198_s1 + $0xf80] sm:$0xff]   ;;  %v7484_v31 = vld [vmem:[%s9198_s1 + $0xf48] sm:$0xff]  }
 0x1be   :  { %6844 = vmatprep.subr.bf16.mxu1 %v7437_v32  ;;  %v7485_v32 = vld [vmem:[%s9198_s1 + $0xfc8] sm:$0xff]  }
 0x1c0   :  { %6823 = vmatpush3.bf16.msra.mxu0 %v7438_v33  ;;  %v7486_v33 = vld [vmem:[%s9198_s1 + $0xf08] sm:$0xff]  }
 0x1c1   :  { %6845 = vmatpush3.bf16.msra.mxu1 %v7439_v34  ;;  %6852 = vmatprep.subr.bf16.mxu0 %v7444_v41  ;;  %v7487_v34 = vld [vmem:[%s9198_s1 + $0xf88] sm:$0xff]   ;;  %v7494_v41 = vld [vmem:[%s9198_s1 + $0xf18] sm:$0xff]  }
 0x1c2   :  { %6874 = vmatprep.subr.bf16.mxu1 %v7445_v42  ;;  %v7495_v42 = vld [vmem:[%s9198_s1 + $0xf98] sm:$0xff]  }
 0x1c3   :  { %5447 = vmatmul.mubr.bf16.vlgmr.msra.gmra.mrb[52].mxu0 %v5712_v36  ;;  %v7489_v36 = vld [vmem:[%s9198_s1 + $0xfd0] sm:$0xff]  }
 0x1c4   :  { %5487 = vmatmul.mubr.bf16.vlgmr.msra.gmra.mrb[52].mxu1 %v5714_v39  ;;  %6853 = vmatpush3.bf16.msra.mxu0 %v7446_v43  ;;  %v7492_v39 = vld [vmem:[%s9198_s1 + $0xf58] sm:$0xff]   ;;  %v7496_v43 = vld [vmem:[%s9198_s1 + $0xf60] sm:$0xff]  }
 0x1c5   :  { %6875 = vmatpush3.bf16.msra.mxu1 %v7447_v44  ;;  %6854 = vmatprep.subr.bf16.mxu0 %v7448_v45  ;;  %v7497_v44 = vld [vmem:[%s9198_s1 + $0xfe0] sm:$0xff]  }
 0x1c6   :  { %6876 = vmatprep.subr.bf16.mxu1 %v7449_v46  ;;  %5526 = vmatprep.mubr.bf16.mxu0 %v5717_v24  ;;  %v7498_v45 = vld [vmem:[%s9198_s1 + $0xf20] sm:$0xff]  }
 0x1c7   :  { %5566 = vmatprep.mubr.bf16.mxu1 %v5719_v26 }
 0x1c8   :  { %6855 = vmatpush3.bf16.msra.mxu0 %v7450_v47  ;;  %v7499_v47 = vld [vmem:[%s9198_s1 + $0xfa0] sm:$0xff]  }
 0x1c9   :  { %6877 = vmatpush3.bf16.msra.mxu1 %v7451_v48  ;;  %6856 = vmatprep.subr.bf16.mxu0 %v7452_v49 }
 0x1ca   :  { %6878 = vmatprep.subr.bf16.mxu1 %v7453_v50 }
 0x1cc   :  { %6857 = vmatpush3.bf16.msra.mxu0 %v7454_v51 }
 0x1cd   :  { %6879 = vmatpush3.bf16.msra.mxu1 %v7455_v52  ;;  %6858 = vmatprep.subr.bf16.mxu0 %v7456_v53  ;;  %v7500_v53 = vld [vmem:[%s9198_s1 + $0xf68] sm:$0xff]  }
 0x1ce   :  { %6880 = vmatprep.subr.bf16.mxu1 %v7457_v54 }
 0x1d0   :  { %6859 = vmatpush3.bf16.msra.mxu0 %v7458_v55  ;;  %v7501_v55 = vld [vmem:[%s9198_s1 + $0xfe8] sm:$0xff]  }
 0x1d1   :  { %6881 = vmatpush3.bf16.msra.mxu1 %v7459_v56  ;;  %6860 = vmatprep.subr.bf16.mxu0 %v7460_v57 }
 0x1d2   :  { %6882 = vmatprep.subr.bf16.mxu1 %v7461_v58  ;;  %v7502_v58 = vld [vmem:[%s9198_s1 + $0xf28] sm:$0xff]  }
 0x1d4   :  { %6861 = vmatpush3.bf16.msra.mxu0 %v7462_v60  ;;  %v7503_v60 = vld [vmem:[%s9198_s1 + $0xfa8] sm:$0xff]  }
 0x1d5   :  { %6883 = vmatpush3.bf16.msra.mxu1 %v7463_v62  ;;  %6862 = vmatprep.subr.bf16.mxu0 %v7464_v1  ;;  %v7506_v1 = vld [vmem:[%s9198_s1 + $0xf30] sm:$0xff]  }
 0x1d6   :  { %v6560_v59 = vpop.f32.mrb[28].mxu0  ;;  %6884 = vmatprep.subr.bf16.mxu1 %v7465_v4  ;;  %v7509_v4 = vld [vmem:[%s9198_s1 + $0xff8] sm:$0xff]  }
 0x1d7   :  { %v6582_v61 = vpop.f32.mrb[28].mxu1  ;;  %v6561_v63 = vpop.f32.mrb[29].mxu0 }
 0x1d8   :  { %v6583_v0 = vpop.f32.mrb[29].mxu1  ;;  %v6562_v2 = vadd.f32 %v6561_v63, %v6560_v59  ;;  %v6563_v5 = vpop.f32.mrb[30].mxu0  ;;  %6863 = vmatpush3.bf16.msra.mxu0 %v7466_v7  ;;  %v7504_v63 = vld [vmem:[%s9198_s1 + $0xf70] sm:$0xff]  }
 0x1d9   :  { %v6584_v3 = vadd.f32 %v6583_v0, %v6582_v61  ;;  %v6585_v6 = vpop.f32.mrb[30].mxu1  ;;  %v6564_v10 = vpop.f32.mrb[31].mxu0  ;;  %6885 = vmatpush3.bf16.msra.mxu1 %v7467_v9  ;;  %6864 = vmatprep.subr.bf16.mxu0 %v7468_v12  ;;  %v7505_v0 = vld [vmem:[%s9198_s1 + $0xff0] sm:$0xff]   ;;  %v7510_v5 = vld [vmem:[%s9198_s1 + $0xf38] sm:$0xff]  }
 0x1da   :  { %v4969_v8 = vadd.f32 %v6562_v2, %v8958_v27  ;;  %v6586_v11 = vpop.f32.mrb[31].mxu1  ;;  %6886 = vmatprep.subr.bf16.mxu1 %v7469_v14  ;;  %v7480_v27 = vld [vmem:[%s9198_s1 + $0xf40] sm:$0xff]   ;;  %v7507_v2 = vld [vmem:[%s9198_s1 + $0xfb0] sm:$0xff]   ;;  %v7511_v6 = vld [vmem:[%s9198_s1 + $0xfb8] sm:$0xff]  }
 0x1db   :  { %v45_v7 = vld [vmem:[%s9199_s0 + $0xf0] sm:$0xff] }
 0x1dc   :  { %v9063_v13 = vadd.f32 %v6584_v3, %v4969_v8  ;;  %6865 = vmatpush3.bf16.msra.mxu0 %v7470_v15  ;;  %v7508_v3 = vld [vmem:[%s9198_s1 + $0xf78] sm:$0xff]   ;;  %v5720_v9 = vcombine.low %v45_v7, %v45_v7  ;;  %v5721_v10 = vcombine.high %v45_v7, %v45_v7 }
 0x1dd   :  { %6887 = vmatpush3.bf16.msra.mxu1 %v7471_v16  ;;  %6866 = vmatprep.subr.bf16.mxu0 %v7472_v17  ;;  %v46_v8 = vld [vmem:[%s9199_s0 + $0xf8] sm:$0xff] }
 0x1de   :  { %6888 = vmatprep.subr.bf16.mxu1 %v7473_v18  ;;  %v5722_v11 = vcombine.low %v46_v8, %v46_v8  ;;  %v5723_v12 = vcombine.high %v46_v8, %v46_v8 }
 0x1e0   :  { %6867 = vmatpush3.bf16.msra.mxu0 %v7474_v19 }
 0x1e1   :  { %6889 = vmatpush3.bf16.msra.mxu1 %v7475_v20  ;;  %6896 = vmatprep.subr.bf16.mxu0 %v7480_v27 }
 0x1e2   :  { %6918 = vmatprep.subr.bf16.mxu1 %v7481_v28 }
 0x1e3   :  { %5527 = vmatmul.mubr.bf16.vlgmr.msra.gmra.mrb[56].mxu0 %v5716_v23 }
 0x1e4   :  { %5567 = vmatmul.mubr.bf16.vlgmr.msra.gmra.mrb[56].mxu1 %v5718_v25  ;;  %6897 = vmatpush3.bf16.msra.mxu0 %v7482_v29 }
 0x1e5   :  { %6919 = vmatpush3.bf16.msra.mxu1 %v7483_v30  ;;  %6898 = vmatprep.subr.bf16.mxu0 %v7484_v31 }
 0x1e6   :  { %6920 = vmatprep.subr.bf16.mxu1 %v7485_v32  ;;  %5606 = vmatprep.mubr.bf16.mxu0 %v5721_v10 }
 0x1e7   :  { %5646 = vmatprep.mubr.bf16.mxu1 %v5723_v12 }
 0x1e8   :  { %6899 = vmatpush3.bf16.msra.mxu0 %v7486_v33 }
 0x1e9   :  { %6921 = vmatpush3.bf16.msra.mxu1 %v7487_v34  ;;  %6900 = vmatprep.subr.bf16.mxu0 %v7488_v35 }
 0x1ea   :  { %6922 = vmatprep.subr.bf16.mxu1 %v7489_v36 }
 0x1ec   :  { %6901 = vmatpush3.bf16.msra.mxu0 %v7490_v37 }
 0x1ed   :  { %6923 = vmatpush3.bf16.msra.mxu1 %v7491_v38  ;;  %6902 = vmatprep.subr.bf16.mxu0 %v7492_v39 }
 0x1ee   :  { %6924 = vmatprep.subr.bf16.mxu1 %v7493_v40 }
 0x1f0   :  { %6903 = vmatpush3.bf16.msra.mxu0 %v7494_v41 }
 0x1f1   :  { %6925 = vmatpush3.bf16.msra.mxu1 %v7495_v42  ;;  %6904 = vmatprep.subr.bf16.mxu0 %v7496_v43 }
 0x1f2   :  { %6926 = vmatprep.subr.bf16.mxu1 %v7497_v44 }
 0x1f4   :  { %6905 = vmatpush3.bf16.msra.mxu0 %v7498_v45 }
 0x1f5   :  { %6927 = vmatpush3.bf16.msra.mxu1 %v7499_v47  ;;  %6906 = vmatprep.subr.bf16.mxu0 %v7500_v53 }
 0x1f6   :  { %v6604_v46 = vpop.f32.mrb[32].mxu0  ;;  %6928 = vmatprep.subr.bf16.mxu1 %v7501_v55 }
 0x1f7   :  { %v6626_v48 = vpop.f32.mrb[32].mxu1  ;;  %v6605_v49 = vpop.f32.mrb[33].mxu0 }
 0x1f8   :  { %v6627_v50 = vpop.f32.mrb[33].mxu1  ;;  %v6606_v51 = vadd.f32 %v6605_v49, %v6604_v46  ;;  %v6607_v54 = vpop.f32.mrb[34].mxu0  ;;  %6907 = vmatpush3.bf16.msra.mxu0 %v7502_v58 }
 0x1f9   :  { %v6628_v52 = vadd.f32 %v6627_v50, %v6626_v48  ;;  %v6629_v56 = vpop.f32.mrb[34].mxu1  ;;  %v6608_v59 = vpop.f32.mrb[35].mxu0  ;;  %6929 = vmatpush3.bf16.msra.mxu1 %v7503_v60  ;;  %6908 = vmatprep.subr.bf16.mxu0 %v7504_v63 }
 0x1fa   :  { %v5049_v57 = vadd.f32 %v6606_v51, %v9063_v13  ;;  %v6630_v61 = vpop.f32.mrb[35].mxu1  ;;  %6930 = vmatprep.subr.bf16.mxu1 %v7505_v0 }
 0x1fc   :  { %v5089_v62 = vadd.f32 %v6628_v52, %v5049_v57  ;;  %6909 = vmatpush3.bf16.msra.mxu0 %v7506_v1 }
 0x1fd   :  { %6931 = vmatpush3.bf16.msra.mxu1 %v7507_v2  ;;  %6910 = vmatprep.subr.bf16.mxu0 %v7508_v3 }
 0x1fe   :  { %6932 = vmatprep.subr.bf16.mxu1 %v7509_v4 }
 0x200   :  { %6911 = vmatpush3.bf16.msra.mxu0 %v7510_v5 }
 0x201   :  { %6933 = vmatpush3.bf16.msra.mxu1 %v7511_v6 }
 0x203   :  { %5607 = vmatmul.mubr.bf16.vlgmr.msra.gmra.mrb[60].mxu0 %v5720_v9 }
 0x204   :  { %5647 = vmatmul.mubr.bf16.vlgmr.msra.gmra.mrb[60].mxu1 %v5722_v11 }
 0x216   :  { %v6648_v13 = vpop.f32.mrb[36].mxu0 }
 0x217   :  { %v6670_v14 = vpop.f32.mrb[36].mxu1  ;;  %v6649_v15 = vpop.f32.mrb[37].mxu0 }
 0x218   :  { %v6650_v16 = vadd.f32 %v6649_v15, %v6648_v13  ;;  %v6671_v17 = vpop.f32.mrb[37].mxu1  ;;  %v6651_v18 = vpop.f32.mrb[38].mxu0 }
 0x219   :  { %v6672_v19 = vadd.f32 %v6671_v17, %v6670_v14  ;;  %v6673_v20 = vpop.f32.mrb[38].mxu1  ;;  %v6652_v21 = vpop.f32.mrb[39].mxu0 }
 0x21a   :  { %v5129_v22 = vadd.f32 %v6650_v16, %v5089_v62  ;;  %v6674_v23 = vpop.f32.mrb[39].mxu1 }
 0x21c   :  { %v5169_v24 = vadd.f32 %v6672_v19, %v5129_v22 }
 0x236   :  { %v6692_v25 = vpop.f32.mrb[40].mxu0 }
 0x237   :  { %v6714_v26 = vpop.f32.mrb[40].mxu1  ;;  %v6693_v27 = vpop.f32.mrb[41].mxu0 }
 0x238   :  { %v6715_v28 = vpop.f32.mrb[41].mxu1  ;;  %v6694_v29 = vadd.f32 %v6693_v27, %v6692_v25  ;;  %v6695_v31 = vpop.f32.mrb[42].mxu0 }
 0x239   :  { %v6716_v30 = vadd.f32 %v6715_v28, %v6714_v26  ;;  %v6717_v32 = vpop.f32.mrb[42].mxu1  ;;  %v6696_v33 = vpop.f32.mrb[43].mxu0 }
 0x23a   :  { %v6718_v34 = vpop.f32.mrb[43].mxu1  ;;  %v5209_v35 = vadd.f32 %v6694_v29, %v5169_v24 }
 0x23c   :  { %v5249_v36 = vadd.f32 %v6716_v30, %v5209_v35 }
 0x256   :  { %v6736_v37 = vpop.f32.mrb[44].mxu0 }
 0x257   :  { %v6758_v38 = vpop.f32.mrb[44].mxu1  ;;  %v6737_v39 = vpop.f32.mrb[45].mxu0 }
 0x258   :  { %v6738_v40 = vadd.f32 %v6737_v39, %v6736_v37  ;;  %v6759_v41 = vpop.f32.mrb[45].mxu1  ;;  %v6739_v42 = vpop.f32.mrb[46].mxu0 }
 0x259   :  { %v6760_v43 = vadd.f32 %v6759_v41, %v6758_v38  ;;  %v6761_v44 = vpop.f32.mrb[46].mxu1  ;;  %v6740_v45 = vpop.f32.mrb[47].mxu0 }
 0x25a   :  { %v5289_v46 = vadd.f32 %v6738_v40, %v5249_v36  ;;  %v6762_v47 = vpop.f32.mrb[47].mxu1 }
 0x25c   :  { %v5329_v48 = vadd.f32 %v6760_v43, %v5289_v46 }
 0x276   :  { %v6780_v49 = vpop.f32.mrb[48].mxu0 }
 0x277   :  { %v6802_v50 = vpop.f32.mrb[48].mxu1  ;;  %v6781_v51 = vpop.f32.mrb[49].mxu0 }
 0x278   :  { %v6782_v52 = vadd.f32 %v6781_v51, %v6780_v49  ;;  %v6803_v53 = vpop.f32.mrb[49].mxu1  ;;  %v6783_v54 = vpop.f32.mrb[50].mxu0 }
 0x279   :  { %v6804_v55 = vadd.f32 %v6803_v53, %v6802_v50  ;;  %v6805_v56 = vpop.f32.mrb[50].mxu1  ;;  %v6784_v57 = vpop.f32.mrb[51].mxu0 }
 0x27a   :  { %v5369_v58 = vadd.f32 %v6782_v52, %v5329_v48  ;;  %v6806_v59 = vpop.f32.mrb[51].mxu1 }
 0x27c   :  { %v5409_v60 = vadd.f32 %v6804_v55, %v5369_v58 }
 0x296   :  { %v6824_v61 = vpop.f32.mrb[52].mxu0 }
 0x297   :  { %v6846_v62 = vpop.f32.mrb[52].mxu1  ;;  %v6825_v63 = vpop.f32.mrb[53].mxu0 }
 0x298   :  { %v6847_v0 = vpop.f32.mrb[53].mxu1  ;;  %v6826_v1 = vadd.f32 %v6825_v63, %v6824_v61  ;;  %v6827_v3 = vpop.f32.mrb[54].mxu0 }
 0x299   :  { %v6848_v2 = vadd.f32 %v6847_v0, %v6846_v62  ;;  %v6849_v4 = vpop.f32.mrb[54].mxu1  ;;  %v6828_v5 = vpop.f32.mrb[55].mxu0 }
 0x29a   :  { %v6850_v6 = vpop.f32.mrb[55].mxu1  ;;  %v5449_v7 = vadd.f32 %v6826_v1, %v5409_v60 }
 0x29c   :  { %v5489_v8 = vadd.f32 %v6848_v2, %v5449_v7 }
 0x2b6   :  { %v6868_v9 = vpop.f32.mrb[56].mxu0 }
 0x2b7   :  { %v6890_v10 = vpop.f32.mrb[56].mxu1  ;;  %v6869_v11 = vpop.f32.mrb[57].mxu0 }
 0x2b8   :  { %v6870_v12 = vadd.f32 %v6869_v11, %v6868_v9  ;;  %v6891_v13 = vpop.f32.mrb[57].mxu1  ;;  %v6871_v14 = vpop.f32.mrb[58].mxu0 }
 0x2b9   :  { %v6892_v15 = vadd.f32 %v6891_v13, %v6890_v10  ;;  %v6893_v16 = vpop.f32.mrb[58].mxu1  ;;  %v6872_v17 = vpop.f32.mrb[59].mxu0 }
 0x2ba   :  { %v5529_v18 = vadd.f32 %v6870_v12, %v5489_v8  ;;  %v6894_v19 = vpop.f32.mrb[59].mxu1 }
 0x2bc   :  { %v5569_v20 = vadd.f32 %v6892_v15, %v5529_v18 }
 0x2d6   :  { %v6912_v21 = vpop.f32.mrb[60].mxu0 }
 0x2d7   :  { %v6934_v22 = vpop.f32.mrb[60].mxu1  ;;  %v6913_v23 = vpop.f32.mrb[61].mxu0 }
 0x2d8   :  { %v6914_v24 = vadd.f32 %v6913_v23, %v6912_v21  ;;  %v6935_v25 = vpop.f32.mrb[61].mxu1  ;;  %v6915_v26 = vpop.f32.mrb[62].mxu0 }
 0x2d9   :  { %v6936_v27 = vadd.f32 %v6935_v25, %v6934_v22  ;;  %v6937_v28 = vpop.f32.mrb[62].mxu1  ;;  %v6916_v29 = vpop.f32.mrb[63].mxu0 }
 0x2da   :  { %v5609_v30 = vadd.f32 %v6914_v24, %v5569_v20  ;;  %v6938_v31 = vpop.f32.mrb[63].mxu1 }
 0x2dc   :  { %v5649_v32 = vadd.f32 %v6936_v27, %v5609_v30 }
 0x2de   :  { %5654 = vst [vmem:[%s9201_s3] sm:$0xff] %v5649_v32 }

</bundles_post_ra>
